<compile_context>
chip_gen: v5e
topology: v5e:2x2
jax: 0.10.0
libtpu: 0.0.40
codegen_flags: <defaults>
</compile_context>

<pallas_src>
import math
import numpy as np
import jax
import jax.numpy as jnp
from jax.experimental import pallas as pl
from jax.experimental.pallas import tpu as pltpu

_VMEM_LIMIT = 64 * 1024 * 1024  # fits every generation; >> v5e/v6e scoped defaults


# ----------------------------------------------------------------- tiling ----

def _pick_tile(n, cap):
    """Largest multiple-of-8 tile <= cap that divides n (falls back to cap with
    Pallas-masked ragged tail).  Full dim if n <= cap."""
    if n <= cap:
        return n
    t = cap - (cap % 8)
    while t >= 8:
        if n % t == 0:
            return t
        t -= 8
    return cap


# -------------------------------------------- fused projections kernel -------

def _fused_proj_kernel(src_ref, pos_ref, ref_ref, wv_ref, bv_ref, wsa_ref,
                       bsa_ref, invn_ref, rexp_ref, seg_ref,
                       val_ref, loc_ref, attn_ref):
    """value_proj(src); sa = (src+pos) @ [W_off ++ W_attn]; sampling locations
    (ref + off/normalizer); per-head softmax of the attention logits."""
    src = src_ref[...]
    q = src + pos_ref[...]

    val_ref[...] = (jnp.dot(src.astype(jnp.bfloat16), wv_ref[...],
                            preferred_element_type=jnp.float32) + bv_ref[...])

    sa = (jnp.dot(q.astype(jnp.bfloat16), wsa_ref[...],
                  preferred_element_type=jnp.float32) + bsa_ref[...])

    n2 = invn_ref.shape[-1]                    # 2 * n_pt  ([x | y] offset block)
    # sampling locations = reference_points + offsets / (W_l, H_l)
    loc_ref[...] = (sa[:, :n2] * invn_ref[...]
                    + jnp.dot(ref_ref[...], rexp_ref[...],
                              preferred_element_type=jnp.float32))

    # per-head softmax over levels*points: shift by the row-global max (exact,
    # softmax is shift-invariant per segment), segment sums via 0/1 matmul.
    logits = sa[:, n2:]
    e = jnp.exp(logits - jnp.max(logits, axis=-1, keepdims=True))
    denom = jnp.dot(e, seg_ref[...], preferred_element_type=jnp.float32)
    attn_ref[...] = e / denom


def fused_projections(src2d, pos2d, ref2d, params, consts, TM):
    M, C = src2d.shape
    n_pt = consts['seg'].shape[0]
    n2 = 2 * n_pt
    L2 = ref2d.shape[1]
    return pl.pallas_call(
        _fused_proj_kernel,
        out_shape=(jax.ShapeDtypeStruct((M, C), jnp.float32),
                   jax.ShapeDtypeStruct((M, n2), jnp.float32),
                   jax.ShapeDtypeStruct((M, n_pt), jnp.float32)),
        grid=(pl.cdiv(M, TM),),
        in_specs=[
            pl.BlockSpec((TM, C), lambda i: (i, 0)),          # src
            pl.BlockSpec((TM, C), lambda i: (i, 0)),          # pos
            pl.BlockSpec((TM, L2), lambda i: (i, 0)),         # reference points
            pl.BlockSpec((C, C), lambda i: (0, 0)),           # value_proj W (bf16)
            pl.BlockSpec((1, C), lambda i: (0, 0)),           # value_proj b
            pl.BlockSpec((C, 3 * n_pt), lambda i: (0, 0)),    # fused offs+attn W (bf16)
            pl.BlockSpec((1, 3 * n_pt), lambda i: (0, 0)),    # fused offs+attn b
            pl.BlockSpec((1, n2), lambda i: (0, 0)),          # 1 / offset_normalizer
            pl.BlockSpec((L2, n2), lambda i: (0, 0)),         # ref -> column expansion
            pl.BlockSpec((n_pt, n_pt), lambda i: (0, 0)),     # same-head 0/1 matrix
        ],
        out_specs=(pl.BlockSpec((TM, C), lambda i: (i, 0)),
                   pl.BlockSpec((TM, n2), lambda i: (i, 0)),
                   pl.BlockSpec((TM, n_pt), lambda i: (i, 0))),
        compiler_params=pltpu.CompilerParams(
            dimension_semantics=("parallel",), vmem_limit_bytes=_VMEM_LIMIT),
    )(src2d, pos2d, ref2d, params['value_wT'], params['value_b'],
      params['sa_wT'], params['sa_b'], consts['inv_norm'], consts['ref_expand'],
      consts['seg'])


# ---------------------------------- fused out_proj+LN1+FFN+LN2 kernel --------

def _post_attn_kernel(attn_ref, src_ref, wo_ref, bo_ref, g1_ref, b1_ref,
                      w1_ref, bb1_ref, w2_ref, bb2_ref, g2_ref, b2_ref, o_ref):
    y = (jnp.dot(attn_ref[...].astype(jnp.bfloat16), wo_ref[...],
                 preferred_element_type=jnp.float32) + bo_ref[...])
    h = src_ref[...] + y                               # dropout1 = identity
    mu = jnp.mean(h, axis=-1, keepdims=True)
    var = jnp.mean((h - mu) ** 2, axis=-1, keepdims=True)
    h = (h - mu) * jax.lax.rsqrt(var + 1e-5) * g1_ref[...] + b1_ref[...]

    f = (jnp.dot(h.astype(jnp.bfloat16), w1_ref[...],
                 preferred_element_type=jnp.float32) + bb1_ref[...])
    f = jnp.maximum(f, 0.0)                            # relu; dropout2 identity
    y2 = (jnp.dot(f.astype(jnp.bfloat16), w2_ref[...],
                  preferred_element_type=jnp.float32) + bb2_ref[...])
    h2 = h + y2                                        # dropout3 = identity
    mu2 = jnp.mean(h2, axis=-1, keepdims=True)
    var2 = jnp.mean((h2 - mu2) ** 2, axis=-1, keepdims=True)
    o_ref[...] = (h2 - mu2) * jax.lax.rsqrt(var2 + 1e-5) * g2_ref[...] + b2_ref[...]


def post_attention(attn_out2d, src2d, params, TM):
    M, C = src2d.shape
    d_ffn = params['lin1_wT'].shape[1]
    return pl.pallas_call(
        _post_attn_kernel,
        out_shape=jax.ShapeDtypeStruct((M, C), jnp.float32),
        grid=(pl.cdiv(M, TM),),
        in_specs=[
            pl.BlockSpec((TM, C), lambda i: (i, 0)),
            pl.BlockSpec((TM, C), lambda i: (i, 0)),
            pl.BlockSpec((C, C), lambda i: (0, 0)),
            pl.BlockSpec((1, C), lambda i: (0, 0)),
            pl.BlockSpec((1, C), lambda i: (0, 0)),
            pl.BlockSpec((1, C), lambda i: (0, 0)),
            pl.BlockSpec((C, d_ffn), lambda i: (0, 0)),
            pl.BlockSpec((1, d_ffn), lambda i: (0, 0)),
            pl.BlockSpec((d_ffn, C), lambda i: (0, 0)),
            pl.BlockSpec((1, C), lambda i: (0, 0)),
            pl.BlockSpec((1, C), lambda i: (0, 0)),
            pl.BlockSpec((1, C), lambda i: (0, 0)),
        ],
        out_specs=pl.BlockSpec((TM, C), lambda i: (i, 0)),
        compiler_params=pltpu.CompilerParams(
            dimension_semantics=("parallel",), vmem_limit_bytes=_VMEM_LIMIT),
    )(attn_out2d, src2d, params['out_wT'], params['out_b'],
      params['ln1_g'], params['ln1_b'],
      params['lin1_wT'], params['lin1_b'], params['lin2_wT'], params['lin2_b'],
      params['ln2_g'], params['ln2_b'])


# ------------------------------------------------- MSDA core kernels ---------

def make_msda_kernel(spatial_shapes, H, L, P, Dh, use_gather):
    """Multi-scale deformable attention core.  Grid = (batch, query tiles).

    value: (1, Len_in, C) per-batch block (constant across the query axis).
    loc:   (1, TQ, 2*n_pt)  [x-block | y-block], column order (l, p, h).
    attn:  (1, TQ, n_pt)    softmaxed attention weights, same column order.
    lvlp:  (2, n_pt)        per-column (W_l, H_l).
    out:   (1, TQ, C).
    """
    C = H * Dh
    n_pt = L * P * H
    sizes = [int(h_) * int(w_) for h_, w_ in spatial_shapes]
    starts = [int(s) for s in np.cumsum([0] + sizes)]

    def kernel(value_ref, loc_ref, attn_ref, lvlp_ref, out_ref):
        loc = loc_ref[0]                       # (TQ, 2*n_pt) f32
        attn = attn_ref[0]                     # (TQ, n_pt)   f32
        wj = lvlp_ref[0:1, :]                  # (1, n_pt)  per-column W_l
        hj = lvlp_ref[1:2, :]                  # (1, n_pt)  per-column H_l
        TQ = attn.shape[0]

        # --- bilinear corner math, hoisted & lane-dense over all columns -----
        # grid_sample(align_corners=False): pixel = loc * size - 0.5
        x = loc[:, :n_pt] * wj - 0.5
        y = loc[:, n_pt:] * hj - 0.5
        x0 = jnp.floor(x)
        y0 = jnp.floor(y)
        lx = x - x0
        ly = y - y0
        x1 = x0 + 1.0
        y1 = y0 + 1.0
        corner_w, corner_idx = [], []
        for yc, xc, wb in ((y0, x0, (1.0 - ly) * (1.0 - lx)),
                           (y0, x1, (1.0 - ly) * lx),
                           (y1, x0, ly * (1.0 - lx)),
                           (y1, x1, ly * lx)):
            valid = ((xc >= 0.0) & (xc < wj) & (yc >= 0.0) & (yc < hj))
            corner_w.append(attn * wb * valid.astype(jnp.float32))
            xci = jnp.clip(xc, 0.0, wj - 1.0)
            yci = jnp.clip(yc, 0.0, hj - 1.0)
            corner_idx.append(yci * wj + xci)      # level-relative row, exact f32

        # (H, C) one-hot mapping head h -> its Dh output lanes (iota-built)
        lane_i = jax.lax.broadcasted_iota(jnp.int32, (H, C), 1)
        head_i = jax.lax.broadcasted_iota(jnp.int32, (H, C), 0) * Dh
        head_expand = ((lane_i >= head_i) & (lane_i < head_i + Dh)
                       ).astype(jnp.float32)

        if use_gather:
            # ---- gather path: full-C row gathers, lane-dense accumulate -----
            acc = jnp.zeros((TQ, C), jnp.float32)
            for lvl, (H_l, W_l) in enumerate(spatial_shapes):
                HW = sizes[lvl]
                v_l = value_ref[0, starts[lvl]:starts[lvl + 1], :]   # (HW, C)
                for p in range(P):
                    s = (lvl * P + p) * H
                    for w_all, i_all in zip(corner_w, corner_idx):
                        w_c = jnp.dot(w_all[:, s:s + H], head_expand,
                                      preferred_element_type=jnp.float32)
                        i_c = jnp.dot(i_all[:, s:s + H], head_expand,
                                      preferred_element_type=jnp.float32)
                        idx = jnp.clip(i_c.astype(jnp.int32), 0, HW - 1)
                        rows = jnp.take_along_axis(v_l, idx, axis=0,
                                                   mode="promise_in_bounds")
                        acc = acc + w_c * rows
            out_ref[0] = acc
        else:
            # ---- fallback: one-hot scatter + per-head matmuls (demo scale) --
            # TODO(synk): VALU/VMEM-bound at production sizes; interim only.
            acc_heads = [jnp.zeros((TQ, Dh), jnp.float32) for _ in range(H)]
            for lvl, (H_l, W_l) in enumerate(spatial_shapes):
                HW = sizes[lvl]
                v_l = value_ref[0, starts[lvl]:starts[lvl + 1], :]   # (HW, C)
                iota_hw = jax.lax.broadcasted_iota(jnp.int32, (TQ, HW), 1)
                for h in range(H):
                    sw = jnp.zeros((TQ, HW), jnp.float32)
                    for p in range(P):
                        col = (lvl * P + p) * H + h
                        for w_all, i_all in zip(corner_w, corner_idx):
                            idx = i_all[:, col:col + 1].astype(jnp.int32)
                            sw = sw + jnp.where(iota_hw == idx,
                                                w_all[:, col:col + 1], 0.0)
                    acc_heads[h] = acc_heads[h] + jnp.dot(
                        sw, v_l[:, h * Dh:(h + 1) * Dh],
                        preferred_element_type=jnp.float32)
            for h in range(H):
                out_ref[0, :, h * Dh:(h + 1) * Dh] = acc_heads[h]

    return kernel


def _msda_call(value, loc, attn, spatial_shapes, H, L, P, Dh, lvl_params, TQ,
               use_gather):
    N, Len_in, C = value.shape
    Lq = loc.shape[1]
    n_pt = L * P * H
    kernel = make_msda_kernel(spatial_shapes, H, L, P, Dh, use_gather)
    return pl.pallas_call(
        kernel,
        out_shape=jax.ShapeDtypeStruct((N, Lq, C), jnp.float32),
        grid=(N, pl.cdiv(Lq, TQ)),
        in_specs=[
            pl.BlockSpec((1, Len_in, C), lambda b, q: (b, 0, 0)),
            pl.BlockSpec((1, TQ, 2 * n_pt), lambda b, q: (b, q, 0)),
            pl.BlockSpec((1, TQ, n_pt), lambda b, q: (b, q, 0)),
            pl.BlockSpec((2, n_pt), lambda b, q: (0, 0)),
        ],
        out_specs=pl.BlockSpec((1, TQ, C), lambda b, q: (b, q, 0)),
        compiler_params=pltpu.CompilerParams(
            dimension_semantics=("parallel", "parallel"),
            vmem_limit_bytes=_VMEM_LIMIT),
    )(value, loc, attn, lvl_params)


_MSDA_GATHER_OK = None  # probed once per process


def msda(value, loc, attn, spatial_shapes, H, L, P, Dh, lvl_params, TQ):
    global _MSDA_GATHER_OK
    if _MSDA_GATHER_OK is None:
        try:
            out = jax.block_until_ready(
                _msda_call(value, loc, attn, spatial_shapes, H, L, P, Dh,
                           lvl_params, TQ, True))
            _MSDA_GATHER_OK = True
            return out
        except Exception:
            # TODO(synk): row gather did not lower on this jax/libtpu;
            # fall back to the one-hot-scatter formulation.
            _MSDA_GATHER_OK = False
    return _msda_call(value, loc, attn, spatial_shapes, H, L, P, Dh,
                      lvl_params, TQ, _MSDA_GATHER_OK)


# -------------------------------------------------------- encoder layer ------

def deformable_encoder_layer_forward(params, consts, src, pos, ref2d,
                                     spatial_shapes, n_heads, n_levels,
                                     n_points, row_tile=1024, q_tile=512):
    N, Len_in, C = src.shape
    H, L, P = n_heads, n_levels, n_points
    Dh = C // H
    n_pt = L * P * H
    M = N * Len_in
    TM = _pick_tile(M, row_tile)

    # fused: query = src + pos, value_proj, offsets+attention projection,
    # sampling-location glue, per-head softmax
    value2d, loc2d, attn2d = fused_projections(
        src.reshape(M, C), pos.reshape(M, C), ref2d, params, consts, TM)

    value = value2d.reshape(N, Len_in, C)
    loc = loc2d.reshape(N, Len_in, 2 * n_pt)
    attn = attn2d.reshape(N, Len_in, n_pt)

    # deformable attention core (batch x query-tile grid)
    TQ = _pick_tile(Len_in, q_tile)
    attn_out = msda(value, loc, attn, spatial_shapes, H, L, P, Dh,
                    consts['lvl_params'], TQ)

    # fused: out_proj + residual + LN1 + FFN + residual + LN2
    out = post_attention(attn_out.reshape(M, C), src.reshape(M, C), params, TM)
    return out.reshape(N, Len_in, C)


# -------------------------------------------------------------- encoder ------

def get_reference_points(spatial_shapes, valid_ratios):
    """Matches DeformableTransformerEncoder.get_reference_points."""
    reference_points_list = []
    for lvl, (H_, W_) in enumerate(spatial_shapes):
        ref_y, ref_x = jnp.meshgrid(
            jnp.linspace(0.5, H_ - 0.5, H_, dtype=jnp.float32),
            jnp.linspace(0.5, W_ - 0.5, W_, dtype=jnp.float32),
            indexing='ij')
        ref_y = ref_y.reshape(-1)[None] / (valid_ratios[:, None, lvl, 1] * H_)
        ref_x = ref_x.reshape(-1)[None] / (valid_ratios[:, None, lvl, 0] * W_)
        ref = jnp.stack((ref_x, ref_y), -1)
        reference_points_list.append(ref)
    reference_points = jnp.concatenate(reference_points_list, 1)      # (N,Len,2)
    reference_points = reference_points[:, :, None] * valid_ratios[:, None]
    return reference_points                                           # (N,Len,L,2)


def deformable_encoder_forward(layer_params, consts, num_layers, src,
                               spatial_shapes, level_start_index, valid_ratios,
                               pos, n_heads, n_levels, n_points):
    """DeformableTransformerEncoder.forward.  `_get_clones` deep-copies one
    initialized layer, so all layers share identical parameters here."""
    del level_start_index  # derived statically from spatial_shapes in kernels
    ref = get_reference_points(spatial_shapes, valid_ratios)
    N, Len_in = ref.shape[0], ref.shape[1]
    ref2d = ref.reshape(N * Len_in, n_levels * 2)
    output = src
    for _ in range(num_layers):
        output = deformable_encoder_layer_forward(
            layer_params, consts, output, pos, ref2d, spatial_shapes,
            n_heads, n_levels, n_points)
    return output


# ------------------------------------------------------ static constants -----

def build_static_consts(spatial_shapes, n_heads, n_levels, n_points):
    """Kernel-facing column order: j = (l * P + p) * H + h for x/y/attn blocks."""
    H, L, P = n_heads, n_levels, n_points
    n_pt = L * P * H
    wj = np.zeros((n_pt,), np.float32)
    hj = np.zeros((n_pt,), np.float32)
    inv_norm = np.zeros((2 * n_pt,), np.float32)
    ref_expand = np.zeros((2 * L, 2 * n_pt), np.float32)
    for l, (H_l, W_l) in enumerate(spatial_shapes):
        for p in range(P):
            for h in range(H):
                j = (l * P + p) * H + h
                wj[j] = W_l
                hj[j] = H_l
                inv_norm[j] = 1.0 / W_l                 # x offsets / W_l
                inv_norm[n_pt + j] = 1.0 / H_l          # y offsets / H_l
                ref_expand[2 * l + 0, j] = 1.0          # ref_x -> x column
                ref_expand[2 * l + 1, n_pt + j] = 1.0   # ref_y -> y column
    seg = (np.arange(n_pt)[:, None] % H == np.arange(n_pt)[None, :] % H
           ).astype(np.float32)
    return {
        'inv_norm': jnp.asarray(inv_norm[None, :]),
        'ref_expand': jnp.asarray(ref_expand),
        'seg': jnp.asarray(seg),
        'lvl_params': jnp.asarray(np.stack([wj, hj], 0)),
    }


# -------------------------------------------------------------- param init ---

def init_params(key, d_model, d_ffn, n_heads, n_levels, n_points):
    H, L, P = n_heads, n_levels, n_points
    n_pt = L * P * H
    ks = jax.random.split(key, 6)

    def xavier(k, fan_out, fan_in):   # torch xavier_uniform_ on (out, in)
        bound = math.sqrt(6.0 / (fan_in + fan_out))
        return jax.random.uniform(k, (fan_out, fan_in), jnp.float32, -bound, bound)

    def torch_linear(kw, kb, out_f, in_f):
        bound = 1.0 / math.sqrt(in_f)
        w = jax.random.uniform(kw, (out_f, in_f), jnp.float32, -bound, bound)
        b = jax.random.uniform(kb, (out_f,), jnp.float32, -bound, bound)
        return w, b

    # MSDeformAttn._reset_parameters: sampling_offsets weight=0, bias=grid init;
    # attention_weights weight=0, bias=0.  Bias permuted into the kernel-facing
    # [x-block | y-block | attn-block] column order.
    thetas = np.arange(H, dtype=np.float64) * (2.0 * math.pi / H)
    grid = np.stack([np.cos(thetas), np.sin(thetas)], -1)
    grid = grid / np.abs(grid).max(-1, keepdims=True)
    grid = np.tile(grid.reshape(H, 1, 1, 2), (1, L, P, 1))
    for i in range(P):
        grid[:, :, i, :] *= (i + 1)
    sa_bias = np.zeros((3 * n_pt,), np.float32)
    for h in range(H):
        for l in range(L):
            for p in range(P):
                j = (l * P + p) * H + h
                sa_bias[j] = grid[h, l, p, 0]
                sa_bias[n_pt + j] = grid[h, l, p, 1]

    value_w = xavier(ks[0], d_model, d_model)
    out_w = xavier(ks[1], d_model, d_model)
    lin1_w, lin1_b = torch_linear(ks[2], ks[3], d_ffn, d_model)
    lin2_w, lin2_b = torch_linear(ks[4], ks[5], d_model, d_ffn)

    bf = jnp.bfloat16
    # weights pre-transposed to (in, out) and stored bf16 (f32 accumulation);
    # biases / LN params stay f32.
    return {
        'sa_wT': jnp.zeros((d_model, 3 * n_pt), bf),
        'sa_b': jnp.asarray(sa_bias[None, :], jnp.float32),
        'value_wT': value_w.T.astype(bf),
        'value_b': jnp.zeros((1, d_model), jnp.float32),
        'out_wT': out_w.T.astype(bf),
        'out_b': jnp.zeros((1, d_model), jnp.float32),
        'ln1_g': jnp.ones((1, d_model), jnp.float32),
        'ln1_b': jnp.zeros((1, d_model), jnp.float32),
        'lin1_wT': lin1_w.T.astype(bf),
        'lin1_b': jnp.asarray(lin1_b[None, :], jnp.float32),
        'lin2_wT': lin2_w.T.astype(bf),
        'lin2_b': jnp.asarray(lin2_b[None, :], jnp.float32),
        'ln2_g': jnp.ones((1, d_model), jnp.float32),
        'ln2_b': jnp.zeros((1, d_model), jnp.float32),
    }


# --------------------------------------------------------------------- main --

if __name__ == "__main__":
    d_model, d_ffn = 32, 64
    n_heads, n_levels, n_points = 4, 2, 2
    num_layers = 2
    spatial_shapes = [(24, 24), (12, 12)]            # per-level (H_l, W_l)
    N = 2
    Len_in = sum(h * w for h, w in spatial_shapes)   # 720 -> exercises tiling

    key = jax.random.PRNGKey(0)
    kp, k1, k2 = jax.random.split(key, 3)
    params = init_params(kp, d_model, d_ffn, n_heads, n_levels, n_points)
    consts = build_static_consts(spatial_shapes, n_heads, n_levels, n_points)

    src = jax.random.normal(k1, (N, Len_in, d_model), jnp.float32)
    pos = jax.random.normal(k2, (N, Len_in, d_model), jnp.float32)
    valid_ratios = jnp.ones((N, n_levels, 2), jnp.float32)   # unpadded batches
    level_start_index = jnp.asarray(
        np.cumsum([0] + [h * w for h, w in spatial_shapes[:-1]]), jnp.int32)

    out = deformable_encoder_forward(
        params, consts, num_layers, src, spatial_shapes, level_start_index,
        valid_ratios, pos, n_heads, n_levels, n_points)
    out = jax.block_until_ready(out)

    assert out.shape == (N, Len_in, d_model)
    assert bool(jnp.all(jnp.isfinite(out)))
    print("KERNEL_OK")
</pallas_src>

<mosaic_0001>
module attributes {stable_mosaic.version = 11 : i64} {
  func.func @_fused_proj_kernel(%arg0: i32, %arg1: memref<720x32xf32, #tpu.memory_space<vmem>>, %arg2: memref<720x32xf32, #tpu.memory_space<vmem>>, %arg3: memref<720x4xf32, #tpu.memory_space<vmem>>, %arg4: memref<32x32xbf16, #tpu.memory_space<vmem>>, %arg5: memref<1x32xf32, #tpu.memory_space<vmem>>, %arg6: memref<32x48xbf16, #tpu.memory_space<vmem>>, %arg7: memref<1x48xf32, #tpu.memory_space<vmem>>, %arg8: memref<1x32xf32, #tpu.memory_space<vmem>>, %arg9: memref<4x32xf32, #tpu.memory_space<vmem>>, %arg10: memref<16x16xf32, #tpu.memory_space<vmem>>, %arg11: memref<720x32xf32, #tpu.memory_space<vmem>>, %arg12: memref<720x32xf32, #tpu.memory_space<vmem>>, %arg13: memref<720x16xf32, #tpu.memory_space<vmem>>) attributes {dimension_semantics = [#tpu.dimension_semantics<parallel>], iteration_bounds = array<i64: 2>, scalar_prefetch = 0 : i64, scratch_operands = 0 : i64, tpu.core_type = #tpu.core_type<tc>, window_params = [{transform_indices = @transform_0, window_bounds = array<i64: 720, 32>}, {transform_indices = @transform_1, window_bounds = array<i64: 720, 32>}, {transform_indices = @transform_2, window_bounds = array<i64: 720, 4>}, {pipeline_mode = #tpu.pipeline_mode<synchronous>, transform_indices = @transform_3, window_bounds = array<i64: 32, 32>}, {pipeline_mode = #tpu.pipeline_mode<synchronous>, transform_indices = @transform_4, window_bounds = array<i64: 1, 32>}, {pipeline_mode = #tpu.pipeline_mode<synchronous>, transform_indices = @transform_5, window_bounds = array<i64: 32, 48>}, {pipeline_mode = #tpu.pipeline_mode<synchronous>, transform_indices = @transform_6, window_bounds = array<i64: 1, 48>}, {pipeline_mode = #tpu.pipeline_mode<synchronous>, transform_indices = @transform_7, window_bounds = array<i64: 1, 32>}, {pipeline_mode = #tpu.pipeline_mode<synchronous>, transform_indices = @transform_8, window_bounds = array<i64: 4, 32>}, {pipeline_mode = #tpu.pipeline_mode<synchronous>, transform_indices = @transform_9, window_bounds = array<i64: 16, 16>}, {transform_indices = @transform_10, window_bounds = array<i64: 720, 32>}, {transform_indices = @transform_11, window_bounds = array<i64: 720, 32>}, {transform_indices = @transform_12, window_bounds = array<i64: 720, 16>}]} {
    %c0 = arith.constant 0 : index
    %c0_0 = arith.constant 0 : index
    %0 = vector.load %arg1[%c0, %c0_0] : memref<720x32xf32, #tpu.memory_space<vmem>>, vector<720x32xf32>
    %c0_1 = arith.constant 0 : index
    %c0_2 = arith.constant 0 : index
    %1 = vector.load %arg2[%c0_1, %c0_2] : memref<720x32xf32, #tpu.memory_space<vmem>>, vector<720x32xf32>
    %2 = arith.addf %0, %1 : vector<720x32xf32>
    %3 = arith.truncf %0 : vector<720x32xf32> to vector<720x32xbf16>
    %c0_3 = arith.constant 0 : index
    %c0_4 = arith.constant 0 : index
    %4 = vector.load %arg4[%c0_3, %c0_4] : memref<32x32xbf16, #tpu.memory_space<vmem>>, vector<32x32xbf16>
    %cst = arith.constant dense<0.000000e+00> : vector<720x32xf32>
    %5 = tpu.matmul %3, %4, %cst {dimension_numbers = #tpu.dot_dimension_numbers<[1], [0], [0], [1], [0, 0, 1, 1], [], []>} : vector<720x32xbf16>, vector<32x32xbf16>, vector<720x32xf32> -> vector<720x32xf32>
    %c0_5 = arith.constant 0 : index
    %c0_6 = arith.constant 0 : index
    %6 = vector.load %arg5[%c0_5, %c0_6] : memref<1x32xf32, #tpu.memory_space<vmem>>, vector<1x32xf32>
    %7 = vector.broadcast %6 : vector<1x32xf32> to vector<720x32xf32>
    %8 = arith.addf %5, %7 : vector<720x32xf32>
    %c0_7 = arith.constant 0 : index
    %c0_8 = arith.constant 0 : index
    %9 = vector.load %arg11[%c0_7, %c0_8] : memref<720x32xf32, #tpu.memory_space<vmem>>, vector<720x32xf32>
    tpu.vector_store %arg11[%c0_7, %c0_8], %8 {strides = array<i32>} : memref<720x32xf32, #tpu.memory_space<vmem>>, vector<720x32xf32>,
    %10 = arith.truncf %2 : vector<720x32xf32> to vector<720x32xbf16>
    %c0_9 = arith.constant 0 : index
    %c0_10 = arith.constant 0 : index
    %11 = vector.load %arg6[%c0_9, %c0_10] : memref<32x48xbf16, #tpu.memory_space<vmem>>, vector<32x48xbf16>
    %cst_11 = arith.constant dense<0.000000e+00> : vector<720x48xf32>
    %12 = tpu.matmul %10, %11, %cst_11 {dimension_numbers = #tpu.dot_dimension_numbers<[1], [0], [0], [1], [0, 0, 1, 1], [], []>} : vector<720x32xbf16>, vector<32x48xbf16>, vector<720x48xf32> -> vector<720x48xf32>
    %c0_12 = arith.constant 0 : index
    %c0_13 = arith.constant 0 : index
    %13 = vector.load %arg7[%c0_12, %c0_13] : memref<1x48xf32, #tpu.memory_space<vmem>>, vector<1x48xf32>
    %14 = vector.broadcast %13 : vector<1x48xf32> to vector<720x48xf32>
    %15 = arith.addf %12, %14 : vector<720x48xf32>
    %16 = vector.extract_strided_slice %15 {offsets = [0, 0], sizes = [720, 32], strides = [1, 1]} : vector<720x48xf32> to vector<720x32xf32>
    %c0_14 = arith.constant 0 : index
    %c0_15 = arith.constant 0 : index
    %17 = vector.load %arg8[%c0_14, %c0_15] : memref<1x32xf32, #tpu.memory_space<vmem>>, vector<1x32xf32>
    %18 = vector.broadcast %17 : vector<1x32xf32> to vector<720x32xf32>
    %19 = arith.mulf %16, %18 : vector<720x32xf32>
    %c0_16 = arith.constant 0 : index
    %c0_17 = arith.constant 0 : index
    %20 = vector.load %arg3[%c0_16, %c0_17] : memref<720x4xf32, #tpu.memory_space<vmem>>, vector<720x4xf32>
    %c0_18 = arith.constant 0 : index
    %c0_19 = arith.constant 0 : index
    %21 = vector.load %arg9[%c0_18, %c0_19] : memref<4x32xf32, #tpu.memory_space<vmem>>, vector<4x32xf32>
    %cst_20 = arith.constant dense<0.000000e+00> : vector<720x32xf32>
    %22 = tpu.matmul %20, %21, %cst_20 {dimension_numbers = #tpu.dot_dimension_numbers<[1], [0], [0], [1], [0, 0, 1, 1], [], []>} : vector<720x4xf32>, vector<4x32xf32>, vector<720x32xf32> -> vector<720x32xf32>
    %23 = arith.addf %19, %22 : vector<720x32xf32>
    %c0_21 = arith.constant 0 : index
    %c0_22 = arith.constant 0 : index
    %24 = vector.load %arg12[%c0_21, %c0_22] : memref<720x32xf32, #tpu.memory_space<vmem>>, vector<720x32xf32>
    tpu.vector_store %arg12[%c0_21, %c0_22], %23 {strides = array<i32>} : memref<720x32xf32, #tpu.memory_space<vmem>>, vector<720x32xf32>,
    %25 = vector.extract_strided_slice %15 {offsets = [0, 32], sizes = [720, 16], strides = [1, 1]} : vector<720x48xf32> to vector<720x16xf32>
    %cst_23 = arith.constant dense<0xFF800000> : vector<720xf32>
    %26 = vector.multi_reduction <maximumf>, %25, %cst_23 [1] : vector<720x16xf32> to vector<720xf32>
    %27 = vector.shape_cast %26 : vector<720xf32> to vector<720x1xf32>
    %28 = vector.broadcast %27 : vector<720x1xf32> to vector<720x16xf32>
    %29 = arith.subf %25, %28 : vector<720x16xf32>
    %30 = math.exp %29 : vector<720x16xf32>
    %c0_24 = arith.constant 0 : index
    %c0_25 = arith.constant 0 : index
    %31 = vector.load %arg10[%c0_24, %c0_25] : memref<16x16xf32, #tpu.memory_space<vmem>>, vector<16x16xf32>
    %cst_26 = arith.constant dense<0.000000e+00> : vector<720x16xf32>
    %32 = tpu.matmul %30, %31, %cst_26 {dimension_numbers = #tpu.dot_dimension_numbers<[1], [0], [0], [1], [0, 0, 1, 1], [], []>} : vector<720x16xf32>, vector<16x16xf32>, vector<720x16xf32> -> vector<720x16xf32>
    %33 = arith.divf %30, %32 : vector<720x16xf32>
    %c0_27 = arith.constant 0 : index
    %c0_28 = arith.constant 0 : index
    %34 = vector.load %arg13[%c0_27, %c0_28] : memref<720x16xf32, #tpu.memory_space<vmem>>, vector<720x16xf32>
    tpu.vector_store %arg13[%c0_27, %c0_28], %33 {strides = array<i32>} : memref<720x16xf32, #tpu.memory_space<vmem>>, vector<720x16xf32>,
    return
  }
  func.func @transform_0(%arg0: i32) -> (i32, i32) {
    %c0_i32 = arith.constant 0 : i32
    %c0_i32_0 = arith.constant 0 : i32
    return %arg0, %c0_i32 : i32, i32
  }
  func.func @transform_1(%arg0: i32) -> (i32, i32) {
    %c0_i32 = arith.constant 0 : i32
    %c0_i32_0 = arith.constant 0 : i32
    return %arg0, %c0_i32 : i32, i32
  }
  func.func @transform_2(%arg0: i32) -> (i32, i32) {
    %c0_i32 = arith.constant 0 : i32
    %c0_i32_0 = arith.constant 0 : i32
    return %arg0, %c0_i32 : i32, i32
  }
  func.func @transform_3(%arg0: i32) -> (i32, i32) {
    %c0_i32 = arith.constant 0 : i32
    %c0_i32_0 = arith.constant 0 : i32
    %c0_i32_1 = arith.constant 0 : i32
    return %c0_i32, %c0_i32_0 : i32, i32
  }
  func.func @transform_4(%arg0: i32) -> (i32, i32) {
    %c0_i32 = arith.constant 0 : i32
    %c0_i32_0 = arith.constant 0 : i32
    %c0_i32_1 = arith.constant 0 : i32
    return %c0_i32, %c0_i32_0 : i32, i32
  }
  func.func @transform_5(%arg0: i32) -> (i32, i32) {
    %c0_i32 = arith.constant 0 : i32
    %c0_i32_0 = arith.constant 0 : i32
    %c0_i32_1 = arith.constant 0 : i32
    return %c0_i32, %c0_i32_0 : i32, i32
  }
  func.func @transform_6(%arg0: i32) -> (i32, i32) {
    %c0_i32 = arith.constant 0 : i32
    %c0_i32_0 = arith.constant 0 : i32
    %c0_i32_1 = arith.constant 0 : i32
    return %c0_i32, %c0_i32_0 : i32, i32
  }
  func.func @transform_7(%arg0: i32) -> (i32, i32) {
    %c0_i32 = arith.constant 0 : i32
    %c0_i32_0 = arith.constant 0 : i32
    %c0_i32_1 = arith.constant 0 : i32
    return %c0_i32, %c0_i32_0 : i32, i32
  }
  func.func @transform_8(%arg0: i32) -> (i32, i32) {
    %c0_i32 = arith.constant 0 : i32
    %c0_i32_0 = arith.constant 0 : i32
    %c0_i32_1 = arith.constant 0 : i32
    return %c0_i32, %c0_i32_0 : i32, i32
  }
  func.func @transform_9(%arg0: i32) -> (i32, i32) {
    %c0_i32 = arith.constant 0 : i32
    %c0_i32_0 = arith.constant 0 : i32
    %c0_i32_1 = arith.constant 0 : i32
    return %c0_i32, %c0_i32_0 : i32, i32
  }
  func.func @transform_10(%arg0: i32) -> (i32, i32) {
    %c0_i32 = arith.constant 0 : i32
    %c0_i32_0 = arith.constant 0 : i32
    return %arg0, %c0_i32 : i32, i32
  }
  func.func @transform_11(%arg0: i32) -> (i32, i32) {
    %c0_i32 = arith.constant 0 : i32
    %c0_i32_0 = arith.constant 0 : i32
    return %arg0, %c0_i32 : i32, i32
  }
  func.func @transform_12(%arg0: i32) -> (i32, i32) {
    %c0_i32 = arith.constant 0 : i32
    %c0_i32_0 = arith.constant 0 : i32
    return %arg0, %c0_i32 : i32, i32
  }
}

</mosaic_0001>

<bundles_post_ra>
// kernel: tpu_custom_call.1
= control target key start
LH: loop header
LB: loop body
LE: loop exit
PB: predicated region body
PF: predicated region fallthrough
CT: control target
= control target key end

     0   :  { %s7086_s21 = smov 0   ;;  %s12727_s0 = inlined_call_operand.vmem [shape: f32[1440,32], index: 0, kind: input, shape index: {}]   ;;  %s12728_s1 = inlined_call_operand.vmem [shape: f32[1440,32], index: 1, kind: input, shape index: {}]   ;;  %s12729_s2 = inlined_call_operand.vmem [shape: f32[1440,4], index: 2, kind: input, shape index: {}]   ;;  %s12730_s3 = inlined_call_operand.vmem [shape: bf16[32,32], index: 3, kind: input, shape index: {}]   ;;  %s12731_s4 = inlined_call_operand.vmem [shape: f32[1,32], index: 4, kind: input, shape index: {}]   ;;  %s12732_s5 = inlined_call_operand.vmem [shape: bf16[32,48], index: 5, kind: input, shape index: {}]   ;;  %s12733_s6 = inlined_call_operand.vmem [shape: f32[1,48], index: 6, kind: input, shape index: {}]   ;;  %s12734_s7 = inlined_call_operand.vmem [shape: f32[1,32], index: 7, kind: input, shape index: {}]   ;;  %s12735_s8 = inlined_call_operand.vmem [shape: f32[4,32], index: 8, kind: input, shape index: {}]   ;;  %s12736_s9 = inlined_call_operand.vmem [shape: f32[16,16], index: 9, kind: input, shape index: {}]   ;;  %s12737_s10 = inlined_call_operand.vmem [shape: f32[1440,32], index: 10, kind: output, shape index: {0}]   ;;  %s12738_s11 = inlined_call_operand.vmem [shape: f32[1440,32], index: 11, kind: output, shape index: {1}]   ;;  %s12739_s12 = inlined_call_operand.vmem [shape: f32[1440,16], index: 12, kind: output, shape index: {2}]  }
   0x1 LB: > { %s6234_s22 = sadd.s32 4294967295, %s7017_s21   ;;  %p6238_p0 = scmp.ge.s32.totalorder %s7017_s21, 1  ;;  %s7017_s21 = sphi %s7086_s21, %s23_s21  }
   0x2   : > { %p390_p1 = scmp.lt.s32.totalorder %s7017_s21, 3 }
   0x4   : > { %p391_p2 = pnand %p6238_p0, %p390_p1 }
   0x6   : > { %394 = sbr.rel (%p391_p2) target bundleno = 2359 (0x937), region = 60 }
   0xb   : > { %v6537_v0 = vld [vmem:[%s12732_s5 + $0x8] sm:$0xff]  ;;  %v1902_v1 = vld [vmem:[%s12735_s8] sm:$0xf]  ;;  %vm2174_vm0 = vcmask 1043456   ;;  %s452_s27 = smul.u32 90, %s6234_s22  ;;  %vm1903_vm1 = vcmask 31744  }
   0xc   : > { %6351 = vmatpush.msk.msra.mxu2 %vm2174_vm0, %v1902_v1  ;;  %1490 = vmatpush.bf16.msra.mxu1 %v6537_v0  ;;  %v6536_v2 = vld [vmem:[%s12732_s5] sm:$0xff]  ;;  %vm824_vm2 = vcmask 261120   ;;  %vm2645_vm3 = vcmask 392448   ;;  %s7019_s13 = smov 96   ;;  %vm3458_vm4 = vcmask 130048   ;;  %s7020_s14 = smov 32  }
   0xd   : > { %p453_p3 = scmp.lt.s32.totalorder %s452_s27, 179 }
   0xf   : > { %s13558_s27 = smov (!%p453_p3, %s452_s27), 179 }
  0x10   : > { %1491 = vmatpush.bf16.msra.mxu1 %v6536_v2  ;;  %s7103_s30 = sshll.u32 %s13558_s27, 3 }
  0x11   : > { %s7109_s15 = scalar_lea.vmem %s12729_s2, %s7103_s30  ;;  %s7115_s18 = scalar_lea.vmem %s12727_s0, %s7103_s30 }
  0x12   : > { %v1812_v3 = vld [vmem:[%s7109_s15] sm:$0xff]  ;;  %s7122_s22 = scalar_lea.vmem %s12728_s1, %s7103_s30  ;;  %v490_v5 = vld [vmem:[%s7115_s18 + $0x8] sm:$0xff]  ;;  %v491_v12 = vld [vmem:[%s7115_s18 + $0x10] sm:$0xff]  ;;  %s7224_s29 = scalar_lea.vmem %s12738_s11, %s7103_s30 }
  0x13   : > { %v489_v4 = vld [vmem:[%s7115_s18] sm:$0xff]  ;;  %6352 = vmatmul.msk.f32.vlgmr.msra.gmra.mxu2 %vm1903_vm1, %v1812_v3  ;;  %v580_v7 = vld [vmem:[%s7122_s22 + $0x8] sm:$0xff]  ;;  %v492_v13 = vld [vmem:[%s7115_s18 + $0x18] sm:$0xff]  ;;  %s9159_s28 = scalar_lea.vmem %s12737_s10, %s7103_s30 }
  0x14   : > { %v579_v6 = vld [vmem:[%s7122_s22] sm:$0xff]  ;;  %v670_v9 = vadd.f32 %v580_v7, %v490_v5  ;;  %v1813_v11 = vld [vmem:[%s7109_s15 + $0x8] sm:$0xff]  ;;  %v581_v14 = vld [vmem:[%s7122_s22 + $0x10] sm:$0xff] }
  0x15   : > { %v669_v8 = vadd.f32 %v579_v6, %v489_v4  ;;  %v582_v15 = vld [vmem:[%s7122_s22 + $0x18] sm:$0xff]  ;;  %v1814_v16 = vld [vmem:[%s7109_s15 + $0x10] sm:$0xff]  ;;  %v671_v17 = vadd.f32 %v581_v14, %v491_v12  ;;  %v493_v21 = vld [vmem:[%s7115_s18 + $0x20] sm:$0xff] }
  0x16   : > { %v672_v18 = vadd.f32 %v582_v15, %v492_v13  ;;  %v1815_v20 = vld [vmem:[%s7109_s15 + $0x18] sm:$0xff]  ;;  %v494_v22 = vld [vmem:[%s7115_s18 + $0x28] sm:$0xff]  ;;  %v583_v23 = vld [vmem:[%s7122_s22 + $0x20] sm:$0xff] }
  0x17   : > { %v1284_v10 = vpack.c.bf16 %v670_v9, %v669_v8  ;;  %v584_v24 = vld [vmem:[%s7122_s22 + $0x28] sm:$0xff]  ;;  %v1816_v25 = vld [vmem:[%s7109_s15 + $0x20] sm:$0xff]  ;;  %v673_v26 = vadd.f32 %v583_v23, %v493_v21  ;;  %v495_v30 = vld [vmem:[%s7115_s18 + $0x30] sm:$0xff] }
  0x18   : > { %v1285_v19 = vpack.c.bf16 %v672_v18, %v671_v17  ;;  %v674_v27 = vadd.f32 %v584_v24, %v494_v22  ;;  %v1817_v29 = vld [vmem:[%s7109_s15 + $0x28] sm:$0xff]  ;;  %v496_v31 = vld [vmem:[%s7115_s18 + $0x38] sm:$0xff]  ;;  %v585_v32 = vld [vmem:[%s7122_s22 + $0x30] sm:$0xff] }
  0x19   : > { %6306 = vmatmul.msk.bf16.vlgmr.msra.gmra.mxu1 %vm824_vm2, %v1284_v10  ;;  %v586_v33 = vld [vmem:[%s7122_s22 + $0x38] sm:$0xff]  ;;  %v1818_v34 = vld [vmem:[%s7109_s15 + $0x30] sm:$0xff]  ;;  %v675_v35 = vadd.f32 %v585_v32, %v495_v30  ;;  %v497_v39 = vld [vmem:[%s7115_s18 + $0x40] sm:$0xff] }
  0x1a   : > { %v1286_v28 = vpack.c.bf16 %v674_v27, %v673_v26  ;;  %v676_v36 = vadd.f32 %v586_v33, %v496_v31  ;;  %v1819_v38 = vld [vmem:[%s7109_s15 + $0x38] sm:$0xff]  ;;  %v498_v40 = vld [vmem:[%s7115_s18 + $0x48] sm:$0xff]  ;;  %v587_v41 = vld [vmem:[%s7122_s22 + $0x40] sm:$0xff] }
  0x1b   : > { %6353 = vmatmul.msk.f32.gmra.mxu2 %vm1903_vm1, %v1813_v11  ;;  %v588_v42 = vld [vmem:[%s7122_s22 + $0x48] sm:$0xff]  ;;  %v1820_v43 = vld [vmem:[%s7109_s15 + $0x40] sm:$0xff]  ;;  %v677_v44 = vadd.f32 %v587_v41, %v497_v39  ;;  %v499_v48 = vld [vmem:[%s7115_s18 + $0x50] sm:$0xff] }
  0x1c   : > { %v1287_v37 = vpack.c.bf16 %v676_v36, %v675_v35  ;;  %v678_v45 = vadd.f32 %v588_v42, %v498_v40  ;;  %v1821_v47 = vld [vmem:[%s7109_s15 + $0x48] sm:$0xff]  ;;  %v500_v49 = vld [vmem:[%s7115_s18 + $0x58] sm:$0xff]  ;;  %v589_v50 = vld [vmem:[%s7122_s22 + $0x50] sm:$0xff] }
  0x1d   : > { %v590_v51 = vld [vmem:[%s7122_s22 + $0x58] sm:$0xff]  ;;  %v1822_v52 = vld [vmem:[%s7109_s15 + $0x50] sm:$0xff]  ;;  %v679_v53 = vadd.f32 %v589_v50, %v499_v48  ;;  %v501_v57 = vld [vmem:[%s7115_s18 + $0x60] sm:$0xff] }
  0x1e   : > { %v1288_v46 = vpack.c.bf16 %v678_v45, %v677_v44  ;;  %v680_v54 = vadd.f32 %v590_v51, %v500_v49  ;;  %v1823_v56 = vld [vmem:[%s7109_s15 + $0x58] sm:$0xff]  ;;  %v502_v58 = vld [vmem:[%s7115_s18 + $0x68] sm:$0xff]  ;;  %v591_v59 = vld [vmem:[%s7122_s22 + $0x60] sm:$0xff] }
  0x1f   : > { %v592_v60 = vld [vmem:[%s7122_s22 + $0x68] sm:$0xff]  ;;  %v1824_v61 = vld [vmem:[%s7109_s15 + $0x60] sm:$0xff]  ;;  %v681_v62 = vadd.f32 %v591_v59, %v501_v57  ;;  %v503_v2 = vld [vmem:[%s7115_s18 + $0x70] sm:$0xff] }
  0x20   : > { %v1289_v55 = vpack.c.bf16 %v680_v54, %v679_v53  ;;  %v682_v63 = vadd.f32 %v592_v60, %v502_v58  ;;  %v1825_v1 = vld [vmem:[%s7109_s15 + $0x68] sm:$0xff]  ;;  %v504_v3 = vld [vmem:[%s7115_s18 + $0x78] sm:$0xff]  ;;  %v593_v4 = vld [vmem:[%s7122_s22 + $0x70] sm:$0xff] }
  0x21   : > { %v594_v5 = vld [vmem:[%s7122_s22 + $0x78] sm:$0xff]  ;;  %v1826_v6 = vld [vmem:[%s7109_s15 + $0x70] sm:$0xff]  ;;  %v683_v7 = vadd.f32 %v593_v4, %v503_v2  ;;  %v505_v11 = vld [vmem:[%s7115_s18 + $0x80] sm:$0xff] }
  0x22   : > { %v1290_v0 = vpack.c.bf16 %v682_v63, %v681_v62  ;;  %v684_v8 = vadd.f32 %v594_v5, %v504_v3  ;;  %v1827_v10 = vld [vmem:[%s7109_s15 + $0x78] sm:$0xff]  ;;  %v506_v12 = vld [vmem:[%s7115_s18 + $0x88] sm:$0xff]  ;;  %v595_v13 = vld [vmem:[%s7122_s22 + $0x80] sm:$0xff] }
  0x23   : > { %6354 = vmatmul.msk.f32.gmra.mxu2 %vm1903_vm1, %v1814_v16  ;;  %v596_v14 = vld [vmem:[%s7122_s22 + $0x88] sm:$0xff]  ;;  %v1828_v15 = vld [vmem:[%s7109_s15 + $0x80] sm:$0xff]  ;;  %v685_v16 = vadd.f32 %v595_v13, %v505_v11  ;;  %v597_v39 = vld [vmem:[%s7122_s22 + $0x90] sm:$0xff] }
  0x24   : > { %v1291_v9 = vpack.c.bf16 %v684_v8, %v683_v7  ;;  %v686_v17 = vadd.f32 %v596_v14, %v506_v12  ;;  %v7203_v18 = vld [vmem:[%s12733_s6] ss:$0 sm:$0xff]  ;;  %v1829_v26 = vld [vmem:[%s7109_s15 + $0x88] sm:$0xff]  ;;  %v598_v40 = vld [vmem:[%s7122_s22 + $0x98] sm:$0xff] }
  0x25   : > { %v1830_v44 = vld [vmem:[%s7109_s15 + $0x90] sm:$0xff]  ;;  %v1831_v53 = vld [vmem:[%s7109_s15 + $0x98] sm:$0xff]  ;;  %v509_v4 = vld [vmem:[%s7115_s18 + $0xa0] sm:$0xff] }
  0x26   : > { %v510_v5 = vld [vmem:[%s7115_s18 + $0xa8] sm:$0xff] }
  0x29   : > { %6307 = vmatmul.msk.bf16.gmra.mxu1 %vm824_vm2, %v1285_v19  ;;  %v1292_v19 = vpack.c.bf16 %v686_v17, %v685_v16 }
  0x2b   : > { %6355 = vmatmul.msk.f32.gmra.mxu2 %vm1903_vm1, %v1815_v20  ;;  %v7209_v20 = vld [vmem:[%s12734_s7] ss:$0 sm:$0xff] }
  0x33   : > { %6356 = vmatmul.msk.f32.gmra.mxu2 %vm1903_vm1, %v1816_v25 }
  0x39   : > { %6308 = vmatmul.msk.bf16.gmra.mxu1 %vm824_vm2, %v1286_v28 }
  0x3b   : > { %6357 = vmatmul.msk.f32.gmra.mxu2 %vm1903_vm1, %v1817_v29 }
  0x43   : > { %6358 = vmatmul.msk.f32.gmra.mxu2 %vm1903_vm1, %v1818_v34 }
  0x49   : > { %6309 = vmatmul.msk.bf16.gmra.mxu1 %vm824_vm2, %v1287_v37  ;;  %v507_v37 = vld [vmem:[%s7115_s18 + $0x90] sm:$0xff] }
  0x4a   : > { %v687_v41 = vadd.f32 %v597_v39, %v507_v37 }
  0x4b   : > { %6359 = vmatmul.msk.f32.gmra.mxu2 %vm1903_vm1, %v1819_v38  ;;  %v508_v38 = vld [vmem:[%s7115_s18 + $0x98] sm:$0xff] }
  0x4c   : > { %v688_v45 = vadd.f32 %v598_v40, %v508_v38 }
  0x53   : > { %6360 = vmatmul.msk.f32.gmra.mxu2 %vm1903_vm1, %v1820_v43 }
  0x59   : > { %6310 = vmatmul.msk.bf16.gmra.mxu1 %vm824_vm2, %v1288_v46 }
  0x5b   : > { %6361 = vmatmul.msk.f32.gmra.mxu2 %vm1903_vm1, %v1821_v47  ;;  %v1293_v47 = vpack.c.bf16 %v688_v45, %v687_v41 }
  0x63   : > { %6362 = vmatmul.msk.f32.gmra.mxu2 %vm1903_vm1, %v1822_v52 }
  0x69   : > { %6311 = vmatmul.msk.bf16.gmra.mxu1 %vm824_vm2, %v1289_v55 }
  0x6b   : > { %6363 = vmatmul.msk.f32.gmra.mxu2 %vm1903_vm1, %v1823_v56 }
  0x73   : > { %6364 = vmatmul.msk.f32.gmra.mxu2 %vm1903_vm1, %v1824_v61 }
  0x79   : > { %6312 = vmatmul.msk.bf16.gmra.mxu1 %vm824_vm2, %v1290_v0 }
  0x7b   : > { %6365 = vmatmul.msk.f32.gmra.mxu2 %vm1903_vm1, %v1825_v1 }
  0x83   : > { %6366 = vmatmul.msk.f32.gmra.mxu2 %vm1903_vm1, %v1826_v6  ;;  %v599_v6 = vld [vmem:[%s7122_s22 + $0xa0] sm:$0xff] }
  0x89   : > { %6313 = vmatmul.msk.bf16.gmra.mxu1 %vm824_vm2, %v1291_v9  ;;  %v600_v9 = vld [vmem:[%s7122_s22 + $0xa8] sm:$0xff] }
  0x8a   : > { %v690_v11 = vadd.f32 %v600_v9, %v510_v5  ;;  %v515_v9 = vld [vmem:[%s7115_s18 + $0xd0] sm:$0xff] }
  0x8b   : > { %6367 = vmatmul.msk.f32.gmra.mxu2 %vm1903_vm1, %v1827_v10  ;;  %v689_v10 = vadd.f32 %v599_v6, %v509_v4  ;;  %v1834_v6 = vld [vmem:[%s7109_s15 + $0xb0] sm:$0xff] }
  0x8d   : > { %v1294_v14 = vpack.c.bf16 %v690_v11, %v689_v10  ;;  %v516_v10 = vld [vmem:[%s7115_s18 + $0xd8] sm:$0xff]  ;;  %v605_v11 = vld [vmem:[%s7122_s22 + $0xd0] sm:$0xff] }
  0x93   : > { %6368 = vmatmul.msk.f32.gmra.mxu2 %vm1903_vm1, %v1828_v15 }
  0x96   : > { %v1493_v21 = vpop.f32.mrf.mxu1  ;;  %v2195_v23 = vpop.f32.mrf.mxu2 }
  0x97   : > { %v7212_v22 = vadd.f32 %v7203_v18, %v1493_v21 }
  0x99   : > { %6314 = vmatmul.msk.bf16.gmra.mxu1 %vm824_vm2, %v1292_v19  ;;  %v1722_v24 = vmul.f32 %v7209_v20, %v7212_v22  ;;  %v2646_v25 = vsel %vm2645_vm3, %v7212_v22, -inf }
  0x9a   : > { %2647 = vmax.xlane.f32.xlu0 %v2646_v25 }
  0x9b   : > { %v2465_v27 = vadd.f32 %v2195_v23, %v1722_v24  ;;  %6369 = vmatmul.msk.f32.gmra.mxu2 %vm1903_vm1, %v1829_v26  ;;  %v511_v26 = vld [vmem:[%s7115_s18 + $0xb0] sm:$0xff] }
  0x9d   : > { %2555 = vst.msk [vmem:[%s7224_s29] sm:$0xff] %vm824_vm2, %v2465_v27  ;;  %v512_v27 = vld [vmem:[%s7115_s18 + $0xb8] sm:$0xff] }
  0x9e   : > { %v1495_v28 = vpop.f32.mrf.mxu1  ;;  %v2198_v30 = vpop.f32.mrf.mxu2 }
  0x9f   : > { %v7230_v29 = vadd.f32 %v7203_v18, %v1495_v28  ;;  %v601_v28 = vld [vmem:[%s7122_s22 + $0xb0] sm:$0xff] }
  0xa1   : > { %v1723_v31 = vmul.f32 %v7209_v20, %v7230_v29  ;;  %v2649_v32 = vsel %vm2645_vm3, %v7230_v29, -inf }
  0xa2   : > { %2650 = vmax.xlane.f32.xlu0 %v2649_v32  ;;  %v602_v32 = vld [vmem:[%s7122_s22 + $0xb8] sm:$0xff] }
  0xa3   : > { %v2466_v33 = vadd.f32 %v2198_v30, %v1723_v31  ;;  %6370 = vmatmul.msk.f32.gmra.mxu2 %vm1903_vm1, %v1830_v44 }
  0xa5   : > { %2556 = vst.msk [vmem:[%s7224_s29 + $0x8] sm:$0xff] %vm824_vm2, %v2466_v33  ;;  %v691_v33 = vadd.f32 %v601_v28, %v511_v26 }
  0xa6   : > { %v1498_v34 = vpop.f32.mrf.mxu1  ;;  %v2201_v36 = vpop.f32.mrf.mxu2 }
  0xa7   : > { %v7239_v35 = vadd.f32 %v7203_v18, %v1498_v34  ;;  %v692_v34 = vadd.f32 %v602_v32, %v512_v27 }
  0xa9   : > { %v1724_v42 = vmul.f32 %v7209_v20, %v7239_v35  ;;  %v2652_v43 = vsel %vm2645_vm3, %v7239_v35, -inf  ;;  %6315 = vmatmul.msk.bf16.gmra.mxu1 %vm824_vm2, %v1293_v47  ;;  %v1295_v38 = vpack.c.bf16 %v692_v34, %v691_v33 }
  0xaa   : > { %2653 = vmax.xlane.f32.xlu1 %v2652_v43 }
  0xab   : > { %v2467_v46 = vadd.f32 %v2201_v36, %v1724_v42  ;;  %6371 = vmatmul.msk.f32.gmra.mxu2 %vm1903_vm1, %v1831_v53 }
  0xad   : > { %2557 = vst.msk [vmem:[%s7224_s29 + $0x10] sm:$0xff] %vm824_vm2, %v2467_v46  ;;  %v1832_v46 = vld [vmem:[%s7109_s15 + $0xa0] sm:$0xff] }
  0xae   : > { %v1500_v48 = vpop.f32.mrf.mxu1  ;;  %v2204_v50 = vpop.f32.mrf.mxu2 }
  0xaf   : > { %v7255_v49 = vadd.f32 %v7203_v18, %v1500_v48  ;;  %v513_v48 = vld [vmem:[%s7115_s18 + $0xc0] sm:$0xff] }
  0xb1   : > { %v1725_v51 = vmul.f32 %v7209_v20, %v7255_v49  ;;  %v2655_v52 = vsel %vm2645_vm3, %v7255_v49, -inf }
  0xb2   : > { %2656 = vmax.xlane.f32.xlu1 %v2655_v52 }
  0xb3   : > { %v2468_v54 = vadd.f32 %v2204_v50, %v1725_v51  ;;  %6372 = vmatmul.msk.f32.gmra.mxu2 %vm1903_vm1, %v1832_v46  ;;  %v514_v50 = vld [vmem:[%s7115_s18 + $0xc8] sm:$0xff]  ;;  %v603_v51 = vld [vmem:[%s7122_s22 + $0xc0] sm:$0xff] }
  0xb5   : > { %2558 = vst.msk [vmem:[%s7224_s29 + $0x18] sm:$0xff] %vm824_vm2, %v2468_v54  ;;  %v604_v54 = vld [vmem:[%s7122_s22 + $0xc8] sm:$0xff] }
  0xb6   : > { %v1503_v55 = vpop.f32.mrf.mxu1  ;;  %v2207_v57 = vpop.f32.mrf.mxu2 }
  0xb7   : > { %v7266_v56 = vadd.f32 %v7203_v18, %v1503_v55  ;;  %v693_v55 = vadd.f32 %v603_v51, %v513_v48 }
  0xb9   : > { %v1726_v58 = vmul.f32 %v7209_v20, %v7266_v56  ;;  %v2658_v59 = vsel %vm2645_vm3, %v7266_v56, -inf  ;;  %6316 = vmatmul.msk.bf16.gmra.mxu1 %vm824_vm2, %v1294_v14  ;;  %v606_v14 = vld [vmem:[%s7122_s22 + $0xd8] sm:$0xff] }
  0xba   : > { %2659 = vmax.xlane.f32.xlu2 %v2658_v59 }
  0xbb   : > { %v2469_v60 = vadd.f32 %v2207_v57, %v1726_v58  ;;  %v694_v57 = vadd.f32 %v604_v54, %v514_v50 }
  0xbd   : > { %2559 = vst.msk [vmem:[%s7224_s29 + $0x20] sm:$0xff] %vm824_vm2, %v2469_v60  ;;  %v1296_v60 = vpack.c.bf16 %v694_v57, %v693_v55 }
  0xbe   : > { %v1505_v61 = vpop.f32.mrf.mxu1  ;;  %v2210_v63 = vpop.f32.mrf.mxu2 }
  0xbf   : > { %v7275_v62 = vadd.f32 %v7203_v18, %v1505_v61 }
  0xc1   : > { %v1727_v0 = vmul.f32 %v7209_v20, %v7275_v62  ;;  %v2661_v1 = vsel %vm2645_vm3, %v7275_v62, -inf }
  0xc2   : > { %2662 = vmax.xlane.f32.xlu2 %v2661_v1 }
  0xc3   : > { %v2470_v2 = vadd.f32 %v2210_v63, %v1727_v0  ;;  %v1833_v63 = vld [vmem:[%s7109_s15 + $0xa8] sm:$0xff] }
  0xc4   : > { %6373 = vmatmul.msk.f32.gmra.mxu2 %vm1903_vm1, %v1833_v63 }
  0xc5   : > { %2560 = vst.msk [vmem:[%s7224_s29 + $0x28] sm:$0xff] %vm824_vm2, %v2470_v2 }
  0xc6   : > { %v1508_v3 = vpop.f32.mrf.mxu1  ;;  %v2213_v8 = vpop.f32.mrf.mxu2 }
  0xc7   : > { %v7287_v7 = vadd.f32 %v7203_v18, %v1508_v3 }
  0xc9   : > { %v1728_v12 = vmul.f32 %v7209_v20, %v7287_v7  ;;  %v2664_v13 = vsel %vm2645_vm3, %v7287_v7, -inf  ;;  %6317 = vmatmul.msk.bf16.gmra.mxu1 %vm824_vm2, %v1295_v38 }
  0xca   : > { %2665 = vmax.xlane.f32.xlu0 %v2664_v13 }
  0xcb   : > { %v2471_v15 = vadd.f32 %v2213_v8, %v1728_v12 }
  0xcc   : > { %6374 = vmatmul.msk.f32.gmra.mxu2 %vm1903_vm1, %v1834_v6 }
  0xcd   : > { %2561 = vst.msk [vmem:[%s7224_s29 + $0x30] sm:$0xff] %vm824_vm2, %v2471_v15  ;;  %v695_v15 = vadd.f32 %v605_v11, %v515_v9  ;;  %v1837_v11 = vld [vmem:[%s7109_s15 + $0xc8] sm:$0xff] }
  0xce   : > { %v1510_v16 = vpop.f32.mrf.mxu1  ;;  %v2216_v19 = vpop.f32.mrf.mxu2 }
  0xcf   : > { %v7298_v17 = vadd.f32 %v7203_v18, %v1510_v16  ;;  %v696_v16 = vadd.f32 %v606_v14, %v516_v10 }
  0xd1   : > { %v1729_v21 = vmul.f32 %v7209_v20, %v7298_v17  ;;  %v2667_v23 = vsel %vm2645_vm3, %v7298_v17, -inf }
  0xd2   : > { %2668 = vmax.xlane.f32.xlu1 %v2667_v23  ;;  %v1297_v23 = vpack.c.bf16 %v696_v16, %v695_v15  ;;  %v517_v16 = vld [vmem:[%s7115_s18 + $0xe0] sm:$0xff] }
  0xd3   : > { %v2472_v24 = vadd.f32 %v2216_v19, %v1729_v21 }
  0xd5   : > { %2562 = vst.msk [vmem:[%s7224_s29 + $0x38] sm:$0xff] %vm824_vm2, %v2472_v24 }
  0xd6   : > { %v1513_v25 = vpop.f32.mrf.mxu1  ;;  %v2219_v31 = vpop.f32.mrf.mxu2 }
  0xd7   : > { %v7310_v30 = vadd.f32 %v7203_v18, %v1513_v25  ;;  %v1835_v25 = vld [vmem:[%s7109_s15 + $0xb8] sm:$0xff] }
  0xd8   : > { %6375 = vmatmul.msk.f32.gmra.mxu2 %vm1903_vm1, %v1835_v25 }
  0xd9   : > { %v1730_v36 = vmul.f32 %v7209_v20, %v7310_v30  ;;  %v2670_v37 = vsel %vm2645_vm3, %v7310_v30, -inf  ;;  %6318 = vmatmul.msk.bf16.gmra.mxu1 %vm824_vm2, %v1296_v60 }
  0xda   : > { %2671 = vmax.xlane.f32.xlu2 %v2670_v37 }
  0xdb   : > { %v2473_v39 = vadd.f32 %v2219_v31, %v1730_v36 }
  0xdd   : > { %2563 = vst.msk [vmem:[%s7224_s29 + $0x40] sm:$0xff] %vm824_vm2, %v2473_v39 }
  0xde   : > { %v1515_v40 = vpop.f32.mrf.mxu1  ;;  %v2222_v42 = vpop.f32.mrf.mxu2 }
  0xdf   : > { %v7321_v41 = vadd.f32 %v7203_v18, %v1515_v40 }
  0xe1   : > { %v1731_v43 = vmul.f32 %v7209_v20, %v7321_v41  ;;  %v2673_v44 = vsel %vm2645_vm3, %v7321_v41, -inf }
  0xe2   : > { %2674 = vmax.xlane.f32.xlu0 %v2673_v44 }
  0xe3   : > { %v2474_v45 = vadd.f32 %v2222_v42, %v1731_v43 }
  0xe5   : > { %2564 = vst.msk [vmem:[%s7224_s29 + $0x48] sm:$0xff] %vm824_vm2, %v2474_v45 }
  0xe6   : > { %v1518_v47 = vpop.f32.mrf.mxu1  ;;  %v2225_v53 = vpop.f32.mrf.mxu2 }
  0xe7   : > { %v7335_v52 = vadd.f32 %v7203_v18, %v1518_v47 }
  0xe9   : > { %v1732_v58 = vmul.f32 %v7209_v20, %v7335_v52  ;;  %v2676_v59 = vsel %vm2645_vm3, %v7335_v52, -inf  ;;  %6319 = vmatmul.msk.bf16.gmra.mxu1 %vm824_vm2, %v1297_v23 }
  0xea   : > { %2677 = vmax.xlane.f32.xlu1 %v2676_v59 }
  0xeb   : > { %v2475_v61 = vadd.f32 %v2225_v53, %v1732_v58 }
  0xed   : > { %2565 = vst.msk [vmem:[%s7224_s29 + $0x50] sm:$0xff] %vm824_vm2, %v2475_v61 }
  0xee   : > { %v1520_v0 = vpop.f32.mrf.mxu1  ;;  %v2228_v2 = vpop.f32.mrf.mxu2 }
  0xef   : > { %v7348_v1 = vadd.f32 %v7203_v18, %v1520_v0 }
  0xf1   : > { %v1733_v3 = vmul.f32 %v7209_v20, %v7348_v1  ;;  %v2679_v4 = vsel %vm2645_vm3, %v7348_v1, -inf }
  0xf2   : > { %2680 = vmax.xlane.f32.xlu2 %v2679_v4 }
  0xf3   : > { %v2476_v5 = vadd.f32 %v2228_v2, %v1733_v3  ;;  %v1836_v2 = vld [vmem:[%s7109_s15 + $0xc0] sm:$0xff] }
  0xf4   : > { %6376 = vmatmul.msk.f32.gmra.mxu2 %vm1903_vm1, %v1836_v2 }
  0xf5   : > { %2566 = vst.msk [vmem:[%s7224_s29 + $0x58] sm:$0xff] %vm824_vm2, %v2476_v5 }
  0xf6   : > { %v1523_v8 = vpop.f32.mrf.mxu1  ;;  %v2231_v13 = vpop.f32.mrf.mxu2 }
  0xf7   : > { %v7362_v12 = vadd.f32 %v7203_v18, %v1523_v8 }
  0xf9   : > { %v1734_v19 = vmul.f32 %v7209_v20, %v7362_v12  ;;  %v2682_v21 = vsel %vm2645_vm3, %v7362_v12, -inf }
  0xfa   : > { %2683 = vmax.xlane.f32.xlu0 %v2682_v21  ;;  %v607_v21 = vld [vmem:[%s7122_s22 + $0xe0] sm:$0xff] }
  0xfb   : > { %v2477_v24 = vadd.f32 %v2231_v13, %v1734_v19  ;;  %v518_v19 = vld [vmem:[%s7115_s18 + $0xe8] sm:$0xff]  ;;  %v697_v25 = vadd.f32 %v607_v21, %v517_v16 }
  0xfc   : > { %6377 = vmatmul.msk.f32.gmra.mxu2 %vm1903_vm1, %v1837_v11 }
  0xfd   : > { %2567 = vst.msk [vmem:[%s7224_s29 + $0x60] sm:$0xff] %vm824_vm2, %v2477_v24  ;;  %v608_v24 = vld [vmem:[%s7122_s22 + $0xe8] sm:$0xff] }
  0xfe   : > { %v1525_v26 = vpop.f32.mrf.mxu1  ;;  %v2234_v28 = vpop.f32.mrf.mxu2 }
  0xff   : > { %v7375_v27 = vadd.f32 %v7203_v18, %v1525_v26  ;;  %v1838_v26 = vld [vmem:[%s7109_s15 + $0xd0] sm:$0xff] }
 0x101   : > { %v1735_v31 = vmul.f32 %v7209_v20, %v7375_v27  ;;  %v2685_v32 = vsel %vm2645_vm3, %v7375_v27, -inf }
 0x102   : > { %2686 = vmax.xlane.f32.xlu1 %v2685_v32 }
 0x103   : > { %v2478_v33 = vadd.f32 %v2234_v28, %v1735_v31  ;;  %v698_v28 = vadd.f32 %v608_v24, %v518_v19 }
 0x104   : > { %6378 = vmatmul.msk.f32.gmra.mxu2 %vm1903_vm1, %v1838_v26 }
 0x105   : > { %2568 = vst.msk [vmem:[%s7224_s29 + $0x68] sm:$0xff] %vm824_vm2, %v2478_v33  ;;  %v1298_v33 = vpack.c.bf16 %v698_v28, %v697_v25 }
 0x106   : > { %v1528_v34 = vpop.f32.mrf.mxu1  ;;  %v2237_v37 = vpop.f32.mrf.mxu2 }
 0x107   : > { %v7384_v36 = vadd.f32 %v7203_v18, %v1528_v34  ;;  %6320 = vmatmul.msk.bf16.gmra.mxu1 %vm824_vm2, %v1298_v33 }
 0x109   : > { %v1736_v38 = vmul.f32 %v7209_v20, %v7384_v36  ;;  %v2688_v39 = vsel %vm2645_vm3, %v7384_v36, -inf }
 0x10a   : > { %2689 = vmax.xlane.f32.xlu2 %v2688_v39 }
 0x10b   : > { %v2479_v40 = vadd.f32 %v2237_v37, %v1736_v38 }
 0x10d   : > { %2569 = vst.msk [vmem:[%s7224_s29 + $0x70] sm:$0xff] %vm824_vm2, %v2479_v40  ;;  %v2648_v42 = vpop.xlane.xlu0 %2647  ;;  %v1839_v40 = vld [vmem:[%s7109_s15 + $0xd8] sm:$0xff] }
 0x10e   : > { %v1530_v43 = vpop.f32.mrf.mxu1  ;;  %v2240_v45 = vpop.f32.mrf.mxu2  ;;  %v2916_v48 = vsub.f32 %v7212_v22, %v2648_v42  ;;  %6379 = vmatmul.msk.f32.gmra.mxu2 %vm1903_vm1, %v1839_v40  ;;  %v519_v42 = vld [vmem:[%s7115_s18 + $0xf0] sm:$0xff]  ;;  %v521_v40 = vld [vmem:[%s7115_s18 + $0x100] sm:$0xff] }
 0x10f   : > { %v7393_v44 = vadd.f32 %v7203_v18, %v1530_v43  ;;  %v520_v43 = vld [vmem:[%s7115_s18 + $0xf8] sm:$0xff] }
 0x110   : > { %v3006_v54 = vmul.f32 1.442695, %v2916_v48 }
 0x111   : > { %v1737_v46 = vmul.f32 %v7209_v20, %v7393_v44  ;;  %v2691_v47 = vsel %vm2645_vm3, %v7393_v44, -inf }
 0x112   : > { %2692 = vmax.xlane.f32.xlu0 %v2691_v47  ;;  %6551 = vpow2.f32 %v3006_v54  ;;  %v1841_v54 = vld [vmem:[%s7109_s15 + $0xe8] sm:$0xff] }
 0x113   : > { %v2480_v50 = vadd.f32 %v2240_v45, %v1737_v46  ;;  %v609_v45 = vld [vmem:[%s7122_s22 + $0xf0] sm:$0xff]  ;;  %v610_v46 = vld [vmem:[%s7122_s22 + $0xf8] sm:$0xff] }
 0x114   : > { %v699_v47 = vadd.f32 %v609_v45, %v519_v42  ;;  %v700_v48 = vadd.f32 %v610_v46, %v520_v43  ;;  %v522_v42 = vld [vmem:[%s7115_s18 + $0x108] sm:$0xff]  ;;  %v611_v43 = vld [vmem:[%s7122_s22 + $0x100] sm:$0xff] }
 0x115   : > { %2570 = vst.msk [vmem:[%s7224_s29 + $0x78] sm:$0xff] %vm824_vm2, %v2480_v50  ;;  %v2651_v51 = vpop.xlane.xlu0 %2650 }
 0x116   : > { %v1533_v53 = vpop.f32.mrf.mxu1  ;;  %v2917_v55 = vsub.f32 %v7230_v29, %v2651_v51  ;;  %v2243_v58 = vpop.f32.mrf.mxu2  ;;  %v1299_v50 = vpack.c.bf16 %v700_v48, %v699_v47  ;;  %v1840_v51 = vld [vmem:[%s7109_s15 + $0xe0] sm:$0xff]  ;;  %v612_v47 = vld [vmem:[%s7122_s22 + $0x108] sm:$0xff]  ;;  %v701_v48 = vadd.f32 %v611_v43, %v521_v40  ;;  %v523_v40 = vld [vmem:[%s7115_s18 + $0x110] sm:$0xff] }
 0x117   : > { %v7404_v57 = vadd.f32 %v7203_v18, %v1533_v53  ;;  %6380 = vmatmul.msk.f32.gmra.mxu2 %vm1903_vm1, %v1840_v51  ;;  %v702_v51 = vadd.f32 %v612_v47, %v522_v42  ;;  %v524_v42 = vld [vmem:[%s7115_s18 + $0x118] sm:$0xff]  ;;  %v613_v43 = vld [vmem:[%s7122_s22 + $0x110] sm:$0xff] }
 0x118   : > { %v3008_v22 = vmul.f32 1.442695, %v2917_v55  ;;  %v7416_v3 = vpop.eup %6551  ;;  %6321 = vmatmul.msk.bf16.gmra.mxu1 %vm824_vm2, %v1299_v50  ;;  %v614_v47 = vld [vmem:[%s7122_s22 + $0x118] sm:$0xff] }
 0x119   : > { %v1738_v59 = vmul.f32 %v7209_v20, %v7404_v57  ;;  %v2694_v60 = vsel %vm2645_vm3, %v7404_v57, -inf  ;;  %12915 = vst [vmem:[#allocation2_spill] sm:$0xff] %v7416_v3 }
 0x11a   : > { %2695 = vmax.xlane.f32.xlu1 %v2694_v60  ;;  %6553 = vpow2.f32 %v3008_v22  ;;  %v1842_v60 = vld [vmem:[%s7109_s15 + $0xf0] sm:$0xff] }
 0x11b   : > { %v2481_v61 = vadd.f32 %v2243_v58, %v1738_v59 }
 0x11d   : > { %2571 = vst.msk [vmem:[%s7224_s29 + $0x80] sm:$0xff] %vm824_vm2, %v2481_v61  ;;  %v2654_v4 = vpop.xlane.xlu1 %2653 }
 0x11e   : > { %v1535_v63 = vpop.f32.mrf.mxu1  ;;  %v2246_v0 = vpop.f32.mrf.mxu2  ;;  %v2918_v8 = vsub.f32 %v7239_v35, %v2654_v4 }
 0x11f   : > { %v7413_v29 = vadd.f32 %v7203_v18, %v1535_v63  ;;  %6381 = vmatmul.msk.f32.gmra.mxu2 %vm1903_vm1, %v1841_v54  ;;  %v1300_v54 = vpack.c.bf16 %v702_v51, %v701_v48  ;;  %v703_v48 = vadd.f32 %v613_v43, %v523_v40 }
 0x120   : > { %v7424_v9 = vpop.eup %6553  ;;  %v3010_v10 = vmul.f32 1.442695, %v2918_v8 }
 0x121   : > { %v1739_v5 = vmul.f32 %v7209_v20, %v7413_v29  ;;  %12916 = vst [vmem:[#allocation3_spill] sm:$0xff] %v7424_v9  ;;  %v2697_v53 = vsel %vm2645_vm3, %v7413_v29, -inf }
 0x122   : > { %3278 = vrot.lane.b32.xlu2 %v7416_v3, %s7019_s13  ;;  %6555 = vpow2.f32 %v3010_v10  ;;  %v667_v3 = vld [vmem:[%s7122_s22 + $0x2c0] sm:$0xff] }
 0x123   : > { %v2482_v6 = vadd.f32 %v2246_v0, %v1739_v5  ;;  %v1843_v5 = vld [vmem:[%s7109_s15 + $0xf8] sm:$0xff] }
 0x125   : > { %2572 = vst.msk [vmem:[%s7224_s29 + $0x88] sm:$0xff] %vm824_vm2, %v2482_v6  ;;  %v2657_v59 = vpop.xlane.xlu1 %2656 }
 0x126   : > { %3280 = vrot.lane.b32.xlu0 %v7424_v9, %s7019_s13  ;;  %v1538_v13 = vpop.f32.mrf.mxu1  ;;  %v2249_v15 = vpop.f32.mrf.mxu2  ;;  %v2919_v22 = vsub.f32 %v7255_v49, %v2657_v59 }
 0x127   : > { %v7433_v14 = vadd.f32 %v7203_v18, %v1538_v13  ;;  %6382 = vmatmul.msk.f32.gmra.mxu2 %vm1903_vm1, %v1842_v60  ;;  %v3186_v13 = vld [vmem:[%s12736_s9] sm:$0xff] }
 0x128   : > { %v7445_v31 = vpop.eup %6555  ;;  %v3012_v0 = vmul.f32 1.442695, %v2919_v22  ;;  %6322 = vmatmul.msk.bf16.gmra.mxu1 %vm824_vm2, %v1300_v54 }
 0x129   : > { %v1740_v35 = vmul.f32 %v7209_v20, %v7433_v14  ;;  %12917 = vst [vmem:[#allocation4_spill] sm:$0xff] %v7445_v31  ;;  %v2700_v55 = vsel %vm2645_vm3, %v7433_v14, -inf }
 0x12a   : > { %6557 = vpow2.f32 %v3012_v0 }
 0x12b   : > { %v2483_v23 = vadd.f32 %v2249_v15, %v1740_v35 }
 0x12d   : > { %2573 = vst.msk [vmem:[%s7224_s29 + $0x90] sm:$0xff] %vm824_vm2, %v2483_v23  ;;  %v2660_v58 = vpop.xlane.xlu2 %2659 }
 0x12e   : > { %v1540_v32 = vpop.f32.mrf.mxu1  ;;  %v2252_v38 = vpop.f32.mrf.mxu2  ;;  %v2920_v61 = vsub.f32 %v7266_v56, %v2660_v58  ;;  %v3187_v56 = vld [vmem:[%s12736_s9 + $0x8] sm:$0xff] }
 0x12f   : > { %v7450_v34 = vadd.f32 %v7203_v18, %v1540_v32  ;;  %6383 = vmatmul.msk.f32.gmra.mxu2 %vm1903_vm1, %v1843_v5  ;;  %3653 = vmatpush.msra.mxu3 %v3187_v56  ;;  %v1844_v5 = vld [vmem:[%s7109_s15 + $0x100] sm:$0xff] }
 0x130   : > { %v3014_v2 = vmul.f32 1.442695, %v2920_v61  ;;  %v7481_v11 = vpop.eup %6557 }
 0x131   : > { %v1741_v37 = vmul.f32 %v7209_v20, %v7450_v34  ;;  %v2703_v6 = vsel %vm2645_vm3, %v7450_v34, -inf  ;;  %12918 = vst [vmem:[#allocation5_spill] sm:$0xff] %v7481_v11  ;;  %3654 = vmatpush.msra.mxu3 %v3186_v13 }
 0x132   : > { %6559 = vpow2.f32 %v3014_v2 }
 0x133   : > { %3282 = vrot.lane.b32.xlu1 %v7445_v31, %s7019_s13  ;;  %v2484_v39 = vadd.f32 %v2252_v38, %v1741_v37 }
 0x135   : > { %2574 = vst.msk [vmem:[%s7224_s29 + $0x98] sm:$0xff] %vm824_vm2, %v2484_v39  ;;  %v2663_v4 = vpop.xlane.xlu2 %2662 }
 0x136   : > { %v1543_v63 = vpop.f32.mrf.mxu1  ;;  %v2921_v8 = vsub.f32 %v7275_v62, %v2663_v4  ;;  %v2255_v19 = vpop.f32.mrf.mxu2 }
 0x137   : > { %v7497_v16 = vadd.f32 %v7203_v18, %v1543_v63  ;;  %6384 = vmatmul.msk.f32.gmra.mxu2 %vm1903_vm1, %v1844_v5 }
 0x138   : > { %v3016_v10 = vmul.f32 1.442695, %v2921_v8  ;;  %v7489_v35 = vpop.eup %6559 }
 0x139   : > { %12919 = vst [vmem:[#allocation6_spill] sm:$0xff] %v7489_v35  ;;  %v1742_v23 = vmul.f32 %v7209_v20, %v7497_v16 }
 0x13a   : > { %6561 = vpow2.f32 %v3016_v10  ;;  %v1845_v10 = vld [vmem:[%s7109_s15 + $0x108] sm:$0xff] }
 0x13d   : > { %v2666_v62 = vpop.xlane.xlu0 %2665 }
 0x13e   : > { %v1545_v49 = vpop.f32.mrf.mxu1  ;;  %v2922_v15 = vsub.f32 %v7287_v7, %v2666_v62  ;;  %v2485_v7 = vadd.f32 %v2255_v19, %v1742_v23 }
 0x13f   : > { %v7504_v26 = vadd.f32 %v7203_v18, %v1545_v49  ;;  %v2706_v49 = vsel %vm2645_vm3, %v7497_v16, -inf  ;;  %6385 = vmatmul.msk.f32.gmra.mxu2 %vm1903_vm1, %v1845_v10 }
 0x140   : > { %v7501_v24 = vpop.eup %6561  ;;  %v3018_v25 = vmul.f32 1.442695, %v2922_v15  ;;  %2575 = vst.msk [vmem:[%s7224_s29 + $0xa0] sm:$0xff] %vm824_vm2, %v2485_v7 }
 0x141   : > { %12920 = vst [vmem:[#allocation7_spill] sm:$0xff] %v7501_v24  ;;  %v1743_v32 = vmul.f32 %v7209_v20, %v7504_v26 }
 0x142   : > { %6563 = vpow2.f32 %v3018_v25 }
 0x145   : > { %v2669_v2 = vpop.xlane.xlu1 %2668 }
 0x146   : > { %v1548_v21 = vpop.f32.mrf.mxu1 }
 0x147   : > { %v2258_v33 = vpop.f32.mrf.mxu2  ;;  %v7515_v38 = vadd.f32 %v7203_v18, %v1548_v21  ;;  %v2709_v21 = vsel %vm2645_vm3, %v7504_v26, -inf }
 0x148   : > { %v2486_v37 = vadd.f32 %v2258_v33, %v1743_v32  ;;  %v7522_v45 = vpop.eup %6563  ;;  %v2923_v32 = vsub.f32 %v7298_v17, %v2669_v2  ;;  %v704_v17 = vadd.f32 %v614_v47, %v524_v42  ;;  %v1846_v42 = vld [vmem:[%s7109_s15 + $0x110] sm:$0xff] }
 0x149   : > { %12921 = vst [vmem:[#allocation8_spill] sm:$0xff] %v7522_v45  ;;  %v1744_v50 = vmul.f32 %v7209_v20, %v7515_v38  ;;  %6386 = vmatmul.msk.f32.gmra.mxu2 %vm1903_vm1, %v1846_v42 }
 0x14a   : > { %2576 = vst.msk [vmem:[%s7224_s29 + $0xa8] sm:$0xff] %vm824_vm2, %v2486_v37  ;;  %v2712_v37 = vsel %vm2645_vm3, %v7515_v38, -inf }
 0x14b   : > { %2698 = vmax.xlane.f32.xlu2 %v2697_v53 }
 0x14d   : > { %v7508_v28 = vpop.xlane.xlu2 %2671 }
 0x14e   : > { %v1550_v39 = vpop.f32.mrf.mxu1  ;;  %v2924_v2 = vsub.f32 %v7310_v30, %v7508_v28  ;;  %v525_v30 = vld [vmem:[%s7115_s18 + $0x120] sm:$0xff]  ;;  %v526_v28 = vld [vmem:[%s7115_s18 + $0x128] sm:$0xff] }
 0x14f   : > { %v2261_v53 = vpop.f32.mrf.mxu2  ;;  %v7533_v58 = vadd.f32 %v7203_v18, %v1550_v39  ;;  %v3020_v39 = vmul.f32 1.442695, %v2923_v32 }
 0x150   : > { %2701 = vmax.xlane.f32.xlu0 %v2700_v55  ;;  %v2487_v55 = vadd.f32 %v2261_v53, %v1744_v50 }
 0x151   : > { %v1745_v60 = vmul.f32 %v7209_v20, %v7533_v58  ;;  %v2715_v62 = vsel %vm2645_vm3, %v7533_v58, -inf  ;;  %6565 = vpow2.f32 %v3020_v39 }
 0x152   : > { %2577 = vst.msk [vmem:[%s7224_s29 + $0xb0] sm:$0xff] %vm824_vm2, %v2487_v55 }
 0x155   : > { %v7541_v61 = vpop.xlane.xlu0 %2674 }
 0x156   : > { %v1553_v22 = vpop.f32.mrf.mxu1  ;;  %v2925_v10 = vsub.f32 %v7321_v41, %v7541_v61 }
 0x157   : > { %v7578_v50 = vadd.f32 %v7203_v18, %v1553_v22  ;;  %v7588_v22 = vpop.eup %6565 }
 0x158   : > { %12922 = vst [vmem:[#allocation9_spill] sm:$0xff] %v7588_v22  ;;  %v3024_v61 = vmul.f32 1.442695, %v2925_v10  ;;  %v527_v10 = vld [vmem:[%s7115_s18 + $0x130] sm:$0xff] }
 0x159   : > { %v2718_v42 = vsel %vm2645_vm3, %v7578_v50, -inf }
 0x15b   : > { %v2264_v63 = vpop.f32.mrf.mxu2 }
 0x15c   : > { %v2488_v0 = vadd.f32 %v2264_v63, %v1745_v60  ;;  %v1301_v60 = vpack.c.bf16 %v704_v17, %v703_v48  ;;  %v1746_v63 = vmul.f32 %v7209_v20, %v7578_v50 }
 0x15d   : > { %2704 = vmax.xlane.f32.xlu1 %v2703_v6  ;;  %v7553_v56 = vpop.xlane.xlu1 %2677 }
 0x15e   : > { %2578 = vst.msk [vmem:[%s7224_s29 + $0xb8] sm:$0xff] %vm824_vm2, %v2488_v0  ;;  %v1555_v8 = vpop.f32.mrf.mxu1  ;;  %6323 = vmatmul.msk.bf16.gmra.mxu1 %vm824_vm2, %v1301_v60 }
 0x15f   : > { %v7582_v54 = vadd.f32 %v7203_v18, %v1555_v8 }
 0x163   : > { %3284 = vrot.lane.b32.xlu2 %v7481_v11, %s7019_s13 }
 0x164   : > { %3286 = vrot.lane.b32.xlu0 %v7489_v35, %s7019_s13 }
 0x165   : > { %v7524_v46 = vpop.xlane.xlu2 %2680 }
 0x166   : > { %v1558_v15 = vpop.f32.mrf.mxu1 }
 0x167   : > { %v7563_v23 = vadd.f32 %v7203_v18, %v1558_v15  ;;  %v615_v15 = vld [vmem:[%s7122_s22 + $0x120] sm:$0xff] }
 0x169   : > { %v2724_v7 = vsel %vm2645_vm3, %v7563_v23, -inf  ;;  %v1748_v41 = vmul.f32 %v7209_v20, %v7563_v23 }
 0x16c   : > { %3288 = vrot.lane.b32.xlu0 %v7501_v24, %s7019_s13  ;;  %v564_v24 = vld [vmem:[%s7115_s18 + $0x258] sm:$0xff] }
 0x16d   : > { %v7548_v6 = vpop.xlane.xlu0 %2683 }
 0x175   : > { %v2687_v19 = vpop.xlane.xlu1 %2686 }
 0x176   : > { %3290 = vrot.lane.b32.xlu1 %v7522_v45, %s7019_s13  ;;  %v2929_v53 = vsub.f32 %v7375_v27, %v2687_v19  ;;  %v1747_v27 = vmul.f32 %v7209_v20, %v7582_v54 }
 0x177   : > { %v2267_v51 = vpop.f32.mrf.mxu2 }
 0x178   : > { %v3032_v0 = vmul.f32 1.442695, %v2929_v53 }
 0x17a   : > { %6567 = vpow2.f32 %v3032_v0 }
 0x17d   : > { %v7537_v59 = vpop.xlane.xlu2 %2689 }
 0x17f   : > { %v2270_v5 = vpop.f32.mrf.mxu2 }
 0x180   : > { %v2490_v8 = vadd.f32 %v2270_v5, %v1747_v27  ;;  %v7605_v19 = vpop.eup %6567  ;;  %v1848_v27 = vld [vmem:[%s7109_s15 + $0x120] sm:$0xff] }
 0x181   : > { %12923 = vst [vmem:[#allocation10_spill] sm:$0xff] %v7605_v19 }
 0x182   : > { %2580 = vst.msk [vmem:[%s7224_s29 + $0xc8] sm:$0xff] %vm824_vm2, %v2490_v8 }
 0x185   : > { %v3279_v4 = vpop.permute.xlu2 %3278  ;;  %v7556_v13 = vpop.xlane.xlu0 %2692 }
 0x186   : > { %6442 = vmatmul.msk.f32.vlgmr.msra.gmra.mxu3 %vm3458_vm4, %v3279_v4  ;;  %v2489_v4 = vadd.f32 %v2267_v51, %v1746_v63 }
 0x188   : > { %2579 = vst.msk [vmem:[%s7224_s29 + $0xc0] sm:$0xff] %vm824_vm2, %v2489_v4 }
 0x18c   : > { %2707 = vmax.xlane.f32.xlu2 %v2706_v49  ;;  %v3022_v49 = vmul.f32 1.442695, %v2924_v2 }
 0x18d   : > { %v7569_v33 = vpop.xlane.xlu1 %2695 }
 0x18e   : > { %6569 = vpow2.f32 %v3022_v49 }
 0x18f   : > { %6571 = vpow2.f32 %v3024_v61 }
 0x194   : > { %2716 = vmax.xlane.f32.xlu2 %v2715_v62  ;;  %v1560_v62 = vpop.f32.mrf.mxu1  ;;  %v7616_v43 = vpop.eup %6569 }
 0x195   : > { %12924 = vst [vmem:[#allocation11_spill] sm:$0xff] %v7616_v43  ;;  %v7631_v60 = vpop.eup %6571 }
 0x196   : > { %2710 = vmax.xlane.f32.xlu0 %v2709_v21  ;;  %v616_v21 = vld [vmem:[%s7122_s22 + $0x128] sm:$0xff]  ;;  %12925 = vst [vmem:[#allocation12_spill] sm:$0xff] %v7631_v60 }
 0x197   : > { %v706_v32 = vadd.f32 %v616_v21, %v526_v28  ;;  %v617_v28 = vld [vmem:[%s7122_s22 + $0x130] sm:$0xff]  ;;  %v1849_v21 = vld [vmem:[%s7109_s15 + $0x128] sm:$0xff] }
 0x198   : > { %v3281_v25 = vpop.permute.xlu0 %3280 }
 0x199   : > { %6443 = vmatmul.msk.f32.gmra.mxu3 %vm3458_vm4, %v3281_v25  ;;  %v705_v25 = vadd.f32 %v615_v15, %v525_v30  ;;  %v618_v15 = vld [vmem:[%s7122_s22 + $0x138] sm:$0xff] }
 0x19b   : > { %v1302_v39 = vpack.c.bf16 %v706_v32, %v705_v25  ;;  %v707_v25 = vadd.f32 %v617_v28, %v527_v10  ;;  %v530_v28 = vld [vmem:[%s7115_s18 + $0x148] sm:$0xff] }
 0x19c   : > { %2725 = vmax.xlane.f32.xlu2 %v2724_v7  ;;  %v2273_v7 = vpop.f32.mrf.mxu2  ;;  %v1563_v48 = vpop.f32.mrf.mxu1 }
 0x19d   : > { %v2491_v40 = vadd.f32 %v2273_v7, %v1748_v41  ;;  %6324 = vmatmul.msk.bf16.gmra.mxu1 %vm824_vm2, %v1302_v39  ;;  %v7634_v63 = vadd.f32 %v7203_v18, %v1563_v48 }
 0x19f   : > { %2581 = vst.msk [vmem:[%s7224_s29 + $0xd0] sm:$0xff] %vm824_vm2, %v2491_v40  ;;  %v1750_v0 = vmul.f32 %v7209_v20, %v7634_v63 }
 0x1a0   : > { %2713 = vmax.xlane.f32.xlu1 %v2712_v37  ;;  %v7611_v37 = vadd.f32 %v7203_v18, %v1560_v62  ;;  %v528_v62 = vld [vmem:[%s7115_s18 + $0x138] sm:$0xff] }
 0x1a1   : > { %v708_v7 = vadd.f32 %v618_v15, %v528_v62  ;;  %v619_v15 = vld [vmem:[%s7122_s22 + $0x140] sm:$0xff] }
 0x1a2   : > { %v1749_v47 = vmul.f32 %v7209_v20, %v7611_v37 }
 0x1a3   : > { %v1303_v61 = vpack.c.bf16 %v708_v7, %v707_v25  ;;  %v620_v25 = vld [vmem:[%s7122_s22 + $0x148] sm:$0xff] }
 0x1a4   : > { %v2276_v51 = vpop.f32.mrf.mxu2  ;;  %v1565_v4 = vpop.f32.mrf.mxu1 }
 0x1a5   : > { %v3283_v55 = vpop.permute.xlu1 %3282  ;;  %v2492_v17 = vadd.f32 %v2276_v51, %v1749_v47  ;;  %v7645_v49 = vadd.f32 %v7203_v18, %v1565_v4 }
 0x1a6   : > { %6444 = vmatmul.msk.f32.gmra.mxu3 %vm3458_vm4, %v3283_v55  ;;  %v1847_v55 = vld [vmem:[%s7109_s15 + $0x118] sm:$0xff] }
 0x1a7   : > { %2582 = vst.msk [vmem:[%s7224_s29 + $0xd8] sm:$0xff] %vm824_vm2, %v2492_v17  ;;  %6387 = vmatmul.msk.f32.gmra.mxu2 %vm1903_vm1, %v1847_v55  ;;  %v1751_v30 = vmul.f32 %v7209_v20, %v7645_v49  ;;  %v2733_v4 = vsel %vm2645_vm3, %v7645_v49, -inf }
 0x1aa   : > { %3292 = vrot.lane.b32.xlu0 %v7588_v22, %s7019_s13  ;;  %v563_v22 = vld [vmem:[%s7115_s18 + $0x250] sm:$0xff] }
 0x1ac   : > { %v2279_v5 = vpop.f32.mrf.mxu2  ;;  %v1568_v39 = vpop.f32.mrf.mxu1 }
 0x1ad   : > { %v2493_v8 = vadd.f32 %v2279_v5, %v1750_v0  ;;  %6325 = vmatmul.msk.bf16.gmra.mxu1 %vm824_vm2, %v1303_v61  ;;  %v7665_v47 = vadd.f32 %v7203_v18, %v1568_v39  ;;  %v1850_v61 = vld [vmem:[%s7109_s15 + $0x130] sm:$0xff]  ;;  %v2932_v39 = vsub.f32 %v7404_v57, %v7569_v33  ;;  %v532_v33 = vld [vmem:[%s7115_s18 + $0x158] sm:$0xff] }
 0x1ae   : > { %v531_v57 = vld [vmem:[%s7115_s18 + $0x150] sm:$0xff] }
 0x1af   : > { %6388 = vmatmul.msk.f32.gmra.mxu2 %vm1903_vm1, %v1848_v27  ;;  %2583 = vst.msk [vmem:[%s7224_s29 + $0xe0] sm:$0xff] %vm824_vm2, %v2493_v8  ;;  %v1752_v48 = vmul.f32 %v7209_v20, %v7665_v47  ;;  %v2727_v27 = vsel %vm2645_vm3, %v7611_v37, -inf }
 0x1b4   : > { %3304 = vrot.lane.b32.xlu2 %v7605_v19, %s7019_s13  ;;  %v2282_v41 = vpop.f32.mrf.mxu2  ;;  %v1570_v0 = vpop.f32.mrf.mxu1 }
 0x1b5   : > { %v2494_v40 = vadd.f32 %v2282_v41, %v1751_v30  ;;  %v529_v30 = vld [vmem:[%s7115_s18 + $0x140] sm:$0xff] }
 0x1b6   : > { %v709_v7 = vadd.f32 %v619_v15, %v529_v30  ;;  %v534_v15 = vld [vmem:[%s7115_s18 + $0x168] sm:$0xff] }
 0x1b7   : > { %6389 = vmatmul.msk.f32.gmra.mxu2 %vm1903_vm1, %v1849_v21  ;;  %2584 = vst.msk [vmem:[%s7224_s29 + $0xe8] sm:$0xff] %vm824_vm2, %v2494_v40  ;;  %v2736_v21 = vsel %vm2645_vm3, %v7665_v47, -inf }
 0x1b9   : > { %3294 = vrot.lane.b32.xlu1 %v7616_v43, %s7019_s13 }
 0x1bc   : > { %v2285_v17 = vpop.f32.mrf.mxu2 }
 0x1bd   : > { %v2495_v55 = vadd.f32 %v2285_v17, %v1752_v48  ;;  %v3038_v48 = vmul.f32 1.442695, %v2932_v39  ;;  %v1854_v39 = vld [vmem:[%s7109_s15 + $0x150] sm:$0xff] }
 0x1be   : > { %v7626_v53 = vpop.xlane.xlu2 %2698 }
 0x1bf   : > { %2585 = vst.msk [vmem:[%s7224_s29 + $0xf0] sm:$0xff] %vm824_vm2, %v2495_v55  ;;  %6390 = vmatmul.msk.f32.gmra.mxu2 %vm1903_vm1, %v1850_v61  ;;  %v1851_v55 = vld [vmem:[%s7109_s15 + $0x138] sm:$0xff]  ;;  %6573 = vpow2.f32 %v3038_v48  ;;  %v7741_v48 = vld [vmem:[%s12733_s6] ss:$0 sm:$0xff] }
 0x1c1   : > { %3296 = vrot.lane.b32.xlu1 %v7631_v60, %s7019_s13 }
 0x1c3   : > { %v7656_v32 = vpop.xlane.xlu0 %2701 }
 0x1c4   : > { %v2288_v10 = vpop.f32.mrf.mxu2 }
 0x1c6   : > { %v3285_v2 = vpop.permute.xlu2 %3284 }
 0x1c7   : > { %6445 = vmatmul.msk.f32.gmra.mxu3 %vm3458_vm4, %v3285_v2  ;;  %v7673_v2 = vadd.f32 %v7203_v18, %v1570_v0  ;;  %6391 = vmatmul.msk.f32.gmra.mxu2 %vm1903_vm1, %v1851_v55  ;;  %v621_v0 = vld [vmem:[%s7122_s22 + $0x150] sm:$0xff] }
 0x1c9   : > { %v1753_v5 = vmul.f32 %v7209_v20, %v7673_v2  ;;  %v710_v20 = vadd.f32 %v620_v25, %v530_v28  ;;  %v533_v28 = vld [vmem:[%s7115_s18 + $0x160] sm:$0xff] }
 0x1cb   : > { %v2496_v18 = vadd.f32 %v2288_v10, %v1753_v5  ;;  %v1304_v41 = vpack.c.bf16 %v710_v20, %v709_v7  ;;  %v1852_v10 = vld [vmem:[%s7109_s15 + $0x140] sm:$0xff]  ;;  %v624_v7 = vld [vmem:[%s7122_s22 + $0x168] sm:$0xff] }
 0x1cc   : > { %v2291_v55 = vpop.f32.mrf.mxu2 }
 0x1cd   : > { %2586 = vst.msk [vmem:[%s7224_s29 + $0xf8] sm:$0xff] %vm824_vm2, %v2496_v18  ;;  %6326 = vmatmul.msk.bf16.gmra.mxu1 %vm824_vm2, %v1304_v41  ;;  %v714_v41 = vadd.f32 %v624_v7, %v534_v15  ;;  %v2934_v7 = vsub.f32 %v7433_v14, %v7656_v32 }
 0x1cf   : > { %6392 = vmatmul.msk.f32.gmra.mxu2 %vm1903_vm1, %v1852_v10  ;;  %v1856_v10 = vld [vmem:[%s7109_s15 + $0x160] sm:$0xff] }
 0x1d0   : > { %v7682_v62 = vpop.xlane.xlu1 %2704 }
 0x1d4   : > { %2719 = vmax.xlane.f32.xlu0 %v2718_v42  ;;  %v2931_v42 = vsub.f32 %v7393_v44, %v7556_v13  ;;  %v711_v44 = vadd.f32 %v621_v0, %v531_v57  ;;  %v1855_v57 = vld [vmem:[%s7109_s15 + $0x158] sm:$0xff] }
 0x1d6   : > { %v3287_v51 = vpop.permute.xlu0 %3286  ;;  %v3036_v17 = vmul.f32 1.442695, %v2931_v42 }
 0x1d7   : > { %6446 = vmatmul.msk.f32.gmra.mxu3 %vm3458_vm4, %v3287_v51  ;;  %v2721_v51 = vsel %vm2645_vm3, %v7582_v54, -inf }
 0x1d8   : > { %6575 = vpow2.f32 %v3036_v17 }
 0x1dc   : > { %2728 = vmax.xlane.f32.xlu0 %v2727_v27  ;;  %v622_v27 = vld [vmem:[%s7122_s22 + $0x158] sm:$0xff] }
 0x1dd   : > { %2734 = vmax.xlane.f32.xlu2 %v2733_v4  ;;  %v712_v13 = vadd.f32 %v622_v27, %v532_v33  ;;  %v7708_v4 = vpop.eup %6573 }
 0x1de   : > { %v3289_v8 = vpop.permute.xlu0 %3288  ;;  %12926 = vst [vmem:[#allocation13_spill] sm:$0xff] %v7708_v4  ;;  %v7717_v18 = vpop.eup %6575 }
 0x1df   : > { %6447 = vmatmul.msk.f32.gmra.mxu3 %vm3458_vm4, %v3289_v8  ;;  %v1305_v5 = vpack.c.bf16 %v712_v13, %v711_v44  ;;  %v2926_v8 = vsub.f32 %v7335_v52, %v7553_v56  ;;  %12927 = vst [vmem:[#allocation14_spill] sm:$0xff] %v7717_v18  ;;  %v2927_v52 = vsub.f32 %v7348_v1, %v7524_v46  ;;  %v1853_v56 = vld [vmem:[%s7109_s15 + $0x148] sm:$0xff]  ;;  %v1573_v46 = vpop.f32.mrf.mxu1 }
 0x1e0   : > { %6393 = vmatmul.msk.f32.gmra.mxu2 %vm1903_vm1, %v1853_v56  ;;  %v2928_v1 = vsub.f32 %v7362_v12, %v7548_v6  ;;  %v7753_v12 = vld [vmem:[%s12734_s7] ss:$0 sm:$0xff]  ;;  %v1857_v56 = vld [vmem:[%s7109_s15 + $0x168] sm:$0xff] }
 0x1e1   : > { %6327 = vmatmul.msk.bf16.gmra.mxu1 %vm824_vm2, %v1305_v5  ;;  %v3026_v30 = vmul.f32 1.442695, %v2926_v8  ;;  %v3028_v25 = vmul.f32 1.442695, %v2927_v52  ;;  %v2294_v8 = vpop.f32.mrf.mxu2 }
 0x1e2   : > { %v3030_v42 = vmul.f32 1.442695, %v2928_v1  ;;  %v535_v1 = vld [vmem:[%s7115_s18 + $0x170] sm:$0xff] }
 0x1e3   : > { %6577 = vpow2.f32 %v3026_v30 }
 0x1e4   : > { %2737 = vmax.xlane.f32.xlu0 %v2736_v21  ;;  %v623_v21 = vld [vmem:[%s7122_s22 + $0x160] sm:$0xff]  ;;  %6579 = vpow2.f32 %v3028_v25  ;;  %v2933_v25 = vsub.f32 %v7413_v29, %v7626_v53 }
 0x1e5   : > { %v713_v20 = vadd.f32 %v623_v21, %v533_v28  ;;  %6581 = vpow2.f32 %v3030_v42  ;;  %v625_v42 = vld [vmem:[%s7122_s22 + $0x170] sm:$0xff] }
 0x1e7   : > { %v1575_v0 = vpop.f32.mrf.mxu1 }
 0x1e8   : > { %v3291_v40 = vpop.permute.xlu1 %3290  ;;  %6394 = vmatmul.msk.f32.gmra.mxu2 %vm1903_vm1, %v1854_v39  ;;  %v7762_v27 = vadd.f32 %v7741_v48, %v1575_v0 }
 0x1e9   : > { %6448 = vmatmul.msk.f32.gmra.mxu3 %vm3458_vm4, %v3291_v40  ;;  %v7729_v61 = vpop.eup %6577  ;;  %v1306_v40 = vpack.c.bf16 %v714_v41, %v713_v20  ;;  %v3040_v20 = vmul.f32 1.442695, %v2933_v25  ;;  %v3042_v41 = vmul.f32 1.442695, %v2934_v7  ;;  %v537_v25 = vld [vmem:[%s7115_s18 + $0x180] sm:$0xff]  ;;  %v538_v7 = vld [vmem:[%s7115_s18 + $0x188] sm:$0xff] }
 0x1ea   : > { %12928 = vst [vmem:[#allocation15_spill] sm:$0xff] %v7729_v61  ;;  %v7746_v17 = vpop.eup %6579  ;;  %v1755_v5 = vmul.f32 %v7753_v12, %v7762_v27  ;;  %v2745_v15 = vsel %vm2645_vm3, %v7762_v27, -inf }
 0x1eb   : > { %2722 = vmax.xlane.f32.xlu1 %v2721_v51  ;;  %v7744_v51 = vadd.f32 %v7741_v48, %v1573_v46  ;;  %12929 = vst [vmem:[#allocation16_spill] sm:$0xff] %v7746_v17  ;;  %v7764_v44 = vpop.eup %6581  ;;  %6583 = vpow2.f32 %v3040_v20  ;;  %v536_v46 = vld [vmem:[%s7115_s18 + $0x178] sm:$0xff]  ;;  %v627_v20 = vld [vmem:[%s7122_s22 + $0x180] sm:$0xff] }
 0x1ec   : > { %12930 = vst [vmem:[#allocation17_spill] sm:$0xff] %v7764_v44  ;;  %v2498_v30 = vadd.f32 %v2294_v8, %v1755_v5  ;;  %6585 = vpow2.f32 %v3042_v41  ;;  %v628_v41 = vld [vmem:[%s7122_s22 + $0x188] sm:$0xff] }
 0x1ed   : > { %v1754_v6 = vmul.f32 %v7753_v12, %v7744_v51  ;;  %v2742_v52 = vsel %vm2645_vm3, %v7744_v51, -inf }
 0x1ee   : > { %2588 = vst.msk [vmem:[%s7224_s29 + $0x108] sm:$0xff] %vm824_vm2, %v2498_v30  ;;  %v2297_v30 = vpop.f32.mrf.mxu2 }
 0x1ef   : > { %v2497_v33 = vadd.f32 %v2291_v55, %v1754_v6  ;;  %v2935_v6 = vsub.f32 %v7450_v34, %v7682_v62  ;;  %v626_v55 = vld [vmem:[%s7122_s22 + $0x178] sm:$0xff] }
 0x1f0   : > { %6395 = vmatmul.msk.f32.gmra.mxu2 %vm1903_vm1, %v1855_v57  ;;  %v715_v57 = vadd.f32 %v625_v42, %v535_v1  ;;  %v716_v29 = vadd.f32 %v626_v55, %v536_v46  ;;  %v1858_v55 = vld [vmem:[%s7109_s15 + $0x170] sm:$0xff] }
 0x1f1   : > { %6328 = vmatmul.msk.bf16.gmra.mxu1 %vm824_vm2, %v1306_v40  ;;  %2587 = vst.msk [vmem:[%s7224_s29 + $0x100] sm:$0xff] %vm824_vm2, %v2497_v33  ;;  %v1578_v40 = vpop.f32.mrf.mxu1  ;;  %v3044_v33 = vmul.f32 1.442695, %v2935_v6  ;;  %v7796_v32 = vpop.eup %6583 }
 0x1f2   : > { %v1307_v53 = vpack.c.bf16 %v716_v29, %v715_v57  ;;  %12931 = vst [vmem:[#allocation18_spill] sm:$0xff] %v7796_v32  ;;  %v7800_v5 = vpop.eup %6585  ;;  %v7808_v8 = vadd.f32 %v7741_v48, %v1578_v40  ;;  %v718_v40 = vadd.f32 %v628_v41, %v538_v7 }
 0x1f3   : > { %12932 = vst [vmem:[#allocation19_spill] sm:$0xff] %v7800_v5  ;;  %6587 = vpow2.f32 %v3044_v33 }
 0x1f5   : > { %3310 = vrot.lane.b32.xlu2 %v7708_v4, %s7019_s13 }
 0x1f8   : > { %3308 = vrot.lane.b32.xlu0 %v7717_v18, %s7019_s13  ;;  %6396 = vmatmul.msk.f32.gmra.mxu2 %vm1903_vm1, %v1856_v10 }
 0x1f9   : > { %v1580_v62 = vpop.f32.mrf.mxu1 }
 0x1ff   : > { %v2708_v0 = vpop.xlane.xlu2 %2707 }
 0x200   : > { %6397 = vmatmul.msk.f32.gmra.mxu2 %vm1903_vm1, %v1857_v56  ;;  %v2936_v34 = vsub.f32 %v7497_v16, %v2708_v0  ;;  %v7812_v56 = vpop.eup %6587  ;;  %v7819_v16 = vadd.f32 %v7741_v48, %v1580_v62  ;;  %v1859_v0 = vld [vmem:[%s7109_s15 + $0x178] sm:$0xff] }
 0x201   : > { %6329 = vmatmul.msk.bf16.gmra.mxu1 %vm824_vm2, %v1307_v53  ;;  %12933 = vst [vmem:[#allocation20_spill] sm:$0xff] %v7812_v56  ;;  %v2930_v53 = vsub.f32 %v7384_v36, %v7537_v59  ;;  %v1860_v59 = vld [vmem:[%s7109_s15 + $0x180] sm:$0xff] }
 0x202   : > { %v3046_v10 = vmul.f32 1.442695, %v2936_v34  ;;  %v1757_v42 = vmul.f32 %v7753_v12, %v7819_v16 }
 0x204   : > { %3298 = vrot.lane.b32.xlu1 %v7729_v61, %s7019_s13  ;;  %6589 = vpow2.f32 %v3046_v10  ;;  %v3034_v10 = vmul.f32 1.442695, %v2930_v53 }
 0x206   : > { %6591 = vpow2.f32 %v3034_v10 }
 0x208   : > { %6398 = vmatmul.msk.f32.gmra.mxu2 %vm1903_vm1, %v1858_v55 }
 0x209   : > { %v7766_v13 = vpop.xlane.xlu0 %2710 }
 0x20a   : > { %v7832_v29 = vpop.eup %6589 }
 0x20b   : > { %12934 = vst [vmem:[#allocation21_spill] sm:$0xff] %v7832_v29 }
 0x20c   : > { %3300 = vrot.lane.b32.xlu1 %v7746_v17, %s7019_s13  ;;  %v7856_v7 = vpop.eup %6591 }
 0x20d   : > { %12935 = vst [vmem:[#allocation22_spill] sm:$0xff] %v7856_v7 }
 0x210   : > { %6399 = vmatmul.msk.f32.gmra.mxu2 %vm1903_vm1, %v1859_v0 }
 0x213   : > { %v7783_v21 = vpop.xlane.xlu1 %2713 }
 0x214   : > { %3302 = vrot.lane.b32.xlu1 %v7764_v44, %s7019_s13 }
 0x218   : > { %6400 = vmatmul.msk.f32.gmra.mxu2 %vm1903_vm1, %v1860_v59 }
 0x21a   : > { %v1583_v1 = vpop.f32.mrf.mxu1 }
 0x21b   : > { %v7841_v33 = vadd.f32 %v7741_v48, %v1583_v1 }
 0x21c   : > { %v3293_v28 = vpop.permute.xlu0 %3292 }
 0x21d   : > { %6449 = vmatmul.msk.f32.gmra.mxu3 %vm3458_vm4, %v3293_v28  ;;  %v2730_v28 = vsel %vm2645_vm3, %v7634_v63, -inf  ;;  %v2754_v0 = vsel %vm2645_vm3, %v7841_v33, -inf }
 0x21e   : > { %2743 = vmax.xlane.f32.xlu2 %v2742_v52  ;;  %v1756_v52 = vmul.f32 %v7753_v12, %v7808_v8 }
 0x222   : > { %2746 = vmax.xlane.f32.xlu0 %v2745_v15  ;;  %v2499_v15 = vadd.f32 %v2297_v30, %v1756_v52  ;;  %v1585_v34 = vpop.f32.mrf.mxu1 }
 0x223   : > { %v7848_v52 = vadd.f32 %v7741_v48, %v1585_v34 }
 0x224   : > { %2589 = vst.msk [vmem:[%s7224_s29 + $0x110] sm:$0xff] %vm824_vm2, %v2499_v15 }
 0x225   : > { %v1759_v36 = vmul.f32 %v7753_v12, %v7848_v52  ;;  %v2757_v41 = vsel %vm2645_vm3, %v7848_v52, -inf }
 0x22a   : > { %v2300_v6 = vpop.f32.mrf.mxu2 }
 0x22b   : > { %v3295_v39 = vpop.permute.xlu1 %3294  ;;  %v2500_v57 = vadd.f32 %v2300_v6, %v1757_v42 }
 0x22c   : > { %6450 = vmatmul.msk.f32.gmra.mxu3 %vm3458_vm4, %v3295_v39  ;;  %v717_v39 = vadd.f32 %v627_v20, %v537_v25  ;;  %v1861_v20 = vld [vmem:[%s7109_s15 + $0x188] sm:$0xff] }
 0x22d   : > { %2590 = vst.msk [vmem:[%s7224_s29 + $0x118] sm:$0xff] %vm824_vm2, %v2500_v57  ;;  %6401 = vmatmul.msk.f32.gmra.mxu2 %vm1903_vm1, %v1861_v20 }
 0x22e   : > { %v1308_v46 = vpack.c.bf16 %v718_v40, %v717_v39  ;;  %v2717_v40 = vpop.xlane.xlu2 %2716 }
 0x230   : > { %6330 = vmatmul.msk.bf16.gmra.mxu1 %vm824_vm2, %v1308_v46  ;;  %v2939_v46 = vsub.f32 %v7533_v58, %v2717_v40 }
 0x232   : > { %v2303_v62 = vpop.f32.mrf.mxu2  ;;  %v3052_v57 = vmul.f32 1.442695, %v2939_v46 }
 0x233   : > { %v3297_v14 = vpop.permute.xlu1 %3296 }
 0x234   : > { %6451 = vmatmul.msk.f32.gmra.mxu3 %vm3458_vm4, %v3297_v14  ;;  %v1758_v14 = vmul.f32 %v7753_v12, %v7841_v33  ;;  %6593 = vpow2.f32 %v3052_v57 }
 0x236   : > { %3312 = vrot.lane.b32.xlu2 %v7796_v32, %s7019_s13  ;;  %3314 = vrot.lane.b32.xlu0 %v7800_v5, %s7019_s13  ;;  %v2501_v30 = vadd.f32 %v2303_v62, %v1758_v14  ;;  %v7907_v57 = vpop.xlane.xlu2 %2725 }
 0x238   : > { %2591 = vst.msk [vmem:[%s7224_s29 + $0x120] sm:$0xff] %vm824_vm2, %v2501_v30 }
 0x23a   : > { %v2306_v15 = vpop.f32.mrf.mxu2 }
 0x23b   : > { %v2502_v25 = vadd.f32 %v2306_v15, %v1759_v36  ;;  %v7883_v36 = vpop.eup %6593 }
 0x23c   : > { %12936 = vst [vmem:[#allocation23_spill] sm:$0xff] %v7883_v36 }
 0x23d   : > { %2592 = vst.msk [vmem:[%s7224_s29 + $0x128] sm:$0xff] %vm824_vm2, %v2502_v25 }
 0x23e   : > { %3316 = vrot.lane.b32.xlu2 %v7812_v56, %s7019_s13  ;;  %2731 = vmax.xlane.f32.xlu1 %v2730_v28  ;;  %v1588_v28 = vpop.f32.mrf.mxu1 }
 0x23f   : > { %v7867_v1 = vadd.f32 %v7741_v48, %v1588_v28  ;;  %v2937_v28 = vsub.f32 %v7504_v26, %v7766_v13  ;;  %v2739_v26 = vsel %vm2645_vm3, %v7673_v2, -inf }
 0x241   : > { %v1760_v6 = vmul.f32 %v7753_v12, %v7867_v1 }
 0x242   : > { %v2309_v55 = vpop.f32.mrf.mxu2 }
 0x243   : > { %v2503_v53 = vadd.f32 %v2309_v55, %v1760_v6 }
 0x245   : > { %2593 = vst.msk [vmem:[%s7224_s29 + $0x130] sm:$0xff] %vm824_vm2, %v2503_v53  ;;  %v539_v53 = vld [vmem:[%s7115_s18 + $0x190] sm:$0xff] }
 0x246   : > { %3318 = vrot.lane.b32.xlu2 %v7832_v29, %s7019_s13  ;;  %v1590_v39 = vpop.f32.mrf.mxu1 }
 0x247   : > { %v7873_v14 = vadd.f32 %v7741_v48, %v1590_v39  ;;  %v3048_v39 = vmul.f32 1.442695, %v2937_v28 }
 0x249   : > { %v1761_v58 = vmul.f32 %v7753_v12, %v7873_v14  ;;  %6595 = vpow2.f32 %v3048_v39  ;;  %v2748_v39 = vsel %vm2645_vm3, %v7808_v8, -inf }
 0x24a   : > { %v2312_v10 = vpop.f32.mrf.mxu2 }
 0x24b   : > { %v2504_v30 = vadd.f32 %v2312_v10, %v1761_v58  ;;  %v629_v58 = vld [vmem:[%s7122_s22 + $0x190] sm:$0xff]  ;;  %v630_v10 = vld [vmem:[%s7122_s22 + $0x198] sm:$0xff] }
 0x24d   : > { %2594 = vst.msk [vmem:[%s7224_s29 + $0x138] sm:$0xff] %vm824_vm2, %v2504_v30  ;;  %v719_v30 = vadd.f32 %v629_v58, %v539_v53  ;;  %v2751_v53 = vsel %vm2645_vm3, %v7819_v16, -inf }
 0x24e   : > { %v1593_v42 = vpop.f32.mrf.mxu1 }
 0x24f   : > { %v7893_v15 = vadd.f32 %v7741_v48, %v1593_v42 }
 0x251   : > { %v1762_v20 = vmul.f32 %v7753_v12, %v7893_v15 }
 0x252   : > { %v2315_v25 = vpop.f32.mrf.mxu2 }
 0x253   : > { %v2505_v46 = vadd.f32 %v2315_v25, %v1762_v20 }
 0x255   : > { %2595 = vst.msk [vmem:[%s7224_s29 + $0x140] sm:$0xff] %vm824_vm2, %v2505_v46 }
 0x256   : > { %v1595_v62 = vpop.f32.mrf.mxu1 }
 0x257   : > { %3306 = vrot.lane.b32.xlu1 %v7856_v7, %s7019_s13  ;;  %v7898_v40 = vadd.f32 %v7741_v48, %v1595_v62  ;;  %v1865_v7 = vld [vmem:[%s7109_s15 + $0x1a8] sm:$0xff] }
 0x259   : > { %v1763_v13 = vmul.f32 %v7753_v12, %v7898_v40 }
 0x25e   : > { %v7879_v34 = vpop.xlane.xlu1 %2722 }
 0x260   : > { %2758 = vmax.xlane.f32.xlu0 %v2757_v41  ;;  %v1598_v41 = vpop.f32.mrf.mxu1 }
 0x261   : > { %v7918_v25 = vadd.f32 %v7741_v48, %v1598_v41 }
 0x263   : > { %v2318_v42 = vpop.f32.mrf.mxu2 }
 0x264   : > { %v2506_v55 = vadd.f32 %v2318_v42, %v1763_v13  ;;  %v3305_v42 = vpop.permute.xlu2 %3304 }
 0x266   : > { %2596 = vst.msk [vmem:[%s7224_s29 + $0x148] sm:$0xff] %vm824_vm2, %v2506_v55 }
 0x268   : > { %v1600_v62 = vpop.f32.mrf.mxu1 }
 0x269   : > { %v7929_v13 = vadd.f32 %v7741_v48, %v1600_v62 }
 0x26f   : > { %2755 = vmax.xlane.f32.xlu2 %v2754_v0  ;;  %v540_v0 = vld [vmem:[%s7115_s18 + $0x198] sm:$0xff] }
 0x270   : > { %v720_v20 = vadd.f32 %v630_v10, %v540_v0  ;;  %v1603_v55 = vpop.f32.mrf.mxu1  ;;  %v1765_v0 = vmul.f32 %v7753_v12, %v7929_v13  ;;  %v1862_v10 = vld [vmem:[%s7109_s15 + $0x190] sm:$0xff] }
 0x271   : > { %6402 = vmatmul.msk.f32.gmra.mxu2 %vm1903_vm1, %v1862_v10  ;;  %v7941_v62 = vadd.f32 %v7741_v48, %v1603_v55  ;;  %v7958_v55 = vpop.xlane.xlu2 %2734 }
 0x272   : > { %v1309_v46 = vpack.c.bf16 %v720_v20, %v719_v30  ;;  %v1863_v20 = vld [vmem:[%s7109_s15 + $0x198] sm:$0xff] }
 0x274   : > { %3324 = vrot.lane.b32.xlu0 %v7883_v36, %s7019_s13  ;;  %6331 = vmatmul.msk.bf16.gmra.mxu1 %vm824_vm2, %v1309_v46  ;;  %v542_v36 = vld [vmem:[%s7115_s18 + $0x1a8] sm:$0xff] }
 0x276   : > { %v3299_v59 = vpop.permute.xlu1 %3298 }
 0x277   : > { %6452 = vmatmul.msk.f32.gmra.mxu3 %vm3458_vm4, %v3299_v59  ;;  %v7915_v59 = vpop.eup %6595 }
 0x278   : > { %12937 = vst [vmem:[#allocation24_spill] sm:$0xff] %v7915_v59 }
 0x279   : > { %6403 = vmatmul.msk.f32.gmra.mxu2 %vm1903_vm1, %v1863_v20  ;;  %v2760_v20 = vsel %vm2645_vm3, %v7867_v1, -inf }
 0x27e   : > { %v3301_v6 = vpop.permute.xlu1 %3300 }
 0x27f   : > { %6453 = vmatmul.msk.f32.gmra.mxu3 %vm3458_vm4, %v3301_v6  ;;  %v1764_v6 = vmul.f32 %v7753_v12, %v7918_v25 }
 0x281   : > { %2740 = vmax.xlane.f32.xlu1 %v2739_v26  ;;  %v2321_v26 = vpop.f32.mrf.mxu2 }
 0x282   : > { %v2507_v41 = vadd.f32 %v2321_v26, %v1764_v6  ;;  %v2938_v26 = vsub.f32 %v7515_v38, %v7783_v21  ;;  %v2772_v38 = vsel %vm2645_vm3, %v7918_v25, -inf  ;;  %v3311_v21 = vpop.permute.xlu2 %3310 }
 0x284   : > { %2597 = vst.msk [vmem:[%s7224_s29 + $0x150] sm:$0xff] %vm824_vm2, %v2507_v41  ;;  %v2766_v41 = vsel %vm2645_vm3, %v7893_v15, -inf }
 0x286   : > { %v3303_v28 = vpop.permute.xlu1 %3302 }
 0x287   : > { %3320 = vrot.lane.b32.xlu2 %v7915_v59, %s7019_s13  ;;  %6454 = vmatmul.msk.f32.gmra.mxu3 %vm3458_vm4, %v3303_v28  ;;  %v1766_v28 = vmul.f32 %v7753_v12, %v7941_v62 }
 0x289   : > { %2749 = vmax.xlane.f32.xlu1 %v2748_v39  ;;  %v2324_v58 = vpop.f32.mrf.mxu2  ;;  %v1605_v39 = vpop.f32.mrf.mxu1 }
 0x28a   : > { %v2508_v30 = vadd.f32 %v2324_v58, %v1765_v0  ;;  %v3050_v0 = vmul.f32 1.442695, %v2938_v26 }
 0x28c   : > { %2598 = vst.msk [vmem:[%s7224_s29 + $0x158] sm:$0xff] %vm824_vm2, %v2508_v30  ;;  %6597 = vpow2.f32 %v3050_v0 }
 0x28f   : > { %6455 = vmatmul.msk.f32.gmra.mxu3 %vm3458_vm4, %v3305_v42  ;;  %v7954_v42 = vadd.f32 %v7741_v48, %v1605_v39 }
 0x291   : > { %2752 = vmax.xlane.f32.xlu1 %v2751_v53  ;;  %v2327_v46 = vpop.f32.mrf.mxu2  ;;  %v1767_v53 = vmul.f32 %v7753_v12, %v7954_v42  ;;  %v2744_v39 = vpop.xlane.xlu2 %2743 }
 0x292   : > { %v2509_v6 = vadd.f32 %v2327_v46, %v1766_v28  ;;  %v7966_v30 = vpop.eup %6597  ;;  %v2781_v28 = vsel %vm2645_vm3, %v7954_v42, -inf  ;;  %v2948_v46 = vsub.f32 %v7744_v51, %v2744_v39 }
 0x293   : > { %12938 = vst [vmem:[#allocation25_spill] sm:$0xff] %v7966_v30 }
 0x294   : > { %2599 = vst.msk [vmem:[%s7224_s29 + $0x160] sm:$0xff] %vm824_vm2, %v2509_v6  ;;  %v7975_v6 = vpop.xlane.xlu0 %2719  ;;  %v3070_v26 = vmul.f32 1.442695, %v2948_v46 }
 0x296   : > { %6599 = vpow2.f32 %v3070_v26 }
 0x299   : > { %v2330_v58 = vpop.f32.mrf.mxu2 }
 0x29a   : > { %v2510_v10 = vadd.f32 %v2330_v58, %v1767_v53  ;;  %v1608_v53 = vpop.f32.mrf.mxu1 }
 0x29b   : > { %v7987_v51 = vadd.f32 %v7741_v48, %v1608_v53  ;;  %v631_v53 = vld [vmem:[%s7122_s22 + $0x1a0] sm:$0xff] }
 0x29c   : > { %2600 = vst.msk [vmem:[%s7224_s29 + $0x168] sm:$0xff] %vm824_vm2, %v2510_v10  ;;  %v2729_v0 = vpop.xlane.xlu0 %2728  ;;  %v7979_v58 = vpop.eup %6599 }
 0x29d   : > { %12939 = vst [vmem:[#allocation26_spill] sm:$0xff] %v7979_v58  ;;  %v2943_v10 = vsub.f32 %v7611_v37, %v2729_v0  ;;  %v1768_v39 = vmul.f32 %v7753_v12, %v7987_v51 }
 0x29e   : > { %2767 = vmax.xlane.f32.xlu0 %v2766_v41  ;;  %v2769_v41 = vsel %vm2645_vm3, %v7898_v40, -inf }
 0x2a1   : > { %v2333_v46 = vpop.f32.mrf.mxu2 }
 0x2a2   : > { %v2511_v0 = vadd.f32 %v2333_v46, %v1768_v39 }
 0x2a4   : > { %v7991_v26 = vpop.xlane.xlu0 %2737  ;;  %2601 = vst.msk [vmem:[%s7224_s29 + $0x170] sm:$0xff] %vm824_vm2, %v2511_v0 }
 0x2a6   : > { %2773 = vmax.xlane.f32.xlu0 %v2772_v38 }
 0x2a9   : > { %v2336_v39 = vpop.f32.mrf.mxu2 }
 0x2aa   : > { %3322 = vrot.lane.b32.xlu1 %v7966_v30, %s7019_s13 }
 0x2ae   : > { %2782 = vmax.xlane.f32.xlu0 %v2781_v28  ;;  %v3060_v28 = vmul.f32 1.442695, %v2943_v10  ;;  %v632_v10 = vld [vmem:[%s7122_s22 + $0x1a8] sm:$0xff] }
 0x2af   : > { %v722_v29 = vadd.f32 %v632_v10, %v542_v36 }
 0x2b0   : > { %2761 = vmax.xlane.f32.xlu2 %v2760_v20  ;;  %v1610_v20 = vpop.f32.mrf.mxu1  ;;  %6601 = vpow2.f32 %v3060_v28 }
 0x2b1   : > { %v7982_v38 = vpop.xlane.xlu1 %2731 }
 0x2b6   : > { %v8005_v32 = vpop.eup %6601 }
 0x2b7   : > { %12940 = vst [vmem:[#allocation27_spill] sm:$0xff] %v8005_v32 }
 0x2b8   : > { %2770 = vmax.xlane.f32.xlu2 %v2769_v41  ;;  %v7994_v41 = vadd.f32 %v7741_v48, %v1610_v20  ;;  %v1613_v20 = vpop.f32.mrf.mxu1 }
 0x2b9   : > { %v8016_v36 = vadd.f32 %v7741_v48, %v1613_v20  ;;  %v543_v20 = vld [vmem:[%s7115_s18 + $0x1b0] sm:$0xff] }
 0x2ba   : > { %v1769_v28 = vmul.f32 %v7753_v12, %v7994_v41 }
 0x2bb   : > { %v1770_v0 = vmul.f32 %v7753_v12, %v8016_v36 }
 0x2bc   : > { %v2512_v46 = vadd.f32 %v2336_v39, %v1769_v28  ;;  %v544_v39 = vld [vmem:[%s7115_s18 + $0x1b8] sm:$0xff] }
 0x2be   : > { %2602 = vst.msk [vmem:[%s7224_s29 + $0x178] sm:$0xff] %vm824_vm2, %v2512_v46  ;;  %v633_v46 = vld [vmem:[%s7122_s22 + $0x1b0] sm:$0xff] }
 0x2bf   : > { %v723_v4 = vadd.f32 %v633_v46, %v543_v20 }
 0x2c2   : > { %3342 = vrot.lane.b32.xlu0 %v7979_v58, %s7019_s13  ;;  %v541_v58 = vld [vmem:[%s7115_s18 + $0x1a0] sm:$0xff] }
 0x2c3   : > { %v721_v30 = vadd.f32 %v631_v53, %v541_v58  ;;  %v1615_v58 = vpop.f32.mrf.mxu1  ;;  %v3313_v53 = vpop.permute.xlu2 %3312 }
 0x2c4   : > { %v8024_v28 = vadd.f32 %v7741_v48, %v1615_v58 }
 0x2c5   : > { %v1310_v56 = vpack.c.bf16 %v722_v29, %v721_v30  ;;  %v2763_v29 = vsel %vm2645_vm3, %v7873_v14, -inf  ;;  %v2339_v30 = vpop.f32.mrf.mxu2 }
 0x2c6   : > { %v2513_v10 = vadd.f32 %v2339_v30, %v1770_v0 }
 0x2c7   : > { %6332 = vmatmul.msk.bf16.gmra.mxu1 %vm824_vm2, %v1310_v56  ;;  %v1864_v56 = vld [vmem:[%s7109_s15 + $0x1a0] sm:$0xff] }
 0x2c8   : > { %6404 = vmatmul.msk.f32.gmra.mxu2 %vm1903_vm1, %v1864_v56  ;;  %2603 = vst.msk [vmem:[%s7224_s29 + $0x180] sm:$0xff] %vm824_vm2, %v2513_v10  ;;  %v634_v56 = vld [vmem:[%s7122_s22 + $0x1b8] sm:$0xff] }
 0x2c9   : > { %v3307_v37 = vpop.permute.xlu1 %3306  ;;  %v724_v30 = vadd.f32 %v634_v56, %v544_v39  ;;  %v2793_v39 = vsel %vm2645_vm3, %v8024_v28, -inf }
 0x2ca   : > { %6456 = vmatmul.msk.f32.gmra.mxu3 %vm3458_vm4, %v3307_v37  ;;  %v3309_v37 = vpop.permute.xlu0 %3308 }
 0x2cb   : > { %v1311_v10 = vpack.c.bf16 %v724_v30, %v723_v4 }
 0x2d0   : > { %3332 = vrot.lane.b32.xlu2 %v8005_v32, %s7019_s13  ;;  %6405 = vmatmul.msk.f32.gmra.mxu2 %vm1903_vm1, %v1865_v7  ;;  %v653_v32 = vld [vmem:[%s7122_s22 + $0x250] sm:$0xff] }
 0x2d2   : > { %6457 = vmatmul.msk.f32.gmra.mxu3 %vm3458_vm4, %v3309_v37  ;;  %v2940_v37 = vsub.f32 %v7578_v50, %v7975_v6  ;;  %v8038_v58 = vpop.xlane.xlu0 %2746  ;;  %v3317_v50 = vpop.permute.xlu2 %3316  ;;  %v2941_v6 = vsub.f32 %v7582_v54, %v7879_v34 }
 0x2d4   : > { %2764 = vmax.xlane.f32.xlu1 %v2763_v29  ;;  %v1771_v29 = vmul.f32 %v7753_v12, %v8024_v28  ;;  %v3054_v19 = vmul.f32 1.442695, %v2940_v37  ;;  %v3056_v7 = vmul.f32 1.442695, %v2941_v6 }
 0x2d6   : > { %6603 = vpow2.f32 %v3054_v19 }
 0x2d7   : > { %6333 = vmatmul.msk.bf16.gmra.mxu1 %vm824_vm2, %v1311_v10  ;;  %6605 = vpow2.f32 %v3056_v7 }
 0x2da   : > { %6458 = vmatmul.msk.f32.gmra.mxu3 %vm3458_vm4, %v3311_v21  ;;  %v2342_v21 = vpop.f32.mrf.mxu2  ;;  %v3315_v20 = vpop.permute.xlu0 %3314 }
 0x2db   : > { %v2514_v0 = vadd.f32 %v2342_v21, %v1771_v29  ;;  %v3319_v19 = vpop.permute.xlu2 %3318  ;;  %v2778_v29 = vsel %vm2645_vm3, %v7941_v62, -inf }
 0x2dc   : > { %v8049_v4 = vpop.eup %6603 }
 0x2dd   : > { %2604 = vst.msk [vmem:[%s7224_s29 + $0x188] sm:$0xff] %vm824_vm2, %v2514_v0  ;;  %v8056_v54 = vpop.eup %6605  ;;  %v2946_v0 = vsub.f32 %v7665_v47, %v7991_v26  ;;  %v1866_v26 = vld [vmem:[%s7109_s15 + $0x1b0] sm:$0xff] }
 0x2de   : > { %12941 = vst [vmem:[#allocation28_spill] sm:$0xff] %v8049_v4  ;;  %6406 = vmatmul.msk.f32.gmra.mxu2 %vm1903_vm1, %v1866_v26 }
 0x2df   : > { %12942 = vst [vmem:[#allocation29_spill] sm:$0xff] %v8056_v54  ;;  %v3066_v10 = vmul.f32 1.442695, %v2946_v0 }
 0x2e2   : > { %6459 = vmatmul.msk.f32.gmra.mxu3 %vm3458_vm4, %v3313_v53  ;;  %v2942_v53 = vsub.f32 %v7563_v23, %v7907_v57  ;;  %v8109_v26 = vpop.xlane.xlu0 %2758 }
 0x2e3   : > { %v8060_v37 = vpop.xlane.xlu2 %2755 }
 0x2e4   : > { %v3058_v46 = vmul.f32 1.442695, %v2942_v53  ;;  %v545_v53 = vld [vmem:[%s7115_s18 + $0x1c0] sm:$0xff] }
 0x2e6   : > { %6607 = vpow2.f32 %v3058_v46 }
 0x2ea   : > { %6460 = vmatmul.msk.f32.gmra.mxu3 %vm3458_vm4, %v3315_v20 }
 0x2eb   : > { %v3321_v30 = vpop.permute.xlu2 %3320 }
 0x2ec   : > { %2794 = vmax.xlane.f32.xlu0 %v2793_v39  ;;  %v8065_v23 = vpop.eup %6607 }
 0x2ed   : > { %3326 = vrot.lane.b32.xlu1 %v8049_v4, %s7019_s13  ;;  %12943 = vst [vmem:[#allocation30_spill] sm:$0xff] %v8065_v23 }
 0x2f1   : > { %v1618_v6 = vpop.f32.mrf.mxu1 }
 0x2f2   : > { %6461 = vmatmul.msk.f32.gmra.mxu3 %vm3458_vm4, %v3317_v50  ;;  %v8081_v47 = vadd.f32 %v7741_v48, %v1618_v6 }
 0x2f4   : > { %v2741_v34 = vpop.xlane.xlu1 %2740 }
 0x2f5   : > { %3328 = vrot.lane.b32.xlu1 %v8056_v54, %s7019_s13  ;;  %v562_v54 = vld [vmem:[%s7115_s18 + $0x248] sm:$0xff] }
 0x2f9   : > { %2779 = vmax.xlane.f32.xlu2 %v2778_v29  ;;  %v1620_v46 = vpop.f32.mrf.mxu1  ;;  %v635_v29 = vld [vmem:[%s7122_s22 + $0x1c0] sm:$0xff] }
 0x2fa   : > { %6462 = vmatmul.msk.f32.gmra.mxu3 %vm3458_vm4, %v3319_v19  ;;  %v546_v19 = vld [vmem:[%s7115_s18 + $0x1c8] sm:$0xff] }
 0x2fc   : > { %v2750_v57 = vpop.xlane.xlu1 %2749 }
 0x2fd   : > { %v2950_v56 = vsub.f32 %v7808_v8, %v2750_v57  ;;  %3330 = vrot.lane.b32.xlu1 %v8065_v23, %s7019_s13  ;;  %v2947_v8 = vsub.f32 %v7673_v2, %v2741_v34  ;;  %v1772_v2 = vmul.f32 %v7753_v12, %v8081_v47  ;;  %v2345_v34 = vpop.f32.mrf.mxu2  ;;  %v636_v57 = vld [vmem:[%s7122_s22 + $0x1c8] sm:$0xff] }
 0x2fe   : > { %v726_v0 = vadd.f32 %v636_v57, %v546_v19  ;;  %v547_v57 = vld [vmem:[%s7115_s18 + $0x1d0] sm:$0xff] }
 0x2ff   : > { %v3074_v21 = vmul.f32 1.442695, %v2950_v56  ;;  %v3068_v20 = vmul.f32 1.442695, %v2947_v8  ;;  %v2515_v56 = vadd.f32 %v2345_v34, %v1772_v2  ;;  %v8099_v8 = vadd.f32 %v7741_v48, %v1620_v46  ;;  %v1868_v46 = vld [vmem:[%s7109_s15 + $0x1c0] sm:$0xff]  ;;  %v3325_v34 = vpop.permute.xlu0 %3324 }
 0x301   : > { %6609 = vpow2.f32 %v3074_v21  ;;  %v1867_v21 = vld [vmem:[%s7109_s15 + $0x1b8] sm:$0xff]  ;;  %2605 = vst.msk [vmem:[%s7224_s29 + $0x190] sm:$0xff] %vm824_vm2, %v2515_v56 }
 0x302   : > { %6463 = vmatmul.msk.f32.gmra.mxu3 %vm3458_vm4, %v3321_v30  ;;  %6611 = vpow2.f32 %v3066_v10  ;;  %v725_v30 = vadd.f32 %v635_v29, %v545_v53  ;;  %6407 = vmatmul.msk.f32.gmra.mxu2 %vm1903_vm1, %v1867_v21  ;;  %v2775_v29 = vsel %vm2645_vm3, %v7929_v13, -inf  ;;  %v548_v56 = vld [vmem:[%s7115_s18 + $0x1d8] sm:$0xff]  ;;  %v637_v21 = vld [vmem:[%s7122_s22 + $0x1d0] sm:$0xff] }
 0x303   : > { %6613 = vpow2.f32 %v3068_v20  ;;  %v1773_v20 = vmul.f32 %v7753_v12, %v8099_v8 }
 0x304   : > { %v8087_v7 = vpop.xlane.xlu1 %2752  ;;  %v1312_v6 = vpack.c.bf16 %v726_v0, %v725_v30  ;;  %v638_v30 = vld [vmem:[%s7122_s22 + $0x1d8] sm:$0xff]  ;;  %v727_v0 = vadd.f32 %v637_v21, %v547_v57  ;;  %v2952_v57 = vsub.f32 %v7841_v33, %v8060_v37  ;;  %v2787_v33 = vsel %vm2645_vm3, %v7994_v41, -inf  ;;  %v1870_v37 = vld [vmem:[%s7109_s15 + $0x1d0] sm:$0xff] }
 0x305   : > { %v2348_v53 = vpop.f32.mrf.mxu2 }
 0x306   : > { %6334 = vmatmul.msk.bf16.gmra.mxu1 %vm824_vm2, %v1312_v6  ;;  %v2516_v19 = vadd.f32 %v2348_v53, %v1773_v20  ;;  %v728_v6 = vadd.f32 %v638_v30, %v548_v56  ;;  %v1869_v20 = vld [vmem:[%s7109_s15 + $0x1c8] sm:$0xff]  ;;  %v2799_v53 = vsel %vm2645_vm3, %v8099_v8, -inf }
 0x307   : > { %v8073_v50 = vpop.eup %6609  ;;  %v640_v56 = vld [vmem:[%s7122_s22 + $0x1e8] sm:$0xff] }
 0x308   : > { %12944 = vst [vmem:[#allocation31_spill] sm:$0xff] %v8073_v50  ;;  %3346 = vrot.lane.b32.xlu0 %v8073_v50, %s7019_s13  ;;  %v8078_v39 = vpop.eup %6611  ;;  %v639_v50 = vld [vmem:[%s7122_s22 + $0x1e0] sm:$0xff] }
 0x309   : > { %12945 = vst [vmem:[#allocation32_spill] sm:$0xff] %v8078_v39  ;;  %v8096_v10 = vpop.eup %6613 }
 0x30a   : > { %12946 = vst [vmem:[#allocation33_spill] sm:$0xff] %v8096_v10  ;;  %6408 = vmatmul.msk.f32.gmra.mxu2 %vm1903_vm1, %v1868_v46 }
 0x30b   : > { %2606 = vst.msk [vmem:[%s7224_s29 + $0x198] sm:$0xff] %vm824_vm2, %v2516_v19  ;;  %v2944_v19 = vsub.f32 %v7634_v63, %v7982_v38 }
 0x30d   : > { %v3062_v46 = vmul.f32 1.442695, %v2944_v19 }
 0x30f   : > { %6615 = vpow2.f32 %v3062_v46 }
 0x311   : > { %3338 = vrot.lane.b32.xlu2 %v8078_v39, %s7019_s13 }
 0x312   : > { %6409 = vmatmul.msk.f32.gmra.mxu2 %vm1903_vm1, %v1869_v20  ;;  %v3078_v20 = vmul.f32 1.442695, %v2952_v57 }
 0x314   : > { %6617 = vpow2.f32 %v3078_v20  ;;  %v641_v20 = vld [vmem:[%s7122_s22 + $0x1f0] sm:$0xff] }
 0x315   : > { %v8139_v38 = vpop.eup %6615 }
 0x316   : > { %12947 = vst [vmem:[#allocation34_spill] sm:$0xff] %v8139_v38 }
 0x319   : > { %3340 = vrot.lane.b32.xlu2 %v8096_v10, %s7019_s13 }
 0x31a   : > { %6410 = vmatmul.msk.f32.gmra.mxu2 %vm1903_vm1, %v1870_v37 }
 0x31c   : > { %v3323_v2 = vpop.permute.xlu1 %3322 }
 0x31d   : > { %6464 = vmatmul.msk.f32.gmra.mxu3 %vm3458_vm4, %v3323_v2  ;;  %v1313_v2 = vpack.c.bf16 %v728_v6, %v727_v0  ;;  %v2945_v0 = vsub.f32 %v7645_v49, %v7958_v55  ;;  %v8145_v49 = vpop.eup %6617 }
 0x31e   : > { %12948 = vst [vmem:[#allocation35_spill] sm:$0xff] %v8145_v49 }
 0x31f   : > { %6335 = vmatmul.msk.bf16.gmra.mxu1 %vm824_vm2, %v1313_v2  ;;  %v3064_v63 = vmul.f32 1.442695, %v2945_v0  ;;  %v551_v0 = vld [vmem:[%s7115_s18 + $0x1f0] sm:$0xff] }
 0x320   : > { %v731_v37 = vadd.f32 %v641_v20, %v551_v0 }
 0x321   : > { %6619 = vpow2.f32 %v3064_v63 }
 0x325   : > { %6465 = vmatmul.msk.f32.gmra.mxu3 %vm3458_vm4, %v3325_v34  ;;  %v549_v34 = vld [vmem:[%s7115_s18 + $0x1e0] sm:$0xff] }
 0x326   : > { %v729_v21 = vadd.f32 %v639_v50, %v549_v34  ;;  %v2949_v50 = vsub.f32 %v7762_v27, %v8038_v58  ;;  %v1872_v58 = vld [vmem:[%s7109_s15 + $0x1e0] sm:$0xff] }
 0x327   : > { %2776 = vmax.xlane.f32.xlu1 %v2775_v29  ;;  %v550_v29 = vld [vmem:[%s7115_s18 + $0x1e8] sm:$0xff]  ;;  %v8149_v55 = vpop.eup %6619 }
 0x328   : > { %v730_v30 = vadd.f32 %v640_v56, %v550_v29  ;;  %12949 = vst [vmem:[#allocation36_spill] sm:$0xff] %v8149_v55  ;;  %v3072_v2 = vmul.f32 1.442695, %v2949_v50  ;;  %v8181_v50 = vpop.f32.mrf.mxu3 }
 0x32a   : > { %v1314_v6 = vpack.c.bf16 %v730_v30, %v729_v21  ;;  %6621 = vpow2.f32 %v3072_v2 }
 0x32f   : > { %6336 = vmatmul.msk.bf16.gmra.mxu1 %vm824_vm2, %v1314_v6  ;;  %v552_v6 = vld [vmem:[%s7115_s18 + $0x1f8] sm:$0xff] }
 0x330   : > { %v8164_v29 = vpop.eup %6621  ;;  %v8193_v0 = vpop.f32.mrf.mxu3 }
 0x331   : > { %12950 = vst [vmem:[#allocation37_spill] sm:$0xff] %v8164_v29 }
 0x332   : > { %2800 = vmax.xlane.f32.xlu0 %v2799_v53  ;;  %v1871_v53 = vld [vmem:[%s7109_s15 + $0x1d8] sm:$0xff] }
 0x333   : > { %6411 = vmatmul.msk.f32.gmra.mxu2 %vm1903_vm1, %v1871_v53 }
 0x33b   : > { %6412 = vmatmul.msk.f32.gmra.mxu2 %vm1903_vm1, %v1872_v58 }
 0x340   : > { %3334 = vrot.lane.b32.xlu1 %v8139_v38, %s7019_s13 }
 0x342   : > { %2788 = vmax.xlane.f32.xlu2 %v2787_v33  ;;  %v642_v33 = vld [vmem:[%s7122_s22 + $0x1f8] sm:$0xff] }
 0x343   : > { %v732_v2 = vadd.f32 %v642_v33, %v552_v6  ;;  %v1874_v6 = vld [vmem:[%s7109_s15 + $0x1f0] sm:$0xff] }
 0x344   : > { %v1623_v19 = vpop.f32.mrf.mxu1 }
 0x345   : > { %v8162_v34 = vadd.f32 %v7741_v48, %v1623_v19  ;;  %v1315_v53 = vpack.c.bf16 %v732_v2, %v731_v37  ;;  %v8202_v37 = vpop.f32.mrf.mxu3  ;;  %v2784_v2 = vsel %vm2645_vm3, %v7987_v51, -inf }
 0x346   : > { %3350 = vrot.lane.b32.xlu0 %v8145_v49, %s7019_s13  ;;  %v652_v49 = vld [vmem:[%s7122_s22 + $0x248] sm:$0xff] }
 0x347   : > { %v8159_v46 = vpop.xlane.xlu1 %2764  ;;  %v1774_v27 = vmul.f32 %v7753_v12, %v8162_v34  ;;  %6337 = vmatmul.msk.bf16.gmra.mxu1 %vm824_vm2, %v1315_v53  ;;  %v1875_v53 = vld [vmem:[%s7109_s15 + $0x1f8] sm:$0xff] }
 0x348   : > { %3336 = vrot.lane.b32.xlu1 %v8149_v55, %s7019_s13 }
 0x34b   : > { %v2351_v57 = vpop.f32.mrf.mxu2 }
 0x34c   : > { %v2517_v56 = vadd.f32 %v2351_v57, %v1774_v27  ;;  %v1625_v21 = vpop.f32.mrf.mxu1  ;;  %v8186_v27 = vpop.xlane.xlu2 %2761  ;;  %v1873_v57 = vld [vmem:[%s7109_s15 + $0x1e8] sm:$0xff] }
 0x34d   : > { %v8173_v30 = vadd.f32 %v7741_v48, %v1625_v21  ;;  %6413 = vmatmul.msk.f32.gmra.mxu2 %vm1903_vm1, %v1873_v57  ;;  %v553_v57 = vld [vmem:[%s7115_s18 + $0x200] sm:$0xff] }
 0x34e   : > { %2607 = vst.msk [vmem:[%s7224_s29 + $0x1a0] sm:$0xff] %vm824_vm2, %v2517_v56 }
 0x34f   : > { %v1775_v19 = vmul.f32 %v7753_v12, %v8173_v30 }
 0x353   : > { %v2354_v58 = vpop.f32.mrf.mxu2 }
 0x354   : > { %v2518_v56 = vadd.f32 %v2354_v58, %v1775_v19  ;;  %v8198_v20 = vpop.xlane.xlu2 %2770  ;;  %v2953_v19 = vsub.f32 %v7848_v52, %v8109_v26 }
 0x355   : > { %6414 = vmatmul.msk.f32.gmra.mxu2 %vm1903_vm1, %v1874_v6  ;;  %v8214_v6 = vpop.f32.mrf.mxu3 }
 0x356   : > { %2608 = vst.msk [vmem:[%s7224_s29 + $0x1a8] sm:$0xff] %vm824_vm2, %v2518_v56  ;;  %v554_v56 = vld [vmem:[%s7115_s18 + $0x208] sm:$0xff]  ;;  %v3080_v10 = vmul.f32 1.442695, %v2953_v19  ;;  %v2796_v19 = vsel %vm2645_vm3, %v8081_v47, -inf }
 0x358   : > { %6623 = vpow2.f32 %v3080_v10 }
 0x35a   : > { %3344 = vrot.lane.b32.xlu2 %v8164_v29, %s7019_s13 }
 0x35c   : > { %v3333_v58 = vpop.permute.xlu2 %3332 }
 0x35d   : > { %6415 = vmatmul.msk.f32.gmra.mxu2 %vm1903_vm1, %v1875_v53  ;;  %v1628_v53 = vpop.f32.mrf.mxu1 }
 0x35e   : > { %v8221_v55 = vadd.f32 %v7741_v48, %v1628_v53  ;;  %v2951_v53 = vsub.f32 %v7819_v16, %v8087_v7  ;;  %v2954_v16 = vsub.f32 %v7867_v1, %v8186_v27 }
 0x35f   : > { %v3327_v63 = vpop.permute.xlu1 %3326 }
 0x360   : > { %6466 = vmatmul.msk.f32.gmra.mxu3 %vm3458_vm4, %v3327_v63  ;;  %v2802_v63 = vsel %vm2645_vm3, %v8162_v34, -inf }
 0x361   : > { %v2357_v7 = vpop.f32.mrf.mxu2 }
 0x365   : > { %v1630_v38 = vpop.f32.mrf.mxu1 }
 0x367   : > { %v3329_v21 = vpop.permute.xlu1 %3328 }
 0x368   : > { %6467 = vmatmul.msk.f32.gmra.mxu3 %vm3458_vm4, %v3329_v21  ;;  %v643_v21 = vld [vmem:[%s7122_s22 + $0x200] sm:$0xff] }
 0x36f   : > { %v3331_v33 = vpop.permute.xlu1 %3330 }
 0x370   : > { %2803 = vmax.xlane.f32.xlu0 %v2802_v63  ;;  %6468 = vmatmul.msk.f32.gmra.mxu3 %vm3458_vm4, %v3331_v33  ;;  %v644_v63 = vld [vmem:[%s7122_s22 + $0x208] sm:$0xff]  ;;  %v733_v33 = vadd.f32 %v643_v21, %v553_v57  ;;  %v8228_v57 = vpop.eup %6623  ;;  %v556_v21 = vld [vmem:[%s7115_s18 + $0x218] sm:$0xff] }
 0x371   : > { %v734_v52 = vadd.f32 %v644_v63, %v554_v56  ;;  %12951 = vst [vmem:[#allocation38_spill] sm:$0xff] %v8228_v57  ;;  %v555_v56 = vld [vmem:[%s7115_s18 + $0x210] sm:$0xff] }
 0x372   : > { %2785 = vmax.xlane.f32.xlu1 %v2784_v2  ;;  %v2790_v2 = vsel %vm2645_vm3, %v8016_v36, -inf  ;;  %v645_v63 = vld [vmem:[%s7122_s22 + $0x210] sm:$0xff] }
 0x373   : > { %v1316_v26 = vpack.c.bf16 %v734_v52, %v733_v33  ;;  %v646_v33 = vld [vmem:[%s7122_s22 + $0x218] sm:$0xff]  ;;  %v735_v10 = vadd.f32 %v645_v63, %v555_v56  ;;  %v1776_v56 = vmul.f32 %v7753_v12, %v8221_v55 }
 0x375   : > { %6338 = vmatmul.msk.bf16.gmra.mxu1 %vm824_vm2, %v1316_v26  ;;  %v2955_v26 = vsub.f32 %v7873_v14, %v8159_v46  ;;  %v1876_v14 = vld [vmem:[%s7109_s15 + $0x200] sm:$0xff]  ;;  %v3082_v46 = vmul.f32 1.442695, %v2954_v16 }
 0x376   : > { %6416 = vmatmul.msk.f32.gmra.mxu2 %vm1903_vm1, %v1876_v14 }
 0x378   : > { %6469 = vmatmul.msk.f32.gmra.mxu3 %vm3458_vm4, %v3333_v58  ;;  %v2808_v58 = vsel %vm2645_vm3, %v8221_v55, -inf }
 0x37a   : > { %2791 = vmax.xlane.f32.xlu1 %v2790_v2  ;;  %v736_v2 = vadd.f32 %v646_v33, %v556_v21  ;;  %v2519_v21 = vadd.f32 %v2357_v7, %v1776_v56 }
 0x37c   : > { %v1317_v52 = vpack.c.bf16 %v736_v2, %v735_v10  ;;  %2609 = vst.msk [vmem:[%s7224_s29 + $0x1b0] sm:$0xff] %vm824_vm2, %v2519_v21 }
 0x382   : > { %2797 = vmax.xlane.f32.xlu1 %v2796_v19  ;;  %v2768_v19 = vpop.xlane.xlu0 %2767 }
 0x383   : > { %2809 = vmax.xlane.f32.xlu2 %v2808_v58  ;;  %v3076_v58 = vmul.f32 1.442695, %v2951_v53  ;;  %v2956_v23 = vsub.f32 %v7893_v15, %v2768_v19  ;;  %v8253_v15 = vadd.f32 %v7741_v48, %v1630_v38  ;;  %v1877_v38 = vld [vmem:[%s7109_s15 + $0x208] sm:$0xff]  ;;  %v8268_v53 = vld [vmem:[%s12733_s6] ss:$0 sm:$0xff] }
 0x384   : > { %3352 = vrot.lane.b32.xlu0 %v8228_v57, %s7019_s13  ;;  %v3084_v57 = vmul.f32 1.442695, %v2955_v26  ;;  %6417 = vmatmul.msk.f32.gmra.mxu2 %vm1903_vm1, %v1877_v38  ;;  %v8287_v19 = vld [vmem:[%s12734_s7] ss:$0 sm:$0xff]  ;;  %v8308_v38 = vpop.f32.mrf.mxu3 }
 0x385   : > { %6339 = vmatmul.msk.bf16.gmra.mxu1 %vm824_vm2, %v1317_v52  ;;  %6625 = vpow2.f32 %v3076_v58  ;;  %v3086_v63 = vmul.f32 1.442695, %v2956_v23  ;;  %v1777_v23 = vmul.f32 %v7753_v12, %v8253_v15  ;;  %v2360_v2 = vpop.f32.mrf.mxu2 }
 0x386   : > { %6627 = vpow2.f32 %v3084_v57  ;;  %v1633_v57 = vpop.f32.mrf.mxu1 }
 0x387   : > { %6629 = vpow2.f32 %v3086_v63  ;;  %v2520_v48 = vadd.f32 %v2360_v2, %v1777_v23  ;;  %v8271_v52 = vadd.f32 %v8268_v53, %v1633_v57  ;;  %v1878_v63 = vld [vmem:[%s7109_s15 + $0x210] sm:$0xff]  ;;  %v1879_v2 = vld [vmem:[%s7109_s15 + $0x218] sm:$0xff] }
 0x388   : > { %6631 = vpow2.f32 %v3082_v46 }
 0x389   : > { %2610 = vst.msk [vmem:[%s7224_s29 + $0x1b8] sm:$0xff] %vm824_vm2, %v2520_v48  ;;  %v1778_v56 = vmul.f32 %v8287_v19, %v8271_v52 }
 0x38b   : > { %v8250_v33 = vpop.eup %6625 }
 0x38c   : > { %12952 = vst [vmem:[#allocation39_spill] sm:$0xff] %v8250_v33  ;;  %v8255_v10 = vpop.eup %6627  ;;  %6418 = vmatmul.msk.f32.gmra.mxu2 %vm1903_vm1, %v1878_v63  ;;  %v648_v63 = vld [vmem:[%s7122_s22 + $0x228] sm:$0xff] }
 0x38d   : > { %12953 = vst [vmem:[#allocation40_spill] sm:$0xff] %v8255_v10  ;;  %v8276_v12 = vpop.eup %6629  ;;  %v2363_v7 = vpop.f32.mrf.mxu2 }
 0x38e   : > { %12954 = vst [vmem:[#allocation41_spill] sm:$0xff] %v8276_v12  ;;  %v8278_v58 = vpop.eup %6631  ;;  %v2521_v21 = vadd.f32 %v2363_v7, %v1778_v56  ;;  %v1635_v14 = vpop.f32.mrf.mxu1  ;;  %v2811_v56 = vsel %vm2645_vm3, %v8253_v15, -inf  ;;  %v558_v7 = vld [vmem:[%s7115_s18 + $0x228] sm:$0xff] }
 0x38f   : > { %12955 = vst [vmem:[#allocation42_spill] sm:$0xff] %v8278_v58  ;;  %v8294_v46 = vadd.f32 %v8268_v53, %v1635_v14  ;;  %v1880_v14 = vld [vmem:[%s7109_s15 + $0x220] sm:$0xff] }
 0x390   : > { %2611 = vst.msk [vmem:[%s7224_s29 + $0x1c0] sm:$0xff] %vm824_vm2, %v2521_v21  ;;  %v647_v21 = vld [vmem:[%s7122_s22 + $0x220] sm:$0xff] }
 0x394   : > { %6419 = vmatmul.msk.f32.gmra.mxu2 %vm1903_vm1, %v1879_v2 }
 0x395   : > { %v2366_v57 = vpop.f32.mrf.mxu2 }
 0x39a   : > { %v2777_v1 = vpop.xlane.xlu1 %2776 }
 0x39b   : > { %3348 = vrot.lane.b32.xlu1 %v8250_v33, %s7019_s13  ;;  %3356 = vrot.lane.b32.xlu2 %v8255_v10, %s7019_s13  ;;  %v2959_v27 = vsub.f32 %v7929_v13, %v2777_v1  ;;  %v2780_v13 = vpop.xlane.xlu2 %2779  ;;  %v561_v33 = vld [vmem:[%s7115_s18 + $0x240] sm:$0xff] }
 0x39c   : > { %v2960_v16 = vsub.f32 %v7941_v62, %v2780_v13  ;;  %v1779_v62 = vmul.f32 %v8287_v19, %v8294_v46  ;;  %6420 = vmatmul.msk.f32.gmra.mxu2 %vm1903_vm1, %v1880_v14  ;;  %v651_v10 = vld [vmem:[%s7122_s22 + $0x240] sm:$0xff] }
 0x39d   : > { %v3092_v26 = vmul.f32 1.442695, %v2959_v27  ;;  %v2805_v27 = vsel %vm2645_vm3, %v8173_v30, -inf }
 0x39e   : > { %v3094_v1 = vmul.f32 1.442695, %v2960_v16  ;;  %v2522_v48 = vadd.f32 %v2366_v57, %v1779_v62  ;;  %v557_v16 = vld [vmem:[%s7115_s18 + $0x220] sm:$0xff]  ;;  %v738_v62 = vadd.f32 %v648_v63, %v558_v7  ;;  %v8326_v57 = vpop.f32.mrf.mxu3 }
 0x39f   : > { %6633 = vpow2.f32 %v3092_v26 }
 0x3a0   : > { %6635 = vpow2.f32 %v3094_v1  ;;  %2612 = vst.msk [vmem:[%s7224_s29 + $0x1c8] sm:$0xff] %vm824_vm2, %v2522_v48  ;;  %v737_v1 = vadd.f32 %v647_v21, %v557_v16  ;;  %v2957_v48 = vsub.f32 %v7898_v40, %v8198_v20  ;;  %v2774_v21 = vpop.xlane.xlu0 %2773  ;;  %v649_v40 = vld [vmem:[%s7122_s22 + $0x230] sm:$0xff] }
 0x3a2   : > { %v3088_v7 = vmul.f32 1.442695, %v2957_v48 }
 0x3a3   : > { %3354 = vrot.lane.b32.xlu1 %v8278_v58, %s7019_s13  ;;  %3358 = vrot.lane.b32.xlu2 %v8276_v12, %s7019_s13  ;;  %v3339_v16 = vpop.permute.xlu2 %3338 }
 0x3a4   : > { %6637 = vpow2.f32 %v3088_v7 }
 0x3a5   : > { %v8299_v23 = vpop.eup %6633 }
 0x3a6   : > { %12956 = vst [vmem:[#allocation43_spill] sm:$0xff] %v8299_v23  ;;  %v8313_v26 = vpop.eup %6635  ;;  %v8334_v63 = vpop.f32.mrf.mxu3 }
 0x3a7   : > { %12957 = vst [vmem:[#allocation44_spill] sm:$0xff] %v8313_v26 }
 0x3a8   : > { %v2783_v48 = vpop.xlane.xlu0 %2782 }
 0x3aa   : > { %v8340_v20 = vpop.eup %6637 }
 0x3ab   : > { %3364 = vrot.lane.b32.xlu2 %v8299_v23, %s7019_s13  ;;  %v3341_v14 = vpop.permute.xlu2 %3340  ;;  %12958 = vst [vmem:[#allocation45_spill] sm:$0xff] %v8340_v20 }
 0x3ae   : > { %2806 = vmax.xlane.f32.xlu0 %v2805_v27  ;;  %v1318_v27 = vpack.c.bf16 %v738_v62, %v737_v1  ;;  %v559_v62 = vld [vmem:[%s7115_s18 + $0x230] sm:$0xff] }
 0x3af   : > { %v739_v23 = vadd.f32 %v649_v40, %v559_v62  ;;  %v2369_v62 = vpop.f32.mrf.mxu2 }
 0x3b0   : > { %6340 = vmatmul.msk.bf16.gmra.mxu1 %vm824_vm2, %v1318_v27  ;;  %v560_v27 = vld [vmem:[%s7115_s18 + $0x238] sm:$0xff]  ;;  %v3343_v58 = vpop.permute.xlu0 %3342 }
 0x3b2   : > { %v3335_v13 = vpop.permute.xlu1 %3334 }
 0x3b3   : > { %6470 = vmatmul.msk.f32.gmra.mxu3 %vm3458_vm4, %v3335_v13  ;;  %3366 = vrot.lane.b32.xlu2 %v8313_v26, %s7019_s13  ;;  %v1881_v13 = vld [vmem:[%s7109_s15 + $0x228] sm:$0xff]  ;;  %v650_v26 = vld [vmem:[%s7122_s22 + $0x238] sm:$0xff] }
 0x3b4   : > { %6421 = vmatmul.msk.f32.gmra.mxu2 %vm1903_vm1, %v1881_v13  ;;  %v2814_v13 = vsel %vm2645_vm3, %v8271_v52, -inf  ;;  %v740_v7 = vadd.f32 %v650_v26, %v560_v27 }
 0x3b5   : > { %v8354_v40 = vpop.xlane.xlu2 %2788 }
 0x3b6   : > { %2812 = vmax.xlane.f32.xlu0 %v2811_v56  ;;  %v1638_v56 = vpop.f32.mrf.mxu1 }
 0x3b7   : > { %v8351_v12 = vadd.f32 %v8268_v53, %v1638_v56 }
 0x3b9   : > { %v1780_v56 = vmul.f32 %v8287_v19, %v8351_v12 }
 0x3ba   : > { %v3337_v2 = vpop.permute.xlu1 %3336 }
 0x3bb   : > { %6471 = vmatmul.msk.f32.gmra.mxu3 %vm3458_vm4, %v3337_v2  ;;  %v8342_v2 = vpop.f32.mrf.mxu3 }
 0x3be   : > { %v1640_v1 = vpop.f32.mrf.mxu1 }
 0x3bf   : > { %v8359_v26 = vadd.f32 %v8268_v53, %v1640_v1  ;;  %v2372_v1 = vpop.f32.mrf.mxu2 }
 0x3c3   : > { %6472 = vmatmul.msk.f32.gmra.mxu3 %vm3458_vm4, %v3339_v16  ;;  %v1319_v16 = vpack.c.bf16 %v740_v7, %v739_v23  ;;  %v2958_v7 = vsub.f32 %v7918_v25, %v2774_v21 }
 0x3c5   : > { %6341 = vmatmul.msk.bf16.gmra.mxu1 %vm824_vm2, %v1319_v16  ;;  %v3090_v25 = vmul.f32 1.442695, %v2958_v7 }
 0x3c6   : > { %v1643_v23 = vpop.f32.mrf.mxu1 }
 0x3c7   : > { %v8365_v27 = vadd.f32 %v8268_v53, %v1643_v23  ;;  %v3345_v23 = vpop.permute.xlu2 %3344  ;;  %6639 = vpow2.f32 %v3090_v25 }
 0x3ca   : > { %3360 = vrot.lane.b32.xlu0 %v8340_v20, %s7019_s13  ;;  %v8356_v20 = vpop.f32.mrf.mxu3 }
 0x3cb   : > { %6473 = vmatmul.msk.f32.gmra.mxu3 %vm3458_vm4, %v3341_v14  ;;  %v2523_v14 = vadd.f32 %v2369_v62, %v1780_v56  ;;  %v741_v62 = vadd.f32 %v651_v10, %v561_v33  ;;  %v8378_v56 = vpop.xlane.xlu0 %2794  ;;  %v1782_v33 = vmul.f32 %v8287_v19, %v8365_v27  ;;  %v2375_v10 = vpop.f32.mrf.mxu2 }
 0x3cd   : > { %2815 = vmax.xlane.f32.xlu1 %v2814_v13  ;;  %2613 = vst.msk [vmem:[%s7224_s29 + $0x1d0] sm:$0xff] %vm824_vm2, %v2523_v14  ;;  %v1781_v13 = vmul.f32 %v8287_v19, %v8359_v26  ;;  %v742_v14 = vadd.f32 %v652_v49, %v562_v54  ;;  %v8396_v7 = vpop.eup %6639 }
 0x3ce   : > { %12959 = vst [vmem:[#allocation46_spill] sm:$0xff] %v8396_v7 }
 0x3cf   : > { %v2524_v16 = vadd.f32 %v2372_v1, %v1781_v13  ;;  %v1320_v21 = vpack.c.bf16 %v742_v14, %v741_v62  ;;  %v1645_v13 = vpop.f32.mrf.mxu1  ;;  %v2525_v1 = vadd.f32 %v2375_v10, %v1782_v33 }
 0x3d0   : > { %v8394_v49 = vadd.f32 %v8268_v53, %v1645_v13 }
 0x3d1   : > { %2614 = vst.msk [vmem:[%s7224_s29 + $0x1d8] sm:$0xff] %vm824_vm2, %v2524_v16  ;;  %v2961_v16 = vsub.f32 %v7954_v42, %v2783_v48 }
 0x3d2   : > { %v8382_v17 = vpop.f32.mrf.mxu3  ;;  %2615 = vst.msk [vmem:[%s7224_s29 + $0x1e0] sm:$0xff] %vm824_vm2, %v2525_v1  ;;  %v1783_v62 = vmul.f32 %v8287_v19, %v8394_v49 }
 0x3d3   : > { %6474 = vmatmul.msk.f32.gmra.mxu3 %vm3458_vm4, %v3343_v58  ;;  %v2826_v58 = vsel %vm2645_vm3, %v8365_v27, -inf  ;;  %v3347_v61 = vpop.permute.xlu0 %3346  ;;  %v2378_v14 = vpop.f32.mrf.mxu2 }
 0x3d4   : > { %v2526_v25 = vadd.f32 %v2378_v14, %v1783_v62  ;;  %v2817_v62 = vsel %vm2645_vm3, %v8294_v46, -inf }
 0x3d5   : > { %6342 = vmatmul.msk.bf16.gmra.mxu1 %vm824_vm2, %v1320_v21  ;;  %v3096_v21 = vmul.f32 1.442695, %v2961_v16 }
 0x3d6   : > { %2616 = vst.msk [vmem:[%s7224_s29 + $0x1e8] sm:$0xff] %vm824_vm2, %v2526_v25  ;;  %v1882_v25 = vld [vmem:[%s7109_s15 + $0x230] sm:$0xff] }
 0x3d7   : > { %6641 = vpow2.f32 %v3096_v21  ;;  %6422 = vmatmul.msk.f32.gmra.mxu2 %vm1903_vm1, %v1882_v25 }
 0x3da   : > { %v8390_v54 = vpop.f32.mrf.mxu3 }
 0x3db   : > { %6475 = vmatmul.msk.f32.gmra.mxu3 %vm3458_vm4, %v3345_v23  ;;  %v1648_v23 = vpop.f32.mrf.mxu1  ;;  %v2381_v33 = vpop.f32.mrf.mxu2 }
 0x3dc   : > { %2827 = vmax.xlane.f32.xlu2 %v2826_v58 }
 0x3dd   : > { %v8413_v16 = vpop.eup %6641 }
 0x3de   : > { %12960 = vst [vmem:[#allocation47_spill] sm:$0xff] %v8413_v16 }
 0x3e3   : > { %6476 = vmatmul.msk.f32.gmra.mxu3 %vm3458_vm4, %v3347_v61  ;;  %v8404_v61 = vadd.f32 %v8268_v53, %v1648_v23  ;;  %v2384_v21 = vpop.f32.mrf.mxu2 }
 0x3e5   : > { %v2786_v58 = vpop.xlane.xlu1 %2785  ;;  %v1784_v13 = vmul.f32 %v8287_v19, %v8404_v61 }
 0x3e6   : > { %3362 = vrot.lane.b32.xlu1 %v8396_v7, %s7019_s13  ;;  %v2962_v42 = vsub.f32 %v7987_v51, %v2786_v58  ;;  %v1650_v7 = vpop.f32.mrf.mxu1 }
 0x3e7   : > { %v2527_v10 = vadd.f32 %v2381_v33, %v1784_v13  ;;  %v8420_v51 = vadd.f32 %v8268_v53, %v1650_v7  ;;  %v2820_v7 = vsel %vm2645_vm3, %v8351_v12, -inf }
 0x3e8   : > { %v3098_v1 = vmul.f32 1.442695, %v2962_v42 }
 0x3e9   : > { %2617 = vst.msk [vmem:[%s7224_s29 + $0x1f0] sm:$0xff] %vm824_vm2, %v2527_v10  ;;  %v1785_v14 = vmul.f32 %v8287_v19, %v8420_v51  ;;  %v2829_v10 = vsel %vm2645_vm3, %v8394_v49, -inf }
 0x3ea   : > { %6643 = vpow2.f32 %v3098_v1 }
 0x3eb   : > { %v2528_v42 = vadd.f32 %v2384_v21, %v1785_v14 }
 0x3ed   : > { %v2792_v48 = vpop.xlane.xlu1 %2791  ;;  %2618 = vst.msk [vmem:[%s7224_s29 + $0x1f8] sm:$0xff] %vm824_vm2, %v2528_v42  ;;  %v2823_v42 = vsel %vm2645_vm3, %v8359_v26, -inf }
 0x3f0   : > { %v8429_v33 = vpop.eup %6643 }
 0x3f1   : > { %12961 = vst [vmem:[#allocation48_spill] sm:$0xff] %v8429_v33 }
 0x3f4   : > { %2818 = vmax.xlane.f32.xlu0 %v2817_v62  ;;  %3368 = vrot.lane.b32.xlu2 %v8413_v16, %s7019_s13  ;;  %v8441_v62 = vpop.f32.mrf.mxu3 }
 0x3f5   : > { %v2798_v58 = vpop.xlane.xlu1 %2797 }
 0x3f6   : > { %v2966_v23 = vsub.f32 %v8081_v47, %v2798_v58  ;;  %v1883_v47 = vld [vmem:[%s7109_s15 + $0x238] sm:$0xff]  ;;  %v8445_v58 = vpop.xlane.xlu0 %2800 }
 0x3f7   : > { %6423 = vmatmul.msk.f32.gmra.mxu2 %vm1903_vm1, %v1883_v47 }
 0x3f8   : > { %v3106_v13 = vmul.f32 1.442695, %v2966_v23  ;;  %v2835_v23 = vsel %vm2645_vm3, %v8420_v51, -inf }
 0x3fa   : > { %6645 = vpow2.f32 %v3106_v13  ;;  %v1653_v13 = vpop.f32.mrf.mxu1 }
 0x3fc   : > { %2821 = vmax.xlane.f32.xlu0 %v2820_v7  ;;  %3370 = vrot.lane.b32.xlu2 %v8429_v33, %s7019_s13  ;;  %v8449_v21 = vpop.f32.mrf.mxu3  ;;  %v2964_v7 = vsub.f32 %v8016_v36, %v2792_v48  ;;  %v2387_v48 = vpop.f32.mrf.mxu2 }
 0x3fe   : > { %v3351_v14 = vpop.permute.xlu0 %3350 }
 0x400   : > { %v8439_v1 = vpop.eup %6645 }
 0x401   : > { %12962 = vst [vmem:[#allocation49_spill] sm:$0xff] %v8439_v1 }
 0x402   : > { %v1655_v33 = vpop.f32.mrf.mxu1 }
 0x404   : > { %2830 = vmax.xlane.f32.xlu0 %v2829_v10  ;;  %3378 = vrot.lane.b32.xlu2 %v8439_v1, %s7019_s13  ;;  %v3102_v10 = vmul.f32 1.442695, %v2964_v7  ;;  %v8460_v1 = vadd.f32 %v8268_v53, %v1653_v13  ;;  %v8469_v7 = vadd.f32 %v8268_v53, %v1655_v33 }
 0x406   : > { %v8455_v47 = vpop.xlane.xlu0 %2803  ;;  %6647 = vpow2.f32 %v3102_v10  ;;  %v1786_v36 = vmul.f32 %v8287_v19, %v8460_v1  ;;  %v8479_v10 = vpop.xlane.xlu2 %2809 }
 0x407   : > { %v2390_v33 = vpop.f32.mrf.mxu2 }
 0x40c   : > { %2836 = vmax.xlane.f32.xlu0 %v2835_v23  ;;  %v2832_v23 = vsel %vm2645_vm3, %v8404_v61, -inf }
 0x40d   : > { %v3349_v25 = vpop.permute.xlu1 %3348 }
 0x40e   : > { %6477 = vmatmul.msk.f32.gmra.mxu3 %vm3458_vm4, %v3349_v25  ;;  %v8463_v25 = vpop.f32.mrf.mxu3  ;;  %v3353_v16 = vpop.permute.xlu0 %3352 }
 0x410   : > { %2824 = vmax.xlane.f32.xlu1 %v2823_v42  ;;  %v2529_v42 = vadd.f32 %v2387_v48, %v1786_v36  ;;  %v1658_v36 = vpop.f32.mrf.mxu1 }
 0x411   : > { %v8487_v43 = vadd.f32 %v8268_v53, %v1658_v36 }
 0x412   : > { %2619 = vst.msk [vmem:[%s7224_s29 + $0x200] sm:$0xff] %vm824_vm2, %v2529_v42 }
 0x415   : > { %v3355_v29 = vpop.permute.xlu1 %3354 }
 0x416   : > { %6478 = vmatmul.msk.f32.gmra.mxu3 %vm3458_vm4, %v3351_v14  ;;  %v8473_v14 = vpop.eup %6647  ;;  %v8475_v13 = vpop.f32.mrf.mxu3 }
 0x417   : > { %12963 = vst [vmem:[#allocation50_spill] sm:$0xff] %v8473_v14 }
 0x418   : > { %2833 = vmax.xlane.f32.xlu1 %v2832_v23  ;;  %v2963_v23 = vsub.f32 %v7994_v41, %v8354_v40  ;;  %v2965_v41 = vsub.f32 %v8024_v28, %v8378_v56  ;;  %v1660_v39 = vpop.f32.mrf.mxu1 }
 0x419   : > { %v8505_v28 = vadd.f32 %v8268_v53, %v1660_v39 }
 0x41a   : > { %v3100_v42 = vmul.f32 1.442695, %v2963_v23  ;;  %v3357_v23 = vpop.permute.xlu2 %3356 }
 0x41c   : > { %6649 = vpow2.f32 %v3100_v42  ;;  %v1789_v42 = vmul.f32 %v8287_v19, %v8505_v28 }
 0x41e   : > { %6479 = vmatmul.msk.f32.gmra.mxu3 %vm3458_vm4, %v3353_v16  ;;  %v1787_v16 = vmul.f32 %v8287_v19, %v8469_v7 }
 0x420   : > { %3374 = vrot.lane.b32.xlu0 %v8473_v14, %s7019_s13  ;;  %v2530_v48 = vadd.f32 %v2390_v33, %v1787_v16  ;;  %v8491_v14 = vpop.f32.mrf.mxu3  ;;  %v2844_v16 = vsel %vm2645_vm3, %v8487_v43, -inf  ;;  %v2393_v33 = vpop.f32.mrf.mxu2 }
 0x421   : > { %v8495_v40 = vpop.xlane.xlu0 %2806 }
 0x422   : > { %2620 = vst.msk [vmem:[%s7224_s29 + $0x208] sm:$0xff] %vm824_vm2, %v2530_v48  ;;  %v3104_v48 = vmul.f32 1.442695, %v2965_v41  ;;  %v8507_v56 = vpop.eup %6649 }
 0x423   : > { %12964 = vst [vmem:[#allocation51_spill] sm:$0xff] %v8507_v56 }
 0x424   : > { %6651 = vpow2.f32 %v3104_v48 }
 0x426   : > { %6480 = vmatmul.msk.f32.gmra.mxu3 %vm3458_vm4, %v3355_v29  ;;  %v1788_v29 = vmul.f32 %v8287_v19, %v8487_v43 }
 0x428   : > { %v2531_v36 = vadd.f32 %v2393_v33, %v1788_v29  ;;  %v2396_v41 = vpop.f32.mrf.mxu2  ;;  %v2967_v33 = vsub.f32 %v8099_v8, %v8445_v58 }
 0x429   : > { %v8515_v29 = vpop.xlane.xlu0 %2812  ;;  %v2532_v39 = vadd.f32 %v2396_v41, %v1789_v42  ;;  %v654_v42 = vld [vmem:[%s7122_s22 + $0x258] sm:$0xff]  ;;  %v743_v41 = vadd.f32 %v653_v32, %v563_v22 }
 0x42a   : > { %2621 = vst.msk [vmem:[%s7224_s29 + $0x210] sm:$0xff] %vm824_vm2, %v2531_v36  ;;  %v8522_v48 = vpop.eup %6651  ;;  %v3108_v8 = vmul.f32 1.442695, %v2967_v33 }
 0x42b   : > { %2622 = vst.msk [vmem:[%s7224_s29 + $0x218] sm:$0xff] %vm824_vm2, %v2532_v39  ;;  %v1884_v39 = vld [vmem:[%s7109_s15 + $0x240] sm:$0xff] }
 0x42c   : > { %12965 = vst [vmem:[#allocation52_spill] sm:$0xff] %v8522_v48  ;;  %6424 = vmatmul.msk.f32.gmra.mxu2 %vm1903_vm1, %v1884_v39  ;;  %6653 = vpow2.f32 %v3108_v8  ;;  %v2841_v39 = vsel %vm2645_vm3, %v8469_v7, -inf }
 0x42d   : > { %2845 = vmax.xlane.f32.xlu2 %v2844_v16  ;;  %v8513_v16 = vpop.f32.mrf.mxu3  ;;  %v1663_v36 = vpop.f32.mrf.mxu1 }
 0x42e   : > { %6481 = vmatmul.msk.f32.gmra.mxu3 %vm3458_vm4, %v3357_v23  ;;  %v3359_v23 = vpop.permute.xlu2 %3358 }
 0x430   : > { %v2399_v35 = vpop.f32.mrf.mxu2 }
 0x431   : > { %3372 = vrot.lane.b32.xlu1 %v8507_v56, %s7019_s13  ;;  %v8525_v56 = vadd.f32 %v8268_v53, %v1663_v36 }
 0x433   : > { %v1790_v58 = vmul.f32 %v8287_v19, %v8525_v56 }
 0x435   : > { %v2533_v9 = vadd.f32 %v2399_v35, %v1790_v58  ;;  %v8537_v59 = vpop.f32.mrf.mxu3  ;;  %v1886_v58 = vld [vmem:[%s7109_s15 + $0x250] sm:$0xff] }
 0x436   : > { %6482 = vmatmul.msk.f32.gmra.mxu3 %vm3458_vm4, %v3359_v23  ;;  %v744_v23 = vadd.f32 %v654_v42, %v564_v24  ;;  %v1665_v24 = vpop.f32.mrf.mxu1 }
 0x437   : > { %2623 = vst.msk [vmem:[%s7224_s29 + $0x220] sm:$0xff] %vm824_vm2, %v2533_v9  ;;  %v8546_v22 = vadd.f32 %v8268_v53, %v1665_v24  ;;  %v1887_v24 = vld [vmem:[%s7109_s15 + $0x258] sm:$0xff] }
 0x438   : > { %v1321_v4 = vpack.c.bf16 %v744_v23, %v743_v41  ;;  %v2402_v42 = vpop.f32.mrf.mxu2  ;;  %v1885_v41 = vld [vmem:[%s7109_s15 + $0x248] sm:$0xff] }
 0x439   : > { %3376 = vrot.lane.b32.xlu1 %v8522_v48, %s7019_s13  ;;  %v2968_v48 = vsub.f32 %v8162_v34, %v8455_v47  ;;  %v1791_v35 = vmul.f32 %v8287_v19, %v8546_v22  ;;  %v8551_v34 = vpop.eup %6653  ;;  %6425 = vmatmul.msk.f32.gmra.mxu2 %vm1903_vm1, %v1885_v41  ;;  %v2969_v41 = vsub.f32 %v8173_v30, %v8495_v40  ;;  %v2853_v40 = vsel %vm2645_vm3, %v8546_v22, -inf }
 0x43a   : > { %6343 = vmatmul.msk.bf16.gmra.mxu1 %vm824_vm2, %v1321_v4  ;;  %12966 = vst [vmem:[#allocation53_spill] sm:$0xff] %v8551_v34  ;;  %v2838_v4 = vsel %vm2645_vm3, %v8460_v1, -inf }
 0x43b   : > { %v3110_v32 = vmul.f32 1.442695, %v2968_v48  ;;  %v2534_v47 = vadd.f32 %v2402_v42, %v1791_v35  ;;  %v2850_v35 = vsel %vm2645_vm3, %v8525_v56, -inf }
 0x43c   : > { %v3361_v36 = vpop.permute.xlu0 %3360 }
 0x43d   : > { %6655 = vpow2.f32 %v3110_v32  ;;  %2624 = vst.msk [vmem:[%s7224_s29 + $0x228] sm:$0xff] %vm824_vm2, %v2534_v47  ;;  %v8569_v23 = vpop.f32.mrf.mxu3 }
 0x43e   : > { %6483 = vmatmul.msk.f32.gmra.mxu3 %vm3458_vm4, %v3361_v36 }
 0x440   : > { %v2816_v33 = vpop.xlane.xlu1 %2815 }
 0x441   : > { %v2972_v9 = vsub.f32 %v8271_v52, %v2816_v33  ;;  %6426 = vmatmul.msk.f32.gmra.mxu2 %vm1903_vm1, %v1886_v58  ;;  %v3365_v52 = vpop.permute.xlu2 %3364  ;;  %v565_v58 = vld [vmem:[%s7115_s18 + $0x260] sm:$0xff] }
 0x442   : > { %v1668_v47 = vpop.f32.mrf.mxu1 }
 0x443   : > { %v3118_v48 = vmul.f32 1.442695, %v2972_v9  ;;  %v8561_v8 = vpop.eup %6655  ;;  %v2847_v9 = vsel %vm2645_vm3, %v8505_v28, -inf }
 0x444   : > { %12967 = vst [vmem:[#allocation54_spill] sm:$0xff] %v8561_v8 }
 0x445   : > { %3380 = vrot.lane.b32.xlu2 %v8551_v34, %s7019_s13  ;;  %6657 = vpow2.f32 %v3118_v48  ;;  %v8580_v42 = vpop.f32.mrf.mxu3 }
 0x449   : > { %6427 = vmatmul.msk.f32.gmra.mxu2 %vm1903_vm1, %v1887_v24  ;;  %v3367_v33 = vpop.permute.xlu2 %3366  ;;  %v655_v24 = vld [vmem:[%s7122_s22 + $0x260] sm:$0xff] }
 0x44a   : > { %2839 = vmax.xlane.f32.xlu0 %v2838_v4  ;;  %v3112_v4 = vmul.f32 1.442695, %v2969_v41 }
 0x44b   : > { %v8571_v36 = vpop.eup %6657 }
 0x44c   : > { %12968 = vst [vmem:[#allocation55_spill] sm:$0xff] %v8571_v36  ;;  %6659 = vpow2.f32 %v3112_v4  ;;  %v8609_v4 = vadd.f32 %v8268_v53, %v1668_v47 }
 0x44d   : > { %3382 = vrot.lane.b32.xlu2 %v8561_v8, %s7019_s13 }
 0x451   : > { %v8587_v48 = vpop.xlane.xlu2 %2827 }
 0x452   : > { %2842 = vmax.xlane.f32.xlu0 %v2841_v39  ;;  %v566_v39 = vld [vmem:[%s7115_s18 + $0x268] sm:$0xff]  ;;  %v8599_v41 = vpop.eup %6659 }
 0x453   : > { %12969 = vst [vmem:[#allocation56_spill] sm:$0xff] %v8599_v41 }
 0x455   : > { %3390 = vrot.lane.b32.xlu2 %v8571_v36, %s7019_s13  ;;  %v8593_v36 = vpop.f32.mrf.mxu3 }
 0x458   : > { %v3363_v32 = vpop.permute.xlu1 %3362 }
 0x459   : > { %6484 = vmatmul.msk.f32.gmra.mxu3 %vm3458_vm4, %v3363_v32  ;;  %v745_v32 = vadd.f32 %v655_v24, %v565_v58 }
 0x45a   : > { %2851 = vmax.xlane.f32.xlu0 %v2850_v35  ;;  %v656_v35 = vld [vmem:[%s7122_s22 + $0x268] sm:$0xff] }
 0x45b   : > { %v746_v8 = vadd.f32 %v656_v35, %v566_v39 }
 0x45d   : > { %v1322_v30 = vpack.c.bf16 %v746_v8, %v745_v32  ;;  %v8603_v58 = vpop.f32.mrf.mxu3  ;;  %v2970_v8 = vsub.f32 %v8221_v55, %v8479_v10 }
 0x45f   : > { %6344 = vmatmul.msk.bf16.gmra.mxu1 %vm824_vm2, %v1322_v30  ;;  %v3114_v32 = vmul.f32 1.442695, %v2970_v8  ;;  %v1792_v30 = vmul.f32 %v8287_v19, %v8609_v4 }
 0x461   : > { %6485 = vmatmul.msk.f32.gmra.mxu3 %vm3458_vm4, %v3365_v52  ;;  %v1670_v52 = vpop.f32.mrf.mxu1  ;;  %6661 = vpow2.f32 %v3114_v32 }
 0x463   : > { %2848 = vmax.xlane.f32.xlu1 %v2847_v9  ;;  %v3369_v9 = vpop.permute.xlu2 %3368 }
 0x465   : > { %v8614_v35 = vpop.f32.mrf.mxu3 }
 0x466   : > { %12970 = vst [vmem:[#allocation57_spill] sm:$0xff] %v8614_v35  ;;  %v6932_v35 = vld [vmem:[%s7115_s18 + $0x78] sm:$0xff] }
 0x467   : > { %v2819_v47 = vpop.xlane.xlu0 %2818  ;;  %v8628_v8 = vpop.eup %6661 }
 0x468   : > { %12971 = vst [vmem:[#allocation58_spill] sm:$0xff] %v8628_v8  ;;  %v2973_v32 = vsub.f32 %v8294_v46, %v2819_v47 }
 0x469   : > { %6486 = vmatmul.msk.f32.gmra.mxu3 %vm3458_vm4, %v3367_v33  ;;  %v1673_v33 = vpop.f32.mrf.mxu1 }
 0x46a   : > { %v8612_v39 = vadd.f32 %v8268_v53, %v1673_v33 }
 0x46b   : > { %2854 = vmax.xlane.f32.xlu1 %v2853_v40  ;;  %v3371_v24 = vpop.permute.xlu2 %3370  ;;  %v2405_v40 = vpop.f32.mrf.mxu2 }
 0x46c   : > { %v2862_v55 = vsel %vm2645_vm3, %v8612_v39, -inf  ;;  %v2535_v10 = vadd.f32 %v2405_v40, %v1792_v30 }
 0x46e   : > { %3384 = vrot.lane.b32.xlu0 %v8599_v41, %s7019_s13  ;;  %2625 = vst.msk [vmem:[%s7224_s29 + $0x230] sm:$0xff] %vm824_vm2, %v2535_v10 }
 0x46f   : > { %v2822_v30 = vpop.xlane.xlu0 %2821 }
 0x471   : > { %6487 = vmatmul.msk.f32.gmra.mxu3 %vm3458_vm4, %v3369_v9  ;;  %v8624_v9 = vadd.f32 %v8268_v53, %v1670_v52  ;;  %v2974_v52 = vsub.f32 %v8351_v12, %v2822_v30  ;;  %v2976_v12 = vsub.f32 %v8365_v27, %v8587_v48 }
 0x473   : > { %v1793_v33 = vmul.f32 %v8287_v19, %v8624_v9  ;;  %v3122_v34 = vmul.f32 1.442695, %v2974_v52 }
 0x477   : > { %v2831_v10 = vpop.xlane.xlu0 %2830 }
 0x478   : > { %v2977_v27 = vsub.f32 %v8394_v49, %v2831_v10  ;;  %v2856_v10 = vsel %vm2645_vm3, %v8609_v4, -inf }
 0x479   : > { %6488 = vmatmul.msk.f32.gmra.mxu3 %vm3458_vm4, %v3371_v24 }
 0x47a   : > { %v2408_v24 = vpop.f32.mrf.mxu2 }
 0x47b   : > { %v2536_v41 = vadd.f32 %v2408_v24, %v1793_v33  ;;  %v2859_v33 = vsel %vm2645_vm3, %v8624_v9, -inf }
 0x47d   : > { %2626 = vst.msk [vmem:[%s7224_s29 + $0x238] sm:$0xff] %vm824_vm2, %v2536_v41 }
 0x47e   : > { %2863 = vmax.xlane.f32.xlu2 %v2862_v55  ;;  %v3120_v55 = vmul.f32 1.442695, %v2973_v32  ;;  %v8649_v32 = vpop.f32.mrf.mxu3 }
 0x47f   : > { %v2837_v47 = vpop.xlane.xlu0 %2836 }
 0x480   : > { %6663 = vpow2.f32 %v3120_v55  ;;  %v2979_v30 = vsub.f32 %v8420_v51, %v2837_v47  ;;  %v3126_v55 = vmul.f32 1.442695, %v2976_v12  ;;  %v1889_v51 = vld [vmem:[%s7109_s15 + $0x268] sm:$0xff]  ;;  %v3379_v47 = vpop.permute.xlu2 %3378 }
 0x481   : > { %6665 = vpow2.f32 %v3122_v34  ;;  %v1888_v34 = vld [vmem:[%s7109_s15 + $0x260] sm:$0xff] }
 0x482   : > { %6428 = vmatmul.msk.f32.gmra.mxu2 %vm1903_vm1, %v1888_v34  ;;  %v568_v34 = vld [vmem:[%s7115_s18 + $0x278] sm:$0xff] }
 0x483   : > { %v8635_v40 = vpop.xlane.xlu1 %2824 }
 0x484   : > { %3386 = vrot.lane.b32.xlu1 %v8628_v8, %s7019_s13 }
 0x486   : > { %v8638_v18 = vpop.eup %6663  ;;  %v8660_v48 = vpop.f32.mrf.mxu3 }
 0x487   : > { %12972 = vst [vmem:[#allocation59_spill] sm:$0xff] %v8638_v18  ;;  %v8645_v24 = vpop.eup %6665 }
 0x488   : > { %12973 = vst [vmem:[#allocation60_spill] sm:$0xff] %v8645_v24 }
 0x48a   : > { %6429 = vmatmul.msk.f32.gmra.mxu2 %vm1903_vm1, %v1889_v51 }
 0x48b   : > { %v2834_v5 = vpop.xlane.xlu1 %2833 }
 0x48c   : > { %v2978_v46 = vsub.f32 %v8404_v61, %v2834_v5  ;;  %v3132_v5 = vmul.f32 1.442695, %v2979_v30  ;;  %v567_v30 = vld [vmem:[%s7115_s18 + $0x270] sm:$0xff] }
 0x48e   : > { %v3130_v41 = vmul.f32 1.442695, %v2978_v46  ;;  %v8677_v12 = vpop.f32.mrf.mxu3 }
 0x48f   : > { %12977 = vst [vmem:[#allocation64_spill] sm:$0xff] %v8677_v12 }
 0x490   : > { %6667 = vpow2.f32 %v3130_v41 }
 0x491   : > { %6669 = vpow2.f32 %v3126_v55  ;;  %v657_v55 = vld [vmem:[%s7122_s22 + $0x270] sm:$0xff] }
 0x492   : > { %6671 = vpow2.f32 %v3132_v5  ;;  %v3375_v41 = vpop.permute.xlu0 %3374  ;;  %v1890_v5 = vld [vmem:[%s7109_s15 + $0x270] sm:$0xff] }
 0x493   : > { %6430 = vmatmul.msk.f32.gmra.mxu2 %vm1903_vm1, %v1890_v5 }
 0x496   : > { %3392 = vrot.lane.b32.xlu2 %v8638_v18, %s7019_s13  ;;  %v8657_v52 = vpop.eup %6667 }
 0x497   : > { %12974 = vst [vmem:[#allocation61_spill] sm:$0xff] %v8657_v52  ;;  %v8666_v46 = vpop.eup %6669 }
 0x498   : > { %2860 = vmax.xlane.f32.xlu0 %v2859_v33  ;;  %v3128_v33 = vmul.f32 1.442695, %v2977_v27  ;;  %12975 = vst [vmem:[#allocation62_spill] sm:$0xff] %v8666_v46  ;;  %v8671_v49 = vpop.eup %6671  ;;  %v747_v27 = vadd.f32 %v657_v55, %v567_v30  ;;  %v8695_v30 = vpop.f32.mrf.mxu3  ;;  %v1891_v55 = vld [vmem:[%s7109_s15 + $0x278] sm:$0xff] }
 0x499   : > { %12976 = vst [vmem:[#allocation63_spill] sm:$0xff] %v8671_v49 }
 0x49a   : > { %6673 = vpow2.f32 %v3128_v33 }
 0x49b   : > { %6431 = vmatmul.msk.f32.gmra.mxu2 %vm1903_vm1, %v1891_v55  ;;  %v659_v55 = vld [vmem:[%s7122_s22 + $0x280] sm:$0xff] }
 0x49e   : > { %3394 = vrot.lane.b32.xlu2 %v8645_v24, %s7019_s13  ;;  %v2971_v24 = vsub.f32 %v8253_v15, %v8515_v29  ;;  %v2975_v15 = vsub.f32 %v8359_v26, %v8635_v40  ;;  %v660_v40 = vld [vmem:[%s7122_s22 + $0x288] sm:$0xff] }
 0x4a0   : > { %v8684_v51 = vpop.eup %6673 }
 0x4a1   : > { %12978 = vst [vmem:[#allocation65_spill] sm:$0xff] %v8684_v51 }
 0x4a3   : > { %v3373_v61 = vpop.permute.xlu1 %3372 }
 0x4a4   : > { %6489 = vmatmul.msk.f32.gmra.mxu3 %vm3458_vm4, %v3373_v61  ;;  %v658_v61 = vld [vmem:[%s7122_s22 + $0x278] sm:$0xff] }
 0x4a6   : > { %3402 = vrot.lane.b32.xlu2 %v8657_v52, %s7019_s13  ;;  %v8690_v52 = vpop.xlane.xlu2 %2845 }
 0x4ab   : > { %v3377_v33 = vpop.permute.xlu1 %3376 }
 0x4ac   : > { %3398 = vrot.lane.b32.xlu0 %v8666_v46, %s7019_s13  ;;  %6490 = vmatmul.msk.f32.gmra.mxu3 %vm3458_vm4, %v3375_v41  ;;  %v748_v41 = vadd.f32 %v658_v61, %v568_v34  ;;  %v1675_v61 = vpop.f32.mrf.mxu1 }
 0x4ae   : > { %2857 = vmax.xlane.f32.xlu1 %v2856_v10  ;;  %3404 = vrot.lane.b32.xlu2 %v8671_v49, %s7019_s13  ;;  %v1323_v10 = vpack.c.bf16 %v748_v41, %v747_v27  ;;  %v3116_v49 = vmul.f32 1.442695, %v2971_v24  ;;  %v1794_v24 = vmul.f32 %v8287_v19, %v8612_v39  ;;  %v3124_v41 = vmul.f32 1.442695, %v2975_v15 }
 0x4af   : > { %v2411_v27 = vpop.f32.mrf.mxu2 }
 0x4b0   : > { %6345 = vmatmul.msk.bf16.gmra.mxu1 %vm824_vm2, %v1323_v10  ;;  %6675 = vpow2.f32 %v3116_v49  ;;  %v569_v10 = vld [vmem:[%s7115_s18 + $0x280] sm:$0xff]  ;;  %v570_v49 = vld [vmem:[%s7115_s18 + $0x288] sm:$0xff]  ;;  %v2537_v26 = vadd.f32 %v2411_v27, %v1794_v24 }
 0x4b1   : > { %v750_v15 = vadd.f32 %v660_v40, %v570_v49 }
 0x4b2   : > { %2627 = vst.msk [vmem:[%s7224_s29 + $0x240] sm:$0xff] %vm824_vm2, %v2537_v26 }
 0x4b4   : > { %3400 = vrot.lane.b32.xlu0 %v8684_v51, %s7019_s13  ;;  %6491 = vmatmul.msk.f32.gmra.mxu3 %vm3458_vm4, %v3377_v33  ;;  %v3381_v33 = vpop.permute.xlu2 %3380 }
 0x4b7   : > { %v1678_v46 = vpop.f32.mrf.mxu1 }
 0x4bc   : > { %6492 = vmatmul.msk.f32.gmra.mxu3 %vm3458_vm4, %v3379_v47  ;;  %v8705_v47 = vpop.f32.mrf.mxu3  ;;  %v3383_v49 = vpop.permute.xlu2 %3382 }
 0x4bd   : > { %v2840_v34 = vpop.xlane.xlu0 %2839 }
 0x4be   : > { %v2980_v5 = vsub.f32 %v8460_v1, %v2840_v34  ;;  %v8709_v1 = vadd.f32 %v8268_v53, %v1675_v61  ;;  %v2414_v61 = vpop.f32.mrf.mxu2 }
 0x4c0   : > { %v3134_v29 = vmul.f32 1.442695, %v2980_v5  ;;  %v749_v5 = vadd.f32 %v659_v55, %v569_v10  ;;  %v1795_v51 = vmul.f32 %v8287_v19, %v8709_v1  ;;  %v8730_v10 = vadd.f32 %v8268_v53, %v1678_v46 }
 0x4c2   : > { %6677 = vpow2.f32 %v3134_v29  ;;  %v8717_v29 = vpop.eup %6675  ;;  %v2538_v27 = vadd.f32 %v2414_v61, %v1795_v51  ;;  %v1324_v24 = vpack.c.bf16 %v750_v15, %v749_v5  ;;  %v1796_v51 = vmul.f32 %v8287_v19, %v8730_v10  ;;  %v1680_v61 = vpop.f32.mrf.mxu1 }
 0x4c3   : > { %12979 = vst [vmem:[#allocation66_spill] sm:$0xff] %v8717_v29  ;;  %6679 = vpow2.f32 %v3124_v41 }
 0x4c4   : > { %6493 = vmatmul.msk.f32.gmra.mxu3 %vm3458_vm4, %v3381_v33  ;;  %2628 = vst.msk [vmem:[%s7224_s29 + $0x248] sm:$0xff] %vm824_vm2, %v2538_v27  ;;  %6346 = vmatmul.msk.bf16.gmra.mxu1 %vm824_vm2, %v1324_v24  ;;  %v8735_v55 = vpop.f32.mrf.mxu3  ;;  %v8748_v27 = vadd.f32 %v8268_v53, %v1680_v61  ;;  %v661_v61 = vld [vmem:[%s7122_s22 + $0x290] sm:$0xff] }
 0x4c5   : > { %v8714_v34 = vpop.xlane.xlu0 %2842  ;;  %12981 = vst [vmem:[#allocation68_spill] sm:$0xff] %v8735_v55  ;;  %v1900_v55 = vld [vmem:[%s7109_s15 + $0x2c0] sm:$0xff] }
 0x4c6   : > { %v2417_v5 = vpop.f32.mrf.mxu2 }
 0x4c7   : > { %3388 = vrot.lane.b32.xlu1 %v8717_v29, %s7019_s13  ;;  %v2539_v15 = vadd.f32 %v2417_v5, %v1796_v51 }
 0x4c8   : > { %v8725_v33 = vpop.eup %6677 }
 0x4c9   : > { %12980 = vst [vmem:[#allocation67_spill] sm:$0xff] %v8725_v33  ;;  %3406 = vrot.lane.b32.xlu2 %v8725_v33, %s7019_s13  ;;  %v8740_v26 = vpop.eup %6679 }
 0x4ca   : > { %12982 = vst [vmem:[#allocation69_spill] sm:$0xff] %v8740_v26 }
 0x4cb   : > { %2629 = vst.msk [vmem:[%s7224_s29 + $0x250] sm:$0xff] %vm824_vm2, %v2539_v15  ;;  %v572_v15 = vld [vmem:[%s7115_s18 + $0x298] sm:$0xff] }
 0x4cc   : > { %6494 = vmatmul.msk.f32.gmra.mxu3 %vm3458_vm4, %v3383_v49  ;;  %v8766_v33 = vpop.f32.mrf.mxu3 }
 0x4cd   : > { %v2852_v41 = vpop.xlane.xlu0 %2851 }
 0x4ce   : > { %v2984_v40 = vsub.f32 %v8525_v56, %v2852_v41  ;;  %v1797_v56 = vmul.f32 %v8287_v19, %v8748_v27  ;;  %v2420_v41 = vpop.f32.mrf.mxu2  ;;  %v571_v19 = vld [vmem:[%s7115_s18 + $0x290] sm:$0xff] }
 0x4cf   : > { %3396 = vrot.lane.b32.xlu1 %v8740_v26, %s7019_s13 }
 0x4d0   : > { %v3142_v46 = vmul.f32 1.442695, %v2984_v40  ;;  %v2540_v51 = vadd.f32 %v2420_v41, %v1797_v56  ;;  %v2865_v40 = vsel %vm2645_vm3, %v8709_v1, -inf  ;;  %v662_v56 = vld [vmem:[%s7122_s22 + $0x298] sm:$0xff]  ;;  %v751_v41 = vadd.f32 %v661_v61, %v571_v19  ;;  %v664_v61 = vld [vmem:[%s7122_s22 + $0x2a8] sm:$0xff] }
 0x4d2   : > { %6681 = vpow2.f32 %v3142_v46  ;;  %2630 = vst.msk [vmem:[%s7224_s29 + $0x258] sm:$0xff] %vm824_vm2, %v2540_v51  ;;  %v752_v51 = vadd.f32 %v662_v56, %v572_v15  ;;  %v663_v15 = vld [vmem:[%s7122_s22 + $0x2a0] sm:$0xff] }
 0x4d6   : > { %v8750_v24 = vpop.xlane.xlu1 %2848 }
 0x4d7   : > { %v2983_v29 = vsub.f32 %v8505_v28, %v8750_v24 }
 0x4d8   : > { %v8754_v49 = vpop.eup %6681 }
 0x4d9   : > { %12983 = vst [vmem:[#allocation70_spill] sm:$0xff] %v8754_v49  ;;  %3414 = vrot.lane.b32.xlu2 %v8754_v49, %s7019_s13  ;;  %v1892_v49 = vld [vmem:[%s7109_s15 + $0x280] sm:$0xff] }
 0x4da   : > { %6432 = vmatmul.msk.f32.gmra.mxu2 %vm1903_vm1, %v1892_v49  ;;  %v574_v49 = vld [vmem:[%s7115_s18 + $0x2a8] sm:$0xff] }
 0x4de   : > { %v2855_v53 = vpop.xlane.xlu1 %2854  ;;  %2866 = vmax.xlane.f32.xlu0 %v2865_v40  ;;  %v1325_v40 = vpack.c.bf16 %v752_v51, %v751_v41  ;;  %v754_v41 = vadd.f32 %v664_v61, %v574_v49  ;;  %v576_v49 = vld [vmem:[%s7115_s18 + $0x2b8] sm:$0xff] }
 0x4df   : > { %v2985_v46 = vsub.f32 %v8546_v22, %v2855_v53  ;;  %v2871_v22 = vsel %vm2645_vm3, %v8748_v27, -inf  ;;  %v666_v61 = vld [vmem:[%s7122_s22 + $0x2b8] sm:$0xff] }
 0x4e0   : > { %v3385_v5 = vpop.permute.xlu0 %3384  ;;  %6347 = vmatmul.msk.bf16.gmra.mxu1 %vm824_vm2, %v1325_v40 }
 0x4e1   : > { %v3144_v26 = vmul.f32 1.442695, %v2985_v46  ;;  %6495 = vmatmul.msk.f32.gmra.mxu3 %vm3458_vm4, %v3385_v5  ;;  %v2982_v46 = vsub.f32 %v8487_v43, %v8690_v52  ;;  %v1893_v5 = vld [vmem:[%s7109_s15 + $0x288] sm:$0xff]  ;;  %v2868_v43 = vsel %vm2645_vm3, %v8730_v10, -inf  ;;  %v8791_v52 = vpop.f32.mrf.mxu3 }
 0x4e2   : > { %6433 = vmatmul.msk.f32.gmra.mxu2 %vm1903_vm1, %v1893_v5  ;;  %v1895_v5 = vld [vmem:[%s7109_s15 + $0x298] sm:$0xff] }
 0x4e3   : > { %6683 = vpow2.f32 %v3144_v26  ;;  %v3138_v19 = vmul.f32 1.442695, %v2982_v46  ;;  %v573_v26 = vld [vmem:[%s7115_s18 + $0x2a0] sm:$0xff] }
 0x4e4   : > { %v753_v56 = vadd.f32 %v663_v15, %v573_v26  ;;  %v575_v26 = vld [vmem:[%s7115_s18 + $0x2b0] sm:$0xff] }
 0x4e5   : > { %6685 = vpow2.f32 %v3138_v19  ;;  %v1683_v19 = vpop.f32.mrf.mxu1  ;;  %v665_v15 = vld [vmem:[%s7122_s22 + $0x2b0] sm:$0xff] }
 0x4e6   : > { %2872 = vmax.xlane.f32.xlu0 %v2871_v22  ;;  %v1326_v51 = vpack.c.bf16 %v754_v41, %v753_v56  ;;  %v1894_v22 = vld [vmem:[%s7109_s15 + $0x290] sm:$0xff]  ;;  %v755_v56 = vadd.f32 %v665_v15, %v575_v26  ;;  %v756_v41 = vadd.f32 %v666_v61, %v576_v49  ;;  %v3140_v49 = vmul.f32 1.442695, %v2983_v29 }
 0x4e9   : > { %v8775_v53 = vpop.eup %6683  ;;  %v8828_v24 = vpop.f32.mrf.mxu3 }
 0x4ea   : > { %12984 = vst [vmem:[#allocation71_spill] sm:$0xff] %v8775_v53  ;;  %3416 = vrot.lane.b32.xlu2 %v8775_v53, %s7019_s13  ;;  %6434 = vmatmul.msk.f32.gmra.mxu2 %vm1903_vm1, %v1894_v22  ;;  %v1327_v22 = vpack.c.bf16 %v756_v41, %v755_v56  ;;  %v8839_v41 = vld [vmem:[%s12734_s7] ss:$0 sm:$0xff] }
 0x4eb   : > { %v8795_v46 = vpop.eup %6685  ;;  %12988 = vst [vmem:[#allocation75_spill] sm:$0xff] %v8828_v24 }
 0x4ec   : > { %12985 = vst [vmem:[#allocation72_spill] sm:$0xff] %v8795_v46 }
 0x4f0   : > { %6348 = vmatmul.msk.bf16.gmra.mxu1 %vm824_vm2, %v1326_v51  ;;  %v2981_v51 = vsub.f32 %v8469_v7, %v8714_v34 }
 0x4f2   : > { %6435 = vmatmul.msk.f32.gmra.mxu2 %vm1903_vm1, %v1895_v5  ;;  %v8813_v5 = vld [vmem:[%s12733_s6] ss:$0 sm:$0xff] }
 0x4f3   : > { %v8831_v29 = vadd.f32 %v8813_v5, %v1683_v19  ;;  %v8843_v19 = vpop.f32.mrf.mxu3 }
 0x4f5   : > { %v2874_v61 = vsel %vm2645_vm3, %v8831_v29, -inf }
 0x4f6   : > { %v3387_v40 = vpop.permute.xlu1 %3386 }
 0x4f7   : > { %6496 = vmatmul.msk.f32.gmra.mxu3 %vm3458_vm4, %v3387_v40  ;;  %v3136_v40 = vmul.f32 1.442695, %v2981_v51  ;;  %v1798_v51 = vmul.f32 %v8839_v41, %v8831_v29 }
 0x4f9   : > { %2869 = vmax.xlane.f32.xlu1 %v2868_v43  ;;  %v1685_v43 = vpop.f32.mrf.mxu1  ;;  %6687 = vpow2.f32 %v3136_v40 }
 0x4fa   : > { %3410 = vrot.lane.b32.xlu0 %v8795_v46, %s7019_s13  ;;  %v8816_v26 = vadd.f32 %v8813_v5, %v1685_v43  ;;  %6689 = vpow2.f32 %v3140_v49  ;;  %v3391_v49 = vpop.permute.xlu2 %3390  ;;  %v1897_v46 = vld [vmem:[%s7109_s15 + $0x2a8] sm:$0xff] }
 0x4fc   : > { %v2877_v7 = vsel %vm2645_vm3, %v8816_v26, -inf }
 0x4ff   : > { %v8820_v34 = vpop.eup %6687 }
 0x500   : > { %6349 = vmatmul.msk.bf16.gmra.mxu1 %vm824_vm2, %v1327_v22  ;;  %12986 = vst [vmem:[#allocation73_spill] sm:$0xff] %v8820_v34  ;;  %v8824_v28 = vpop.eup %6689 }
 0x501   : > { %12987 = vst [vmem:[#allocation74_spill] sm:$0xff] %v8824_v28 }
 0x502   : > { %v2864_v53 = vpop.xlane.xlu2 %2863 }
 0x505   : > { %v2423_v40 = vpop.f32.mrf.mxu2 }
 0x506   : > { %v2541_v43 = vadd.f32 %v2423_v40, %v1798_v51  ;;  %v8856_v51 = vpop.f32.mrf.mxu3 }
 0x508   : > { %2631 = vst.msk [vmem:[%s7224_s29 + $0x260] sm:$0xff] %vm824_vm2, %v2541_v43 }
 0x512   : > { %3408 = vrot.lane.b32.xlu1 %v8820_v34, %s7019_s13  ;;  %v2426_v34 = vpop.f32.mrf.mxu2 }
 0x513   : > { %2878 = vmax.xlane.f32.xlu2 %v2877_v7  ;;  %v2861_v7 = vpop.xlane.xlu0 %2860 }
 0x51a   : > { %3412 = vrot.lane.b32.xlu1 %v8824_v28, %s7019_s13 }
 0x521   : > { %v2858_v15 = vpop.xlane.xlu1 %2857 }
 0x522   : > { %v2986_v56 = vsub.f32 %v8609_v4, %v2858_v15  ;;  %v2987_v4 = vsub.f32 %v8624_v9, %v2861_v7  ;;  %v1799_v15 = vmul.f32 %v8839_v41, %v8816_v26  ;;  %v2429_v7 = vpop.f32.mrf.mxu2 }
 0x524   : > { %v3146_v22 = vmul.f32 1.442695, %v2986_v56  ;;  %2875 = vmax.xlane.f32.xlu0 %v2874_v61  ;;  %v3148_v56 = vmul.f32 1.442695, %v2987_v4  ;;  %v2542_v61 = vadd.f32 %v2426_v34, %v1799_v15 }
 0x526   : > { %6691 = vpow2.f32 %v3146_v22  ;;  %2632 = vst.msk [vmem:[%s7224_s29 + $0x268] sm:$0xff] %vm824_vm2, %v2542_v61  ;;  %v2988_v22 = vsub.f32 %v8612_v39, %v2864_v53  ;;  %v8868_v53 = vpop.f32.mrf.mxu3 }
 0x527   : > { %6693 = vpow2.f32 %v3148_v56  ;;  %12991 = vst [vmem:[#allocation78_spill] sm:$0xff] %v8868_v53 }
 0x528   : > { %v3150_v40 = vmul.f32 1.442695, %v2988_v22 }
 0x52a   : > { %6695 = vpow2.f32 %v3150_v40 }
 0x52c   : > { %v8850_v28 = vpop.eup %6691 }
 0x52d   : > { %12989 = vst [vmem:[#allocation76_spill] sm:$0xff] %v8850_v28  ;;  %3418 = vrot.lane.b32.xlu1 %v8850_v28, %s7019_s13  ;;  %v1688_v9 = vpop.f32.mrf.mxu1  ;;  %v8862_v4 = vpop.eup %6693 }
 0x52e   : > { %v8860_v43 = vadd.f32 %v8813_v5, %v1688_v9  ;;  %12990 = vst [vmem:[#allocation77_spill] sm:$0xff] %v8862_v4  ;;  %v3399_v9 = vpop.permute.xlu0 %3398 }
 0x530   : > { %v1800_v34 = vmul.f32 %v8839_v41, %v8860_v43  ;;  %v8876_v22 = vpop.eup %6695 }
 0x531   : > { %12992 = vst [vmem:[#allocation79_spill] sm:$0xff] %v8876_v22 }
 0x532   : > { %v2543_v39 = vadd.f32 %v2429_v7, %v1800_v34  ;;  %v8882_v34 = vpop.f32.mrf.mxu3 }
 0x534   : > { %2633 = vst.msk [vmem:[%s7224_s29 + $0x270] sm:$0xff] %vm824_vm2, %v2543_v39  ;;  %v3393_v39 = vpop.permute.xlu2 %3392 }
 0x535   : > { %v1690_v56 = vpop.f32.mrf.mxu1 }
 0x536   : > { %v8874_v61 = vadd.f32 %v8813_v5, %v1690_v56  ;;  %v3401_v56 = vpop.permute.xlu0 %3400 }
 0x538   : > { %3420 = vrot.lane.b32.xlu0 %v8862_v4, %s7019_s13  ;;  %v1801_v40 = vmul.f32 %v8839_v41, %v8874_v61  ;;  %v2432_v4 = vpop.f32.mrf.mxu2 }
 0x539   : > { %v3389_v15 = vpop.permute.xlu1 %3388 }
 0x53a   : > { %6497 = vmatmul.msk.f32.gmra.mxu3 %vm3458_vm4, %v3389_v15  ;;  %v2544_v7 = vadd.f32 %v2432_v4, %v1801_v40  ;;  %v1896_v15 = vld [vmem:[%s7109_s15 + $0x2a0] sm:$0xff]  ;;  %v8890_v28 = vpop.f32.mrf.mxu3 }
 0x53b   : > { %6436 = vmatmul.msk.f32.gmra.mxu2 %vm1903_vm1, %v1896_v15  ;;  %v2880_v15 = vsel %vm2645_vm3, %v8860_v43, -inf }
 0x53c   : > { %2634 = vst.msk [vmem:[%s7224_s29 + $0x278] sm:$0xff] %vm824_vm2, %v2544_v7  ;;  %v3395_v4 = vpop.permute.xlu2 %3394 }
 0x540   : > { %3422 = vrot.lane.b32.xlu0 %v8876_v22, %s7019_s13 }
 0x542   : > { %6498 = vmatmul.msk.f32.gmra.mxu3 %vm3458_vm4, %v3391_v49  ;;  %v1898_v49 = vld [vmem:[%s7109_s15 + $0x2b0] sm:$0xff]  ;;  %v8899_v18 = vpop.f32.mrf.mxu3 }
 0x543   : > { %6437 = vmatmul.msk.f32.gmra.mxu2 %vm1903_vm1, %v1897_v46  ;;  %12993 = vst [vmem:[#allocation80_spill] sm:$0xff] %v8899_v18  ;;  %v1899_v46 = vld [vmem:[%s7109_s15 + $0x2b8] sm:$0xff] }
 0x544   : > { %v3403_v44 = vpop.permute.xlu2 %3402 }
 0x54a   : > { %6499 = vmatmul.msk.f32.gmra.mxu3 %vm3458_vm4, %v3393_v39  ;;  %v3397_v39 = vpop.permute.xlu1 %3396 }
 0x54b   : > { %6438 = vmatmul.msk.f32.gmra.mxu2 %vm1903_vm1, %v1898_v49  ;;  %v2883_v49 = vsel %vm2645_vm3, %v8874_v61, -inf }
 0x551   : > { %v2867_v40 = vpop.xlane.xlu0 %2866 }
 0x552   : > { %v2989_v22 = vsub.f32 %v8709_v1, %v2867_v40  ;;  %6500 = vmatmul.msk.f32.gmra.mxu3 %vm3458_vm4, %v3395_v4  ;;  %v1693_v1 = vpop.f32.mrf.mxu1 }
 0x553   : > { %6439 = vmatmul.msk.f32.gmra.mxu2 %vm1903_vm1, %v1899_v46  ;;  %v8913_v40 = vadd.f32 %v8813_v5, %v1693_v1 }
 0x554   : > { %v3152_v7 = vmul.f32 1.442695, %v2989_v22  ;;  %v8909_v22 = vpop.f32.mrf.mxu3 }
 0x556   : > { %6697 = vpow2.f32 %v3152_v7 }
 0x557   : > { %2881 = vmax.xlane.f32.xlu1 %v2880_v15 }
 0x55a   : > { %6501 = vmatmul.msk.f32.gmra.mxu3 %vm3458_vm4, %v3397_v39  ;;  %v1695_v4 = vpop.f32.mrf.mxu1 }
 0x55b   : > { %v8921_v39 = vadd.f32 %v8813_v5, %v1695_v4  ;;  %6440 = vmatmul.msk.f32.gmra.mxu2 %vm1903_vm1, %v1900_v55 }
 0x55c   : > { %v8904_v8 = vpop.eup %6697  ;;  %v8917_v7 = vpop.f32.mrf.mxu3 }
 0x55d   : > { %12994 = vst [vmem:[#allocation81_spill] sm:$0xff] %v8904_v8  ;;  %3424 = vrot.lane.b32.xlu2 %v8904_v8, %s7019_s13  ;;  %v2435_v15 = vpop.f32.mrf.mxu2  ;;  %v2889_v45 = vsel %vm2645_vm3, %v8921_v39, -inf }
 0x562   : > { %6502 = vmatmul.msk.f32.gmra.mxu3 %vm3458_vm4, %v3399_v9  ;;  %v1802_v9 = vmul.f32 %v8839_v41, %v8913_v40  ;;  %v1698_v4 = vpop.f32.mrf.mxu1 }
 0x564   : > { %v2545_v8 = vadd.f32 %v2435_v15, %v1802_v9  ;;  %v8933_v31 = vpop.f32.mrf.mxu3 }
 0x565   : > { %12995 = vst [vmem:[#allocation82_spill] sm:$0xff] %v8933_v31 }
 0x566   : > { %2635 = vst.msk [vmem:[%s7224_s29 + $0x280] sm:$0xff] %vm824_vm2, %v2545_v8 }
 0x56a   : > { %2884 = vmax.xlane.f32.xlu0 %v2883_v49  ;;  %6503 = vmatmul.msk.f32.gmra.mxu3 %vm3458_vm4, %v3401_v56  ;;  %v1803_v56 = vmul.f32 %v8839_v41, %v8921_v39  ;;  %v2438_v49 = vpop.f32.mrf.mxu2 }
 0x56c   : > { %v2870_v46 = vpop.xlane.xlu1 %2869  ;;  %v2546_v11 = vadd.f32 %v2438_v49, %v1803_v56 }
 0x56d   : > { %v2990_v1 = vsub.f32 %v8730_v10, %v2870_v46  ;;  %v2873_v10 = vpop.xlane.xlu0 %2872 }
 0x56e   : > { %2636 = vst.msk [vmem:[%s7224_s29 + $0x288] sm:$0xff] %vm824_vm2, %v2546_v11  ;;  %v2991_v8 = vsub.f32 %v8748_v27, %v2873_v10  ;;  %v8951_v27 = vpop.f32.mrf.mxu3 }
 0x56f   : > { %v3154_v60 = vmul.f32 1.442695, %v2990_v1 }
 0x570   : > { %v3156_v46 = vmul.f32 1.442695, %v2991_v8  ;;  %v2886_v8 = vsel %vm2645_vm3, %v8913_v40, -inf }
 0x571   : > { %6699 = vpow2.f32 %v3154_v60  ;;  %v8943_v60 = vadd.f32 %v8813_v5, %v1698_v4 }
 0x572   : > { %2890 = vmax.xlane.f32.xlu0 %v2889_v45  ;;  %6504 = vmatmul.msk.f32.gmra.mxu3 %vm3458_vm4, %v3403_v44  ;;  %v3405_v45 = vpop.permute.xlu2 %3404  ;;  %v1700_v44 = vpop.f32.mrf.mxu1  ;;  %6701 = vpow2.f32 %v3156_v46 }
 0x573   : > { %v2441_v9 = vpop.f32.mrf.mxu2  ;;  %v1804_v11 = vmul.f32 %v8839_v41, %v8943_v60  ;;  %v8949_v1 = vadd.f32 %v8813_v5, %v1700_v44 }
 0x575   : > { %v2547_v56 = vadd.f32 %v2441_v9, %v1804_v11  ;;  %v1805_v4 = vmul.f32 %v8839_v41, %v8949_v1 }
 0x576   : > { %v8964_v9 = vpop.f32.mrf.mxu3 }
 0x577   : > { %v8937_v15 = vpop.eup %6699  ;;  %2637 = vst.msk [vmem:[%s7224_s29 + $0x290] sm:$0xff] %vm824_vm2, %v2547_v56 }
 0x578   : > { %12996 = vst [vmem:[#allocation83_spill] sm:$0xff] %v8937_v15  ;;  %3426 = vrot.lane.b32.xlu1 %v8937_v15, %s7019_s13  ;;  %v8960_v44 = vpop.eup %6701  ;;  %v578_v15 = vld [vmem:[%s7115_s18 + $0x2c8] sm:$0xff] }
 0x579   : > { %12997 = vst [vmem:[#allocation84_spill] sm:$0xff] %v8960_v44 }
 0x57a   : > { %6505 = vmatmul.msk.f32.gmra.mxu3 %vm3458_vm4, %v3405_v45  ;;  %v3407_v49 = vpop.permute.xlu2 %3406  ;;  %v1703_v46 = vpop.f32.mrf.mxu1 }
 0x57b   : > { %v2444_v10 = vpop.f32.mrf.mxu2 }
 0x57c   : > { %v2548_v45 = vadd.f32 %v2444_v10, %v1805_v4  ;;  %v668_v4 = vld [vmem:[%s7122_s22 + $0x2c8] sm:$0xff] }
 0x57d   : > { %v758_v31 = vadd.f32 %v668_v4, %v578_v15 }
 0x57e   : > { %2638 = vst.msk [vmem:[%s7224_s29 + $0x298] sm:$0xff] %vm824_vm2, %v2548_v45  ;;  %v2895_v45 = vsel %vm2645_vm3, %v8949_v1, -inf  ;;  %v8979_v53 = vpop.f32.mrf.mxu3 }
 0x57f   : > { %12998 = vst [vmem:[#allocation85_spill] sm:$0xff] %v8979_v53  ;;  %v6922_v53 = vld [vmem:[%s7115_s18 + $0x28] sm:$0xff] }
 0x582   : > { %6506 = vmatmul.msk.f32.gmra.mxu3 %vm3458_vm4, %v3407_v49  ;;  %v3415_v11 = vpop.permute.xlu2 %3414  ;;  %v577_v49 = vld [vmem:[%s7115_s18 + $0x2c0] sm:$0xff] }
 0x583   : > { %v757_v10 = vadd.f32 %v667_v3, %v577_v49 }
 0x584   : > { %v3409_v56 = vpop.permute.xlu1 %3408 }
 0x585   : > { %v1328_v18 = vpack.c.bf16 %v758_v31, %v757_v10 }
 0x586   : > { %2887 = vmax.xlane.f32.xlu2 %v2886_v8  ;;  %3428 = vrot.lane.b32.xlu0 %v8960_v44, %s7019_s13  ;;  %v3411_v8 = vpop.permute.xlu0 %3410  ;;  %v8976_v44 = vadd.f32 %v8813_v5, %v1703_v46  ;;  %v8990_v4 = vpop.f32.mrf.mxu3 }
 0x587   : > { %6350 = vmatmul.msk.bf16.gmra.mxu1 %vm824_vm2, %v1328_v18 }
 0x588   : > { %v2898_v3 = vsel %vm2645_vm3, %v8976_v44, -inf }
 0x58a   : > { %6507 = vmatmul.msk.f32.gmra.mxu3 %vm3458_vm4, %v3409_v56  ;;  %v3417_v24 = vpop.permute.xlu2 %3416  ;;  %v1705_v56 = vpop.f32.mrf.mxu1 }
 0x58b   : > { %v8987_v15 = vadd.f32 %v8813_v5, %v1705_v56  ;;  %v2892_v56 = vsel %vm2645_vm3, %v8943_v60, -inf }
 0x58c   : > { %v3413_v49 = vpop.permute.xlu1 %3412 }
 0x58e   : > { %2896 = vmax.xlane.f32.xlu2 %v2895_v45  ;;  %v2901_v45 = vsel %vm2645_vm3, %v8987_v15, -inf }
 0x592   : > { %6508 = vmatmul.msk.f32.gmra.mxu3 %vm3458_vm4, %v3411_v8  ;;  %v2879_v46 = vpop.xlane.xlu2 %2878  ;;  %v1708_v55 = vpop.f32.mrf.mxu1 }
 0x593   : > { %v2993_v8 = vsub.f32 %v8816_v26, %v2879_v46  ;;  %v9010_v46 = vpop.f32.mrf.mxu3 }
 0x594   : > { %13000 = vst [vmem:[#allocation87_spill] sm:$0xff] %v9010_v46  ;;  %v6931_v46 = vld [vmem:[%s7115_s18 + $0x70] sm:$0xff] }
 0x596   : > { %2899 = vmax.xlane.f32.xlu2 %v2898_v3  ;;  %v1901_v3 = vld [vmem:[%s7109_s15 + $0x2c8] sm:$0xff]  ;;  %s10617_s15 = scalar_lea.vmem %s12739_s12, %s7103_s30 }
 0x597   : > { %v2876_v31 = vpop.xlane.xlu0 %2875  ;;  %6441 = vmatmul.msk.f32.gmra.mxu2 %vm1903_vm1, %v1901_v3 }
 0x598   : > { %v2992_v18 = vsub.f32 %v8831_v29, %v2876_v31  ;;  %v8999_v29 = vadd.f32 %v8813_v5, %v1708_v55  ;;  %v3160_v31 = vmul.f32 1.442695, %v2993_v8  ;;  %v6917_v8 = vld [vmem:[%s7115_s18] sm:$0xff]  ;;  %v6918_v55 = vld [vmem:[%s7115_s18 + $0x8] sm:$0xff] }
 0x599   : > { %v759_v3 = vpack.c.bf16 %v6918_v55, %v6917_v8 }
 0x59a   : > { %v3158_v10 = vmul.f32 1.442695, %v2992_v18  ;;  %6509 = vmatmul.msk.f32.gmra.mxu3 %vm3458_vm4, %v3413_v49  ;;  %v2904_v26 = vsel %vm2645_vm3, %v8999_v29, -inf }
 0x59c   : > { %6703 = vpow2.f32 %v3158_v10  ;;  %v6535_v10 = vld [vmem:[%s12730_s3 + $0x8] sm:$0xff] }
 0x59d   : > { %6705 = vpow2.f32 %v3160_v31  ;;  %966 = vmatpush.bf16.msra.mxu0 %v6535_v10 }
 0x59e   : > { %2902 = vmax.xlane.f32.xlu2 %v2901_v45  ;;  %v6534_v45 = vld [vmem:[%s12730_s3] sm:$0xff] }
 0x5a1   : > { %967 = vmatpush.bf16.msra.mxu0 %v6534_v45 }
 0x5a2   : > { %v9003_v18 = vpop.eup %6703  ;;  %2893 = vmax.xlane.f32.xlu1 %v2892_v56  ;;  %6510 = vmatmul.msk.f32.gmra.mxu3 %vm3458_vm4, %v3415_v11  ;;  %v9020_v11 = vpop.f32.mrf.mxu3 }
 0x5a3   : > { %12999 = vst [vmem:[#allocation86_spill] sm:$0xff] %v9003_v18  ;;  %3430 = vrot.lane.b32.xlu0 %v9003_v18, %s7019_s13  ;;  %v9012_v49 = vpop.eup %6705  ;;  %v6920_v18 = vld [vmem:[%s7115_s18 + $0x18] sm:$0xff] }
 0x5a4   : > { %13001 = vst [vmem:[#allocation88_spill] sm:$0xff] %v9012_v49  ;;  %6253 = vmatmul.msk.bf16.vlgmr.msra.gmra.mxu0 %vm824_vm2, %v759_v3 }
 0x5a5   : > { %13002 = vst [vmem:[#allocation89_spill] sm:$0xff] %v9020_v11 }
 0x5a6   : > { %2905 = vmax.xlane.f32.xlu2 %v2904_v26 }
 0x5aa   : > { %6511 = vmatmul.msk.f32.gmra.mxu3 %vm3458_vm4, %v3417_v24  ;;  %v3419_v24 = vpop.permute.xlu1 %3418  ;;  %v9029_v56 = vpop.f32.mrf.mxu3 }
 0x5ab   : > { %3432 = vrot.lane.b32.xlu0 %v9012_v49, %s7019_s13  ;;  %v3421_v31 = vpop.permute.xlu0 %3420  ;;  %v6919_v49 = vld [vmem:[%s7115_s18 + $0x10] sm:$0xff] }
 0x5ac   : > { %v760_v11 = vpack.c.bf16 %v6920_v18, %v6919_v49 }
 0x5b2   : > { %6512 = vmatmul.msk.f32.gmra.mxu3 %vm3458_vm4, %v3419_v24  ;;  %v9032_v26 = vpop.f32.mrf.mxu3  ;;  %v1806_v24 = vmul.f32 %v8839_v41, %v8976_v44 }
 0x5b3   : > { %13003 = vst [vmem:[#allocation90_spill] sm:$0xff] %v9032_v26  ;;  %v3423_v10 = vpop.permute.xlu0 %3422 }
 0x5b4   : > { %6254 = vmatmul.msk.bf16.gmra.mxu0 %vm824_vm2, %v760_v11  ;;  %v1807_v11 = vmul.f32 %v8839_v41, %v8987_v15 }
 0x5b7   : > { %v3425_v45 = vpop.permute.xlu2 %3424 }
 0x5ba   : > { %6513 = vmatmul.msk.f32.gmra.mxu3 %vm3458_vm4, %v3421_v31  ;;  %v9038_v55 = vpop.f32.mrf.mxu3 }
 0x5bb   : > { %13004 = vst [vmem:[#allocation91_spill] sm:$0xff] %v9038_v55  ;;  %v6921_v55 = vld [vmem:[%s7115_s18 + $0x20] sm:$0xff] }
 0x5bc   : > { %v761_v26 = vpack.c.bf16 %v6922_v53, %v6921_v55 }
 0x5be   : > { %v2447_v8 = vpop.f32.mrf.mxu2 }
 0x5bf   : > { %v2549_v18 = vadd.f32 %v2447_v8, %v1806_v24 }
 0x5c1   : > { %2639 = vst.msk [vmem:[%s7224_s29 + $0x2a0] sm:$0xff] %vm824_vm2, %v2549_v18 }
 0x5c2   : > { %6514 = vmatmul.msk.f32.gmra.mxu3 %vm3458_vm4, %v3423_v10 }
 0x5c4   : > { %6255 = vmatmul.msk.bf16.gmra.mxu0 %vm824_vm2, %v761_v26  ;;  %v1710_v26 = vpop.f32.mrf.mxu1 }
 0x5c5   : > { %v9063_v24 = vadd.f32 %v8813_v5, %v1710_v26  ;;  %v9077_v26 = vpop.f32.mrf.mxu3 }
 0x5c6   : > { %v2450_v10 = vpop.f32.mrf.mxu2 }
 0x5c7   : > { %v2550_v12 = vadd.f32 %v2450_v10, %v1807_v11  ;;  %v6924_v11 = vld [vmem:[%s7115_s18 + $0x38] sm:$0xff] }
 0x5c9   : > { %2640 = vst.msk [vmem:[%s7224_s29 + $0x2a8] sm:$0xff] %vm824_vm2, %v2550_v12 }
 0x5ca   : > { %v2882_v3 = vpop.xlane.xlu1 %2881  ;;  %6515 = vmatmul.msk.f32.gmra.mxu3 %vm3458_vm4, %v3425_v45  ;;  %v1808_v45 = vmul.f32 %v8839_v41, %v8999_v29 }
 0x5cb   : > { %v2994_v31 = vsub.f32 %v8860_v43, %v2882_v3 }
 0x5cd   : > { %v3162_v49 = vmul.f32 1.442695, %v2994_v31  ;;  %v1809_v31 = vmul.f32 %v8839_v41, %v9063_v24 }
 0x5ce   : > { %v2453_v8 = vpop.f32.mrf.mxu2 }
 0x5cf   : > { %6707 = vpow2.f32 %v3162_v49  ;;  %v2551_v3 = vadd.f32 %v2453_v8, %v1808_v45  ;;  %v6923_v49 = vld [vmem:[%s7115_s18 + $0x30] sm:$0xff] }
 0x5d0   : > { %v762_v10 = vpack.c.bf16 %v6924_v11, %v6923_v49  ;;  %v9087_v11 = vpop.f32.mrf.mxu3 }
 0x5d1   : > { %2641 = vst.msk [vmem:[%s7224_s29 + $0x2b0] sm:$0xff] %vm824_vm2, %v2551_v3 }
 0x5d2   : > { %13008 = vst [vmem:[#allocation95_spill] sm:$0xff] %v9087_v11 }
 0x5d4   : > { %6256 = vmatmul.msk.bf16.gmra.mxu0 %vm824_vm2, %v762_v10 }
 0x5d5   : > { %v9053_v43 = vpop.eup %6707 }
 0x5d6   : > { %13005 = vst [vmem:[#allocation92_spill] sm:$0xff] %v9053_v43  ;;  %3434 = vrot.lane.b32.xlu0 %v9053_v43, %s7019_s13  ;;  %v2456_v18 = vpop.f32.mrf.mxu2 }
 0x5d7   : > { %v2552_v45 = vadd.f32 %v2456_v18, %v1809_v31  ;;  %v6926_v31 = vld [vmem:[%s7115_s18 + $0x48] sm:$0xff] }
 0x5d9   : > { %2642 = vst.msk [vmem:[%s7224_s29 + $0x2b8] sm:$0xff] %vm824_vm2, %v2552_v45 }
 0x5dd   : > { %v2885_v53 = vpop.xlane.xlu0 %2884 }
 0x5de   : > { %v2995_v55 = vsub.f32 %v8874_v61, %v2885_v53 }
 0x5e0   : > { %v3164_v12 = vmul.f32 1.442695, %v2995_v55 }
 0x5e2   : > { %6709 = vpow2.f32 %v3164_v12 }
 0x5e5   : > { %v2891_v8 = vpop.xlane.xlu0 %2890 }
 0x5e6   : > { %v2997_v61 = vsub.f32 %v8921_v39, %v2891_v8  ;;  %v6925_v39 = vld [vmem:[%s7115_s18 + $0x40] sm:$0xff] }
 0x5e7   : > { %v763_v18 = vpack.c.bf16 %v6926_v31, %v6925_v39 }
 0x5e8   : > { %v9073_v3 = vpop.eup %6709  ;;  %v3168_v53 = vmul.f32 1.442695, %v2997_v61  ;;  %v6927_v61 = vld [vmem:[%s7115_s18 + $0x50] sm:$0xff] }
 0x5e9   : > { %13006 = vst [vmem:[#allocation93_spill] sm:$0xff] %v9073_v3  ;;  %3436 = vrot.lane.b32.xlu0 %v9073_v3, %s7019_s13  ;;  %6257 = vmatmul.msk.bf16.gmra.mxu0 %vm824_vm2, %v763_v18  ;;  %v9098_v18 = vpop.f32.mrf.mxu3  ;;  %v6929_v3 = vld [vmem:[%s7115_s18 + $0x60] sm:$0xff] }
 0x5ea   : > { %6711 = vpow2.f32 %v3168_v53  ;;  %v3427_v55 = vpop.permute.xlu1 %3426  ;;  %v6928_v53 = vld [vmem:[%s7115_s18 + $0x58] sm:$0xff]  ;;  %13010 = vst [vmem:[#allocation97_spill] sm:$0xff] %v9098_v18 }
 0x5eb   : > { %6516 = vmatmul.msk.f32.gmra.mxu3 %vm3458_vm4, %v3427_v55  ;;  %v764_v55 = vpack.c.bf16 %v6928_v53, %v6927_v61 }
 0x5f0   : > { %v9080_v12 = vpop.eup %6711 }
 0x5f1   : > { %13007 = vst [vmem:[#allocation94_spill] sm:$0xff] %v9080_v12  ;;  %3440 = vrot.lane.b32.xlu2 %v9080_v12, %s7019_s13  ;;  %v6930_v12 = vld [vmem:[%s7115_s18 + $0x68] sm:$0xff] }
 0x5f8   : > { %v3429_v49 = vpop.permute.xlu0 %3428 }
 0x5f9   : > { %v2888_v10 = vpop.xlane.xlu2 %2887  ;;  %6517 = vmatmul.msk.f32.gmra.mxu3 %vm3458_vm4, %v3429_v49  ;;  %6258 = vmatmul.msk.bf16.gmra.mxu0 %vm824_vm2, %v764_v55  ;;  %v765_v49 = vpack.c.bf16 %v6930_v12, %v6929_v3  ;;  %v2459_v12 = vpop.f32.mrf.mxu2 }
 0x5fa   : > { %v2996_v45 = vsub.f32 %v8913_v40, %v2888_v10  ;;  %v9102_v40 = vpop.f32.mrf.mxu3  ;;  %v2907_v10 = vsel %vm2645_vm3, %v9063_v24, -inf }
 0x5fc   : > { %v3166_v8 = vmul.f32 1.442695, %v2996_v45 }
 0x5fe   : > { %6713 = vpow2.f32 %v3166_v8 }
 0x601   : > { %v2897_v31 = vpop.xlane.xlu2 %2896 }
 0x604   : > { %v9094_v39 = vpop.eup %6713  ;;  %v1713_v45 = vpop.f32.mrf.mxu1 }
 0x605   : > { %13009 = vst [vmem:[#allocation96_spill] sm:$0xff] %v9094_v39  ;;  %3438 = vrot.lane.b32.xlu1 %v9094_v39, %s7019_s13  ;;  %v9108_v61 = vadd.f32 %v8813_v5, %v1713_v45  ;;  %v2999_v39 = vsub.f32 %v8949_v1, %v2897_v31  ;;  %v766_v1 = vpack.c.bf16 %v6932_v35, %v6931_v46 }
 0x607   : > { %v1810_v3 = vmul.f32 %v8839_v41, %v9108_v61 }
 0x609   : > { %v2900_v43 = vpop.xlane.xlu2 %2899  ;;  %6259 = vmatmul.msk.bf16.gmra.mxu0 %vm824_vm2, %v765_v49  ;;  %v2553_v18 = vadd.f32 %v2459_v12, %v1810_v3  ;;  %v9115_v49 = vpop.f32.mrf.mxu3  ;;  %v2910_v12 = vsel %vm2645_vm3, %v9108_v61, -inf }
 0x60b   : > { %2643 = vst.msk [vmem:[%s7224_s29 + $0x2c0] sm:$0xff] %vm824_vm2, %v2553_v18 }
 0x611   : > { %v2903_v45 = vpop.xlane.xlu2 %2902  ;;  %v9132_v3 = vpop.f32.mrf.mxu3 }
 0x613   : > { %2908 = vmax.xlane.f32.xlu0 %v2907_v10 }
 0x615   : > { %v2894_v8 = vpop.xlane.xlu1 %2893  ;;  %v3431_v55 = vpop.permute.xlu0 %3430 }
 0x616   : > { %v2998_v53 = vsub.f32 %v8943_v60, %v2894_v8  ;;  %6518 = vmatmul.msk.f32.gmra.mxu3 %vm3458_vm4, %v3431_v55  ;;  %v3172_v60 = vmul.f32 1.442695, %v2999_v39  ;;  %v1715_v8 = vpop.f32.mrf.mxu1 }
 0x617   : > { %v9120_v55 = vadd.f32 %v8813_v5, %v1715_v8  ;;  %v6933_v8 = vld [vmem:[%s7115_s18 + $0x80] sm:$0xff] }
 0x618   : > { %v3170_v10 = vmul.f32 1.442695, %v2998_v53  ;;  %v3000_v53 = vsub.f32 %v8976_v44, %v2900_v43 }
 0x619   : > { %v1811_v18 = vmul.f32 %v8839_v41, %v9120_v55  ;;  %6260 = vmatmul.msk.bf16.gmra.mxu0 %vm824_vm2, %v766_v1  ;;  %v2906_v35 = vpop.xlane.xlu2 %2905  ;;  %v9142_v46 = vpop.f32.mrf.mxu3  ;;  %v6934_v1 = vld [vmem:[%s7115_s18 + $0x88] sm:$0xff] }
 0x61a   : > { %6715 = vpow2.f32 %v3170_v10  ;;  %v2462_v39 = vpop.f32.mrf.mxu2  ;;  %v3002_v41 = vsub.f32 %v8999_v29, %v2906_v35  ;;  %v9149_v10 = vld [vmem:[%s12731_s4] ss:$0 sm:$0xff]  ;;  %v3001_v35 = vsub.f32 %v8987_v15, %v2903_v45 }
 0x61b   : > { %6717 = vpow2.f32 %v3172_v60  ;;  %v2554_v5 = vadd.f32 %v2462_v39, %v1811_v18 }
 0x61c   : > { %v3178_v43 = vmul.f32 1.442695, %v3002_v41 }
 0x61d   : > { %v3433_v11 = vpop.permute.xlu0 %3432  ;;  %2644 = vst.msk [vmem:[%s7224_s29 + $0x2c8] sm:$0xff] %vm824_vm2, %v2554_v5 }
 0x61e   : > { %6519 = vmatmul.msk.f32.gmra.mxu3 %vm3458_vm4, %v3433_v11  ;;  %v3174_v11 = vmul.f32 1.442695, %v3000_v53  ;;  %v767_v53 = vpack.c.bf16 %v6934_v1, %v6933_v8  ;;  %v6935_v8 = vld [vmem:[%s7115_s18 + $0x90] sm:$0xff]  ;;  %v6936_v1 = vld [vmem:[%s7115_s18 + $0x98] sm:$0xff] }
 0x620   : > { %v9125_v31 = vpop.eup %6715  ;;  %6719 = vpow2.f32 %v3174_v11 }
 0x621   : > { %13011 = vst [vmem:[#allocation98_spill] sm:$0xff] %v9125_v31  ;;  %3442 = vrot.lane.b32.xlu2 %v9125_v31, %s7019_s13  ;;  %v9137_v44 = vpop.eup %6717  ;;  %6721 = vpow2.f32 %v3178_v43  ;;  %v969_v29 = vpop.f32.mrf.mxu0  ;;  %v3176_v43 = vmul.f32 1.442695, %v3001_v35  ;;  %v2913_v35 = vsel %vm2645_vm3, %v9120_v55, -inf }
 0x622   : > { %13012 = vst [vmem:[#allocation99_spill] sm:$0xff] %v9137_v44  ;;  %v970_v18 = vadd.f32 %v9149_v10, %v969_v29  ;;  %v9169_v5 = vpop.f32.mrf.mxu3 }
 0x623   : > { %6723 = vpow2.f32 %v3176_v43 }
 0x624   : > { %1194 = vst.msk [vmem:[%s9159_s28] sm:$0xff] %vm824_vm2, %v970_v18 }
 0x626   : > { %v9151_v60 = vpop.eup %6719 }
 0x627   : > { %3444 = vrot.lane.b32.xlu0 %v9137_v44, %s7019_s13  ;;  %13013 = vst [vmem:[#allocation100_spill] sm:$0xff] %v9151_v60  ;;  %v9167_v39 = vpop.eup %6721 }
 0x628   : > { %13014 = vst [vmem:[#allocation101_spill] sm:$0xff] %v9167_v39 }
 0x629   : > { %6261 = vmatmul.msk.bf16.gmra.mxu0 %vm824_vm2, %v767_v53  ;;  %v971_v11 = vpop.f32.mrf.mxu0  ;;  %v768_v53 = vpack.c.bf16 %v6936_v1, %v6935_v8  ;;  %v9185_v15 = vpop.eup %6723  ;;  %v6937_v8 = vld [vmem:[%s7115_s18 + $0xa0] sm:$0xff]  ;;  %v6938_v1 = vld [vmem:[%s7115_s18 + $0xa8] sm:$0xff] }
 0x62a   : > { %v972_v41 = vadd.f32 %v9149_v10, %v971_v11  ;;  %13015 = vst [vmem:[#allocation102_spill] sm:$0xff] %v9185_v15 }
 0x62c   : > { %1195 = vst.msk [vmem:[%s9159_s28 + $0x8] sm:$0xff] %vm824_vm2, %v972_v41 }
 0x62f   : > { %2911 = vmax.xlane.f32.xlu1 %v2910_v12  ;;  %3446 = vrot.lane.b32.xlu0 %v9151_v60, %s7019_s13  ;;  %v9177_v12 = vpop.f32.mrf.mxu3 }
 0x631   : > { %v974_v29 = vpop.f32.mrf.mxu0 }
 0x632   : > { %v975_v18 = vadd.f32 %v9149_v10, %v974_v29 }
 0x634   : > { %1196 = vst.msk [vmem:[%s9159_s28 + $0x10] sm:$0xff] %vm824_vm2, %v975_v18 }
 0x637   : > { %3450 = vrot.lane.b32.xlu0 %v9167_v39, %s7019_s13  ;;  %v9193_v43 = vpop.f32.mrf.mxu3 }
 0x639   : > { %6262 = vmatmul.msk.bf16.gmra.mxu0 %vm824_vm2, %v768_v53  ;;  %v976_v11 = vpop.f32.mrf.mxu0  ;;  %v769_v53 = vpack.c.bf16 %v6938_v1, %v6937_v8  ;;  %v6939_v8 = vld [vmem:[%s7115_s18 + $0xb0] sm:$0xff]  ;;  %v6940_v1 = vld [vmem:[%s7115_s18 + $0xb8] sm:$0xff] }
 0x63a   : > { %v977_v41 = vadd.f32 %v9149_v10, %v976_v11 }
 0x63c   : > { %1197 = vst.msk [vmem:[%s9159_s28 + $0x18] sm:$0xff] %vm824_vm2, %v977_v41 }
 0x641   : > { %v979_v29 = vpop.f32.mrf.mxu0 }
 0x642   : > { %v980_v18 = vadd.f32 %v9149_v10, %v979_v29 }
 0x644   : > { %1198 = vst.msk [vmem:[%s9159_s28 + $0x20] sm:$0xff] %vm824_vm2, %v980_v18 }
 0x648   : > { %3448 = vrot.lane.b32.xlu1 %v9185_v15, %s7019_s13  ;;  %v3435_v45 = vpop.permute.xlu0 %3434 }
 0x649   : > { %6520 = vmatmul.msk.f32.gmra.mxu3 %vm3458_vm4, %v3435_v45  ;;  %6263 = vmatmul.msk.bf16.gmra.mxu0 %vm824_vm2, %v769_v53  ;;  %v9205_v45 = vpop.f32.mrf.mxu3  ;;  %v981_v11 = vpop.f32.mrf.mxu0 }
 0x64a   : > { %2914 = vmax.xlane.f32.xlu2 %v2913_v35 }
 0x650   : > { %4016 = vrot.lane.b32.xlu1 %v8181_v50, %s7020_s14  ;;  %v982_v50 = vadd.f32 %v9149_v10, %v981_v11 }
 0x651   : > { %v9213_v41 = vpop.f32.mrf.mxu3  ;;  %v984_v29 = vpop.f32.mrf.mxu0 }
 0x652   : > { %1199 = vst.msk [vmem:[%s9159_s28 + $0x28] sm:$0xff] %vm824_vm2, %v982_v50  ;;  %v985_v53 = vadd.f32 %v9149_v10, %v984_v29 }
 0x654   : > { %1200 = vst.msk [vmem:[%s9159_s28 + $0x30] sm:$0xff] %vm824_vm2, %v985_v53 }
 0x658   : > { %4020 = vrot.lane.b32.xlu1 %v8202_v37, %s7020_s14  ;;  %v770_v37 = vpack.c.bf16 %v6940_v1, %v6939_v8  ;;  %v6941_v8 = vld [vmem:[%s7115_s18 + $0xc0] sm:$0xff]  ;;  %v6942_v1 = vld [vmem:[%s7115_s18 + $0xc8] sm:$0xff] }
 0x659   : > { %v9223_v18 = vpop.f32.mrf.mxu3  ;;  %v986_v11 = vpop.f32.mrf.mxu0 }
 0x65a   : > { %6264 = vmatmul.msk.bf16.gmra.mxu0 %vm824_vm2, %v770_v37  ;;  %v771_v37 = vpack.c.bf16 %v6942_v1, %v6941_v8  ;;  %v6944_v8 = vld [vmem:[%s7115_s18 + $0xd8] sm:$0xff] }
 0x65b   : > { %v3437_v35 = vpop.permute.xlu0 %3436 }
 0x65c   : > { %6521 = vmatmul.msk.f32.gmra.mxu3 %vm3458_vm4, %v3437_v35 }
 0x660   : > { %4026 = vrot.lane.b32.xlu1 %v8326_v57, %s7020_s14  ;;  %v987_v57 = vadd.f32 %v9149_v10, %v986_v11 }
 0x661   : > { %v9232_v35 = vpop.f32.mrf.mxu3 }
 0x662   : > { %1201 = vst.msk [vmem:[%s9159_s28 + $0x38] sm:$0xff] %vm824_vm2, %v987_v57  ;;  %v3441_v57 = vpop.permute.xlu2 %3440 }
 0x666   : > { %v989_v50 = vpop.f32.mrf.mxu0 }
 0x667   : > { %v990_v29 = vadd.f32 %v9149_v10, %v989_v50 }
 0x668   : > { %4032 = vrot.lane.b32.xlu1 %v8356_v20, %s7020_s14 }
 0x669   : > { %1202 = vst.msk [vmem:[%s9159_s28 + $0x40] sm:$0xff] %vm824_vm2, %v990_v29  ;;  %v9244_v11 = vpop.f32.mrf.mxu3 }
 0x66a   : > { %6265 = vmatmul.msk.bf16.gmra.mxu0 %vm824_vm2, %v771_v37 }
 0x670   : > { %4038 = vrot.lane.b32.xlu1 %v8441_v62, %s7020_s14  ;;  %v991_v62 = vpop.f32.mrf.mxu0 }
 0x671   : > { %v992_v53 = vadd.f32 %v9149_v10, %v991_v62  ;;  %v9257_v37 = vpop.f32.mrf.mxu3 }
 0x673   : > { %1203 = vst.msk [vmem:[%s9159_s28 + $0x48] sm:$0xff] %vm824_vm2, %v992_v53 }
 0x677   : > { %v3439_v20 = vpop.permute.xlu1 %3438 }
 0x678   : > { %4044 = vrot.lane.b32.xlu1 %v8475_v13, %s7020_s14  ;;  %6522 = vmatmul.msk.f32.gmra.mxu3 %vm3458_vm4, %v3439_v20  ;;  %v994_v50 = vpop.f32.mrf.mxu0  ;;  %v6943_v13 = vld [vmem:[%s7115_s18 + $0xd0] sm:$0xff] }
 0x679   : > { %v995_v29 = vadd.f32 %v9149_v10, %v994_v50  ;;  %v772_v1 = vpack.c.bf16 %v6944_v8, %v6943_v13  ;;  %v6945_v8 = vld [vmem:[%s7115_s18 + $0xe0] sm:$0xff] }
 0x67b   : > { %1204 = vst.msk [vmem:[%s9159_s28 + $0x50] sm:$0xff] %vm824_vm2, %v995_v29  ;;  %6266 = vmatmul.msk.bf16.gmra.mxu0 %vm824_vm2, %v772_v1  ;;  %v3443_v62 = vpop.permute.xlu2 %3442  ;;  %v9266_v29 = vpop.f32.mrf.mxu3  ;;  %v6946_v1 = vld [vmem:[%s7115_s18 + $0xe8] sm:$0xff] }
 0x680   : > { %4050 = vrot.lane.b32.xlu1 %v8537_v59, %s7020_s14  ;;  %6523 = vmatmul.msk.f32.gmra.mxu3 %vm3458_vm4, %v3441_v57  ;;  %v996_v57 = vpop.f32.mrf.mxu0 }
 0x681   : > { %v997_v50 = vadd.f32 %v9149_v10, %v996_v57 }
 0x683   : > { %1205 = vst.msk [vmem:[%s9159_s28 + $0x58] sm:$0xff] %vm824_vm2, %v997_v50 }
 0x686   : > { %v2909_v20 = vpop.xlane.xlu0 %2908 }
 0x687   : > { %v3003_v59 = vsub.f32 %v9063_v24, %v2909_v20  ;;  %v773_v20 = vpack.c.bf16 %v6946_v1, %v6945_v8 }
 0x688   : > { %4056 = vrot.lane.b32.xlu1 %v8593_v36, %s7020_s14  ;;  %6524 = vmatmul.msk.f32.gmra.mxu3 %vm3458_vm4, %v3443_v62  ;;  %v999_v24 = vpop.f32.mrf.mxu0 }
 0x689   : > { %v3180_v53 = vmul.f32 1.442695, %v3003_v59  ;;  %v1000_v36 = vadd.f32 %v9149_v10, %v999_v24  ;;  %v9282_v59 = vpop.f32.mrf.mxu3  ;;  %v6947_v24 = vld [vmem:[%s7115_s18 + $0xf0] sm:$0xff] }
 0x68b   : > { %6725 = vpow2.f32 %v3180_v53  ;;  %1206 = vst.msk [vmem:[%s9159_s28 + $0x60] sm:$0xff] %vm824_vm2, %v1000_v36  ;;  %6267 = vmatmul.msk.bf16.gmra.mxu0 %vm824_vm2, %v773_v20  ;;  %v6948_v36 = vld [vmem:[%s7115_s18 + $0xf8] sm:$0xff] }
 0x68c   : > { %v774_v8 = vpack.c.bf16 %v6948_v36, %v6947_v24 }
 0x690   : > { %4062 = vrot.lane.b32.xlu1 %v8649_v32, %s7020_s14  ;;  %v1001_v62 = vpop.f32.mrf.mxu0 }
 0x691   : > { %v9270_v13 = vpop.eup %6725  ;;  %v1002_v53 = vadd.f32 %v9149_v10, %v1001_v62  ;;  %v9299_v20 = vpop.f32.mrf.mxu3 }
 0x692   : > { %13016 = vst [vmem:[#allocation103_spill] sm:$0xff] %v9270_v13  ;;  %3452 = vrot.lane.b32.xlu2 %v9270_v13, %s7019_s13 }
 0x693   : > { %1207 = vst.msk [vmem:[%s9159_s28 + $0x68] sm:$0xff] %vm824_vm2, %v1002_v53  ;;  %v6950_v53 = vld [vmem:[%s7115_s18 + $0x108] sm:$0xff] }
 0x698   : > { %4068 = vrot.lane.b32.xlu1 %v8695_v30, %s7020_s14  ;;  %v1004_v30 = vpop.f32.mrf.mxu0 }
 0x699   : > { %v3445_v32 = vpop.permute.xlu0 %3444  ;;  %v9313_v62 = vpop.f32.mrf.mxu3 }
 0x69a   : > { %4022 = vrot.lane.b32.xlu2 %v8214_v6, %s7020_s14  ;;  %6525 = vmatmul.msk.f32.gmra.mxu3 %vm3458_vm4, %v3445_v32  ;;  %v1005_v6 = vadd.f32 %v9149_v10, %v1004_v30 }
 0x69b   : > { %6268 = vmatmul.msk.bf16.gmra.mxu0 %vm824_vm2, %v774_v8 }
 0x69c   : > { %1208 = vst.msk [vmem:[%s9159_s28 + $0x70] sm:$0xff] %vm824_vm2, %v1005_v6 }
 0x6a0   : > { %4074 = vrot.lane.b32.xlu1 %v8766_v33, %s7020_s14 }
 0x6a1   : > { %v3447_v57 = vpop.permute.xlu0 %3446 }
 0x6a2   : > { %v2912_v50 = vpop.xlane.xlu1 %2911  ;;  %4028 = vrot.lane.b32.xlu2 %v8334_v63, %s7020_s14  ;;  %6526 = vmatmul.msk.f32.gmra.mxu3 %vm3458_vm4, %v3447_v57  ;;  %v1006_v63 = vpop.f32.mrf.mxu0 }
 0x6a3   : > { %v3004_v1 = vsub.f32 %v9108_v61, %v2912_v50  ;;  %v1007_v61 = vadd.f32 %v9149_v10, %v1006_v63  ;;  %v9325_v50 = vpop.f32.mrf.mxu3  ;;  %v6952_v63 = vld [vmem:[%s7115_s18 + $0x118] sm:$0xff] }
 0x6a5   : > { %v3182_v33 = vmul.f32 1.442695, %v3004_v1  ;;  %1209 = vst.msk [vmem:[%s9159_s28 + $0x78] sm:$0xff] %vm824_vm2, %v1007_v61 }
 0x6a7   : > { %6727 = vpow2.f32 %v3182_v33 }
 0x6a8   : > { %4080 = vrot.lane.b32.xlu1 %v8843_v19, %s7020_s14 }
 0x6a9   : > { %v3451_v33 = vpop.permute.xlu0 %3450 }
 0x6aa   : > { %4034 = vrot.lane.b32.xlu2 %v8382_v17, %s7020_s14  ;;  %v1009_v19 = vpop.f32.mrf.mxu0  ;;  %v6949_v17 = vld [vmem:[%s7115_s18 + $0x100] sm:$0xff] }
 0x6ab   : > { %v775_v57 = vpack.c.bf16 %v6950_v53, %v6949_v17  ;;  %v1010_v30 = vadd.f32 %v9149_v10, %v1009_v19  ;;  %v9340_v1 = vpop.f32.mrf.mxu3  ;;  %v6953_v53 = vld [vmem:[%s7115_s18 + $0x120] sm:$0xff] }
 0x6ad   : > { %v9311_v32 = vpop.eup %6727  ;;  %6269 = vmatmul.msk.bf16.gmra.mxu0 %vm824_vm2, %v775_v57  ;;  %1210 = vst.msk [vmem:[%s9159_s28 + $0x80] sm:$0xff] %vm824_vm2, %v1010_v30  ;;  %v6954_v57 = vld [vmem:[%s7115_s18 + $0x128] sm:$0xff] }
 0x6ae   : > { %13017 = vst [vmem:[#allocation104_spill] sm:$0xff] %v9311_v32  ;;  %3454 = vrot.lane.b32.xlu0 %v9311_v32, %s7019_s13 }
 0x6b0   : > { %4086 = vrot.lane.b32.xlu1 %v8882_v34, %s7020_s14 }
 0x6b2   : > { %4040 = vrot.lane.b32.xlu2 %v8449_v21, %s7020_s14  ;;  %v1011_v34 = vpop.f32.mrf.mxu0 }
 0x6b3   : > { %v1012_v21 = vadd.f32 %v9149_v10, %v1011_v34  ;;  %v9360_v17 = vpop.f32.mrf.mxu3 }
 0x6b5   : > { %1211 = vst.msk [vmem:[%s9159_s28 + $0x88] sm:$0xff] %vm824_vm2, %v1012_v21 }
 0x6b8   : > { %4092 = vrot.lane.b32.xlu1 %v8909_v22, %s7020_s14 }
 0x6ba   : > { %v3449_v6 = vpop.permute.xlu1 %3448  ;;  %4046 = vrot.lane.b32.xlu2 %v8491_v14, %s7020_s14  ;;  %v1014_v8 = vpop.f32.mrf.mxu0  ;;  %v6951_v14 = vld [vmem:[%s7115_s18 + $0x110] sm:$0xff] }
 0x6bb   : > { %6527 = vmatmul.msk.f32.gmra.mxu3 %vm3458_vm4, %v3449_v6  ;;  %v776_v61 = vpack.c.bf16 %v6952_v63, %v6951_v14  ;;  %v9373_v30 = vpop.f32.mrf.mxu3 }
 0x6bd   : > { %v2915_v24 = vpop.xlane.xlu2 %2914  ;;  %6270 = vmatmul.msk.bf16.gmra.mxu0 %vm824_vm2, %v776_v61  ;;  %v6960_v61 = vld [vmem:[%s7115_s18 + $0x158] sm:$0xff] }
 0x6be   : > { %v3005_v36 = vsub.f32 %v9120_v55, %v2915_v24 }
 0x6c0   : > { %v3184_v22 = vmul.f32 1.442695, %v3005_v36  ;;  %4098 = vrot.lane.b32.xlu1 %v8951_v27, %s7020_s14  ;;  %v1015_v27 = vadd.f32 %v9149_v10, %v1014_v8  ;;  %v6958_v36 = vld [vmem:[%s7115_s18 + $0x148] sm:$0xff] }
 0x6c2   : > { %6729 = vpow2.f32 %v3184_v22  ;;  %4052 = vrot.lane.b32.xlu2 %v8569_v23, %s7020_s14  ;;  %1212 = vst.msk [vmem:[%s9159_s28 + $0x90] sm:$0xff] %vm824_vm2, %v1015_v27  ;;  %v1016_v23 = vpop.f32.mrf.mxu0  ;;  %v9436_v14 = vpop.permute.xlu1 %4016 }
 0x6c3   : > { %6528 = vmatmul.msk.f32.gmra.mxu3 %vm3458_vm4, %v3451_v33  ;;  %v1017_v19 = vadd.f32 %v9149_v10, %v1016_v23  ;;  %6731 = vrcp.f32 %v9436_v14  ;;  %vm4291_vm6 = vweird.f32 %v9436_v14 }
 0x6c5   : > { %1213 = vst.msk [vmem:[%s9159_s28 + $0x98] sm:$0xff] %vm824_vm2, %v1017_v19 }
 0x6c8   : > { %v9349_v55 = vpop.eup %6729  ;;  %4104 = vrot.lane.b32.xlu1 %v8990_v4, %s7020_s14 }
 0x6c9   : > { %13018 = vst [vmem:[#allocation105_spill] sm:$0xff] %v9349_v55  ;;  %3456 = vrot.lane.b32.xlu0 %v9349_v55, %s7019_s13 }
 0x6ca   : > { %4058 = vrot.lane.b32.xlu2 %v8603_v58, %s7020_s14  ;;  %v1019_v4 = vpop.f32.mrf.mxu0  ;;  %v777_v58 = vpack.c.bf16 %v6954_v57, %v6953_v53  ;;  %v9455_v19 = vpop.permute.xlu1 %4020  ;;  %v13020_v53 = vld [vmem:[#allocation87_spill] sm:$0xff] }
 0x6cb   : > { %v1020_v34 = vadd.f32 %v9149_v10, %v1019_v4  ;;  %6733 = vrcp.f32 %v9455_v19  ;;  %v4325_v15 = vand.u32 2147483647, %v9455_v19  ;;  %vm4321_vm9 = vweird.f32 %v9455_v19 }
 0x6cd   : > { %6271 = vmatmul.msk.bf16.gmra.mxu0 %vm824_vm2, %v777_v58  ;;  %1214 = vst.msk [vmem:[%s9159_s28 + $0xa0] sm:$0xff] %vm824_vm2, %v1020_v34  ;;  %vm4326_vm12 = vcmp.eq.f32.partialorder %v4325_v15, 8.507059e+37  ;;  %v6974_v15 = vld [vmem:[%s7115_s18 + $0x1c8] sm:$0xff] }
 0x6d0   : > { %4110 = vrot.lane.b32.xlu1 %v9029_v56, %s7020_s14  ;;  %v9387_v56 = vpop.f32.mrf.mxu3 }
 0x6d1   : > { %4018 = vrot.lane.b32.xlu0 %v8193_v0, %s7020_s14 }
 0x6d2   : > { %4064 = vrot.lane.b32.xlu2 %v8660_v48, %s7020_s14  ;;  %v1021_v0 = vpop.f32.mrf.mxu0  ;;  %v9473_v34 = vpop.permute.xlu1 %4026 }
 0x6d3   : > { %v1022_v48 = vadd.f32 %v9149_v10, %v1021_v0  ;;  %v13021_v0 = vld [vmem:[#allocation64_spill] sm:$0xff] }
 0x6d5   : > { %1215 = vst.msk [vmem:[%s9159_s28 + $0xa8] sm:$0xff] %vm824_vm2, %v1022_v48 }
 0x6d8   : > { %4116 = vrot.lane.b32.xlu1 %v9077_v26, %s7020_s14  ;;  %v9398_v21 = vpop.f32.mrf.mxu3 }
 0x6d9   : > { %4024 = vrot.lane.b32.xlu0 %v8308_v38, %s7020_s14  ;;  %v6955_v38 = vld [vmem:[%s7115_s18 + $0x130] sm:$0xff] }
 0x6da   : > { %4070 = vrot.lane.b32.xlu2 %v8705_v47, %s7020_s14  ;;  %v1024_v26 = vpop.f32.mrf.mxu0  ;;  %v6956_v47 = vld [vmem:[%s7115_s18 + $0x138] sm:$0xff] }
 0x6db   : > { %v778_v6 = vpack.c.bf16 %v6956_v47, %v6955_v38  ;;  %v6961_v38 = vld [vmem:[%s7115_s18 + $0x160] sm:$0xff]  ;;  %v6962_v47 = vld [vmem:[%s7115_s18 + $0x168] sm:$0xff] }
 0x6dd   : > { %6272 = vmatmul.msk.bf16.gmra.mxu0 %vm824_vm2, %v778_v6  ;;  %v781_v6 = vpack.c.bf16 %v6962_v47, %v6961_v38  ;;  %v6966_v38 = vld [vmem:[%s7115_s18 + $0x188] sm:$0xff] }
 0x6e0   : > { %4122 = vrot.lane.b32.xlu1 %v9102_v40, %s7020_s14  ;;  %v1025_v40 = vadd.f32 %v9149_v10, %v1024_v26  ;;  %v13022_v26 = vld [vmem:[#allocation90_spill] sm:$0xff] }
 0x6e1   : > { %4030 = vrot.lane.b32.xlu0 %v8342_v2, %s7020_s14 }
 0x6e2   : > { %4076 = vrot.lane.b32.xlu2 %v8791_v52, %s7020_s14  ;;  %v1026_v2 = vpop.f32.mrf.mxu0  ;;  %1216 = vst.msk [vmem:[%s9159_s28 + $0xb0] sm:$0xff] %vm824_vm2, %v1025_v40 }
 0x6e3   : > { %v1027_v52 = vadd.f32 %v9149_v10, %v1026_v2  ;;  %v9489_v2 = vpop.permute.xlu1 %4032 }
 0x6e5   : > { %1217 = vst.msk [vmem:[%s9159_s28 + $0xb8] sm:$0xff] %vm824_vm2, %v1027_v52  ;;  %v13024_v52 = vld [vmem:[#allocation68_spill] sm:$0xff] }
 0x6e8   : > { %4128 = vrot.lane.b32.xlu1 %v9142_v46, %s7020_s14  ;;  %v9413_v46 = vpop.f32.mrf.mxu3 }
 0x6e9   : > { %4036 = vrot.lane.b32.xlu0 %v8390_v54, %s7020_s14 }
 0x6ea   : > { %4082 = vrot.lane.b32.xlu2 %v8856_v51, %s7020_s14  ;;  %v1029_v54 = vpop.f32.mrf.mxu0  ;;  %v6957_v51 = vld [vmem:[%s7115_s18 + $0x140] sm:$0xff] }
 0x6eb   : > { %v779_v22 = vpack.c.bf16 %v6958_v36, %v6957_v51  ;;  %v13025_v51 = vld [vmem:[#allocation95_spill] sm:$0xff] }
 0x6ec   : > { %v3453_v24 = vpop.permute.xlu2 %3452 }
 0x6ed   : > { %6529 = vmatmul.msk.f32.gmra.mxu3 %vm3458_vm4, %v3453_v24  ;;  %6273 = vmatmul.msk.bf16.gmra.mxu0 %vm824_vm2, %v779_v22 }
 0x6f0   : > { %4134 = vrot.lane.b32.xlu1 %v9193_v43, %s7020_s14  ;;  %v3887_v33 = vpop.f32.mrf.mxu3 }
 0x6f1   : > { %4042 = vrot.lane.b32.xlu0 %v8463_v25, %s7020_s14  ;;  %v1030_v25 = vadd.f32 %v9149_v10, %v1029_v54 }
 0x6f2   : > { %4088 = vrot.lane.b32.xlu2 %v8890_v28, %s7020_s14  ;;  %v1031_v28 = vpop.f32.mrf.mxu0 }
 0x6f3   : > { %1218 = vst.msk [vmem:[%s9159_s28 + $0xc0] sm:$0xff] %vm824_vm2, %v1030_v25  ;;  %v1032_v43 = vadd.f32 %v9149_v10, %v1031_v28  ;;  %v13026_v25 = vld [vmem:[#allocation75_spill] sm:$0xff] }
 0x6f4   : > { %v9423_v8 = vpop.permute.xlu2 %4022 }
 0x6f5   : > { %1219 = vst.msk [vmem:[%s9159_s28 + $0xc8] sm:$0xff] %vm824_vm2, %v1032_v43  ;;  %v6963_v43 = vld [vmem:[%s7115_s18 + $0x170] sm:$0xff]  ;;  %6735 = vrcp.f32 %v9423_v8  ;;  %vm4336_vm14 = vweird.f32 %v9423_v8 }
 0x6f6   : > { %6737 = vrcp.f32 %v9473_v34 }
 0x6f7   : > { %6739 = vrcp.f32 %v9489_v2 }
 0x6f8   : > { %4140 = vrot.lane.b32.xlu1 %v9223_v18, %s7020_s14  ;;  %v9442_v18 = vpop.f32.mrf.mxu3 }
 0x6f9   : > { %4048 = vrot.lane.b32.xlu0 %v8513_v16, %s7020_s14 }
 0x6fa   : > { %4094 = vrot.lane.b32.xlu2 %v8917_v7, %s7020_s14  ;;  %v1034_v16 = vpop.f32.mrf.mxu0  ;;  %v6959_v7 = vld [vmem:[%s7115_s18 + $0x150] sm:$0xff] }
 0x6fb   : > { %v780_v27 = vpack.c.bf16 %v6960_v61, %v6959_v7  ;;  %v9512_v61 = vpop.permute.xlu1 %4038 }
 0x6fc   : > { %v9438_v63 = vpop.permute.xlu2 %4028  ;;  %13027 = vst [vmem:[#allocation87_spill] sm:$0xff] %v9512_v61 }
 0x6fd   : > { %6274 = vmatmul.msk.bf16.gmra.mxu0 %vm824_vm2, %v780_v27  ;;  %6741 = vrcp.f32 %v9438_v63  ;;  %vm4381_vm3 = vweird.f32 %v9438_v63 }
 0x6fe   : > { %6743 = vrcp.f32 %v9512_v61 }
 0x700   : > { %4146 = vrot.lane.b32.xlu1 %v9257_v37, %s7020_s14  ;;  %v9457_v4 = vpop.f32.mrf.mxu3 }
 0x701   : > { %4054 = vrot.lane.b32.xlu0 %v8580_v42, %s7020_s14  ;;  %v1035_v42 = vadd.f32 %v9149_v10, %v1034_v16  ;;  %v6964_v16 = vld [vmem:[%s7115_s18 + $0x178] sm:$0xff] }
 0x702   : > { %4100 = vrot.lane.b32.xlu2 %v8964_v9, %s7020_s14  ;;  %v13019_v9 = vld [vmem:[#allocation57_spill] sm:$0xff]  ;;  %v1036_v37 = vpop.f32.mrf.mxu0  ;;  %v782_v7 = vpack.c.bf16 %v6964_v16, %v6963_v43 }
 0x703   : > { %1220 = vst.msk [vmem:[%s9159_s28 + $0xd0] sm:$0xff] %vm824_vm2, %v1035_v42  ;;  %v1037_v57 = vadd.f32 %v9149_v10, %v1036_v37 }
 0x704   : > { %v9452_v23 = vpop.permute.xlu2 %4034  ;;  %13023 = vst [vmem:[#allocation57_spill] sm:$0xff] %v9489_v2 }
 0x705   : > { %1221 = vst.msk [vmem:[%s9159_s28 + $0xd8] sm:$0xff] %vm824_vm2, %v1037_v57 }
 0x708   : > { %4152 = vrot.lane.b32.xlu1 %v9299_v20, %s7020_s14  ;;  %v3896_v20 = vpop.f32.mrf.mxu3 }
 0x709   : > { %4060 = vrot.lane.b32.xlu0 %v13019_v9, %s7020_s14  ;;  %v13028_v9 = vld [vmem:[#allocation78_spill] sm:$0xff] }
 0x70a   : > { %4106 = vrot.lane.b32.xlu2 %v13020_v53, %s7020_s14  ;;  %v1039_v48 = vpop.f32.mrf.mxu0 }
 0x70c   : > { %v9469_v58 = vpop.permute.xlu2 %4040 }
 0x70d   : > { %6275 = vmatmul.msk.bf16.gmra.mxu0 %vm824_vm2, %v781_v6 }
 0x710   : > { %4158 = vrot.lane.b32.xlu1 %v9340_v1, %s7020_s14  ;;  %v1040_v1 = vadd.f32 %v9149_v10, %v1039_v48  ;;  %v9493_v54 = vpop.f32.mrf.mxu3 }
 0x711   : > { %4066 = vrot.lane.b32.xlu0 %v13021_v0, %s7020_s14  ;;  %v9530_v0 = vpop.permute.xlu1 %4044 }
 0x712   : > { %4112 = vrot.lane.b32.xlu2 %v13022_v26, %s7020_s14  ;;  %v1041_v24 = vpop.f32.mrf.mxu0  ;;  %1222 = vst.msk [vmem:[%s9159_s28 + $0xe0] sm:$0xff] %vm824_vm2, %v1040_v1  ;;  %v6965_v26 = vld [vmem:[%s7115_s18 + $0x180] sm:$0xff]  ;;  %6745 = vrcp.f32 %v9530_v0 }
 0x713   : > { %v1042_v36 = vadd.f32 %v9149_v10, %v1041_v24  ;;  %13029 = vst [vmem:[#allocation64_spill] sm:$0xff] %v9530_v0  ;;  %v783_v47 = vpack.c.bf16 %v6966_v38, %v6965_v26  ;;  %v13037_v38 = vld [vmem:[#allocation91_spill] sm:$0xff]  ;;  %6747 = vrcp.f32 %v9452_v23 }
 0x714   : > { %v9483_v40 = vpop.permute.xlu2 %4046 }
 0x715   : > { %1223 = vst.msk [vmem:[%s9159_s28 + $0xe8] sm:$0xff] %vm824_vm2, %v1042_v36 }
 0x718   : > { %4164 = vrot.lane.b32.xlu1 %v9387_v56, %s7020_s14  ;;  %v9514_v27 = vpop.f32.mrf.mxu3 }
 0x719   : > { %4072 = vrot.lane.b32.xlu0 %v13024_v52, %s7020_s14  ;;  %v9546_v1 = vpop.permute.xlu1 %4050  ;;  %v13032_v52 = vld [vmem:[#allocation82_spill] sm:$0xff] }
 0x71a   : > { %4118 = vrot.lane.b32.xlu2 %v13025_v51, %s7020_s14  ;;  %v1044_v28 = vpop.f32.mrf.mxu0  ;;  %13031 = vst [vmem:[#allocation90_spill] sm:$0xff] %v9546_v1  ;;  %6749 = vrcp.f32 %v9546_v1 }
 0x71b   : > { %v1045_v42 = vadd.f32 %v9149_v10, %v1044_v28 }
 0x71c   : > { %v9500_v56 = vpop.permute.xlu2 %4052 }
 0x71d   : > { %6276 = vmatmul.msk.bf16.gmra.mxu0 %vm824_vm2, %v782_v7  ;;  %1224 = vst.msk [vmem:[%s9159_s28 + $0xf0] sm:$0xff] %vm824_vm2, %v1045_v42 }
 0x720   : > { %4170 = vrot.lane.b32.xlu1 %v3887_v33, %s7020_s14  ;;  %v3455_v22 = vpop.permute.xlu0 %3454  ;;  %v3905_v37 = vpop.f32.mrf.mxu3 }
 0x721   : > { %4078 = vrot.lane.b32.xlu0 %v13026_v25, %s7020_s14  ;;  %6530 = vmatmul.msk.f32.gmra.mxu3 %vm3458_vm4, %v3455_v22  ;;  %v9563_v28 = vpop.permute.xlu1 %4056 }
 0x722   : > { %4124 = vrot.lane.b32.xlu2 %v9115_v49, %s7020_s14  ;;  %v1046_v49 = vpop.f32.mrf.mxu0  ;;  %13033 = vst [vmem:[#allocation68_spill] sm:$0xff] %v9563_v28  ;;  %6751 = vrcp.f32 %v9563_v28 }
 0x723   : > { %v1047_v57 = vadd.f32 %v9149_v10, %v1046_v49  ;;  %v6968_v49 = vld [vmem:[%s7115_s18 + $0x198] sm:$0xff]  ;;  %6753 = vrcp.f32 %v9469_v58 }
 0x724   : > { %v9516_v33 = vpop.permute.xlu2 %4058 }
 0x725   : > { %1225 = vst.msk [vmem:[%s9159_s28 + $0xf8] sm:$0xff] %vm824_vm2, %v1047_v57  ;;  %v13035_v57 = vld [vmem:[#allocation89_spill] sm:$0xff] }
 0x728   : > { %4176 = vrot.lane.b32.xlu1 %v3896_v20, %s7020_s14  ;;  %v13030_v20 = vld [vmem:[#allocation80_spill] sm:$0xff]  ;;  %v9543_v6 = vpop.f32.mrf.mxu3 }
 0x729   : > { %4084 = vrot.lane.b32.xlu0 %v13028_v9, %s7020_s14  ;;  %v6967_v9 = vld [vmem:[%s7115_s18 + $0x190] sm:$0xff] }
 0x72a   : > { %4130 = vrot.lane.b32.xlu2 %v9169_v5, %s7020_s14  ;;  %v1049_v5 = vpop.f32.mrf.mxu0 }
 0x72b   : > { %v1050_v51 = vadd.f32 %v9149_v10, %v1049_v5 }
 0x72c   : > { %v9527_v53 = vpop.permute.xlu2 %4064 }
 0x72d   : > { %6277 = vmatmul.msk.bf16.gmra.mxu0 %vm824_vm2, %v783_v47  ;;  %1226 = vst.msk [vmem:[%s9159_s28 + $0x100] sm:$0xff] %vm824_vm2, %v1050_v51 }
 0x730   : > { %4182 = vrot.lane.b32.xlu1 %v3905_v37, %s7020_s14  ;;  %v784_v37 = vpack.c.bf16 %v6968_v49, %v6967_v9 }
 0x731   : > { %4090 = vrot.lane.b32.xlu0 %v13030_v20, %s7020_s14 }
 0x732   : > { %4136 = vrot.lane.b32.xlu2 %v9205_v45, %s7020_s14  ;;  %v1051_v36 = vpop.f32.mrf.mxu0 }
 0x733   : > { %v1052_v25 = vadd.f32 %v9149_v10, %v1051_v36 }
 0x734   : > { %v9539_v48 = vpop.permute.xlu2 %4070 }
 0x735   : > { %1227 = vst.msk [vmem:[%s9159_s28 + $0x108] sm:$0xff] %vm824_vm2, %v1052_v25  ;;  %v13039_v25 = vld [vmem:[#allocation97_spill] sm:$0xff] }
 0x739   : > { %4096 = vrot.lane.b32.xlu0 %v13032_v52, %s7020_s14 }
 0x73a   : > { %4142 = vrot.lane.b32.xlu2 %v9232_v35, %s7020_s14  ;;  %v13034_v35 = vld [vmem:[#allocation85_spill] sm:$0xff]  ;;  %v1054_v7 = vpop.f32.mrf.mxu0 }
 0x73b   : > { %v3457_v45 = vpop.permute.xlu0 %3456  ;;  %v1055_v47 = vadd.f32 %v9149_v10, %v1054_v7  ;;  %v6970_v7 = vld [vmem:[%s7115_s18 + $0x1a8] sm:$0xff] }
 0x73c   : > { %v9552_v24 = vpop.permute.xlu2 %4076  ;;  %6531 = vmatmul.msk.f32.gmra.mxu3 %vm3458_vm4, %v3457_v45 }
 0x73d   : > { %6278 = vmatmul.msk.bf16.gmra.mxu0 %vm824_vm2, %v784_v37  ;;  %1228 = vst.msk [vmem:[%s9159_s28 + $0x110] sm:$0xff] %vm824_vm2, %v1055_v47 }
 0x73e   : > { %v9556_v22 = vpop.f32.mrf.mxu3 }
 0x741   : > { %4102 = vrot.lane.b32.xlu0 %v13034_v35, %s7020_s14  ;;  %v6969_v35 = vld [vmem:[%s7115_s18 + $0x1a0] sm:$0xff] }
 0x742   : > { %4148 = vrot.lane.b32.xlu2 %v9266_v29, %s7020_s14  ;;  %v9581_v29 = vpop.permute.xlu1 %4062  ;;  %v1056_v26 = vpop.f32.mrf.mxu0 }
 0x743   : > { %v9569_v43 = vpop.permute.xlu0 %4018  ;;  %13036 = vst [vmem:[#allocation95_spill] sm:$0xff] %v9581_v29  ;;  %v1057_v52 = vadd.f32 %v9149_v10, %v1056_v26  ;;  %v9622_v26 = vpop.eup %6731  ;;  %6755 = vrcp.f32 %v9581_v29 }
 0x744   : > { %v9571_v16 = vpop.permute.xlu2 %4082  ;;  %v9630_v47 = vpop.eup %6733  ;;  %vm4292_vm5 = vweird.f32 %v9622_v26  ;;  %6757 = vrcp.f32 %v9483_v40 }
 0x745   : > { %1229 = vst.msk [vmem:[%s9159_s28 + $0x118] sm:$0xff] %vm824_vm2, %v1057_v52  ;;  %v9656_v39 = vpop.eup %6735  ;;  %vm4322_vm7 = vweird.f32 %v9630_v47  ;;  %vm9688_vm8 = vmor %vm4291_vm6, %vm4292_vm5 }
 0x746   : > { %v3914_v42 = vpop.f32.mrf.mxu3  ;;  %vm9711_vm10 = vmor %vm4321_vm9, %vm4322_vm7  ;;  %vm4337_vm13 = vweird.f32 %v9656_v39 }
 0x747   : > { %4188 = vrot.lane.b32.xlu1 %v3914_v42, %s7020_s14  ;;  %v785_v42 = vpack.c.bf16 %v6970_v7, %v6969_v35  ;;  %v6971_v7 = vld [vmem:[%s7115_s18 + $0x1b0] sm:$0xff]  ;;  %vm9779_vm15 = vmor %vm4336_vm14, %vm4337_vm13  ;;  %vm4516_vm14 = vweird.f32 %v9483_v40 }
 0x749   : > { %4108 = vrot.lane.b32.xlu0 %v13035_v57, %s7020_s14 }
 0x74a   : > { %4154 = vrot.lane.b32.xlu2 %v9313_v62, %s7020_s14  ;;  %v1059_v51 = vpop.f32.mrf.mxu0  ;;  %v9601_v36 = vpop.permute.xlu1 %4068 }
 0x74b   : > { %v9583_v20 = vpop.permute.xlu0 %4024  ;;  %13038 = vst [vmem:[#allocation75_spill] sm:$0xff] %v9601_v36  ;;  %v1060_v57 = vadd.f32 %v9149_v10, %v1059_v51  ;;  %v4287_v51 = vmul.f32 %v9622_v26, %v9436_v14  ;;  %6759 = vrcp.f32 %v9601_v36 }
 0x74c   : > { %v9585_v5 = vpop.permute.xlu2 %4088  ;;  %6761 = vrcp.f32 %v9500_v56 }
 0x74d   : > { %6279 = vmatmul.msk.bf16.gmra.mxu0 %vm824_vm2, %v785_v42  ;;  %1230 = vst.msk [vmem:[%s9159_s28 + $0x120] sm:$0xff] %vm824_vm2, %v1060_v57  ;;  %v4288_v35 = vsub.f32 1.0, %v4287_v51  ;;  %v6972_v42 = vld [vmem:[%s7115_s18 + $0x1b8] sm:$0xff] }
 0x74f   : > { %v4289_v32 = vmul.f32 %v9622_v26, %v4288_v35 }
 0x751   : > { %4114 = vrot.lane.b32.xlu0 %v13037_v38, %s7020_s14 }
 0x752   : > { %4160 = vrot.lane.b32.xlu2 %v9360_v17, %s7020_s14  ;;  %v1061_v49 = vpop.f32.mrf.mxu0  ;;  %v9616_v37 = vpop.permute.xlu1 %4074 }
 0x753   : > { %v9593_v62 = vpop.permute.xlu0 %4030  ;;  %13040 = vst [vmem:[#allocation78_spill] sm:$0xff] %v9616_v37  ;;  %6763 = vrcp.f32 %v9616_v37 }
 0x754   : > { %v9597_v45 = vpop.permute.xlu2 %4094  ;;  %6765 = vrcp.f32 %v9516_v33 }
 0x759   : > { %4120 = vrot.lane.b32.xlu0 %v13039_v25, %s7020_s14  ;;  %v4317_v25 = vmul.f32 %v9630_v47, %v9455_v19 }
 0x75a   : > { %4166 = vrot.lane.b32.xlu2 %v9398_v21, %s7020_s14  ;;  %v1062_v21 = vadd.f32 %v9149_v10, %v1061_v49  ;;  %v786_v49 = vpack.c.bf16 %v6972_v42, %v6971_v7  ;;  %v9667_v7 = vpop.eup %6737  ;;  %v4297_v42 = vand.u32 2147483648, %v9436_v14 }
 0x75b   : > { %v9609_v17 = vpop.permute.xlu0 %4036  ;;  %v4318_v57 = vsub.f32 1.0, %v4317_v25  ;;  %v4290_v25 = vadd.f32 %v9622_v26, %v4289_v32  ;;  %v4327_v32 = vand.u32 2147483648, %v9455_v19  ;;  %v9698_v31 = vpop.eup %6739 }
 0x75c   : > { %v9613_v9 = vpop.permute.xlu2 %4100  ;;  %1231 = vst.msk [vmem:[%s9159_s28 + $0x128] sm:$0xff] %vm824_vm2, %v1062_v21  ;;  %v9707_v13 = vpop.eup %6741  ;;  %v4298_v60 = vor.u32 1.1754944e-38, %v4297_v42  ;;  %v4407_v42 = vmul.f32 %v9698_v31, %v9489_v2 }
 0x75d   : > { %6280 = vmatmul.msk.bf16.gmra.mxu0 %vm824_vm2, %v786_v49  ;;  %v4332_v49 = vmul.f32 %v9656_v39, %v9423_v8  ;;  %vm4382_vm1 = vweird.f32 %v9707_v13 }
 0x75e   : > { %vm9838_vm5 = vmor %vm4381_vm3, %vm4382_vm1 }
 0x75f   : > { %v4333_v19 = vsub.f32 1.0, %v4332_v49  ;;  %v4377_v49 = vmul.f32 %v9707_v13, %v9438_v63 }
 0x761   : > { %4126 = vrot.lane.b32.xlu0 %v9132_v3, %s7020_s14  ;;  %v1064_v3 = vpop.f32.mrf.mxu0 }
 0x762   : > { %4172 = vrot.lane.b32.xlu2 %v9442_v18, %s7020_s14  ;;  %v9641_v18 = vpop.permute.xlu1 %4080 }
 0x763   : > { %v9626_v38 = vpop.permute.xlu0 %4042  ;;  %13043 = vst [vmem:[#allocation85_spill] sm:$0xff] %v9641_v18  ;;  %6767 = vrcp.f32 %v9641_v18 }
 0x764   : > { %13041 = vst [vmem:[#allocation80_spill] sm:$0xff] %v9626_v38  ;;  %v9632_v52 = vpop.permute.xlu2 %4106 }
 0x765   : > { %13042 = vst [vmem:[#allocation82_spill] sm:$0xff] %v9632_v52 }
 0x769   : > { %4132 = vrot.lane.b32.xlu0 %v9177_v12, %s7020_s14  ;;  %v1066_v55 = vpop.f32.mrf.mxu0  ;;  %v4319_v12 = vmul.f32 %v9630_v47, %v4318_v57 }
 0x76a   : > { %4178 = vrot.lane.b32.xlu2 %v9493_v54, %s7020_s14  ;;  %v1065_v54 = vadd.f32 %v9149_v10, %v1064_v3  ;;  %v1067_v35 = vadd.f32 %v9149_v10, %v1066_v55  ;;  %v9678_v55 = vpop.permute.xlu1 %4086 }
 0x76b   : > { %v9649_v21 = vpop.permute.xlu0 %4048  ;;  %13046 = vst [vmem:[#allocation97_spill] sm:$0xff] %v9678_v55  ;;  %v4320_v57 = vadd.f32 %v9630_v47, %v4319_v12  ;;  %v4362_v12 = vmul.f32 %v9667_v7, %v9473_v34  ;;  %6769 = vrcp.f32 %v9678_v55 }
 0x76c   : > { %13044 = vst [vmem:[#allocation89_spill] sm:$0xff] %v9649_v21  ;;  %v9653_v51 = vpop.permute.xlu2 %4112  ;;  %v9733_v21 = vpop.eup %6743  ;;  %6771 = vrcp.f32 %v9527_v53 }
 0x76d   : > { %13045 = vst [vmem:[#allocation91_spill] sm:$0xff] %v9653_v51 }
 0x76e   : > { %1232 = vst.msk [vmem:[%s9159_s28 + $0x130] sm:$0xff] %vm824_vm2, %v1065_v54  ;;  %v4294_v54 = vsel %vm9688_vm8, %v9622_v26, %v4290_v25  ;;  %v4324_v26 = vsel %vm9711_vm10, %v9630_v47, %v4320_v57  ;;  %v4372_v25 = vand.u32 2147483648, %v9473_v34  ;;  %v6973_v47 = vld [vmem:[%s7115_s18 + $0x1c0] sm:$0xff]  ;;  %v4334_v57 = vmul.f32 %v9656_v39, %v4333_v19 }
 0x76f   : > { %1233 = vst.msk [vmem:[%s9159_s28 + $0x138] sm:$0xff] %vm824_vm2, %v1067_v35  ;;  %v13056_v19 = vld [vmem:[#allocation2_spill] sm:$0xff]  ;;  %vm4426_vm8 = vweird.f32 %v9452_v23  ;;  %vm4471_vm10 = vweird.f32 %v9469_v58 }
 0x770   : > { %v9741_v52 = vor.u32 1.1754944e-38, %v4372_v25  ;;  %v4452_v25 = vmul.f32 %v9733_v21, %v9512_v61 }
 0x771   : > { %4138 = vrot.lane.b32.xlu0 %v9213_v41, %s7020_s14  ;;  %v4295_v41 = vand.u32 2147483647, %v9436_v14  ;;  %v9696_v44 = vpop.f32.mrf.mxu0 }
 0x772   : > { %4184 = vrot.lane.b32.xlu2 %v9543_v6, %s7020_s14  ;;  %v4417_v6 = vand.u32 2147483648, %v9489_v2  ;;  %13054 = vst [vmem:[#allocation109_spill] sm:$0xff] %v9741_v52  ;;  %v13058_v2 = vld [vmem:[#allocation4_spill] sm:$0xff] }
 0x773   : > { %v9680_v3 = vpop.permute.xlu0 %4054  ;;  %vm4296_vm11 = vcmp.eq.f32.partialorder %v4295_v41, 8.507059e+37  ;;  %v3917_v41 = vpop.f32.mrf.mxu3 }
 0x774   : > { %13047 = vst [vmem:[#allocation106_spill] sm:$0xff] %v9680_v3  ;;  %v9692_v14 = vpop.permute.xlu2 %4118  ;;  %v4299_v51 = vsel %vm4296_vm11, %v4298_v60, %v4294_v54  ;;  %v4363_v3 = vsub.f32 1.0, %v4362_v12  ;;  %v4462_v60 = vand.u32 2147483648, %v9512_v61  ;;  %v9739_v54 = vpop.eup %6745 }
 0x775   : > { %13050 = vst [vmem:[#allocation107_spill] sm:$0xff] %v9692_v14  ;;  %v4328_v14 = vor.u32 1.1754944e-38, %v4327_v32  ;;  %v787_v32 = vpack.c.bf16 %v6974_v15, %v6973_v47 }
 0x776   : > { %v9750_v15 = vmul.f32 %v9667_v7, %v4363_v3  ;;  %v9766_v3 = vor.u32 1.1754944e-38, %v4462_v60 }
 0x777   : > { %v4329_v35 = vsel %vm4326_vm12, %v4328_v14, %v4324_v26  ;;  %6281 = vmatmul.msk.bf16.gmra.mxu0 %vm824_vm2, %v787_v32  ;;  %v9747_v26 = vpop.eup %6747  ;;  %v4378_v32 = vsub.f32 1.0, %v4377_v49  ;;  %v4342_v49 = vand.u32 2147483648, %v9423_v8 }
 0x778   : > { %v9755_v38 = vmul.f32 %v13058_v2, %v4329_v35  ;;  %13060 = vst [vmem:[#allocation111_spill] sm:$0xff] %v9766_v3  ;;  %v4507_v2 = vand.u32 2147483648, %v9530_v0  ;;  %vm4427_vm7 = vweird.f32 %v9747_v26 }
 0x779   : > { %4144 = vrot.lane.b32.xlu0 %v9244_v11, %s7020_s14  ;;  %v4408_v11 = vsub.f32 1.0, %v4407_v42  ;;  %v1071_v14 = vpop.f32.mrf.mxu0  ;;  %v4335_v42 = vadd.f32 %v9656_v39, %v4334_v57  ;;  %v4340_v57 = vand.u32 2147483647, %v9423_v8  ;;  %v4379_v3 = vmul.f32 %v9707_v13, %v4378_v32  ;;  %vm9890_vm9 = vmor %vm4426_vm8, %vm4427_vm7 }
 0x77a   : > { %4190 = vrot.lane.b32.xlu2 %v3917_v41, %s7020_s14  ;;  %v4300_v41 = vmul.f32 %v13056_v19, %v4299_v51  ;;  %v9761_v51 = vpop.permute.xlu1 %4092  ;;  %v9764_v19 = vpop.eup %6749  ;;  %v4453_v8 = vsub.f32 1.0, %v4452_v25  ;;  %v4552_v32 = vand.u32 2147483648, %v9546_v1  ;;  %v9799_v52 = vor.u32 1.1754944e-38, %v4507_v2 }
 0x77b   : > { %v9736_v12 = vpop.permute.xlu0 %4060  ;;  %13059 = vst [vmem:[#allocation4_spill] sm:$0xff] %v9761_v51  ;;  %v9773_v35 = vmul.f32 %v9698_v31, %v4408_v11  ;;  %v1070_v11 = vadd.f32 %v9149_v10, %v9696_v44  ;;  %v4542_v61 = vmul.f32 %v9764_v19, %v9546_v1  ;;  %v4343_v44 = vor.u32 1.1754944e-38, %v4342_v49 }
 0x77c   : > { %13053 = vst [vmem:[#allocation108_spill] sm:$0xff] %v9736_v12  ;;  %v9744_v47 = vpop.permute.xlu2 %4124  ;;  %v9752_v12 = vor.u32 1.1754944e-38, %v4417_v6  ;;  %v4497_v6 = vmul.f32 %v9739_v54, %v9530_v0  ;;  %v1072_v0 = vadd.f32 %v9149_v10, %v1071_v14  ;;  %v4597_v25 = vand.u32 2147483648, %v9563_v28 }
 0x77d   : > { %13055 = vst [vmem:[#allocation110_spill] sm:$0xff] %v9744_v47  ;;  %v4422_v47 = vmul.f32 %v9747_v26, %v9452_v23  ;;  %vm4341_vm0 = vcmp.eq.f32.partialorder %v4340_v57, 8.507059e+37  ;;  %v4380_v2 = vadd.f32 %v9707_v13, %v4379_v3  ;;  %v9821_v49 = vmul.f32 %v9733_v21, %v4453_v8 }
 0x77e   : > { %13057 = vst [vmem:[#allocation2_spill] sm:$0xff] %v9752_v12  ;;  %v9790_v12 = vpop.eup %6751  ;;  %v9823_v60 = vor.u32 1.1754944e-38, %v4552_v32  ;;  %v4387_v57 = vand.u32 2147483648, %v9438_v63  ;;  %v4385_v3 = vand.u32 2147483647, %v9438_v63  ;;  %6773 = vrcp.f32 %v9761_v51 }
 0x77f   : > { %13061 = vst [vmem:[#allocation112_spill] sm:$0xff] %v9773_v35  ;;  %v4498_v35 = vsub.f32 1.0, %v4497_v6  ;;  %v9806_v14 = vpop.eup %6753  ;;  %v4423_v1 = vsub.f32 1.0, %v4422_v47  ;;  %v4543_v47 = vsub.f32 1.0, %v4542_v61  ;;  %v9836_v61 = vor.u32 1.1754944e-38, %v4597_v25  ;;  %v6976_v25 = vld [vmem:[%s7115_s18 + $0x1d8] sm:$0xff] }
 0x780   : > { %13064 = vst [vmem:[#allocation113_spill] sm:$0xff] %v9799_v52  ;;  %v4384_v63 = vsel %vm9838_vm5, %v9707_v13, %v4380_v2  ;;  %vm4386_vm6 = vcmp.eq.f32.partialorder %v4385_v3, 8.507059e+37  ;;  %v4430_v3 = vand.u32 2147483647, %v9452_v23  ;;  %vm4472_vm12 = vweird.f32 %v9806_v14 }
 0x781   : > { %4150 = vrot.lane.b32.xlu0 %v9282_v59, %s7020_s14  ;;  %v4339_v59 = vsel %vm9779_vm15, %v9656_v39, %v4335_v42  ;;  %1234 = vst.msk [vmem:[%s9159_s28 + $0x140] sm:$0xff] %vm824_vm2, %v1070_v11  ;;  %v9814_v39 = vpop.f32.mrf.mxu0  ;;  %v4587_v42 = vmul.f32 %v9790_v12, %v9563_v28  ;;  %v9826_v11 = vpop.eup %6755  ;;  %v9834_v8 = vmul.f32 %v9739_v54, %v4498_v35  ;;  %v6975_v35 = vld [vmem:[%s7115_s18 + $0x1d0] sm:$0xff]  ;;  %vm9959_vm15 = vmor %vm4471_vm10, %vm4472_vm12  ;;  %vm4561_vm5 = vweird.f32 %v9500_v56 }
 0x782   : > { %5726 = vrot.lane.b32.xlu2 %v4300_v41, %s7019_s13  ;;  %1235 = vst.msk [vmem:[%s9159_s28 + $0x148] sm:$0xff] %vm824_vm2, %v1072_v0  ;;  %v4344_v6 = vsel %vm4341_vm0, %v4343_v44, %v4339_v59  ;;  %v4642_v0 = vand.u32 2147483648, %v9581_v29  ;;  %v4467_v59 = vmul.f32 %v9806_v14, %v9469_v58  ;;  %v4424_v44 = vmul.f32 %v9747_v26, %v4423_v1  ;;  %v9846_v52 = vpop.eup %6757 }
 0x783   : > { %v9802_v10 = vpop.permute.xlu0 %4066  ;;  %13067 = vst [vmem:[#allocation116_spill] sm:$0xff] %v9823_v60  ;;  %v13074_v60 = vld [vmem:[#allocation5_spill] sm:$0xff]  ;;  %v9856_v1 = vpop.eup %6759  ;;  %v4512_v2 = vmul.f32 %v9846_v52, %v9483_v40  ;;  %vm4431_vm11 = vcmp.eq.f32.partialorder %v4430_v3, 8.507059e+37  ;;  %vm4517_vm0 = vweird.f32 %v9846_v52 }
 0x784   : > { %13065 = vst [vmem:[#allocation114_spill] sm:$0xff] %v9802_v10  ;;  %v9810_v41 = vpop.permute.xlu2 %4130  ;;  %v4345_v28 = vmul.f32 %v13074_v60, %v4344_v6  ;;  %v4588_v10 = vsub.f32 1.0, %v4587_v42  ;;  %v4388_v6 = vor.u32 1.1754944e-38, %v4387_v57  ;;  %v4632_v42 = vmul.f32 %v9826_v11, %v9581_v29  ;;  %vm9998_vm1 = vmor %vm4516_vm14, %vm4517_vm0 }
 0x785   : > { %13066 = vst [vmem:[#allocation115_spill] sm:$0xff] %v9810_v41  ;;  %v9843_v41 = vpop.permute.xlu1 %4098  ;;  %v4432_v60 = vand.u32 2147483648, %v9452_v23  ;;  %v4468_v32 = vsub.f32 1.0, %v4467_v59  ;;  %v4677_v59 = vmul.f32 %v9856_v1, %v9601_v36  ;;  %v13082_v23 = vld [vmem:[#allocation8_spill] sm:$0xff] }
 0x786   : > { %13068 = vst [vmem:[#allocation117_spill] sm:$0xff] %v9826_v11  ;;  %v4389_v57 = vsel %vm4386_vm6, %v4388_v6, %v4384_v63  ;;  %v9886_v63 = vpop.eup %6761  ;;  %v4477_v6 = vand.u32 2147483648, %v9469_v58  ;;  %6775 = vrcp.f32 %v9843_v41 }
 0x787   : > { %13069 = vst [vmem:[#allocation118_spill] sm:$0xff] %v9834_v8  ;;  %v9859_v8 = vmul.f32 %v9764_v19, %v4543_v47  ;;  %vm4562_vm7 = vweird.f32 %v9886_v63  ;;  %6777 = vrcp.f32 %v9539_v48 }
 0x788   : > { %13070 = vst [vmem:[#allocation119_spill] sm:$0xff] %v9836_v61  ;;  %v788_v61 = vpack.c.bf16 %v6976_v25, %v6975_v35  ;;  %v4433_v35 = vor.u32 1.1754944e-38, %v4432_v60  ;;  %v4687_v25 = vand.u32 2147483648, %v9601_v36  ;;  %v4475_v60 = vand.u32 2147483647, %v9469_v58  ;;  %vm10057_vm8 = vmor %vm4561_vm5, %vm4562_vm7 }
 0x789   : > { %13073 = vst [vmem:[#allocation120_spill] sm:$0xff] %v9843_v41  ;;  %4156 = vrot.lane.b32.xlu0 %v9325_v50, %s7020_s14  ;;  %v9865_v50 = vor.u32 1.1754944e-38, %v4642_v0  ;;  %v9878_v0 = vmul.f32 %v9790_v12, %v4588_v10  ;;  %v4513_v36 = vsub.f32 1.0, %v4512_v2  ;;  %6779 = vrcp.f32 %v9569_v43 }
 0x78a   : > { %13075 = vst [vmem:[#allocation5_spill] sm:$0xff] %v9856_v1  ;;  %5732 = vrot.lane.b32.xlu2 %v4345_v28, %s7019_s13  ;;  %6282 = vmatmul.msk.bf16.gmra.mxu0 %vm824_vm2, %v788_v61  ;;  %v4425_v28 = vadd.f32 %v9747_v26, %v4424_v44  ;;  %v4633_v61 = vsub.f32 1.0, %v4632_v42  ;;  %v4469_v44 = vmul.f32 %v9806_v14, %v4468_v32  ;;  %v9911_v32 = vld [vmem:[%s12731_s4] ss:$0 sm:$0xff]  ;;  %vm9940_vm13 = vcmp.eq.f32.partialorder %v4475_v60, 8.507059e+37 }
 0x78b   : > { %13076 = vst [vmem:[#allocation121_spill] sm:$0xff] %v9865_v50  ;;  %v9868_v13 = vpop.permute.xlu0 %4072  ;;  %v4390_v42 = vmul.f32 %v13082_v23, %v4389_v57  ;;  %v4732_v50 = vand.u32 2147483648, %v9616_v37  ;;  %v1075_v2 = vadd.f32 %v9911_v32, %v9814_v39  ;;  %v4478_v23 = vor.u32 1.1754944e-38, %v4477_v6 }
 0x78c   : > { %13077 = vst [vmem:[#allocation122_spill] sm:$0xff] %v9868_v13  ;;  %v9874_v47 = vpop.permute.xlu2 %4136  ;;  %v4429_v29 = vsel %vm9890_vm9, %v9747_v26, %v4425_v28  ;;  %v4678_v13 = vsub.f32 1.0, %v4677_v59  ;;  %v9916_v26 = vor.u32 1.1754944e-38, %v4687_v25  ;;  %v4557_v28 = vmul.f32 %v9886_v63, %v9500_v56 }
 0x78d   : > { %13078 = vst [vmem:[#allocation123_spill] sm:$0xff] %v9874_v47  ;;  %v1076_v47 = vpop.f32.mrf.mxu0  ;;  %v9921_v59 = vpop.permute.xlu1 %4104  ;;  %v4470_v25 = vadd.f32 %v9806_v14, %v4469_v44  ;;  %v4514_v3 = vmul.f32 %v9846_v52, %v4513_v36  ;;  %v4522_v44 = vand.u32 2147483648, %v9483_v40  ;;  %vm4606_vm9 = vweird.f32 %v9516_v33 }
 0x78e   : > { %13079 = vst [vmem:[#allocation124_spill] sm:$0xff] %v9878_v0  ;;  %v9903_v0 = vpop.eup %6763  ;;  %v1077_v57 = vadd.f32 %v9911_v32, %v1076_v47  ;;  %v4434_v47 = vsel %vm4431_vm11, %v4433_v35, %v4429_v29  ;;  %v9947_v29 = vmul.f32 %v9856_v1, %v4678_v13  ;;  %v9949_v35 = vor.u32 1.1754944e-38, %v4732_v50  ;;  %v13094_v13 = vld [vmem:[#allocation12_spill] sm:$0xff] }
 0x78f   : > { %13083 = vst [vmem:[#allocation8_spill] sm:$0xff] %v9916_v26  ;;  %v9933_v10 = vpop.eup %6765  ;;  %v4722_v26 = vmul.f32 %v9903_v0, %v9616_v37  ;;  %v4558_v60 = vsub.f32 1.0, %v4557_v28  ;;  %v4435_v50 = vmul.f32 %v13094_v13, %v4434_v47  ;;  %v4474_v28 = vsel %vm9959_vm15, %v9806_v14, %v4470_v25 }
 0x790   : > { %13084 = vst [vmem:[#allocation125_spill] sm:$0xff] %v9921_v59  ;;  %v9953_v6 = vpop.eup %6767  ;;  %v4602_v58 = vmul.f32 %v9933_v10, %v9516_v33  ;;  %v4567_v13 = vand.u32 2147483648, %v9500_v56  ;;  %v4515_v37 = vadd.f32 %v9846_v52, %v4514_v3  ;;  %v4565_v1 = vand.u32 2147483647, %v9500_v56 }
 0x791   : > { %4162 = vrot.lane.b32.xlu0 %v9373_v30, %s7020_s14  ;;  %v9925_v30 = vmul.f32 %v9826_v11, %v4633_v61  ;;  %1236 = vst.msk [vmem:[%s9159_s28 + $0x150] sm:$0xff] %vm824_vm2, %v1075_v2  ;;  %v4520_v2 = vand.u32 2147483647, %v9483_v40  ;;  %v4723_v47 = vsub.f32 1.0, %v4722_v26  ;;  %v6979_v11 = vld [vmem:[%s7115_s18 + $0x1e8] sm:$0xff]  ;;  %v4559_v14 = vmul.f32 %v9886_v63, %v4558_v60  ;;  %v13113_v60 = vld [vmem:[#allocation14_spill] sm:$0xff] }
 0x792   : > { %5738 = vrot.lane.b32.xlu2 %v4390_v42, %s7019_s13  ;;  %1237 = vst.msk [vmem:[%s9159_s28 + $0x158] sm:$0xff] %vm824_vm2, %v1077_v57  ;;  %v4822_v25 = vand.u32 2147483648, %v9678_v55  ;;  %v4479_v3 = vsel %vm9940_vm13, %v4478_v23, %v4474_v28  ;;  %vm10029_vm6 = vcmp.eq.f32.partialorder %v4565_v1, 8.507059e+37  ;;  %6781 = vrcp.f32 %v9921_v59 }
 0x793   : > { %13085 = vst [vmem:[#allocation126_spill] sm:$0xff] %v9925_v30  ;;  %v9928_v39 = vpop.permute.xlu0 %4078  ;;  %v4767_v30 = vmul.f32 %v9953_v6, %v9641_v18  ;;  %vm10007_vm3 = vcmp.eq.f32.partialorder %v4520_v2, 8.507059e+37  ;;  %v10015_v40 = vmul.f32 %v9903_v0, %v4723_v47  ;;  %v4519_v2 = vsel %vm9998_vm1, %v9846_v52, %v4515_v37 }
 0x794   : > { %13086 = vst [vmem:[#allocation127_spill] sm:$0xff] %v9928_v39  ;;  %v9938_v42 = vpop.permute.xlu2 %4142  ;;  %v6978_v39 = vld [vmem:[%s7115_s18 + $0x1e0] sm:$0xff]  ;;  %vm4607_vm10 = vweird.f32 %v9933_v10  ;;  %6783 = vrcp.f32 %v9552_v24  ;;  %vm4651_vm13 = vweird.f32 %v9527_v53  ;;  %vm4306_vm1 = vweird.f32 %v9569_v43 }
 0x795   : > { %13087 = vst [vmem:[#allocation128_spill] sm:$0xff] %v9938_v42  ;;  %v9966_v57 = vpop.f32.mrf.mxu0  ;;  %v4777_v42 = vand.u32 2147483648, %v9641_v18  ;;  %v789_v36 = vpack.c.bf16 %v6979_v11, %v6978_v39  ;;  %v4603_v39 = vsub.f32 1.0, %v4602_v58  ;;  %v10018_v61 = vpop.permute.xlu1 %4110  ;;  %v4768_v28 = vsub.f32 1.0, %v4767_v30  ;;  %vm10106_vm12 = vmor %vm4606_vm9, %vm4607_vm10 }
 0x796   : > { %13090 = vst [vmem:[#allocation129_spill] sm:$0xff] %v9947_v29  ;;  %v4523_v29 = vor.u32 1.1754944e-38, %v4522_v44  ;;  %6785 = vrcp.f32 %v10018_v61  ;;  %vm4351_vm9 = vweird.f32 %v9583_v20 }
 0x797   : > { %13091 = vst [vmem:[#allocation130_spill] sm:$0xff] %v9949_v35  ;;  %v9968_v35 = vpop.eup %6769  ;;  %v10002_v11 = vor.u32 1.1754944e-38, %v4777_v42  ;;  %v4568_v42 = vor.u32 1.1754944e-38, %v4567_v13  ;;  %v4604_v37 = vmul.f32 %v9933_v10, %v4603_v39  ;;  %6787 = vrcp.f32 %v9583_v20 }
 0x798   : > { %13095 = vst [vmem:[#allocation12_spill] sm:$0xff] %v9968_v35  ;;  %v4812_v26 = vmul.f32 %v9968_v35, %v9678_v55  ;;  %v10012_v23 = vpop.eup %6771  ;;  %v4524_v1 = vsel %vm10007_vm3, %v4523_v29, %v4519_v2  ;;  %v1080_v2 = vadd.f32 %v9911_v32, %v9966_v57  ;;  %v4912_v29 = vand.u32 2147483648, %v9843_v41 }
 0x799   : > { %4168 = vrot.lane.b32.xlu0 %v9413_v46, %s7020_s14  ;;  %13098 = vst [vmem:[#allocation131_spill] sm:$0xff] %v10002_v11  ;;  %v10025_v58 = vpop.eup %6773  ;;  %v13105_v11 = vld [vmem:[#allocation17_spill] sm:$0xff]  ;;  %v4647_v52 = vmul.f32 %v10012_v23, %v9527_v53  ;;  %v10051_v46 = vmul.f32 %v9953_v6, %v4768_v28  ;;  %v4525_v56 = vmul.f32 %v13113_v60, %v4524_v1  ;;  %vm4652_vm14 = vweird.f32 %v10012_v23 }
 0x79a   : > { %5744 = vrot.lane.b32.xlu2 %v4435_v50, %s7019_s13  ;;  %6283 = vmatmul.msk.bf16.gmra.mxu0 %vm824_vm2, %v789_v36  ;;  %13101 = vst [vmem:[#allocation132_spill] sm:$0xff] %v10015_v40  ;;  %v4480_v18 = vmul.f32 %v13105_v11, %v4479_v3  ;;  %v4813_v13 = vsub.f32 1.0, %v4812_v26  ;;  %v10034_v40 = vor.u32 1.1754944e-38, %v4822_v25  ;;  %v4612_v3 = vand.u32 2147483648, %v9516_v33  ;;  %v10048_v25 = vpop.eup %6775  ;;  %vm10177_vm0 = vmor %vm4651_vm13, %vm4652_vm14 }
 0x79b   : > { %v10005_v44 = vpop.permute.xlu0 %4084  ;;  %13102 = vst [vmem:[#allocation133_spill] sm:$0xff] %v10018_v61  ;;  %v4857_v26 = vmul.f32 %v10025_v58, %v9761_v51  ;;  %v4867_v11 = vand.u32 2147483648, %v9761_v51  ;;  %v4648_v36 = vsub.f32 1.0, %v4647_v52  ;;  %v4902_v1 = vmul.f32 %v10048_v25, %v9843_v41  ;;  %v10089_v57 = vpop.eup %6777 }
 0x79c   : > { %v10020_v50 = vpop.permute.xlu2 %4148  ;;  %13104 = vst [vmem:[#allocation135_spill] sm:$0xff] %v10025_v58  ;;  %v4814_v39 = vmul.f32 %v9968_v35, %v4813_v13  ;;  %v4613_v13 = vor.u32 1.1754944e-38, %v4612_v3  ;;  %v10097_v3 = vpop.eup %6779  ;;  %6789 = vrcp.f32 %v9571_v16  ;;  %vm4697_vm5 = vweird.f32 %v10089_v57 }
 0x79d   : > { %13103 = vst [vmem:[#allocation134_spill] sm:$0xff] %v10020_v50  ;;  %v4560_v50 = vadd.f32 %v9886_v63, %v4559_v14  ;;  %v1081_v30 = vpop.f32.mrf.mxu0  ;;  %v4610_v14 = vand.u32 2147483647, %v9516_v33  ;;  %v10092_v52 = vor.u32 1.1754944e-38, %v4867_v11  ;;  %v10115_v47 = vpop.eup %6781  ;;  %v4649_v11 = vmul.f32 %v10012_v23, %v4648_v36 }
 0x79e   : > { %13108 = vst [vmem:[#allocation17_spill] sm:$0xff] %v10034_v40  ;;  %v4657_v40 = vand.u32 2147483648, %v9527_v53  ;;  %v4692_v36 = vmul.f32 %v10089_v57, %v9539_v48  ;;  %vm4307_vm3 = vweird.f32 %v10097_v3 }
 0x79f   : > { %13109 = vst [vmem:[#allocation136_spill] sm:$0xff] %v10048_v25  ;;  %v4564_v28 = vsel %vm10057_vm8, %v9886_v63, %v4560_v50  ;;  %vm10085_vm11 = vcmp.eq.f32.partialorder %v4610_v14, 8.507059e+37  ;;  %v4903_v50 = vsub.f32 1.0, %v4902_v1  ;;  %v4302_v14 = vmul.f32 %v10097_v3, %v9569_v43  ;;  %vm10259_vm7 = vmor %vm4306_vm1, %vm4307_vm3 }
 0x7a0   : > { %13110 = vst [vmem:[#allocation137_spill] sm:$0xff] %v10051_v46  ;;  %v4957_v63 = vand.u32 2147483648, %v9921_v59  ;;  %vm4367_vm8 = vweird.f32 %v9667_v7 }
 0x7a1   : > { %4174 = vrot.lane.b32.xlu0 %v9457_v4, %s7020_s14  ;;  %v4605_v4 = vadd.f32 %v9933_v10, %v4604_v37  ;;  %1238 = vst.msk [vmem:[%s9159_s28 + $0x160] sm:$0xff] %vm824_vm2, %v1080_v2  ;;  %v4569_v37 = vsel %vm10029_vm6, %v4568_v42, %v4564_v28  ;;  %v10113_v42 = vpop.permute.xlu1 %4116  ;;  %v4655_v2 = vand.u32 2147483647, %v9527_v53  ;;  %vm4696_vm6 = vweird.f32 %v9539_v48 }
 0x7a2   : > { %5750 = vrot.lane.b32.xlu2 %v4480_v18, %s7019_s13  ;;  %v4858_v18 = vsub.f32 1.0, %v4857_v26  ;;  %13117 = vst [vmem:[#allocation138_spill] sm:$0xff] %v10092_v52  ;;  %v10100_v26 = vadd.f32 %v9968_v35, %v4814_v39  ;;  %v10118_v39 = vor.u32 1.1754944e-38, %v4657_v40  ;;  %v13123_v52 = vld [vmem:[#allocation19_spill] sm:$0xff]  ;;  %v4702_v40 = vand.u32 2147483648, %v9539_v48  ;;  %vm10336_vm14 = vmor %vm4696_vm6, %vm4697_vm5 }
 0x7a3   : > { %v10076_v55 = vpop.permute.xlu0 %4090  ;;  %13121 = vst [vmem:[#allocation140_spill] sm:$0xff] %v10113_v42  ;;  %v4609_v33 = vsel %vm10106_vm12, %v9933_v10, %v4605_v4  ;;  %v10136_v4 = vor.u32 1.1754944e-38, %v4912_v29  ;;  %v4650_v29 = vadd.f32 %v10012_v23, %v4649_v11  ;;  %vm10150_vm15 = vcmp.eq.f32.partialorder %v4655_v2, 8.507059e+37 }
 0x7a4   : > { %v10081_v60 = vpop.permute.xlu2 %4154  ;;  %13118 = vst [vmem:[#allocation139_spill] sm:$0xff] %v10100_v26  ;;  %v4859_v28 = vmul.f32 %v10025_v58, %v4858_v18  ;;  %v4570_v26 = vmul.f32 %v13123_v52, %v4569_v37  ;;  %v4947_v18 = vmul.f32 %v10115_v47, %v9921_v59  ;;  %v4614_v1 = vsel %vm10085_vm11, %v4613_v13, %v4609_v33  ;;  %v10143_v52 = vpop.eup %6783 }
 0x7a5   : > { %13114 = vst [vmem:[#allocation14_spill] sm:$0xff] %v10081_v60  ;;  %v1084_v10 = vpop.f32.mrf.mxu0  ;;  %v10154_v41 = vpop.eup %6785  ;;  %v4904_v13 = vmul.f32 %v10048_v25, %v4903_v50  ;;  %v4693_v33 = vsub.f32 1.0, %v4692_v36  ;;  %v10164_v11 = vor.u32 1.1754944e-38, %v4702_v40  ;;  %v4303_v2 = vsub.f32 1.0, %v4302_v14 }
 0x7a6   : > { %13122 = vst [vmem:[#allocation141_spill] sm:$0xff] %v10115_v47  ;;  %v1085_v60 = vadd.f32 %v9911_v32, %v1084_v10  ;;  %v13130_v10 = vld [vmem:[#allocation24_spill] sm:$0xff]  ;;  %v4737_v36 = vmul.f32 %v10143_v52, %v9552_v24  ;;  %v4747_v40 = vand.u32 2147483648, %v9552_v24  ;;  %6791 = vrcp.f32 %v10113_v42 }
 0x7a7   : > { %13124 = vst [vmem:[#allocation19_spill] sm:$0xff] %v10136_v4  ;;  %v10169_v51 = vmul.f32 %v13130_v10, %v4614_v1  ;;  %v4992_v53 = vmul.f32 %v10154_v41, %v10018_v61  ;;  %v5002_v1 = vand.u32 2147483648, %v10018_v61  ;;  %v10197_v10 = vor.u32 1.1754944e-38, %v4957_v63  ;;  %v3920_v61 = vpop.f32.mrf.mxu3 }
 0x7a8   : > { %13127 = vst [vmem:[#allocation142_spill] sm:$0xff] %v10154_v41  ;;  %v10204_v14 = vmul.f32 %v10089_v57, %v4693_v33  ;;  %v4304_v59 = vmul.f32 %v10097_v3, %v4303_v2  ;;  %6793 = vrcp.f32 %v9593_v62  ;;  %vm4366_vm11 = vweird.f32 %v9473_v34 }
 0x7a9   : > { %4180 = vrot.lane.b32.xlu0 %v9514_v27, %s7020_s14  ;;  %v1082_v27 = vadd.f32 %v9911_v32, %v1081_v30  ;;  %1240 = vst.msk [vmem:[%s9159_s28 + $0x170] sm:$0xff] %vm824_vm2, %v1085_v60  ;;  %v10216_v60 = vor.u32 1.1754944e-38, %v4747_v40  ;;  %v4993_v2 = vsub.f32 1.0, %v4992_v53  ;;  %6795 = vrcp.f32 %v9585_v5  ;;  %vm10388_vm6 = vmor %vm4366_vm11, %vm4367_vm8 }
 0x7aa   : > { %5756 = vrot.lane.b32.xlu2 %v4525_v56, %s7019_s13  ;;  %v10157_v56 = vadd.f32 %v10025_v58, %v4859_v28  ;;  %v10171_v28 = vpop.eup %6787  ;;  %13134 = vst [vmem:[#allocation145_spill] sm:$0xff] %v10197_v10  ;;  %v10200_v58 = vpop.permute.xlu1 %4122  ;;  %vm4742_vm3 = vweird.f32 %v10143_v52 }
 0x7ab   : > { %v10145_v37 = vpop.permute.xlu0 %4096  ;;  %1239 = vst.msk [vmem:[%s9159_s28 + $0x168] sm:$0xff] %vm824_vm2, %v1082_v27  ;;  %v10195_v27 = vadd.f32 %v10048_v25, %v4904_v13  ;;  %v4347_v50 = vmul.f32 %v10171_v28, %v9583_v20  ;;  %v10213_v63 = vpop.eup %6789  ;;  %v4994_v25 = vmul.f32 %v10154_v41, %v4993_v2  ;;  %6797 = vrcp.f32 %v10200_v58  ;;  %v13143_v2 = vld [vmem:[#allocation28_spill] sm:$0xff] }
 0x7ac   : > { %13128 = vst [vmem:[#allocation143_spill] sm:$0xff] %v10157_v56  ;;  %v10162_v30 = vpop.permute.xlu2 %4160  ;;  %v4948_v56 = vsub.f32 1.0, %v4947_v18  ;;  %v4654_v18 = vsel %vm10177_vm0, %v10012_v23, %v4650_v29  ;;  %v6980_v23 = vld [vmem:[%s7115_s18 + $0x1f0] sm:$0xff]  ;;  %v6981_v29 = vld [vmem:[%s7115_s18 + $0x1f8] sm:$0xff]  ;;  %v4782_v40 = vmul.f32 %v10213_v63, %v9571_v16  ;;  %6799 = vrcp.f32 %v9597_v45 }
 0x7ad   : > { %13129 = vst [vmem:[#allocation144_spill] sm:$0xff] %v10162_v30  ;;  %v4312_v30 = vand.u32 2147483648, %v9569_v43  ;;  %v790_v13 = vpack.c.bf16 %v6981_v29, %v6980_v23  ;;  %v4659_v33 = vsel %vm10150_vm15, %v10118_v39, %v4654_v18  ;;  %v4792_v39 = vand.u32 2147483648, %v9571_v16 }
 0x7ae   : > { %13133 = vst [vmem:[#allocation24_spill] sm:$0xff] %v10195_v27  ;;  %v4949_v10 = vmul.f32 %v10115_v47, %v4948_v56  ;;  %v4738_v27 = vsub.f32 1.0, %v4737_v36  ;;  %v1086_v56 = vpop.f32.mrf.mxu0  ;;  %v10229_v36 = vpop.eup %6791  ;;  %v4348_v53 = vsub.f32 1.0, %v4347_v50  ;;  %vm4352_vm12 = vweird.f32 %v10171_v28 }
 0x7af   : > { %13135 = vst [vmem:[#allocation146_spill] sm:$0xff] %v10200_v58  ;;  %6284 = vmatmul.msk.bf16.gmra.mxu0 %vm824_vm2, %v790_v13  ;;  %v4310_v13 = vand.u32 2147483647, %v9569_v43  ;;  %v5037_v50 = vmul.f32 %v10229_v36, %v10113_v42  ;;  %v4837_v43 = vand.u32 2147483648, %v9585_v5  ;;  %vm10324_vm13 = vmor %vm4351_vm9, %vm4352_vm12  ;;  %vm4396_vm0 = vweird.f32 %v9593_v62 }
 0x7b0   : > { %13138 = vst [vmem:[#allocation149_spill] sm:$0xff] %v10229_v36  ;;  %v10242_v18 = vadd.f32 %v10115_v47, %v4949_v10  ;;  %v10245_v29 = vmul.f32 %v10143_v52, %v4738_v27  ;;  %v10263_v10 = vor.u32 1.1754944e-38, %v4792_v39  ;;  %v4783_v47 = vsub.f32 1.0, %v4782_v40 }
 0x7b1   : > { %4186 = vrot.lane.b32.xlu0 %v9556_v22, %s7020_s14  ;;  %v10223_v22 = vor.u32 1.1754944e-38, %v5002_v1  ;;  %v4305_v1 = vadd.f32 %v10097_v3, %v4304_v59  ;;  %v4357_v59 = vand.u32 2147483648, %v9583_v20  ;;  %vm4311_vm10 = vcmp.eq.f32.partialorder %v4310_v13, 8.507059e+37 }
 0x7b2   : > { %5762 = vrot.lane.b32.xlu2 %v4570_v26, %s7019_s13  ;;  %v4313_v26 = vor.u32 1.1754944e-38, %v4312_v30  ;;  %13140 = vst [vmem:[#allocation151_spill] sm:$0xff] %v10242_v18  ;;  %v4660_v30 = vmul.f32 %v13143_v2, %v4659_v33  ;;  %v1087_v18 = vadd.f32 %v9911_v32, %v1086_v56  ;;  %v10279_v33 = vpop.permute.xlu1 %4128  ;;  %v5038_v40 = vsub.f32 1.0, %v5037_v50 }
 0x7b3   : > { %13136 = vst [vmem:[#allocation147_spill] sm:$0xff] %v10223_v22  ;;  %v10226_v23 = vpop.permute.xlu0 %4102  ;;  %v5047_v22 = vand.u32 2147483648, %v10113_v42  ;;  %v4309_v39 = vsel %vm10259_vm7, %v10097_v3, %v4305_v1  ;;  %v10292_v3 = vadd.f32 %v10154_v41, %v4994_v25  ;;  %v4358_v1 = vor.u32 1.1754944e-38, %v4357_v59 }
 0x7b4   : > { %13137 = vst [vmem:[#allocation148_spill] sm:$0xff] %v10226_v23  ;;  %v10234_v4 = vpop.permute.xlu2 %4166  ;;  %v4349_v23 = vmul.f32 %v10171_v28, %v4348_v53  ;;  %v4314_v25 = vsel %vm4311_vm10, %v4313_v26, %v4309_v39  ;;  %v4784_v13 = vmul.f32 %v10213_v63, %v4783_v47  ;;  %6801 = vrcp.f32 %v10279_v33 }
 0x7b5   : > { %13139 = vst [vmem:[#allocation150_spill] sm:$0xff] %v10234_v4  ;;  %v10268_v4 = vpop.eup %6793  ;;  %v10294_v53 = vor.u32 1.1754944e-38, %v5047_v22  ;;  %v10307_v22 = vor.u32 1.1754944e-38, %v4837_v43  ;;  %v4695_v26 = vadd.f32 %v10089_v57, %v10204_v14  ;;  %v5039_v47 = vmul.f32 %v10229_v36, %v5038_v40 }
 0x7b6   : > { %13144 = vst [vmem:[#allocation28_spill] sm:$0xff] %v10279_v33  ;;  %v10289_v56 = vpop.eup %6795  ;;  %v1089_v2 = vpop.f32.mrf.mxu0  ;;  %v4350_v50 = vadd.f32 %v10171_v28, %v4349_v23  ;;  %v4402_v39 = vand.u32 2147483648, %v9593_v62  ;;  %v4355_v23 = vand.u32 2147483647, %v9583_v20  ;;  %6803 = vrcp.f32 %v9609_v17 }
 0x7b7   : > { %1241 = vst.msk [vmem:[%s9159_s28 + $0x178] sm:$0xff] %vm824_vm2, %v1087_v18  ;;  %v10310_v59 = vpop.eup %6797  ;;  %v4827_v46 = vmul.f32 %v10289_v56, %v9585_v5  ;;  %v4700_v14 = vand.u32 2147483647, %v9539_v48  ;;  %v1090_v40 = vadd.f32 %v9911_v32, %v1089_v2  ;;  %6805 = vrcp.f32 %v9613_v9 }
 0x7b8   : > { %13145 = vst [vmem:[#allocation152_spill] sm:$0xff] %v10292_v3  ;;  %v4354_v2 = vsel %vm10324_vm13, %v10171_v28, %v4350_v50  ;;  %v4882_v41 = vand.u32 2147483648, %v9597_v45  ;;  %vm4356_vm1 = vcmp.eq.f32.partialorder %v4355_v23, 8.507059e+37  ;;  %vm4741_vm7 = vweird.f32 %v9552_v24 }
 0x7b9   : > { %4192 = vrot.lane.b32.xlu0 %v3920_v61, %s7020_s14  ;;  %v10287_v61 = vadd.f32 %v9667_v7, %v9750_v15  ;;  %13146 = vst [vmem:[#allocation153_spill] sm:$0xff] %v10294_v53  ;;  %v4392_v15 = vmul.f32 %v10268_v4, %v9593_v62  ;;  %v13150_v53 = vld [vmem:[#allocation3_spill] sm:$0xff]  ;;  %v4828_v48 = vsub.f32 1.0, %v4827_v46  ;;  %v4403_v46 = vor.u32 1.1754944e-38, %v4402_v39 }
 0x7ba   : > { %5768 = vrot.lane.b32.xlu2 %v10169_v51, %s7019_s13  ;;  %13149 = vst [vmem:[#allocation156_spill] sm:$0xff] %v10310_v59  ;;  %v5092_v51 = vand.u32 2147483648, %v10200_v58  ;;  %v4315_v3 = vmul.f32 %v13150_v53, %v4314_v25  ;;  %v10341_v53 = vadd.f32 %v10213_v63, %v4784_v13  ;;  %v10350_v25 = vpop.eup %6799  ;;  %v4699_v13 = vsel %vm10336_vm14, %v10089_v57, %v4695_v26  ;;  %vm10475_vm14 = vmor %vm4741_vm7, %vm4742_vm3 }
 0x7bb   : > { %v10296_v27 = vpop.permute.xlu0 %4108  ;;  %1242 = vst.msk [vmem:[%s9159_s28 + $0x180] sm:$0xff] %vm824_vm2, %v1090_v40  ;;  %v10373_v20 = vpop.eup %6801  ;;  %v10377_v57 = vadd.f32 %v10229_v36, %v5039_v47  ;;  %vm4701_vm5 = vcmp.eq.f32.partialorder %v4700_v14, 8.507059e+37  ;;  %v4872_v47 = vmul.f32 %v10350_v25, %v9597_v45  ;;  %vm4397_vm9 = vweird.f32 %v10268_v4 }
 0x7bc   : > { %13147 = vst [vmem:[#allocation154_spill] sm:$0xff] %v10296_v27  ;;  %v10303_v18 = vpop.permute.xlu2 %4172  ;;  %v10366_v28 = vor.u32 1.1754944e-38, %v5092_v51  ;;  %v10380_v40 = vpop.permute.xlu1 %4134  ;;  %v4369_v14 = vsel %vm10388_vm6, %v9667_v7, %v10287_v61  ;;  %v4400_v61 = vand.u32 2147483647, %v9593_v62  ;;  %vm10423_vm8 = vmor %vm4396_vm0, %vm4397_vm9  ;;  %vm4412_vm10 = vweird.f32 %v9698_v31  ;;  %v13204_v27 = vld [vmem:[#allocation11_spill] sm:$0xff] }
 0x7bd   : > { %13148 = vst [vmem:[#allocation155_spill] sm:$0xff] %v10303_v18  ;;  %v4393_v18 = vsub.f32 1.0, %v4392_v15  ;;  %v5082_v15 = vmul.f32 %v10310_v59, %v10200_v58  ;;  %6807 = vrcp.f32 %v10380_v40  ;;  %vm4787_vm13 = vweird.f32 %v10213_v63 }
 0x7be   : > { %13158 = vst [vmem:[#allocation3_spill] sm:$0xff] %v10366_v28  ;;  %v10396_v28 = vpop.eup %6803  ;;  %vm4401_vm11 = vcmp.eq.f32.partialorder %v4400_v61, 8.507059e+37  ;;  %vm4786_vm0 = vweird.f32 %v9571_v16 }
 0x7bf   : > { %v3923_v43 = vpop.f32.mrf.mxu3  ;;  %13160 = vst [vmem:[#allocation158_spill] sm:$0xff] %v10373_v20  ;;  %v4394_v26 = vmul.f32 %v10268_v4, %v4393_v18  ;;  %v5083_v23 = vsub.f32 1.0, %v5082_v15  ;;  %v10407_v15 = vpop.eup %6805  ;;  %v5137_v18 = vand.u32 2147483648, %v10279_v33  ;;  %vm4442_vm6 = vweird.f32 %v10396_v28 }
 0x7c0   : > { %4194 = vrot.lane.b32.xlu1 %v3923_v43, %s7020_s14  ;;  %13161 = vst [vmem:[#allocation159_spill] sm:$0xff] %v10377_v57  ;;  %v4704_v43 = vsel %vm4701_vm5, %v10164_v11, %v4699_v13  ;;  %v5127_v11 = vmul.f32 %v10373_v20, %v10279_v33  ;;  %v13166_v13 = vld [vmem:[#allocation6_spill] sm:$0xff]  ;;  %v13172_v33 = vld [vmem:[#allocation109_spill] sm:$0xff]  ;;  %vm4457_vm5 = vweird.f32 %v9733_v21 }
 0x7c1   : > { %5728 = vrot.lane.b32.xlu0 %v4315_v3, %s7019_s13  ;;  %v13155_v3 = vand.u32 2147483647, %v9473_v34  ;;  %13162 = vst [vmem:[#allocation160_spill] sm:$0xff] %v10380_v40  ;;  %v10401_v34 = vor.u32 1.1754944e-38, %v4882_v41  ;;  %v13167_v41 = vld [vmem:[#allocation27_spill] sm:$0xff]  ;;  %v4395_v7 = vadd.f32 %v10268_v4, %v4394_v26  ;;  %v5084_v39 = vmul.f32 %v10310_v59, %v5083_v23  ;;  %v13170_v23 = vld [vmem:[#allocation80_spill] sm:$0xff] }
 0x7c2   : > { %5774 = vrot.lane.b32.xlu2 %v4660_v30, %s7019_s13  ;;  %v10371_v30 = vpop.f32.mrf.mxu0  ;;  %v4705_v57 = vmul.f32 %v13167_v41, %v4704_v43  ;;  %v4917_v43 = vmul.f32 %v10407_v15, %v9613_v9  ;;  %v4927_v26 = vand.u32 2147483648, %v9613_v9  ;;  %6809 = vrcp.f32 %v13170_v23 }
 0x7c3   : > { %vm10362_vm15 = vcmp.eq.f32.partialorder %v13155_v3, 8.507059e+37  ;;  %v10369_v50 = vpop.permute.xlu0 %4114  ;;  %v4359_v3 = vsel %vm4356_vm1, %v4358_v1, %v4354_v2  ;;  %v4829_v1 = vmul.f32 %v10289_v56, %v4828_v48  ;;  %v4399_v62 = vsel %vm10423_vm8, %v10268_v4, %v4395_v7  ;;  %v13175_v7 = vld [vmem:[#allocation57_spill] sm:$0xff] }
 0x7c4   : > { %13159 = vst [vmem:[#allocation157_spill] sm:$0xff] %v10369_v50  ;;  %v10382_v51 = vpop.permute.xlu2 %4178  ;;  %v4360_v48 = vmul.f32 %v13166_v13, %v4359_v3  ;;  %v4873_v3 = vsub.f32 1.0, %v4872_v47  ;;  %v4437_v13 = vmul.f32 %v10396_v28, %v9609_v17  ;;  %v5128_v41 = vsub.f32 1.0, %v5127_v11  ;;  %v10457_v11 = vpop.eup %6807 }
 0x7c5   : > { %13163 = vst [vmem:[#allocation161_spill] sm:$0xff] %v10382_v51  ;;  %v10441_v47 = vadd.f32 %v10289_v56, %v4829_v1  ;;  %v4374_v58 = vsel %vm10362_vm15, %v13172_v33, %v4369_v14  ;;  %v4404_v4 = vsel %vm4401_vm11, %v4403_v46, %v4399_v62  ;;  %v4740_v2 = vadd.f32 %v10143_v52, %v10245_v29  ;;  %v13177_v62 = vld [vmem:[#allocation7_spill] sm:$0xff] }
 0x7c6   : > { %v4745_v1 = vand.u32 2147483647, %v9552_v24  ;;  %vm4411_vm12 = vweird.f32 %v13175_v7  ;;  %v10461_v42 = vadd.f32 %v10310_v59, %v5084_v39  ;;  %v4438_v33 = vsub.f32 1.0, %v4437_v13  ;;  %v13182_v59 = vld [vmem:[#allocation89_spill] sm:$0xff] }
 0x7c7   : > { %v4874_v46 = vmul.f32 %v10350_v25, %v4873_v3  ;;  %v4918_v61 = vsub.f32 1.0, %v4917_v43  ;;  %v10468_v29 = vor.u32 1.1754944e-38, %v4927_v26  ;;  %v5129_v13 = vmul.f32 %v10373_v20, %v5128_v41  ;;  %v13181_v43 = vld [vmem:[#allocation9_spill] sm:$0xff]  ;;  %vm10548_vm7 = vmor %vm4411_vm12, %vm4412_vm10 }
 0x7c8   : > { %5730 = vrot.lane.b32.xlu1 %v9755_v38, %s7019_s13  ;;  %v4447_v38 = vand.u32 2147483648, %v9609_v17  ;;  %13176 = vst [vmem:[#allocation109_spill] sm:$0xff] %v10461_v42  ;;  %vm4441_vm15 = vweird.f32 %v9609_v17  ;;  %v5182_v3 = vand.u32 2147483648, %v10380_v40  ;;  %v4405_v26 = vmul.f32 %v13181_v43, %v4404_v4  ;;  %v6983_v42 = vld [vmem:[%s7115_s18 + $0x208] sm:$0xff] }
 0x7c9   : > { %5734 = vrot.lane.b32.xlu0 %v4360_v48, %s7019_s13  ;;  %v5172_v24 = vmul.f32 %v10457_v11, %v10380_v40  ;;  %v4744_v41 = vsel %vm10475_vm14, %v10143_v52, %v4740_v2  ;;  %vm4746_vm1 = vcmp.eq.f32.partialorder %v4745_v1, 8.507059e+37  ;;  %v4439_v4 = vmul.f32 %v10396_v28, %v4438_v33  ;;  %v13186_v1 = vld [vmem:[#allocation32_spill] sm:$0xff]  ;;  %vm10575_vm14 = vmor %vm4441_vm15, %vm4442_vm6 }
 0x7ca   : > { %5780 = vrot.lane.b32.xlu2 %v4705_v57, %s7019_s13  ;;  %v10448_v51 = vpop.f32.mrf.mxu0  ;;  %v10450_v57 = vor.u32 1.1754944e-38, %v5137_v18  ;;  %v10463_v14 = vor.u32 1.1754944e-38, %v4447_v38  ;;  %v13180_v38 = vld [vmem:[#allocation82_spill] sm:$0xff]  ;;  %v10484_v18 = vpop.eup %6809  ;;  %v4492_v43 = vand.u32 2147483648, %v13170_v23  ;;  %v4919_v52 = vmul.f32 %v10407_v15, %v4918_v61  ;;  %v13188_v61 = vld [vmem:[#allocation112_spill] sm:$0xff] }
 0x7cb   : > { %v10443_v48 = vpop.permute.xlu0 %4120  ;;  %6811 = vrcp.f32 %v13180_v38  ;;  %v4972_v2 = vand.u32 2147483648, %v13180_v38  ;;  %v1092_v33 = vadd.f32 %v9911_v32, %v10371_v30  ;;  %v4482_v39 = vmul.f32 %v10484_v18, %v13170_v23 }
 0x7cc   : > { %13171 = vst [vmem:[#allocation6_spill] sm:$0xff] %v10443_v48  ;;  %v10452_v36 = vpop.permute.xlu2 %4184  ;;  %6813 = vrcp.f32 %v13182_v59  ;;  %v4749_v48 = vsel %vm4746_vm1, %v10216_v60, %v4744_v41  ;;  %v4410_v41 = vadd.f32 %v9698_v31, %v13188_v61  ;;  %v5173_v30 = vsub.f32 1.0, %v5172_v24 }
 0x7cd   : > { %13173 = vst [vmem:[#allocation27_spill] sm:$0xff] %v10450_v57  ;;  %v4375_v57 = vmul.f32 %v13177_v62, %v4374_v58  ;;  %v10489_v58 = vpop.permute.xlu1 %4140  ;;  %v6982_v62 = vld [vmem:[%s7115_s18 + $0x200] sm:$0xff]  ;;  %v10538_v61 = vadd.f32 %v10373_v20, %v5129_v13  ;;  %v10540_v60 = vor.u32 1.1754944e-38, %v5182_v3  ;;  %v4440_v40 = vadd.f32 %v10396_v28, %v4439_v4 }
 0x7ce   : > { %13174 = vst [vmem:[#allocation80_spill] sm:$0xff] %v10452_v36  ;;  %v791_v36 = vpack.c.bf16 %v6983_v42, %v6982_v62  ;;  %v4750_v42 = vmul.f32 %v13186_v1, %v4749_v48  ;;  %6815 = vrcp.f32 %v10489_v58  ;;  %vm4832_vm8 = vweird.f32 %v10289_v56 }
 0x7cf   : > { %1243 = vst.msk [vmem:[%s9159_s28 + $0x188] sm:$0xff] %vm824_vm2, %v1092_v33  ;;  %v10555_v13 = vadd.f32 %v10407_v15, %v4919_v52  ;;  %v10557_v3 = vor.u32 1.1754944e-38, %v4492_v43  ;;  %v10559_v33 = vor.u32 1.1754944e-38, %v4972_v2  ;;  %vm4486_vm10 = vweird.f32 %v13170_v23  ;;  %v13207_v43 = vld [vmem:[#allocation37_spill] sm:$0xff] }
 0x7d0   : > { %5736 = vrot.lane.b32.xlu1 %v4375_v57, %s7019_s13  ;;  %v13183_v57 = vand.u32 2147483647, %v9571_v16  ;;  %6285 = vmatmul.msk.bf16.gmra.mxu0 %vm824_vm2, %v791_v36  ;;  %v10526_v36 = vadd.f32 %v10350_v25, %v4874_v46  ;;  %13190 = vst [vmem:[#allocation82_spill] sm:$0xff] %v10538_v61  ;;  %vm4487_vm11 = vweird.f32 %v10484_v18  ;;  %v4414_v52 = vsel %vm10548_vm7, %v9698_v31, %v4410_v41  ;;  %vm10589_vm7 = vmor %vm4786_vm0, %vm4787_vm13  ;;  %v13200_v61 = vld [vmem:[#allocation2_spill] sm:$0xff] }
 0x7d1   : > { %5740 = vrot.lane.b32.xlu0 %v4405_v26, %s7019_s13  ;;  %v10535_v1 = vpop.eup %6811  ;;  %13191 = vst [vmem:[#allocation9_spill] sm:$0xff] %v10540_v60  ;;  %v13195_v60 = vld [vmem:[#allocation106_spill] sm:$0xff]  ;;  %vm4831_vm12 = vweird.f32 %v9585_v5  ;;  %v5174_v2 = vmul.f32 %v10457_v11, %v5173_v30  ;;  %v5227_v4 = vand.u32 2147483648, %v10489_v58  ;;  %v4537_v24 = vand.u32 2147483648, %v13182_v59 }
 0x7d2   : > { %vm10504_vm3 = vcmp.eq.f32.partialorder %v13183_v57, 8.507059e+37  ;;  %v10522_v62 = vpop.f32.mrf.mxu0  ;;  %5786 = vrot.lane.b32.xlu2 %v4750_v42, %s7019_s13  ;;  %v4415_v57 = vand.u32 2147483647, %v13175_v7  ;;  %v13194_v42 = vld [vmem:[#allocation87_spill] sm:$0xff]  ;;  %v10562_v46 = vpop.eup %6813  ;;  %v4483_v7 = vsub.f32 1.0, %v4482_v39  ;;  %6817 = vrcp.f32 %v13195_v60 }
 0x7d3   : > { %v10518_v26 = vpop.permute.xlu0 %4126  ;;  %vm4456_vm9 = vweird.f32 %v13194_v42  ;;  %v4962_v39 = vmul.f32 %v10535_v1, %v13180_v38  ;;  %vm4502_vm15 = vweird.f32 %v9739_v54  ;;  %v13201_v20 = vand.u32 2147483647, %v9585_v5 }
 0x7d4   : > { %13187 = vst [vmem:[#allocation57_spill] sm:$0xff] %v10518_v26  ;;  %v10530_v48 = vpop.permute.xlu2 %4190  ;;  %vm4416_vm1 = vcmp.eq.f32.partialorder %v4415_v57, 8.507059e+37  ;;  %v10583_v31 = vpop.eup %6815  ;;  %v4445_v57 = vand.u32 2147483647, %v9609_v17  ;;  %v4527_v26 = vmul.f32 %v10562_v46, %v13182_v59  ;;  %v1095_v17 = vadd.f32 %v9911_v32, %v10448_v51 }
 0x7d5   : > { %13189 = vst [vmem:[#allocation7_spill] sm:$0xff] %v10530_v48  ;;  %v4419_v30 = vsel %vm4416_vm1, %v13200_v61, %v4414_v52  ;;  %v4444_v48 = vsel %vm10575_vm14, %v10396_v28, %v4440_v40  ;;  %vm10602_vm6 = vcmp.eq.f32.partialorder %v13201_v20, 8.507059e+37  ;;  %v4789_v28 = vsel %vm10589_vm7, %v10213_v63, %v10341_v53  ;;  %v13205_v40 = vld [vmem:[#allocation91_spill] sm:$0xff]  ;;  %v13206_v61 = vld [vmem:[#allocation64_spill] sm:$0xff]  ;;  %vm10661_vm7 = vmor %vm4456_vm9, %vm4457_vm5 }
 0x7d6   : > { %v4420_v35 = vmul.f32 %v13204_v27, %v4419_v30  ;;  %vm4877_vm13 = vweird.f32 %v10350_v25  ;;  %v4484_v20 = vmul.f32 %v10484_v18, %v4483_v7  ;;  %6819 = vrcp.f32 %v13205_v40  ;;  %1244 = vst.msk [vmem:[%s9159_s28 + $0x190] sm:$0xff] %vm824_vm2, %v1095_v17  ;;  %v13209_v17 = vld [vmem:[#allocation108_spill] sm:$0xff]  ;;  %vm10681_vm5 = vmor %vm4486_vm10, %vm4487_vm11 }
 0x7d7   : > { %vm4446_vm0 = vcmp.eq.f32.partialorder %v4445_v57, 8.507059e+37  ;;  %v4794_v63 = vsel %vm10504_vm3, %v10263_v10, %v4789_v28  ;;  %vm4501_vm14 = vweird.f32 %v13206_v61  ;;  %v4963_v52 = vsub.f32 1.0, %v4962_v39  ;;  %v13208_v28 = vld [vmem:[#allocation15_spill] sm:$0xff]  ;;  %vm4833_vm10 = vmor %vm4831_vm12, %vm4832_vm8 }
 0x7d8   : > { %v5217_v51 = vmul.f32 %v10583_v31, %v10489_v58  ;;  %5742 = vrot.lane.b32.xlu1 %v4420_v35, %s7019_s13  ;;  %v4449_v7 = vsel %vm4446_vm0, %v10463_v14, %v4444_v48  ;;  %v4795_v41 = vmul.f32 %v13207_v43, %v4794_v63  ;;  %v10639_v10 = vpop.eup %6817  ;;  %vm4876_vm3 = vweird.f32 %v9597_v45 }
 0x7d9   : > { %v10643_v50 = vadd.f32 %v10457_v11, %v5174_v2  ;;  %v10645_v39 = vor.u32 1.1754944e-38, %v5227_v4  ;;  %v5017_v57 = vand.u32 2147483648, %v13205_v40  ;;  %v4450_v35 = vmul.f32 %v13208_v28, %v4449_v7 }
 0x7da   : > { %v10629_v53 = vpop.f32.mrf.mxu0  ;;  %v4528_v14 = vsub.f32 1.0, %v4527_v26  ;;  %v5015_v48 = vand.u32 2147483647, %v13205_v40  ;;  %6821 = vrcp.f32 %v13209_v17  ;;  %5792 = vrot.lane.b32.xlu2 %v4795_v41, %s7019_s13  ;;  %v4455_v2 = vadd.f32 %v9733_v21, %v9821_v49 }
 0x7db   : > { %v10627_v27 = vpop.permute.xlu0 %4132  ;;  %v10665_v26 = vor.u32 1.1754944e-38, %v4537_v24  ;;  %5746 = vrot.lane.b32.xlu0 %v4450_v35, %s7019_s13  ;;  %v4460_v63 = vand.u32 2147483647, %v13194_v42  ;;  %v4485_v7 = vadd.f32 %v10484_v18, %v4484_v20  ;;  %v4490_v43 = vand.u32 2147483647, %v13170_v23 }
 0x7dc   : > { %v5727_v30 = vpop.permute.xlu2 %5726  ;;  %v13212_v49 = vand.u32 2147483647, %v9597_v45  ;;  %v10686_v42 = vmul.f32 %v10535_v1, %v4963_v52  ;;  %v5218_v20 = vsub.f32 1.0, %v5217_v51  ;;  %v4459_v28 = vsel %vm10661_vm7, %v9733_v21, %v4455_v2  ;;  %v10693_v35 = vpop.eup %6819  ;;  %v13217_v2 = vld [vmem:[#allocation111_spill] sm:$0xff] }
 0x7dd   : > { %5996 = vst.msk [vmem:[%s10617_s15] sm:$0xff] %vm3458_vm4, %v5727_v30  ;;  %v4572_v30 = vmul.f32 %v10639_v10, %v13195_v60  ;;  %vm4547_vm9 = vweird.f32 %v9764_v19  ;;  %v10700_v23 = vor.u32 1.1754944e-38, %v5017_v57  ;;  %vm4461_vm11 = vcmp.eq.f32.partialorder %v4460_v63, 8.507059e+37  ;;  %v10707_v51 = vpop.permute.xlu1 %4146  ;;  %v13219_v63 = vld [vmem:[#allocation16_spill] sm:$0xff] }
 0x7de   : > { %vm10673_vm0 = vcmp.eq.f32.partialorder %v13212_v49, 8.507059e+37  ;;  %v4489_v52 = vsel %vm10681_vm5, %v10484_v18, %v4485_v7  ;;  %vm4491_vm1 = vcmp.eq.f32.partialorder %v4490_v43, 8.507059e+37  ;;  %vm4922_vm7 = vweird.f32 %v10407_v15  ;;  %v13218_v49 = vld [vmem:[#allocation90_spill] sm:$0xff]  ;;  %v6985_v43 = vld [vmem:[%s7115_s18 + $0x218] sm:$0xff] }
 0x7df   : > { %v4529_v21 = vmul.f32 %v10562_v46, %v4528_v14  ;;  %v4464_v4 = vsel %vm4461_vm11, %v13217_v2, %v4459_v28  ;;  %v4494_v5 = vsel %vm4491_vm1, %v10557_v3, %v4489_v52  ;;  %v4834_v57 = vsel %vm4833_vm10, %v10289_v56, %v10441_v47  ;;  %v6984_v14 = vld [vmem:[%s7115_s18 + $0x210] sm:$0xff] }
 0x7e0   : > { %vm4546_vm8 = vweird.f32 %v13218_v49  ;;  %vm4532_vm12 = vweird.f32 %v10562_v46  ;;  %v4465_v18 = vmul.f32 %v13219_v63, %v4464_v4  ;;  %v4839_v7 = vsel %vm10602_vm6, %v10307_v22, %v4834_v57  ;;  %v10725_v52 = vpop.eup %6821  ;;  %v13220_v22 = vld [vmem:[#allocation35_spill] sm:$0xff]  ;;  %vm10738_vm6 = vmor %vm4501_vm14, %vm4502_vm15  ;;  %v13223_v63 = vld [vmem:[#allocation10_spill] sm:$0xff] }
 0x7e1   : > { %v792_v24 = vpack.c.bf16 %v6985_v43, %v6984_v14  ;;  %vm4921_vm1 = vweird.f32 %v9613_v9  ;;  %v5219_v56 = vmul.f32 %v10583_v31, %v5218_v20  ;;  %v10731_v47 = vmul.f32 %v10693_v35, %v13205_v40  ;;  %vm10755_vm15 = vmor %vm4876_vm3, %vm4877_vm13  ;;  %v13226_v43 = vld [vmem:[#allocation114_spill] sm:$0xff]  ;;  %v13236_v14 = vld [vmem:[#allocation68_spill] sm:$0xff] }
 0x7e2   : > { %v10723_v3 = vpop.f32.mrf.mxu0  ;;  %v4573_v16 = vsub.f32 1.0, %v4572_v30  ;;  %v4840_v2 = vmul.f32 %v13220_v22, %v4839_v7  ;;  %6823 = vrcp.f32 %v10707_v51  ;;  %v4582_v20 = vand.u32 2147483648, %v13195_v60  ;;  %5748 = vrot.lane.b32.xlu1 %v4465_v18, %s7019_s13 }
 0x7e3   : > { %v10721_v28 = vpop.permute.xlu0 %4138  ;;  %v4495_v30 = vmul.f32 %v13223_v63, %v4494_v5  ;;  %6286 = vmatmul.msk.bf16.gmra.mxu0 %vm824_vm2, %v792_v24  ;;  %v1097_v7 = vadd.f32 %v9911_v32, %v10522_v62  ;;  %6825 = vrcp.f32 %v13226_v43  ;;  %v13227_v5 = vld [vmem:[#allocation118_spill] sm:$0xff]  ;;  %v4505_v24 = vand.u32 2147483647, %v13206_v61  ;;  %v13231_v32 = vld [vmem:[#allocation107_spill] sm:$0xff] }
 0x7e4   : > { %v5733_v4 = vpop.permute.xlu2 %5732  ;;  %5798 = vrot.lane.b32.xlu2 %v4840_v2, %s7019_s13  ;;  %v4500_v18 = vadd.f32 %v9739_v54, %v13227_v5  ;;  %v4530_v22 = vadd.f32 %v10562_v46, %v4529_v21  ;;  %vm13228_vm14 = vweird.f32 %v13182_v59  ;;  %6827 = vrcp.f32 %v13231_v32  ;;  %v13237_v5 = vld [vmem:[#allocation22_spill] sm:$0xff] }
 0x7e5   : > { %5999 = vst.msk [vmem:[%s10617_s15 + $0x18] sm:$0xff] %vm3458_vm4, %v5733_v4  ;;  %vm10769_vm5 = vmor %vm13228_vm14, %vm4532_vm12  ;;  %v4617_v62 = vmul.f32 %v10725_v52, %v13209_v17  ;;  %5752 = vrot.lane.b32.xlu0 %v4495_v30, %s7019_s13  ;;  %v4535_v61 = vand.u32 2147483647, %v13182_v59  ;;  %v4879_v21 = vsel %vm10755_vm15, %v10350_v25, %v10526_v36  ;;  %v13232_v2 = vand.u32 2147483647, %v9613_v9  ;;  %v13235_v25 = vld [vmem:[#allocation113_spill] sm:$0xff] }
 0x7e6   : > { %1245 = vst.msk [vmem:[%s9159_s28 + $0x198] sm:$0xff] %vm824_vm2, %v1097_v7  ;;  %v4574_v63 = vmul.f32 %v10639_v10, %v4573_v16  ;;  %v4504_v30 = vsel %vm10738_vm6, %v9739_v54, %v4500_v18  ;;  %vm4506_vm3 = vcmp.eq.f32.partialorder %v4505_v24, 8.507059e+37  ;;  %v4534_v59 = vsel %vm10769_vm5, %v10562_v46, %v4530_v22  ;;  %v10805_v16 = vld [vmem:[%s12731_s4] ss:$0 sm:$0xff]  ;;  %vm10838_vm14 = vmor %vm4546_vm8, %vm4547_vm9  ;;  %v13254_v4 = vld [vmem:[#allocation95_spill] sm:$0xff] }
 0x7e7   : > { %vm10786_vm13 = vcmp.eq.f32.partialorder %v13232_v2, 8.507059e+37  ;;  %vm4592_vm10 = vweird.f32 %v9790_v12  ;;  %v4509_v36 = vsel %vm4506_vm3, %v13235_v25, %v4504_v30  ;;  %vm4536_vm11 = vcmp.eq.f32.partialorder %v4535_v61, 8.507059e+37  ;;  %vm10852_vm9 = vmor %vm4921_vm1, %vm4922_vm7  ;;  %v13243_v25 = vld [vmem:[#allocation13_spill] sm:$0xff]  ;;  %v13250_v22 = vld [vmem:[#allocation110_spill] sm:$0xff] }
 0x7e8   : > { %v4884_v7 = vsel %vm10673_vm0, %v10401_v34, %v4879_v21  ;;  %v1100_v54 = vadd.f32 %v10805_v16, %v10629_v53  ;;  %v10811_v46 = vadd.f32 %v10535_v1, %v10686_v42  ;;  %vm4967_vm12 = vweird.f32 %v10535_v1  ;;  %v10819_v41 = vpop.eup %6823 }
 0x7e9   : > { %v10815_v57 = vadd.f32 %v10583_v31, %v5219_v56  ;;  %vm4576_vm6 = vweird.f32 %v13195_v60  ;;  %v4539_v34 = vsel %vm4536_vm11, %v10665_v26, %v4534_v59  ;;  %vm4591_vm0 = vweird.f32 %v13236_v14  ;;  %v10832_v26 = vpop.eup %6825  ;;  %v6987_v59 = vld [vmem:[%s7115_s18 + $0x220] sm:$0xff] }
 0x7ea   : > { %vm4577_vm15 = vweird.f32 %v10639_v10  ;;  %v4618_v53 = vsub.f32 1.0, %v4617_v62  ;;  %v4510_v18 = vmul.f32 %v13237_v5, %v4509_v36  ;;  %1246 = vst.msk [vmem:[%s9159_s28 + $0x1a0] sm:$0xff] %vm824_vm2, %v1100_v54  ;;  %v4545_v56 = vadd.f32 %v9764_v19, %v9859_v8  ;;  %v10830_v24 = vpop.f32.mrf.mxu0  ;;  %v13240_v8 = vld [vmem:[#allocation40_spill] sm:$0xff]  ;;  %v10846_v30 = vpop.eup %6827 }
 0x7eb   : > { %v10824_v42 = vpop.permute.xlu0 %4144  ;;  %vm4966_vm5 = vweird.f32 %v13180_v38  ;;  %v5008_v45 = vsub.f32 1.0, %v10731_v47  ;;  %v4583_v62 = vor.u32 1.1754944e-38, %v4582_v20  ;;  %v4885_v21 = vmul.f32 %v13240_v8, %v4884_v7  ;;  %vm10869_vm7 = vmor %vm4576_vm6, %vm4577_vm15  ;;  %v13251_v8 = vld [vmem:[#allocation116_spill] sm:$0xff] }
 0x7ec   : > { %v5739_v2 = vpop.permute.xlu2 %5738  ;;  %5754 = vrot.lane.b32.xlu1 %v4510_v18, %s7019_s13  ;;  %v4540_v47 = vmul.f32 %v13243_v25, %v4539_v34  ;;  %v4549_v20 = vsel %vm10838_vm14, %v9764_v19, %v4545_v56  ;;  %v4550_v36 = vand.u32 2147483647, %v13218_v49  ;;  %v4575_v7 = vadd.f32 %v10639_v10, %v4574_v63  ;;  %v13246_v34 = vld [vmem:[#allocation122_spill] sm:$0xff]  ;;  %vm10933_vm14 = vmor %vm4591_vm0, %vm4592_vm10  ;;  %v13271_v56 = vld [vmem:[#allocation75_spill] sm:$0xff] }
 0x7ed   : > { %6002 = vst.msk [vmem:[%s10617_s15 + $0x30] sm:$0xff] %vm3458_vm4, %v5739_v2  ;;  %v5062_v54 = vand.u32 2147483648, %v13231_v32  ;;  %6829 = vrcp.f32 %v13246_v34  ;;  %5804 = vrot.lane.b32.xlu2 %v4885_v21, %s7019_s13  ;;  %v4580_v19 = vand.u32 2147483647, %v13195_v60  ;;  %v4924_v49 = vsel %vm10852_vm9, %v10407_v15, %v10555_v13  ;;  %v13252_v2 = vld [vmem:[#allocation117_spill] sm:$0xff] }
 0x7ee   : > { %v4619_v63 = vmul.f32 %v10725_v52, %v4618_v53  ;;  %v4662_v5 = vmul.f32 %v10832_v26, %v13226_v43  ;;  %5758 = vrot.lane.b32.xlu0 %v4540_v47, %s7019_s13  ;;  %vm4551_vm8 = vcmp.eq.f32.partialorder %v4550_v36, 8.507059e+37  ;;  %v4579_v18 = vsel %vm10869_vm7, %v10639_v10, %v4575_v7  ;;  %v10899_v53 = vpop.permute.xlu1 %4152  ;;  %v13253_v7 = vld [vmem:[#allocation124_spill] sm:$0xff]  ;;  %vm10947_vm7 = vmor %vm4966_vm5, %vm4967_vm12 }
 0x7ef   : > { %v13247_v60 = vand.u32 2147483647, %v13180_v38  ;;  %v5009_v15 = vmul.f32 %v10693_v35, %v5008_v45  ;;  %v10897_v13 = vmul.f32 %v10819_v41, %v10707_v51  ;;  %6831 = vrcp.f32 %v13250_v22  ;;  %v6988_v45 = vld [vmem:[%s7115_s18 + $0x228] sm:$0xff] }
 0x7f0   : > { %v4554_v21 = vsel %vm4551_vm8, %v13251_v8, %v4549_v20  ;;  %vm4637_vm3 = vweird.f32 %v13252_v2  ;;  %vm4581_vm11 = vcmp.eq.f32.partialorder %v4580_v19, 8.507059e+37  ;;  %v4929_v10 = vsel %vm10786_vm13, %v10468_v29, %v4924_v49  ;;  %v13255_v19 = vld [vmem:[#allocation18_spill] sm:$0xff] }
 0x7f1   : > { %vm10890_vm1 = vcmp.eq.f32.partialorder %v13247_v60, 8.507059e+37  ;;  %v793_v25 = vpack.c.bf16 %v6988_v45, %v6987_v59  ;;  %v1102_v47 = vadd.f32 %v10805_v16, %v10723_v3  ;;  %vm5012_vm6 = vweird.f32 %v10693_v35 }
 0x7f2   : > { %v10914_v36 = vmul.f32 %v10846_v30, %v13231_v32  ;;  %vm4622_vm15 = vweird.f32 %v10725_v52  ;;  %v4584_v20 = vsel %vm4581_vm11, %v4583_v62, %v4579_v18  ;;  %v4590_v9 = vadd.f32 %v9790_v12, %v13253_v7  ;;  %v1106_v59 = vpop.f32.mrf.mxu0 }
 0x7f3   : > { %vm4636_vm13 = vweird.f32 %v13254_v4  ;;  %v4663_v29 = vsub.f32 1.0, %v4662_v5  ;;  %v4555_v49 = vmul.f32 %v13255_v19, %v4554_v21  ;;  %v10921_v60 = vpop.permute.xlu0 %4150  ;;  %1247 = vst.msk [vmem:[%s9159_s28 + $0x1a8] sm:$0xff] %vm824_vm2, %v1102_v47  ;;  %v4595_v3 = vand.u32 2147483647, %v13236_v14  ;;  %v10927_v45 = vpop.eup %6829  ;;  %6287 = vmatmul.msk.bf16.gmra.mxu0 %vm824_vm2, %v793_v25  ;;  %v13264_v25 = vld [vmem:[#allocation127_spill] sm:$0xff] }
 0x7f4   : > { %v4620_v8 = vadd.f32 %v10725_v52, %v4619_v63  ;;  %vm5011_vm9 = vweird.f32 %v13205_v40  ;;  %v10938_v5 = vor.u32 1.1754944e-38, %v5062_v54  ;;  %6833 = vrcp.f32 %v10899_v53  ;;  %v13258_v63 = vld [vmem:[#allocation46_spill] sm:$0xff]  ;;  %v5745_v47 = vpop.permute.xlu2 %5744  ;;  %v13261_v54 = vld [vmem:[#allocation20_spill] sm:$0xff] }
 0x7f5   : > { %v4627_v18 = vand.u32 2147483648, %v13209_v17  ;;  %v4930_v21 = vmul.f32 %v13258_v63, %v4929_v10  ;;  %vm4621_vm10 = vweird.f32 %v13209_v17  ;;  %5760 = vrot.lane.b32.xlu1 %v4555_v49, %s7019_s13  ;;  %v4585_v7 = vmul.f32 %v13261_v54, %v4584_v20  ;;  %6005 = vst.msk [vmem:[%s10617_s15 + $0x48] sm:$0xff] %vm3458_vm4, %v5745_v47  ;;  %v10961_v19 = vpop.eup %6831 }
 0x7f6   : > { %v4594_v10 = vsel %vm10933_vm14, %v9790_v12, %v4590_v9  ;;  %v4625_v38 = vand.u32 2147483647, %v13209_v17  ;;  %v10964_v63 = vadd.f32 %v10693_v35, %v5009_v15  ;;  %v5053_v61 = vsub.f32 1.0, %v10914_v36  ;;  %vm10969_vm12 = vmor %vm4621_vm10, %vm4622_vm15  ;;  %v11007_v47 = vpop.permute.xlu1 %4158 }
 0x7f7   : > { %6835 = vrcp.f32 %v13264_v25  ;;  %5810 = vrot.lane.b32.xlu2 %v4930_v21, %s7019_s13  ;;  %v4969_v12 = vsel %vm10947_vm7, %v10535_v1, %v10811_v46  ;;  %v4664_v17 = vmul.f32 %v10832_v26, %v4663_v29  ;;  %v4707_v15 = vmul.f32 %v10927_v45, %v13246_v34  ;;  %5764 = vrot.lane.b32.xlu0 %v4585_v7, %s7019_s13  ;;  %v13267_v29 = vld [vmem:[#allocation119_spill] sm:$0xff]  ;;  %v13272_v7 = vld [vmem:[#allocation21_spill] sm:$0xff]  ;;  %vm11026_vm7 = vmor %vm4636_vm13, %vm4637_vm3 }
 0x7f8   : > { %vm4596_vm0 = vcmp.eq.f32.partialorder %v4595_v3, 8.507059e+37  ;;  %v4624_v36 = vsel %vm10969_vm12, %v10725_v52, %v4620_v8  ;;  %vm10988_vm5 = vcmp.eq.f32.partialorder %v5015_v48, 8.507059e+37  ;;  %v4628_v1 = vor.u32 1.1754944e-38, %v4627_v18  ;;  %v13268_v3 = vld [vmem:[#allocation5_spill] sm:$0xff]  ;;  %v13269_v8 = vld [vmem:[#allocation126_spill] sm:$0xff]  ;;  %vm11041_vm3 = vmor %vm5011_vm9, %vm5012_vm6 }
 0x7f9   : > { %v5107_v46 = vand.u32 2147483648, %v13250_v22  ;;  %v4599_v49 = vsel %vm4596_vm0, %v13267_v29, %v4594_v10  ;;  %v1105_v62 = vadd.f32 %v10805_v16, %v10830_v24  ;;  %vm4682_vm8 = vweird.f32 %v13268_v3  ;;  %v13270_v24 = vld [vmem:[#allocation115_spill] sm:$0xff] }
 0x7fa   : > { %v5097_v52 = vmul.f32 %v10961_v19, %v13250_v22  ;;  %vm4626_vm11 = vcmp.eq.f32.partialorder %v4625_v38, 8.507059e+37  ;;  %v4974_v48 = vsel %vm10890_vm1, %v10559_v33, %v4969_v12  ;;  %v4635_v18 = vadd.f32 %v13252_v2, %v13269_v8  ;;  %v11004_v21 = vpop.eup %6833  ;;  %v1109_v29 = vpop.f32.mrf.mxu0 }
 0x7fb   : > { %vm5057_vm15 = vweird.f32 %v10846_v30  ;;  %vm4667_vm14 = vweird.f32 %v10832_v26  ;;  %6837 = vrcp.f32 %v13270_v24  ;;  %v4629_v14 = vsel %vm4626_vm11, %v4628_v1, %v4624_v36  ;;  %1248 = vst.msk [vmem:[%s9159_s28 + $0x1b0] sm:$0xff] %vm824_vm2, %v1105_v62  ;;  %v11016_v38 = vpop.permute.xlu0 %4156 }
 0x7fc   : > { %v1107_v54 = vadd.f32 %v10805_v16, %v1106_v59  ;;  %vm4681_vm1 = vweird.f32 %v13271_v56  ;;  %v4708_v33 = vsub.f32 1.0, %v4707_v15  ;;  %v4600_v10 = vmul.f32 %v13272_v7, %v4599_v49  ;;  %v5751_v62 = vpop.permute.xlu2 %5750 }
 0x7fd   : > { %v4640_v20 = vand.u32 2147483647, %v13254_v4  ;;  %v4665_v12 = vadd.f32 %v10832_v26, %v4664_v17  ;;  %v11020_v8 = vpop.eup %6835  ;;  %v5054_v15 = vmul.f32 %v10846_v30, %v5053_v61  ;;  %vm5056_vm10 = vweird.f32 %v13231_v32  ;;  %v13275_v17 = vld [vmem:[#allocation47_spill] sm:$0xff]  ;;  %v13278_v61 = vld [vmem:[#allocation25_spill] sm:$0xff]  ;;  %6008 = vst.msk [vmem:[%s10617_s15 + $0x60] sm:$0xff] %vm3458_vm4, %v5751_v62 }
 0x7fe   : > { %v4672_v1 = vand.u32 2147483648, %v13226_v43  ;;  %v4975_v49 = vmul.f32 %v13275_v17, %v4974_v48  ;;  %1249 = vst.msk [vmem:[%s9159_s28 + $0x1b8] sm:$0xff] %vm824_vm2, %v1107_v54  ;;  %vm4666_vm13 = vweird.f32 %v13226_v43  ;;  %5766 = vrot.lane.b32.xlu1 %v4600_v10, %s7019_s13  ;;  %v4630_v7 = vmul.f32 %v13278_v61, %v4629_v14  ;;  %v6990_v62 = vld [vmem:[%s7115_s18 + $0x238] sm:$0xff] }
 0x7ff   : > { %v4639_v48 = vsel %vm11026_vm7, %v13252_v2, %v4635_v18  ;;  %v4670_v54 = vand.u32 2147483647, %v13226_v43  ;;  %v5098_v17 = vsub.f32 1.0, %v5097_v52  ;;  %v11054_v40 = vor.u32 1.1754944e-38, %v5107_v46  ;;  %vm11058_vm6 = vmor %vm4666_vm13, %vm4667_vm14 }
 0x800   : > { %6839 = vrcp.f32 %v10005_v44  ;;  %5816 = vrot.lane.b32.xlu2 %v4975_v49, %s7019_s13  ;;  %v5014_v43 = vsel %vm11041_vm3, %v10693_v35, %v10964_v63  ;;  %v4709_v2 = vmul.f32 %v10927_v45, %v4708_v33  ;;  %v4752_v46 = vmul.f32 %v11020_v8, %v13264_v25  ;;  %5770 = vrot.lane.b32.xlu0 %v4630_v7, %s7019_s13  ;;  %v13284_v33 = vld [vmem:[#allocation121_spill] sm:$0xff]  ;;  %v6989_v49 = vld [vmem:[%s7115_s18 + $0x230] sm:$0xff]  ;;  %v13286_v7 = vld [vmem:[#allocation78_spill] sm:$0xff] }
 0x801   : > { %vm4641_vm9 = vcmp.eq.f32.partialorder %v4640_v20, 8.507059e+37  ;;  %v4669_v52 = vsel %vm11058_vm6, %v10832_v26, %v4665_v12  ;;  %v11075_v18 = vpop.eup %6837  ;;  %v5055_v14 = vadd.f32 %v10846_v30, %v5054_v15  ;;  %v13281_v10 = vand.u32 2147483647, %v13231_v32  ;;  %v13285_v12 = vld [vmem:[#allocation129_spill] sm:$0xff]  ;;  %v13303_v35 = vld [vmem:[#allocation30_spill] sm:$0xff] }
 0x802   : > { %v4673_v63 = vor.u32 1.1754944e-38, %v4672_v1  ;;  %v4644_v59 = vsel %vm4641_vm9, %v13284_v33, %v4639_v48  ;;  %v794_v20 = vpack.c.bf16 %v6990_v62, %v6989_v49  ;;  %vm4727_vm0 = vweird.f32 %v9903_v0  ;;  %v13293_v62 = vld [vmem:[#allocation123_spill] sm:$0xff] }
 0x803   : > { %vm11080_vm12 = vcmp.eq.f32.partialorder %v13281_v10, 8.507059e+37  ;;  %vm4671_vm11 = vcmp.eq.f32.partialorder %v4670_v54, 8.507059e+37  ;;  %v5019_v26 = vsel %vm10988_vm5, %v10700_v23, %v5014_v43  ;;  %v4680_v15 = vadd.f32 %v13268_v3, %v13285_v12  ;;  %v13287_v54 = vld [vmem:[#allocation23_spill] sm:$0xff]  ;;  %v11099_v33 = vpop.permute.xlu0 %4162  ;;  %vm11111_vm5 = vmor %vm4681_vm1, %vm4682_vm8  ;;  %v13294_v12 = vld [vmem:[#allocation29_spill] sm:$0xff] }
 0x804   : > { %v1110_v36 = vadd.f32 %v10805_v16, %v1109_v29  ;;  %v5099_v1 = vmul.f32 %v10961_v19, %v5098_v17  ;;  %v5152_v4 = vand.u32 2147483648, %v13270_v24  ;;  %vm4712_vm14 = vweird.f32 %v10927_v45  ;;  %v1111_v29 = vpop.f32.mrf.mxu0  ;;  %v5757_v49 = vpop.permute.xlu2 %5756  ;;  %vm11127_vm8 = vmor %vm5056_vm10, %vm5057_vm15  ;;  %6288 = vmatmul.msk.bf16.gmra.mxu0 %vm824_vm2, %v794_v20 }
 0x805   : > { %v4674_v61 = vsel %vm4671_vm11, %v4673_v63, %v4669_v52  ;;  %vm4726_vm7 = vweird.f32 %v13286_v7  ;;  %v4753_v48 = vsub.f32 1.0, %v4752_v46  ;;  %v4645_v10 = vmul.f32 %v13287_v54, %v4644_v59  ;;  %v13290_v63 = vld [vmem:[#allocation50_spill] sm:$0xff]  ;;  %6011 = vst.msk [vmem:[%s10617_s15 + $0x78] sm:$0xff] %vm3458_vm4, %v5757_v49 }
 0x806   : > { %v4685_v23 = vand.u32 2147483647, %v13271_v56  ;;  %v4710_v9 = vadd.f32 %v10927_v45, %v4709_v2  ;;  %1250 = vst.msk [vmem:[%s9159_s28 + $0x1c0] sm:$0xff] %vm824_vm2, %v1110_v36  ;;  %v11105_v17 = vpop.eup %6839  ;;  %vm5101_vm3 = vweird.f32 %v13250_v22  ;;  %v5142_v46 = vmul.f32 %v11075_v18, %v13270_v24  ;;  %v11118_v2 = vpop.permute.xlu1 %4164 }
 0x807   : > { %vm4711_vm13 = vweird.f32 %v13246_v34  ;;  %v4717_v52 = vand.u32 2147483648, %v13246_v34  ;;  %v5020_v59 = vmul.f32 %v13290_v63, %v5019_v26  ;;  %6841 = vrcp.f32 %v13293_v62  ;;  %5772 = vrot.lane.b32.xlu1 %v4645_v10, %s7019_s13 }
 0x808   : > { %v4675_v36 = vmul.f32 %v13294_v12, %v4674_v61  ;;  %v4684_v26 = vsel %vm11111_vm5, %v13268_v3, %v4680_v15  ;;  %v4715_v32 = vand.u32 2147483647, %v13246_v34  ;;  %vm5102_vm15 = vweird.f32 %v10961_v19  ;;  %vm11145_vm1 = vmor %vm4711_vm13, %vm4712_vm14 }
 0x809   : > { %v5150_v54 = vand.u32 2147483647, %v13270_v24  ;;  %6843 = vrcp.f32 %v10076_v55  ;;  %5822 = vrot.lane.b32.xlu2 %v5020_v59, %s7019_s13  ;;  %v5059_v3 = vsel %vm11127_vm8, %v10846_v30, %v5055_v14  ;;  %v4754_v34 = vmul.f32 %v11020_v8, %v4753_v48  ;;  %v13300_v48 = vld [vmem:[#allocation8_spill] sm:$0xff] }
 0x80a   : > { %v4797_v20 = vmul.f32 %v11105_v17, %v10005_v44  ;;  %5776 = vrot.lane.b32.xlu0 %v4675_v36, %s7019_s13  ;;  %vm4686_vm10 = vcmp.eq.f32.partialorder %v4685_v23, 8.507059e+37  ;;  %v4714_v15 = vsel %vm11145_vm1, %v10927_v45, %v4710_v9  ;;  %v13297_v61 = vand.u32 2147483647, %v13250_v22  ;;  %v13301_v9 = vld [vmem:[#allocation132_spill] sm:$0xff] }
 0x80b   : > { %v5143_v63 = vsub.f32 1.0, %v5142_v46  ;;  %v11167_v30 = vor.u32 1.1754944e-38, %v5152_v4  ;;  %v4718_v14 = vor.u32 1.1754944e-38, %v4717_v52  ;;  %v4689_v59 = vsel %vm4686_vm10, %v13300_v48, %v4684_v26  ;;  %v11185_v36 = vpop.permute.xlu0 %4168  ;;  %v13310_v48 = vld [vmem:[#allocation34_spill] sm:$0xff] }
 0x80c   : > { %vm11163_vm6 = vcmp.eq.f32.partialorder %v13297_v61, 8.507059e+37  ;;  %vm4772_vm9 = vweird.f32 %v9953_v6  ;;  %v5100_v23 = vadd.f32 %v10961_v19, %v5099_v1  ;;  %vm4716_vm11 = vcmp.eq.f32.partialorder %v4715_v32, 8.507059e+37  ;;  %v13302_v1 = vld [vmem:[#allocation85_spill] sm:$0xff]  ;;  %v1114_v10 = vpop.f32.mrf.mxu0 }
 0x80d   : > { %v5064_v45 = vsel %vm11080_vm12, %v10938_v5, %v5059_v3  ;;  %v4725_v49 = vadd.f32 %v9903_v0, %v13301_v9  ;;  %vm5147_vm14 = vweird.f32 %v11075_v18  ;;  %v5195_v4 = vand.u32 2147483647, %v13293_v62  ;;  %v11181_v56 = vpop.eup %6841  ;;  %vm11195_vm12 = vmor %vm4726_vm7, %vm4727_vm0 }
 0x80e   : > { %vm4757_vm5 = vweird.f32 %v11020_v8  ;;  %v4719_v46 = vsel %vm4716_vm11, %v4718_v14, %v4714_v15  ;;  %v1112_v52 = vadd.f32 %v10805_v16, %v1111_v29  ;;  %vm4771_vm13 = vweird.f32 %v13302_v1  ;;  %v5763_v14 = vpop.permute.xlu2 %5762  ;;  %vm11210_vm0 = vmor %vm5101_vm3, %vm5102_vm15 }
 0x80f   : > { %v4798_v12 = vsub.f32 1.0, %v4797_v20  ;;  %v4690_v5 = vmul.f32 %v13303_v35, %v4689_v59  ;;  %v4730_v26 = vand.u32 2147483647, %v13286_v7  ;;  %v4755_v32 = vadd.f32 %v11020_v8, %v4754_v34  ;;  %v11189_v3 = vpop.eup %6843  ;;  %v13306_v34 = vld [vmem:[#allocation53_spill] sm:$0xff]  ;;  %6014 = vst.msk [vmem:[%s10617_s15 + $0x90] sm:$0xff] %vm3458_vm4, %v5763_v14  ;;  %v11226_v35 = vpop.permute.xlu1 %4170  ;;  %v6992_v7 = vld [vmem:[%s7115_s18 + $0x248] sm:$0xff] }
 0x810   : > { %v5144_v20 = vmul.f32 %v11075_v18, %v5143_v63  ;;  %vm5146_vm8 = vweird.f32 %v13270_v24  ;;  %vm4756_vm1 = vweird.f32 %v13264_v25  ;;  %v4762_v15 = vand.u32 2147483648, %v13264_v25  ;;  %1251 = vst.msk [vmem:[%s9159_s28 + $0x1c8] sm:$0xff] %vm824_vm2, %v1112_v52  ;;  %v13309_v63 = vld [vmem:[#allocation128_spill] sm:$0xff] }
 0x811   : > { %v5065_v61 = vmul.f32 %v13306_v34, %v5064_v45  ;;  %6845 = vrcp.f32 %v13309_v63  ;;  %5778 = vrot.lane.b32.xlu1 %v4690_v5, %s7019_s13  ;;  %v4720_v59 = vmul.f32 %v13310_v48, %v4719_v46  ;;  %v4729_v45 = vsel %vm11195_vm12, %v9903_v0, %v4725_v49  ;;  %vm11232_vm7 = vmor %vm4756_vm1, %vm4757_vm5 }
 0x812   : > { %v4760_v9 = vand.u32 2147483647, %v13264_v25  ;;  %v5187_v22 = vmul.f32 %v11181_v56, %v13293_v62  ;;  %6847 = vrcp.f32 %v10145_v37  ;;  %v5104_v0 = vsel %vm11210_vm0, %v10961_v19, %v5100_v23  ;;  %v13314_v23 = vld [vmem:[#allocation12_spill] sm:$0xff]  ;;  %vm11289_vm1 = vmor %vm5146_vm8, %vm5147_vm14 }
 0x813   : > { %5828 = vrot.lane.b32.xlu2 %v5065_v61, %s7019_s13  ;;  %v4799_v49 = vmul.f32 %v11105_v17, %v4798_v12  ;;  %v4842_v5 = vmul.f32 %v11189_v3, %v10076_v55  ;;  %5782 = vrot.lane.b32.xlu0 %v4720_v59, %s7019_s13  ;;  %vm4731_vm3 = vcmp.eq.f32.partialorder %v4730_v26, 8.507059e+37  ;;  %v4759_v25 = vsel %vm11232_vm7, %v11020_v8, %v4755_v32  ;;  %v13313_v61 = vld [vmem:[#allocation130_spill] sm:$0xff]  ;;  %v13315_v59 = vld [vmem:[#allocation137_spill] sm:$0xff]  ;;  %v11268_v46 = vpop.permute.xlu0 %4174 }
 0x814   : > { %v5145_v29 = vadd.f32 %v11075_v18, %v5144_v20  ;;  %v4763_v34 = vor.u32 1.1754944e-38, %v4762_v15  ;;  %v4734_v14 = vsel %vm4731_vm3, %v13313_v61, %v4729_v45  ;;  %v1115_v19 = vadd.f32 %v10805_v16, %v1114_v10  ;;  %v6991_v26 = vld [vmem:[%s7115_s18 + $0x240] sm:$0xff]  ;;  %v13316_v15 = vld [vmem:[#allocation97_spill] sm:$0xff]  ;;  %v13317_v45 = vld [vmem:[#allocation36_spill] sm:$0xff] }
 0x815   : > { %vm4817_vm15 = vweird.f32 %v13314_v23  ;;  %vm4761_vm10 = vcmp.eq.f32.partialorder %v4760_v9, 8.507059e+37  ;;  %v5109_v12 = vsel %vm11163_vm6, %v11054_v40, %v5104_v0  ;;  %v795_v48 = vpack.c.bf16 %v6992_v7, %v6991_v26  ;;  %v1116_v0 = vpop.f32.mrf.mxu0  ;;  %vm11277_vm6 = vmor %vm4771_vm13, %vm4772_vm9 }
 0x816   : > { %v4770_v8 = vadd.f32 %v9953_v6, %v13315_v59  ;;  %v5188_v32 = vsub.f32 1.0, %v5187_v22  ;;  %vm4801_vm11 = vweird.f32 %v10005_v44  ;;  %vm4802_vm5 = vweird.f32 %v11105_v17  ;;  %1252 = vst.msk [vmem:[%s9159_s28 + $0x1d0] sm:$0xff] %vm824_vm2, %v1115_v19  ;;  %v5769_v26 = vpop.permute.xlu2 %5768 }
 0x817   : > { %v4764_v20 = vsel %vm4761_vm10, %v4763_v34, %v4759_v25  ;;  %v11263_v10 = vpop.eup %6845  ;;  %vm4816_vm12 = vweird.f32 %v13316_v15  ;;  %v4800_v40 = vadd.f32 %v11105_v17, %v4799_v49  ;;  %v4843_v43 = vsub.f32 1.0, %v4842_v5  ;;  %v13320_v34 = vld [vmem:[#allocation134_spill] sm:$0xff]  ;;  %6289 = vmatmul.msk.bf16.gmra.mxu0 %vm824_vm2, %v795_v48  ;;  %6017 = vst.msk [vmem:[%s10617_s15 + $0xa8] sm:$0xff] %vm3458_vm4, %v5769_v26  ;;  %vm11309_vm9 = vmor %vm4801_vm11, %vm4802_vm5 }
 0x818   : > { %v4735_v9 = vmul.f32 %v13317_v45, %v4734_v14  ;;  %v4775_v22 = vand.u32 2147483647, %v13302_v1  ;;  %v11271_v61 = vpop.eup %6847  ;;  %v4805_v49 = vand.u32 2147483647, %v10005_v44  ;;  %v4807_v5 = vand.u32 2147483648, %v10005_v44  ;;  %v13321_v14 = vld [vmem:[#allocation58_spill] sm:$0xff] }
 0x819   : > { %6849 = vrcp.f32 %v13320_v34  ;;  %v5110_v19 = vmul.f32 %v13321_v14, %v5109_v12  ;;  %v13324_v1 = vld [vmem:[#allocation33_spill] sm:$0xff]  ;;  %v4774_v12 = vsel %vm11277_vm6, %v9953_v6, %v4770_v8  ;;  %v1117_v45 = vadd.f32 %v10805_v16, %v1116_v0 }
 0x81a   : > { %5784 = vrot.lane.b32.xlu1 %v4735_v9, %s7019_s13  ;;  %v4765_v59 = vmul.f32 %v13324_v1, %v4764_v20  ;;  %v5189_v14 = vmul.f32 %v11181_v56, %v5188_v32  ;;  %v5232_v52 = vmul.f32 %v11263_v10, %v13309_v63  ;;  %v13327_v20 = vld [vmem:[#allocation148_spill] sm:$0xff]  ;;  %v5149_v6 = vsel %vm11289_vm1, %v11075_v18, %v5145_v29  ;;  %v11336_v18 = vpop.permute.xlu1 %4176  ;;  %vm11365_vm1 = vmor %vm4816_vm12, %vm4817_vm15 }
 0x81b   : > { %6851 = vrcp.f32 %v13327_v20  ;;  %5834 = vrot.lane.b32.xlu2 %v5110_v19, %s7019_s13  ;;  %v13328_v8 = vand.u32 2147483647, %v13316_v15  ;;  %v4844_v44 = vmul.f32 %v11189_v3, %v4843_v43  ;;  %v4887_v9 = vmul.f32 %v11271_v61, %v10145_v37  ;;  %1253 = vst.msk [vmem:[%s9159_s28 + $0x1d8] sm:$0xff] %vm824_vm2, %v1117_v45  ;;  %v13331_v43 = vld [vmem:[#allocation131_spill] sm:$0xff]  ;;  %v13336_v1 = vld [vmem:[#allocation4_spill] sm:$0xff]  ;;  %v11357_v45 = vpop.permute.xlu0 %4180  ;;  %v13343_v15 = vld [vmem:[#allocation14_spill] sm:$0xff] }
 0x81c   : > { %5788 = vrot.lane.b32.xlu0 %v4765_v59, %s7019_s13  ;;  %vm4776_vm13 = vcmp.eq.f32.partialorder %v4775_v22, 8.507059e+37  ;;  %v4804_v0 = vsel %vm11309_vm9, %v11105_v17, %v4800_v40  ;;  %vm5151_vm8 = vcmp.eq.f32.partialorder %v5150_v54, 8.507059e+37  ;;  %vm5191_vm0 = vweird.f32 %v13293_v62  ;;  %v13332_v19 = vld [vmem:[#allocation135_spill] sm:$0xff] }
 0x81d   : > { %vm11320_vm14 = vcmp.eq.f32.partialorder %v13328_v8, 8.507059e+37  ;;  %v4808_v29 = vor.u32 1.1754944e-38, %v4807_v5  ;;  %v4779_v25 = vsel %vm4776_vm13, %v13331_v43, %v4774_v12  ;;  %vm4862_vm7 = vweird.f32 %v13332_v19  ;;  %v13337_v12 = vld [vmem:[#allocation26_spill] sm:$0xff]  ;;  %v13340_v8 = vld [vmem:[#allocation59_spill] sm:$0xff] }
 0x81e   : > { %vm11342_vm3 = vcmp.eq.f32.partialorder %v5195_v4, 8.507059e+37  ;;  %v13335_v17 = vand.u32 2147483648, %v13293_v62  ;;  %vm4806_vm10 = vcmp.eq.f32.partialorder %v4805_v49, 8.507059e+37  ;;  %v5154_v24 = vsel %vm5151_vm8, %v11167_v30, %v5149_v6  ;;  %v1119_v30 = vpop.f32.mrf.mxu0 }
 0x81f   : > { %v11349_v54 = vpop.eup %6849  ;;  %v5190_v5 = vadd.f32 %v11181_v56, %v5189_v14  ;;  %vm5192_vm11 = vweird.f32 %v11181_v56  ;;  %v5233_v26 = vsub.f32 1.0, %v5232_v52  ;;  %v4809_v7 = vsel %vm4806_vm10, %v4808_v29, %v4804_v0  ;;  %v13344_v29 = vld [vmem:[#allocation31_spill] sm:$0xff]  ;;  %v13353_v0 = vld [vmem:[#allocation136_spill] sm:$0xff] }
 0x820   : > { %v5198_v40 = vor.u32 1.1754944e-38, %v13335_v17  ;;  %vm4861_vm5 = vweird.f32 %v13336_v1  ;;  %v4845_v4 = vadd.f32 %v11189_v3, %v4844_v44  ;;  %vm4847_vm6 = vweird.f32 %v11189_v3  ;;  %vm11377_vm13 = vmor %vm5191_vm0, %vm5192_vm11 }
 0x821   : > { %v4888_v59 = vsub.f32 1.0, %v4887_v9  ;;  %v4780_v49 = vmul.f32 %v13337_v12, %v4779_v25  ;;  %v11359_v48 = vpop.eup %6851  ;;  %vm4846_vm9 = vweird.f32 %v10076_v55  ;;  %v4850_v14 = vand.u32 2147483647, %v10076_v55  ;;  %v5775_v9 = vpop.permute.xlu2 %5774 }
 0x822   : > { %v4852_v6 = vand.u32 2147483648, %v10076_v55  ;;  %v5155_v44 = vmul.f32 %v13340_v8, %v5154_v24  ;;  %6853 = vrcp.f32 %v13343_v15  ;;  %v4810_v43 = vmul.f32 %v13344_v29, %v4809_v7  ;;  %6020 = vst.msk [vmem:[%s10617_s15 + $0xc0] sm:$0xff] %vm3458_vm4, %v5775_v9  ;;  %v13345_v55 = vld [vmem:[#allocation139_spill] sm:$0xff]  ;;  %vm11396_vm15 = vmor %vm4846_vm9, %vm4847_vm6  ;;  %v13348_v7 = vld [vmem:[#allocation154_spill] sm:$0xff]  ;;  %v11433_v12 = vpop.permute.xlu1 %4182 }
 0x823   : > { %5790 = vrot.lane.b32.xlu1 %v4780_v49, %s7019_s13  ;;  %v4819_v25 = vsel %vm11365_vm1, %v13314_v23, %v13345_v55  ;;  %v1120_v62 = vadd.f32 %v10805_v16, %v1119_v30  ;;  %v5234_v17 = vmul.f32 %v11263_v10, %v5233_v26  ;;  %v5277_v24 = vmul.f32 %v11349_v54, %v13320_v34  ;;  %v13352_v9 = vld [vmem:[#allocation17_spill] sm:$0xff] }
 0x824   : > { %6855 = vrcp.f32 %v13348_v7  ;;  %5840 = vrot.lane.b32.xlu2 %v5155_v44, %s7019_s13  ;;  %v5194_v23 = vsel %vm11377_vm13, %v11181_v56, %v5190_v5  ;;  %v13349_v49 = vand.u32 2147483647, %v13336_v1  ;;  %vm5236_vm8 = vweird.f32 %v13309_v63  ;;  %5794 = vrot.lane.b32.xlu0 %v4810_v43, %s7019_s13  ;;  %13354 = vst [vmem:[#allocation89_spill] sm:$0xff] %v11433_v12  ;;  %v13364_v1 = vld [vmem:[#allocation38_spill] sm:$0xff]  ;;  %v13374_v26 = vld [vmem:[#allocation125_spill] sm:$0xff] }
 0x825   : > { %v4889_v30 = vmul.f32 %v11271_v61, %v4888_v59  ;;  %v4932_v52 = vmul.f32 %v11359_v48, %v13327_v20  ;;  %v4849_v56 = vsel %vm11396_vm15, %v11189_v3, %v4845_v4  ;;  %1254 = vst.msk [vmem:[%s9159_s28 + $0x1e0] sm:$0xff] %vm824_vm2, %v1120_v62  ;;  %v5240_v5 = vand.u32 2147483647, %v13309_v63  ;;  %v6993_v3 = vld [vmem:[%s7115_s18 + $0x250] sm:$0xff]  ;;  %v6994_v4 = vld [vmem:[%s7115_s18 + $0x258] sm:$0xff] }
 0x826   : > { %vm11407_vm12 = vcmp.eq.f32.partialorder %v13349_v49, 8.507059e+37  ;;  %v5242_v8 = vand.u32 2147483648, %v13309_v63  ;;  %v4853_v44 = vor.u32 1.1754944e-38, %v4852_v6  ;;  %v4824_v59 = vsel %vm11320_vm14, %v13352_v9, %v4819_v25  ;;  %v13355_v25 = vld [vmem:[#allocation120_spill] sm:$0xff]  ;;  %v11442_v49 = vpop.permute.xlu0 %4186  ;;  %v13361_v9 = vld [vmem:[#allocation62_spill] sm:$0xff] }
 0x827   : > { %vm4907_vm0 = vweird.f32 %v13353_v0  ;;  %vm5237_vm10 = vweird.f32 %v11263_v10  ;;  %vm4851_vm11 = vcmp.eq.f32.partialorder %v4850_v14, 8.507059e+37  ;;  %v5199_v29 = vsel %vm11342_vm3, %v5198_v40, %v5194_v23  ;;  %v13356_v40 = vld [vmem:[#allocation39_spill] sm:$0xff]  ;;  %13357 = vst [vmem:[#allocation32_spill] sm:$0xff] %v11442_v49  ;;  %vm11450_vm3 = vmor %vm4861_vm5, %vm4862_vm7 }
 0x828   : > { %v796_v43 = vpack.c.bf16 %v6994_v4, %v6993_v3  ;;  %v5235_v55 = vadd.f32 %v11263_v10, %v5234_v17  ;;  %v5278_v62 = vsub.f32 1.0, %v5277_v24  ;;  %vm4891_vm6 = vweird.f32 %v10145_v37  ;;  %v11436_v6 = vpop.eup %6853  ;;  %v1121_v17 = vpop.f32.mrf.mxu0  ;;  %vm11462_vm9 = vmor %vm5236_vm8, %vm5237_vm10  ;;  %v13365_v49 = vld [vmem:[#allocation143_spill] sm:$0xff] }
 0x829   : > { %v4854_v32 = vsel %vm4851_vm11, %v4853_v44, %v4849_v56  ;;  %vm4906_vm14 = vweird.f32 %v13355_v25  ;;  %v4890_v14 = vadd.f32 %v11271_v61, %v4889_v30  ;;  %vm4892_vm1 = vweird.f32 %v11271_v61  ;;  %v5781_v3 = vpop.permute.xlu2 %5780 }
 0x82a   : > { %v4933_v22 = vsub.f32 1.0, %v4932_v52  ;;  %v4825_v23 = vmul.f32 %v13356_v40, %v4824_v59  ;;  %v11444_v24 = vpop.eup %6855  ;;  %v4895_v30 = vand.u32 2147483647, %v10145_v37  ;;  %v4897_v44 = vand.u32 2147483648, %v10145_v37  ;;  %v13360_v52 = vld [vmem:[#allocation144_spill] sm:$0xff]  ;;  %6290 = vmatmul.msk.bf16.gmra.mxu0 %vm824_vm2, %v796_v43  ;;  %6023 = vst.msk [vmem:[%s10617_s15 + $0xd8] sm:$0xff] %vm3458_vm4, %v5781_v3  ;;  %vm11483_vm7 = vmor %vm4891_vm6, %vm4892_vm1 }
 0x82b   : > { %6857 = vrcp.f32 %v13360_v52  ;;  %v5200_v59 = vmul.f32 %v13361_v9, %v5199_v29  ;;  %v4855_v40 = vmul.f32 %v13364_v1, %v4854_v32  ;;  %v4864_v29 = vsel %vm11450_vm3, %v13332_v19, %v13365_v49  ;;  %v13368_v32 = vld [vmem:[#allocation157_spill] sm:$0xff]  ;;  %vm11532_vm1 = vmor %vm4906_vm14, %vm4907_vm0 }
 0x82c   : > { %5796 = vrot.lane.b32.xlu1 %v4825_v23, %s7019_s13  ;;  %v1122_v63 = vadd.f32 %v10805_v16, %v1121_v17  ;;  %v5279_v9 = vmul.f32 %v11349_v54, %v5278_v62  ;;  %v5322_v12 = vmul.f32 %v11436_v6, %v13343_v15  ;;  %6859 = vrcp.f32 %v13368_v32 }
 0x82d   : > { %5846 = vrot.lane.b32.xlu2 %v5200_v59, %s7019_s13  ;;  %v5239_v19 = vsel %vm11462_vm9, %v11263_v10, %v5235_v55  ;;  %v13369_v62 = vand.u32 2147483647, %v13355_v25  ;;  %v5243_v49 = vor.u32 1.1754944e-38, %v5242_v8  ;;  %v4934_v37 = vmul.f32 %v11359_v48, %v4933_v22  ;;  %5800 = vrot.lane.b32.xlu0 %v4855_v40, %s7019_s13  ;;  %v13372_v59 = vld [vmem:[#allocation138_spill] sm:$0xff]  ;;  %v13373_v22 = vld [vmem:[#allocation141_spill] sm:$0xff]  ;;  %v13392_v25 = vld [vmem:[#allocation19_spill] sm:$0xff] }
 0x82e   : > { %v4977_v17 = vmul.f32 %v11444_v24, %v13348_v7  ;;  %v4894_v56 = vsel %vm11483_vm7, %v11271_v61, %v4890_v14  ;;  %1255 = vst.msk [vmem:[%s9159_s28 + $0x1e8] sm:$0xff] %vm824_vm2, %v1122_v63  ;;  %vm5241_vm13 = vcmp.eq.f32.partialorder %v5240_v5, 8.507059e+37  ;;  %v5285_v10 = vand.u32 2147483647, %v13320_v34  ;;  %v11518_v14 = vpop.permute.xlu1 %4188  ;;  %v13375_v63 = vld [vmem:[#allocation42_spill] sm:$0xff]  ;;  %v11524_v43 = vpop.permute.xlu0 %4192 }
 0x82f   : > { %vm11494_vm5 = vcmp.eq.f32.partialorder %v13369_v62, 8.507059e+37  ;;  %v4898_v55 = vor.u32 1.1754944e-38, %v4897_v44  ;;  %v4869_v8 = vsel %vm11407_vm12, %v13372_v59, %v4864_v29  ;;  %vm4952_vm15 = vweird.f32 %v13373_v22  ;;  %v13385_v59 = vld [vmem:[#allocation24_spill] sm:$0xff] }
 0x830   : > { %vm5281_vm8 = vweird.f32 %v13320_v34  ;;  %v5287_v3 = vand.u32 2147483648, %v13320_v34  ;;  %vm4896_vm10 = vcmp.eq.f32.partialorder %v4895_v30, 8.507059e+37  ;;  %v5244_v4 = vsel %vm5241_vm13, %v5243_v49, %v5239_v19  ;;  %v13380_v49 = vld [vmem:[#allocation63_spill] sm:$0xff] }
 0x831   : > { %v11514_v1 = vpop.eup %6857  ;;  %v5280_v61 = vadd.f32 %v11349_v54, %v5279_v9  ;;  %vm5282_vm11 = vweird.f32 %v11349_v54  ;;  %v5323_v5 = vsub.f32 1.0, %v5322_v12  ;;  %v4899_v44 = vsel %vm4896_vm10, %v4898_v55, %v4894_v56  ;;  %v13383_v56 = vld [vmem:[#allocation150_spill] sm:$0xff] }
 0x832   : > { %vm4951_vm12 = vweird.f32 %v13374_v26  ;;  %v4935_v40 = vadd.f32 %v11359_v48, %v4934_v37  ;;  %vm4937_vm6 = vweird.f32 %v11359_v48  ;;  %v4978_v29 = vsub.f32 1.0, %v4977_v17  ;;  %v11526_v19 = vpop.eup %6859  ;;  %vm11547_vm7 = vmor %vm5281_vm8, %vm5282_vm11 }
 0x833   : > { %v4870_v30 = vmul.f32 %v13375_v63, %v4869_v8  ;;  %vm11536_vm3 = vcmp.eq.f32.partialorder %v5285_v10, 8.507059e+37  ;;  %vm4936_vm9 = vweird.f32 %v13327_v20  ;;  %v4942_v62 = vand.u32 2147483648, %v13327_v20  ;;  %v13384_v10 = vld [vmem:[#allocation41_spill] sm:$0xff]  ;;  %v13388_v63 = vld [vmem:[#allocation6_spill] sm:$0xff] }
 0x834   : > { %v5245_v37 = vmul.f32 %v13380_v49, %v5244_v4  ;;  %v4940_v17 = vand.u32 2147483647, %v13327_v20  ;;  %6861 = vrcp.f32 %v13383_v56  ;;  %v4900_v55 = vmul.f32 %v13384_v10, %v4899_v44  ;;  %vm11564_vm0 = vmor %vm4936_vm9, %vm4937_vm6  ;;  %v5787_v44 = vpop.permute.xlu2 %5786  ;;  %v6996_v20 = vld [vmem:[%s7115_s18 + $0x268] sm:$0xff] }
 0x835   : > { %5802 = vrot.lane.b32.xlu1 %v4870_v30, %s7019_s13  ;;  %v4909_v8 = vsel %vm11532_vm1, %v13353_v0, %v13385_v59  ;;  %v5324_v34 = vmul.f32 %v11436_v6, %v5323_v5  ;;  %v5367_v4 = vmul.f32 %v11514_v1, %v13360_v52  ;;  %6863 = vrcp.f32 %v13388_v63  ;;  %6026 = vst.msk [vmem:[%s10617_s15 + $0xf0] sm:$0xff] %vm3458_vm4, %v5787_v44  ;;  %v13393_v59 = vld [vmem:[#allocation142_spill] sm:$0xff]  ;;  %vm11617_vm1 = vmor %vm4951_vm12, %vm4952_vm15 }
 0x836   : > { %5852 = vrot.lane.b32.xlu2 %v5245_v37, %s7019_s13  ;;  %v5284_v0 = vsel %vm11547_vm7, %v11349_v54, %v5280_v61  ;;  %v13389_v5 = vand.u32 2147483647, %v13374_v26  ;;  %v5288_v12 = vor.u32 1.1754944e-38, %v5287_v3  ;;  %v4979_v49 = vmul.f32 %v11444_v24, %v4978_v29  ;;  %5806 = vrot.lane.b32.xlu0 %v4900_v55, %s7019_s13  ;;  %v1124_v29 = vpop.f32.mrf.mxu0  ;;  %v6995_v44 = vld [vmem:[%s7115_s18 + $0x260] sm:$0xff]  ;;  %v13410_v26 = vld [vmem:[#allocation145_spill] sm:$0xff] }
 0x837   : > { %v5022_v10 = vmul.f32 %v11526_v19, %v13368_v32  ;;  %v4939_v54 = vsel %vm11564_vm0, %v11359_v48, %v4935_v40  ;;  %vm5326_vm13 = vweird.f32 %v13343_v15  ;;  %v5332_v61 = vand.u32 2147483648, %v13343_v15 }
 0x838   : > { %vm11575_vm14 = vcmp.eq.f32.partialorder %v13389_v5, 8.507059e+37  ;;  %v4943_v37 = vor.u32 1.1754944e-38, %v4942_v62  ;;  %v4914_v3 = vsel %vm11494_vm5, %v13392_v25, %v4909_v8  ;;  %vm4997_vm8 = vweird.f32 %v13393_v59  ;;  %v11601_v8 = vpop.permute.xlu1 %4194 }
 0x839   : > { %vm4941_vm10 = vcmp.eq.f32.partialorder %v4940_v17, 8.507059e+37  ;;  %v5289_v55 = vsel %vm11536_vm3, %v5288_v12, %v5284_v0  ;;  %v797_v48 = vpack.c.bf16 %v6996_v20, %v6995_v44  ;;  %v1125_v40 = vadd.f32 %v10805_v16, %v1124_v29  ;;  %v13394_v17 = vld [vmem:[#allocation133_spill] sm:$0xff]  ;;  %v5729_v44 = vpop.permute.xlu0 %5728  ;;  %v13401_v20 = vld [vmem:[#allocation155_spill] sm:$0xff] }
 0x83a   : > { %v5325_v5 = vadd.f32 %v11436_v6, %v5324_v34  ;;  %vm5327_vm11 = vweird.f32 %v11436_v6  ;;  %v5368_v62 = vsub.f32 1.0, %v5367_v4  ;;  %v4944_v23 = vsel %vm4941_vm10, %v4943_v37, %v4939_v54  ;;  %v11603_v25 = vpop.eup %6861  ;;  %v13395_v12 = vld [vmem:[#allocation45_spill] sm:$0xff]  ;;  %v13398_v54 = vld [vmem:[#allocation72_spill] sm:$0xff]  ;;  %5997 = vst.msk [vmem:[%s10617_s15 + $0x8] sm:$0xff] %vm3458_vm4, %v5729_v44 }
 0x83b   : > { %vm4996_vm5 = vweird.f32 %v13394_v17  ;;  %v4980_v9 = vadd.f32 %v11444_v24, %v4979_v49  ;;  %vm4982_vm6 = vweird.f32 %v11444_v24  ;;  %v5023_v0 = vsub.f32 1.0, %v5022_v10  ;;  %1256 = vst.msk [vmem:[%s9159_s28 + $0x1f0] sm:$0xff] %vm824_vm2, %v1125_v40  ;;  %v11611_v34 = vpop.eup %6863  ;;  %vm11631_vm9 = vmor %vm5326_vm13, %vm5327_vm11  ;;  %v13402_v40 = vld [vmem:[#allocation43_spill] sm:$0xff]  ;;  %6291 = vmatmul.msk.bf16.gmra.mxu0 %vm824_vm2, %v797_v48 }
 0x83c   : > { %v4915_v29 = vmul.f32 %v13395_v12, %v4914_v3  ;;  %v5330_v49 = vand.u32 2147483647, %v13343_v15  ;;  %vm4981_vm3 = vweird.f32 %v13348_v7  ;;  %v4987_v10 = vand.u32 2147483648, %v13348_v7 }
 0x83d   : > { %v5290_v37 = vmul.f32 %v13398_v54, %v5289_v55  ;;  %v4985_v3 = vand.u32 2147483647, %v13348_v7  ;;  %6865 = vrcp.f32 %v13401_v20  ;;  %v4945_v12 = vmul.f32 %v13402_v40, %v4944_v23  ;;  %v13403_v55 = vld [vmem:[#allocation151_spill] sm:$0xff]  ;;  %vm11649_vm15 = vmor %vm4981_vm3, %vm4982_vm6  ;;  %v13412_v7 = vld [vmem:[#allocation140_spill] sm:$0xff] }
 0x83e   : > { %5808 = vrot.lane.b32.xlu1 %v4915_v29, %s7019_s13  ;;  %v4954_v44 = vsel %vm11617_vm1, %v13373_v22, %v13403_v55  ;;  %v5369_v15 = vmul.f32 %v11514_v1, %v5368_v62  ;;  %v5412_v54 = vmul.f32 %v11603_v25, %v13383_v56  ;;  %v13406_v29 = vld [vmem:[#allocation57_spill] sm:$0xff]  ;;  %v5329_v48 = vsel %vm11631_vm9, %v11436_v6, %v5325_v5  ;;  %v5793_v5 = vpop.permute.xlu2 %5792  ;;  %v1126_v55 = vpop.f32.mrf.mxu0  ;;  %vm11696_vm1 = vmor %vm4996_vm5, %vm4997_vm8 }
 0x83f   : > { %6867 = vrcp.f32 %v13406_v29  ;;  %5858 = vrot.lane.b32.xlu2 %v5290_v37, %s7019_s13  ;;  %v13407_v22 = vand.u32 2147483647, %v13394_v17  ;;  %v5333_v23 = vor.u32 1.1754944e-38, %v5332_v61  ;;  %v5024_v4 = vmul.f32 %v11526_v19, %v5023_v0  ;;  %5812 = vrot.lane.b32.xlu0 %v4945_v12, %s7019_s13  ;;  %v13411_v0 = vld [vmem:[#allocation149_spill] sm:$0xff]  ;;  %6029 = vst.msk [vmem:[%s10617_s15 + $0x108] sm:$0xff] %vm3458_vm4, %v5793_v5  ;;  %v13428_v17 = vld [vmem:[#allocation156_spill] sm:$0xff] }
 0x840   : > { %v5067_v40 = vmul.f32 %v11611_v34, %v13388_v63  ;;  %v4984_v37 = vsel %vm11649_vm15, %v11444_v24, %v4980_v9  ;;  %vm5331_vm7 = vcmp.eq.f32.partialorder %v5330_v49, 8.507059e+37  ;;  %vm5371_vm0 = vweird.f32 %v13360_v52  ;;  %v5731_v30 = vpop.permute.xlu1 %5730 }
 0x841   : > { %vm11660_vm12 = vcmp.eq.f32.partialorder %v13407_v22, 8.507059e+37  ;;  %v4988_v6 = vor.u32 1.1754944e-38, %v4987_v10  ;;  %v4959_v61 = vsel %vm11575_vm14, %v13410_v26, %v4954_v44  ;;  %vm5042_vm13 = vweird.f32 %v13411_v0  ;;  %5998 = vst.msk [vmem:[%s10617_s15 + $0x10] sm:$0xff] %vm3458_vm4, %v5731_v30 }
 0x842   : > { %v5377_v22 = vand.u32 2147483648, %v13360_v52  ;;  %vm4986_vm10 = vcmp.eq.f32.partialorder %v4985_v3, 8.507059e+37  ;;  %v5334_v12 = vsel %vm5331_vm7, %v5333_v23, %v5329_v48  ;;  %v1127_v24 = vadd.f32 %v10805_v16, %v1126_v55  ;;  %v13413_v48 = vld [vmem:[#allocation44_spill] sm:$0xff]  ;;  %v5735_v16 = vpop.permute.xlu0 %5734 }
 0x843   : > { %v5370_v9 = vadd.f32 %v11514_v1, %v5369_v15  ;;  %vm5372_vm11 = vweird.f32 %v11514_v1  ;;  %v5413_v49 = vsub.f32 1.0, %v5412_v54  ;;  %v4989_v10 = vsel %vm4986_vm10, %v4988_v6, %v4984_v37  ;;  %v11682_v44 = vpop.eup %6865  ;;  %v13416_v37 = vld [vmem:[#allocation71_spill] sm:$0xff]  ;;  %6000 = vst.msk [vmem:[%s10617_s15 + $0x20] sm:$0xff] %vm3458_vm4, %v5735_v16  ;;  %v13420_v55 = vld [vmem:[#allocation48_spill] sm:$0xff] }
 0x844   : > { %vm5041_vm14 = vweird.f32 %v13412_v7  ;;  %v5025_v26 = vadd.f32 %v11526_v19, %v5024_v4  ;;  %vm5027_vm6 = vweird.f32 %v11526_v19  ;;  %v5068_v3 = vsub.f32 1.0, %v5067_v40  ;;  %vm11710_vm9 = vmor %vm5371_vm0, %vm5372_vm11  ;;  %1257 = vst.msk [vmem:[%s9159_s28 + $0x1f8] sm:$0xff] %vm824_vm2, %v1127_v24 }
 0x845   : > { %v4960_v23 = vmul.f32 %v13413_v48, %v4959_v61  ;;  %v11690_v15 = vpop.eup %6867  ;;  %v5375_v4 = vand.u32 2147483647, %v13360_v52  ;;  %vm5026_vm3 = vweird.f32 %v13368_v32  ;;  %v5032_v40 = vand.u32 2147483648, %v13368_v32  ;;  %v13419_v61 = vld [vmem:[#allocation161_spill] sm:$0xff]  ;;  %v13421_v48 = vld [vmem:[#allocation152_spill] sm:$0xff] }
 0x846   : > { %v5335_v6 = vmul.f32 %v13416_v37, %v5334_v12  ;;  %v5030_v5 = vand.u32 2147483647, %v13368_v32  ;;  %6869 = vrcp.f32 %v13419_v61  ;;  %v4990_v30 = vmul.f32 %v13420_v55, %v4989_v10  ;;  %vm11729_vm8 = vmor %vm5026_vm3, %vm5027_vm6  ;;  %v5799_v37 = vpop.permute.xlu2 %5798  ;;  %v13429_v32 = vld [vmem:[#allocation146_spill] sm:$0xff] }
 0x847   : > { %5814 = vrot.lane.b32.xlu1 %v4960_v23, %s7019_s13  ;;  %v4999_v12 = vsel %vm11696_vm1, %v13393_v59, %v13421_v48  ;;  %v5414_v52 = vmul.f32 %v11603_v25, %v5413_v49  ;;  %v5457_v16 = vmul.f32 %v11682_v44, %v13401_v20  ;;  %6871 = vrcp.f32 %v10627_v27  ;;  %6032 = vst.msk [vmem:[%s10617_s15 + $0x120] sm:$0xff] %vm3458_vm4, %v5799_v37  ;;  %vm11777_vm1 = vmor %vm5041_vm14, %vm5042_vm13  ;;  %v13446_v49 = vld [vmem:[#allocation28_spill] sm:$0xff] }
 0x848   : > { %5864 = vrot.lane.b32.xlu2 %v5335_v6, %s7019_s13  ;;  %v5374_v59 = vsel %vm11710_vm9, %v11514_v1, %v5370_v9  ;;  %v13424_v24 = vand.u32 2147483647, %v13412_v7  ;;  %v5378_v10 = vor.u32 1.1754944e-38, %v5377_v22  ;;  %v5069_v23 = vmul.f32 %v11611_v34, %v5068_v3  ;;  %5818 = vrot.lane.b32.xlu0 %v4990_v30, %s7019_s13  ;;  %v13427_v6 = vld [vmem:[#allocation147_spill] sm:$0xff]  ;;  %v6997_v30 = vld [vmem:[%s7115_s18 + $0x270] sm:$0xff]  ;;  %v5737_v62 = vpop.permute.xlu1 %5736  ;;  %v13445_v7 = vld [vmem:[#allocation158_spill] sm:$0xff] }
 0x849   : > { %v5112_v54 = vmul.f32 %v11690_v15, %v13406_v29  ;;  %v5029_v1 = vsel %vm11729_vm8, %v11526_v19, %v5025_v26  ;;  %vm5376_vm15 = vcmp.eq.f32.partialorder %v5375_v4, 8.507059e+37  ;;  %vm5416_vm7 = vweird.f32 %v13383_v56  ;;  %v6998_v19 = vld [vmem:[%s7115_s18 + $0x278] sm:$0xff]  ;;  %6001 = vst.msk [vmem:[%s10617_s15 + $0x28] sm:$0xff] %vm3458_vm4, %v5737_v62 }
 0x84a   : > { %vm11740_vm5 = vcmp.eq.f32.partialorder %v13424_v24, 8.507059e+37  ;;  %v5033_v9 = vor.u32 1.1754944e-38, %v5032_v40  ;;  %v5004_v22 = vsel %vm11660_vm12, %v13427_v6, %v4999_v12  ;;  %vm5087_vm0 = vweird.f32 %v13428_v17  ;;  %v13430_v24 = vld [vmem:[#allocation51_spill] sm:$0xff] }
 0x84b   : > { %v5422_v3 = vand.u32 2147483648, %v13383_v56  ;;  %vm5031_vm10 = vcmp.eq.f32.partialorder %v5030_v5, 8.507059e+37  ;;  %v5379_v55 = vsel %vm5376_vm15, %v5378_v10, %v5374_v59  ;;  %v798_v26 = vpack.c.bf16 %v6998_v19, %v6997_v30  ;;  %v13437_v30 = vld [vmem:[#allocation52_spill] sm:$0xff] }
 0x84c   : > { %v5415_v4 = vadd.f32 %v11603_v25, %v5414_v52  ;;  %vm5417_vm11 = vweird.f32 %v11603_v25  ;;  %v5458_v40 = vsub.f32 1.0, %v5457_v16  ;;  %v5034_v48 = vsel %vm5031_vm10, %v5033_v9, %v5029_v1  ;;  %v11763_v12 = vpop.eup %6869  ;;  %v5741_v52 = vpop.permute.xlu0 %5740  ;;  %v13433_v1 = vld [vmem:[#allocation79_spill] sm:$0xff] }
 0x84d   : > { %vm5086_vm12 = vweird.f32 %v13429_v32  ;;  %v5070_v5 = vadd.f32 %v11611_v34, %v5069_v23  ;;  %vm5072_vm6 = vweird.f32 %v11611_v34  ;;  %v5113_v59 = vsub.f32 1.0, %v5112_v54  ;;  %v11771_v37 = vpop.eup %6871  ;;  %6003 = vst.msk [vmem:[%s10617_s15 + $0x38] sm:$0xff] %vm3458_vm4, %v5741_v52  ;;  %vm11791_vm9 = vmor %vm5416_vm7, %vm5417_vm11  ;;  %6292 = vmatmul.msk.bf16.gmra.mxu0 %vm824_vm2, %v798_v26 }
 0x84e   : > { %v5005_v10 = vmul.f32 %v13430_v24, %v5004_v22  ;;  %v5420_v23 = vand.u32 2147483647, %v13383_v56  ;;  %vm5071_vm3 = vweird.f32 %v13388_v63  ;;  %v5077_v54 = vand.u32 2147483648, %v13388_v63  ;;  %v13436_v22 = vld [vmem:[#allocation80_spill] sm:$0xff] }
 0x84f   : > { %v5380_v9 = vmul.f32 %v13433_v1, %v5379_v55  ;;  %v5075_v6 = vand.u32 2147483647, %v13388_v63  ;;  %6873 = vrcp.f32 %v13436_v22  ;;  %v5035_v19 = vmul.f32 %v13437_v30, %v5034_v48  ;;  %v13438_v55 = vld [vmem:[#allocation159_spill] sm:$0xff]  ;;  %vm11809_vm13 = vmor %vm5071_vm3, %vm5072_vm6  ;;  %v5805_v1 = vpop.permute.xlu2 %5804 }
 0x850   : > { %5820 = vrot.lane.b32.xlu1 %v5005_v10, %s7019_s13  ;;  %v5044_v62 = vsel %vm11777_vm1, %v13411_v0, %v13438_v55  ;;  %v5459_v56 = vmul.f32 %v11682_v44, %v5458_v40  ;;  %v5502_v24 = vmul.f32 %v11763_v12, %v13419_v61  ;;  %6875 = vrcp.f32 %v10721_v28  ;;  %6035 = vst.msk [vmem:[%s10617_s15 + $0x138] sm:$0xff] %vm3458_vm4, %v5805_v1  ;;  %vm11854_vm1 = vmor %vm5086_vm12, %vm5087_vm0  ;;  %v13455_v1 = vld [vmem:[#allocation109_spill] sm:$0xff] }
 0x851   : > { %5870 = vrot.lane.b32.xlu2 %v5380_v9, %s7019_s13  ;;  %v5419_v26 = vsel %vm11791_vm9, %v11603_v25, %v5415_v4  ;;  %v13441_v0 = vand.u32 2147483647, %v13429_v32  ;;  %v5423_v48 = vor.u32 1.1754944e-38, %v5422_v3  ;;  %v5114_v10 = vmul.f32 %v11690_v15, %v5113_v59  ;;  %5824 = vrot.lane.b32.xlu0 %v5035_v19, %s7019_s13  ;;  %v13444_v9 = vld [vmem:[#allocation153_spill] sm:$0xff] }
 0x852   : > { %v5157_v52 = vmul.f32 %v11771_v37, %v10627_v27  ;;  %v5074_v16 = vsel %vm11809_vm13, %v11611_v34, %v5070_v5  ;;  %v5263_v25 = vsub.f32 1.0, %v10897_v13  ;;  %vm5421_vm8 = vcmp.eq.f32.partialorder %v5420_v23, 8.507059e+37 }
 0x853   : > { %vm11820_vm14 = vcmp.eq.f32.partialorder %v13441_v0, 8.507059e+37  ;;  %v5078_v4 = vor.u32 1.1754944e-38, %v5077_v54  ;;  %v5049_v3 = vsel %vm11740_vm5, %v13444_v9, %v5044_v62  ;;  %vm5132_vm15 = vweird.f32 %v13445_v7  ;;  %v13447_v62 = vld [vmem:[#allocation49_spill] sm:$0xff]  ;;  %v13450_v0 = vld [vmem:[#allocation84_spill] sm:$0xff] }
 0x854   : > { %vm5461_vm7 = vweird.f32 %v13401_v20  ;;  %v5467_v59 = vand.u32 2147483648, %v13401_v20  ;;  %vm5076_vm10 = vcmp.eq.f32.partialorder %v5075_v6, 8.507059e+37  ;;  %v5424_v30 = vsel %vm5421_vm8, %v5423_v48, %v5419_v26 }
 0x855   : > { %v5460_v34 = vadd.f32 %v11682_v44, %v5459_v56  ;;  %vm5462_vm11 = vweird.f32 %v11682_v44  ;;  %v5503_v5 = vsub.f32 1.0, %v5502_v24  ;;  %v5079_v23 = vsel %vm5076_vm10, %v5078_v4, %v5074_v16  ;;  %v11842_v54 = vpop.eup %6873  ;;  %v13454_v16 = vld [vmem:[#allocation54_spill] sm:$0xff] }
 0x856   : > { %vm5131_vm5 = vweird.f32 %v13446_v49  ;;  %v5115_v19 = vadd.f32 %v11690_v15, %v5114_v10  ;;  %vm5117_vm6 = vweird.f32 %v11690_v15  ;;  %v5158_v55 = vsub.f32 1.0, %v5157_v52  ;;  %v11848_v63 = vpop.eup %6875  ;;  %vm11866_vm9 = vmor %vm5461_vm7, %vm5462_vm11  ;;  %v13453_v52 = vld [vmem:[#allocation7_spill] sm:$0xff] }
 0x857   : > { %v5050_v6 = vmul.f32 %v13447_v62, %v5049_v3  ;;  %v5465_v24 = vand.u32 2147483647, %v13401_v20  ;;  %vm5116_vm3 = vweird.f32 %v13406_v29  ;;  %v5122_v26 = vand.u32 2147483648, %v13406_v29  ;;  %v13461_v10 = vld [vmem:[#allocation3_spill] sm:$0xff] }
 0x858   : > { %v5425_v48 = vmul.f32 %v13450_v0, %v5424_v30  ;;  %v5120_v32 = vand.u32 2147483647, %v13406_v29  ;;  %6877 = vrcp.f32 %v13453_v52  ;;  %v5080_v4 = vmul.f32 %v13454_v16, %v5079_v23  ;;  %vm11883_vm0 = vmor %vm5116_vm3, %vm5117_vm6  ;;  %v5743_v30 = vpop.permute.xlu1 %5742 }
 0x859   : > { %5826 = vrot.lane.b32.xlu1 %v5050_v6, %s7019_s13  ;;  %v5089_v9 = vsel %vm11854_vm1, %v13428_v17, %v13455_v1  ;;  %v5504_v20 = vmul.f32 %v11763_v12, %v5503_v5  ;;  %v5547_v3 = vmul.f32 %v11842_v54, %v13436_v22  ;;  %6879 = vrcp.f32 %v10824_v42  ;;  %6004 = vst.msk [vmem:[%s10617_s15 + $0x40] sm:$0xff] %vm3458_vm4, %v5743_v30  ;;  %vm11940_vm6 = vmor %vm5131_vm5, %vm5132_vm15 }
 0x85a   : > { %5876 = vrot.lane.b32.xlu2 %v5425_v48, %s7019_s13  ;;  %v5464_v17 = vsel %vm11866_vm9, %v11682_v44, %v5460_v34  ;;  %v13458_v5 = vand.u32 2147483647, %v13446_v49  ;;  %v5468_v62 = vor.u32 1.1754944e-38, %v5467_v59  ;;  %v5159_v6 = vmul.f32 %v11771_v37, %v5158_v55  ;;  %5830 = vrot.lane.b32.xlu0 %v5080_v4, %s7019_s13  ;;  %v1129_v44 = vpop.f32.mrf.mxu0  ;;  %v5811_v59 = vpop.permute.xlu2 %5810  ;;  %v11910_v55 = vld [vmem:[%s12731_s4] ss:$0 sm:$0xff] }
 0x85b   : > { %v5202_v56 = vmul.f32 %v11848_v63, %v10721_v28  ;;  %v5119_v34 = vsel %vm11883_vm0, %v11690_v15, %v5115_v19  ;;  %vm5466_vm13 = vcmp.eq.f32.partialorder %v5465_v24, 8.507059e+37  ;;  %v5123_v0 = vor.u32 1.1754944e-38, %v5122_v26  ;;  %v5747_v15 = vpop.permute.xlu0 %5746  ;;  %6038 = vst.msk [vmem:[%s10617_s15 + $0x150] sm:$0xff] %vm3458_vm4, %v5811_v59  ;;  %v7000_v24 = vld [vmem:[%s7115_s18 + $0x280] sm:$0xff]  ;;  %v7001_v26 = vld [vmem:[%s7115_s18 + $0x288] sm:$0xff] }
 0x85c   : > { %vm11894_vm12 = vcmp.eq.f32.partialorder %v13458_v5, 8.507059e+37  ;;  %v1130_v48 = vadd.f32 %v11910_v55, %v1129_v44  ;;  %v5094_v16 = vsel %vm11820_vm14, %v13461_v10, %v5089_v9  ;;  %vm5177_vm8 = vweird.f32 %v10457_v11  ;;  %6006 = vst.msk [vmem:[%s10617_s15 + $0x50] sm:$0xff] %vm3458_vm4, %v5747_v15  ;;  %v13462_v5 = vld [vmem:[#allocation160_spill] sm:$0xff] }
 0x85d   : > { %v5512_v4 = vand.u32 2147483648, %v13419_v61  ;;  %vm5121_vm7 = vcmp.eq.f32.partialorder %v5120_v32, 8.507059e+37  ;;  %v5469_v19 = vsel %vm5466_vm13, %v5468_v62, %v5464_v17  ;;  %v799_v1 = vpack.c.bf16 %v7001_v26, %v7000_v24  ;;  %v13463_v62 = vld [vmem:[#allocation56_spill] sm:$0xff] }
 0x85e   : > { %v5505_v29 = vadd.f32 %v11763_v12, %v5504_v20  ;;  %vm5507_vm10 = vweird.f32 %v11763_v12  ;;  %v5548_v30 = vsub.f32 1.0, %v5547_v3  ;;  %v5124_v40 = vsel %vm5121_vm7, %v5123_v0, %v5119_v34  ;;  %v11926_v9 = vpop.eup %6877  ;;  %1258 = vst.msk [vmem:[%s9159_s28 + $0x200] sm:$0xff] %vm824_vm2, %v1130_v48  ;;  %v13466_v34 = vld [vmem:[#allocation92_spill] sm:$0xff]  ;;  %v13469_v48 = vld [vmem:[#allocation66_spill] sm:$0xff]  ;;  %v13476_v3 = vld [vmem:[#allocation27_spill] sm:$0xff] }
 0x85f   : > { %vm5176_vm14 = vweird.f32 %v13462_v5  ;;  %v5160_v32 = vadd.f32 %v11771_v37, %v5159_v6  ;;  %vm5162_vm11 = vweird.f32 %v11771_v37  ;;  %v5203_v17 = vsub.f32 1.0, %v5202_v56  ;;  %v11934_v20 = vpop.eup %6879  ;;  %6293 = vmatmul.msk.bf16.gmra.mxu0 %vm824_vm2, %v799_v1 }
 0x860   : > { %v5095_v44 = vmul.f32 %v13463_v62, %v5094_v16  ;;  %vm5506_vm1 = vweird.f32 %v13419_v61  ;;  %v5510_v6 = vand.u32 2147483647, %v13419_v61  ;;  %v5167_v56 = vand.u32 2147483648, %v10627_v27  ;;  %v13470_v61 = vld [vmem:[#allocation82_spill] sm:$0xff]  ;;  %v5749_v62 = vpop.permute.xlu1 %5748 }
 0x861   : > { %v5470_v0 = vmul.f32 %v13466_v34, %v5469_v19  ;;  %vm11950_vm3 = vmor %vm5506_vm1, %vm5507_vm10  ;;  %vm5161_vm9 = vweird.f32 %v10627_v27  ;;  %v5165_v49 = vand.u32 2147483647, %v10627_v27  ;;  %v5125_v10 = vmul.f32 %v13469_v48, %v5124_v40  ;;  %6007 = vst.msk [vmem:[%s10617_s15 + $0x58] sm:$0xff] %vm3458_vm4, %v5749_v62 }
 0x862   : > { %5832 = vrot.lane.b32.xlu1 %v5095_v44, %s7019_s13  ;;  %v5134_v16 = vsel %vm11940_vm6, %v13445_v7, %v13470_v61  ;;  %v5549_v15 = vmul.f32 %v11842_v54, %v5548_v30  ;;  %v5592_v19 = vmul.f32 %v11926_v9, %v13453_v52  ;;  %vm11968_vm15 = vmor %vm5161_vm9, %vm5162_vm11  ;;  %6881 = vrcp.f32 %v10921_v60  ;;  %v1131_v44 = vpop.f32.mrf.mxu0 }
 0x863   : > { %5882 = vrot.lane.b32.xlu2 %v5470_v0, %s7019_s13  ;;  %v5509_v7 = vsel %vm11950_vm3, %v11763_v12, %v5505_v29  ;;  %v13473_v24 = vand.u32 2147483647, %v13462_v5  ;;  %v5513_v1 = vor.u32 1.1754944e-38, %v5512_v4  ;;  %v5204_v30 = vmul.f32 %v11848_v63, %v5203_v17  ;;  %5836 = vrot.lane.b32.xlu0 %v5125_v10, %s7019_s13  ;;  %v5817_v4 = vpop.permute.xlu2 %5816  ;;  %vm12021_vm6 = vmor %vm5176_vm14, %vm5177_vm8 }
 0x864   : > { %v5247_v40 = vmul.f32 %v11934_v20, %v10824_v42  ;;  %v5164_v12 = vsel %vm11968_vm15, %v11771_v37, %v5160_v32  ;;  %vm5511_vm0 = vcmp.eq.f32.partialorder %v5510_v6, 8.507059e+37  ;;  %v5168_v29 = vor.u32 1.1754944e-38, %v5167_v56  ;;  %v5753_v32 = vpop.permute.xlu0 %5752  ;;  %6041 = vst.msk [vmem:[%s10617_s15 + $0x168] sm:$0xff] %vm3458_vm4, %v5817_v4 }
 0x865   : > { %vm11979_vm5 = vcmp.eq.f32.partialorder %v13473_v24, 8.507059e+37  ;;  %v1132_v17 = vadd.f32 %v11910_v55, %v1131_v44  ;;  %v5139_v34 = vsel %vm11894_vm12, %v13476_v3, %v5134_v16  ;;  %vm5222_vm13 = vweird.f32 %v10583_v31  ;;  %6009 = vst.msk [vmem:[%s10617_s15 + $0x68] sm:$0xff] %vm3458_vm4, %v5753_v32  ;;  %v13483_v24 = vld [vmem:[#allocation60_spill] sm:$0xff] }
 0x866   : > { %v12000_v0 = vmul.f32 %v10819_v41, %v5263_v25  ;;  %v5557_v37 = vand.u32 2147483648, %v13436_v22  ;;  %vm5166_vm7 = vcmp.eq.f32.partialorder %v5165_v49, 8.507059e+37  ;;  %v5514_v6 = vsel %vm5511_vm0, %v5513_v1, %v5509_v7  ;;  %v13477_v49 = vld [vmem:[#allocation55_spill] sm:$0xff] }
 0x867   : > { %v5550_v56 = vadd.f32 %v11842_v54, %v5549_v15  ;;  %vm5552_vm10 = vweird.f32 %v11842_v54  ;;  %v5593_v23 = vsub.f32 1.0, %v5592_v19  ;;  %v5169_v59 = vsel %vm5166_vm7, %v5168_v29, %v5164_v12  ;;  %1259 = vst.msk [vmem:[%s9159_s28 + $0x208] sm:$0xff] %vm824_vm2, %v1132_v17  ;;  %v13480_v19 = vld [vmem:[#allocation94_spill] sm:$0xff] }
 0x868   : > { %vm5221_vm12 = vweird.f32 %v10489_v58  ;;  %v5205_v13 = vadd.f32 %v11848_v63, %v5204_v30  ;;  %vm5207_vm11 = vweird.f32 %v11848_v63  ;;  %v5248_v25 = vsub.f32 1.0, %v5247_v40  ;;  %v12015_v10 = vpop.eup %6881  ;;  %v5755_v4 = vpop.permute.xlu1 %5754 }
 0x869   : > { %v5140_v48 = vmul.f32 %v13477_v49, %v5139_v34  ;;  %vm5551_vm1 = vweird.f32 %v13436_v22  ;;  %v5555_v16 = vand.u32 2147483647, %v13436_v22  ;;  %v5212_v15 = vand.u32 2147483648, %v10721_v28  ;;  %6010 = vst.msk [vmem:[%s10617_s15 + $0x70] sm:$0xff] %vm3458_vm4, %v5755_v4  ;;  %v13489_v34 = vld [vmem:[#allocation9_spill] sm:$0xff] }
 0x86a   : > { %v5515_v27 = vmul.f32 %v13480_v19, %v5514_v6  ;;  %vm12031_vm3 = vmor %vm5551_vm1, %vm5552_vm10  ;;  %vm5206_vm9 = vweird.f32 %v10721_v28  ;;  %v5210_v5 = vand.u32 2147483647, %v10721_v28  ;;  %v5170_v1 = vmul.f32 %v13483_v24, %v5169_v59  ;;  %v1134_v26 = vpop.f32.mrf.mxu0  ;;  %v13493_v24 = vld [vmem:[#allocation100_spill] sm:$0xff] }
 0x86b   : > { %5838 = vrot.lane.b32.xlu1 %v5140_v48, %s7019_s13  ;;  %v5179_v22 = vsel %vm12021_vm6, %v10457_v11, %v10643_v50  ;;  %v12045_v30 = vmul.f32 %v11004_v21, %v10899_v53  ;;  %v5594_v40 = vmul.f32 %v11926_v9, %v5593_v23  ;;  %vm12050_vm8 = vmor %vm5206_vm9, %vm5207_vm11  ;;  %6883 = vrcp.f32 %v11016_v38  ;;  %v5823_v3 = vpop.permute.xlu2 %5822  ;;  %v7003_v23 = vld [vmem:[%s7115_s18 + $0x298] sm:$0xff] }
 0x86c   : > { %5888 = vrot.lane.b32.xlu2 %v5515_v27, %s7019_s13  ;;  %v5554_v11 = vsel %vm12031_vm3, %v11842_v54, %v5550_v56  ;;  %v13486_v50 = vand.u32 2147483647, %v10489_v58  ;;  %v5558_v44 = vor.u32 1.1754944e-38, %v5557_v37  ;;  %v5249_v12 = vmul.f32 %v11934_v20, %v5248_v25  ;;  %5842 = vrot.lane.b32.xlu0 %v5170_v1, %s7019_s13  ;;  %v5759_v6 = vpop.permute.xlu0 %5758  ;;  %6044 = vst.msk [vmem:[%s10617_s15 + $0x180] sm:$0xff] %vm3458_vm4, %v5823_v3 }
 0x86d   : > { %v5292_v29 = vmul.f32 %v12015_v10, %v10921_v60  ;;  %v5209_v54 = vsel %vm12050_vm8, %v11848_v63, %v5205_v13  ;;  %6885 = vrcp.f32 %v11007_v47  ;;  %vm5556_vm15 = vcmp.eq.f32.partialorder %v5555_v16, 8.507059e+37  ;;  %v7002_v63 = vld [vmem:[%s7115_s18 + $0x290] sm:$0xff]  ;;  %6012 = vst.msk [vmem:[%s10617_s15 + $0x80] sm:$0xff] %vm3458_vm4, %v5759_v6  ;;  %v13490_v16 = vld [vmem:[#allocation69_spill] sm:$0xff] }
 0x86e   : > { %vm12061_vm14 = vcmp.eq.f32.partialorder %v13486_v50, 8.507059e+37  ;;  %v5213_v17 = vor.u32 1.1754944e-38, %v5212_v15  ;;  %v5184_v37 = vsel %vm11979_vm5, %v13489_v34, %v5179_v22  ;;  %v5602_v32 = vand.u32 2147483648, %v13453_v52  ;;  %vm12097_vm5 = vmor %vm5221_vm12, %vm5222_vm13 }
 0x86f   : > { %vm5211_vm0 = vcmp.eq.f32.partialorder %v5210_v5, 8.507059e+37  ;;  %v5559_v56 = vsel %vm5556_vm15, %v5558_v44, %v5554_v11  ;;  %v800_v59 = vpack.c.bf16 %v7003_v23, %v7002_v63  ;;  %v5595_v13 = vadd.f32 %v11926_v9, %v5594_v40  ;;  %v13496_v40 = vld [vmem:[#allocation65_spill] sm:$0xff] }
 0x870   : > { %vm5597_vm7 = vweird.f32 %v11926_v9  ;;  %vm5252_vm10 = vweird.f32 %v11934_v20  ;;  %v5214_v25 = vsel %vm5211_vm0, %v5213_v17, %v5209_v54  ;;  %v5250_v49 = vadd.f32 %v11934_v20, %v5249_v12 }
 0x871   : > { %v5293_v48 = vsub.f32 1.0, %v5292_v29  ;;  %v1135_v61 = vadd.f32 %v11910_v55, %v1134_v26  ;;  %v5185_v15 = vmul.f32 %v13490_v16, %v5184_v37  ;;  %v12091_v19 = vpop.eup %6883  ;;  %vm5596_vm11 = vweird.f32 %v13453_v52  ;;  %6294 = vmatmul.msk.bf16.gmra.mxu0 %vm824_vm2, %v800_v59  ;;  %v5761_v29 = vpop.permute.xlu1 %5760 }
 0x872   : > { %v5600_v7 = vand.u32 2147483647, %v13453_v52  ;;  %v5257_v5 = vand.u32 2147483648, %v10824_v42  ;;  %v5560_v1 = vmul.f32 %v13493_v24, %v5559_v56  ;;  %vm12107_vm6 = vmor %vm5596_vm11, %vm5597_vm7  ;;  %vm5251_vm1 = vweird.f32 %v10824_v42  ;;  %6013 = vst.msk [vmem:[%s10617_s15 + $0x88] sm:$0xff] %vm3458_vm4, %v5761_v29  ;;  %v13499_v56 = vld [vmem:[#allocation61_spill] sm:$0xff] }
 0x873   : > { %v5255_v58 = vand.u32 2147483647, %v10824_v42  ;;  %1260 = vst.msk [vmem:[%s9159_s28 + $0x210] sm:$0xff] %vm824_vm2, %v1135_v61  ;;  %5844 = vrot.lane.b32.xlu1 %v5185_v15, %s7019_s13  ;;  %v5215_v52 = vmul.f32 %v13496_v40, %v5214_v25  ;;  %v5224_v28 = vsel %vm12097_vm5, %v10583_v31, %v10815_v57  ;;  %v12122_v11 = vpop.eup %6885  ;;  %vm5266_vm13 = vweird.f32 %v10707_v51  ;;  %vm12128_vm12 = vmor %vm5251_vm1, %vm5252_vm10 }
 0x874   : > { %v5270_v42 = vand.u32 2147483647, %v10707_v51  ;;  %6887 = vrcp.f32 %v11099_v33  ;;  %5894 = vrot.lane.b32.xlu2 %v5560_v1, %s7019_s13  ;;  %v5599_v31 = vsel %vm12107_vm6, %v11926_v9, %v5595_v13  ;;  %v5603_v57 = vor.u32 1.1754944e-38, %v5602_v32  ;;  %v5829_v9 = vpop.permute.xlu2 %5828  ;;  %v5765_v37 = vpop.permute.xlu0 %5764 }
 0x875   : > { %v5294_v44 = vmul.f32 %v12015_v10, %v5293_v48  ;;  %v5337_v12 = vmul.f32 %v12091_v19, %v11016_v38  ;;  %5848 = vrot.lane.b32.xlu0 %v5215_v52, %s7019_s13  ;;  %v5254_v4 = vsel %vm12128_vm12, %v11934_v20, %v5250_v49  ;;  %v5308_v54 = vsub.f32 1.0, %v12045_v30  ;;  %6047 = vst.msk [vmem:[%s10617_s15 + $0x198] sm:$0xff] %vm3458_vm4, %v5829_v9  ;;  %v13502_v49 = vld [vmem:[#allocation103_spill] sm:$0xff] }
 0x876   : > { %vm5601_vm3 = vcmp.eq.f32.partialorder %v5600_v7, 8.507059e+37  ;;  %v5258_v17 = vor.u32 1.1754944e-38, %v5257_v5  ;;  %v5229_v3 = vsel %vm12061_vm14, %v10645_v39, %v5224_v28  ;;  %v5265_v34 = vadd.f32 %v10819_v41, %v12000_v0  ;;  %6015 = vst.msk [vmem:[%s10617_s15 + $0x98] sm:$0xff] %vm3458_vm4, %v5765_v37  ;;  %v1136_v39 = vpop.f32.mrf.mxu0 }
 0x877   : > { %vm5267_vm9 = vweird.f32 %v10819_v41  ;;  %vm5256_vm8 = vcmp.eq.f32.partialorder %v5255_v58, 8.507059e+37  ;;  %v5604_v20 = vsel %vm5601_vm3, %v5603_v57, %v5599_v31  ;;  %v5272_v30 = vand.u32 2147483648, %v10707_v51  ;;  %v13503_v51 = vld [vmem:[#allocation67_spill] sm:$0xff] }
 0x878   : > { %6889 = vrcp.f32 %v11118_v2  ;;  %vm5297_vm15 = vweird.f32 %v12015_v10  ;;  %v5259_v62 = vsel %vm5256_vm8, %v5258_v17, %v5254_v4  ;;  %v5295_v0 = vadd.f32 %v12015_v10, %v5294_v44  ;;  %vm12169_vm14 = vmor %vm5266_vm13, %vm5267_vm9  ;;  %v7005_v57 = vld [vmem:[%s7115_s18 + $0x2a8] sm:$0xff] }
 0x879   : > { %v5338_v32 = vsub.f32 1.0, %v5337_v12  ;;  %v1137_v6 = vadd.f32 %v11910_v55, %v1136_v39  ;;  %v5230_v63 = vmul.f32 %v13499_v56, %v5229_v3  ;;  %v5309_v13 = vmul.f32 %v11004_v21, %v5308_v54  ;;  %v5767_v24 = vpop.permute.xlu1 %5766  ;;  %v13508_v3 = vld [vmem:[#allocation73_spill] sm:$0xff] }
 0x87a   : > { %v12163_v23 = vpop.eup %6887  ;;  %v5352_v26 = vmul.f32 %v12122_v11, %v11007_v47  ;;  %v5302_v25 = vand.u32 2147483648, %v10921_v60  ;;  %v5605_v48 = vmul.f32 %v13502_v49, %v5604_v20  ;;  %vm5296_vm0 = vweird.f32 %v10921_v60  ;;  %6016 = vst.msk [vmem:[%s10617_s15 + $0xa0] sm:$0xff] %vm3458_vm4, %v5767_v24  ;;  %v13514_v24 = vld [vmem:[#allocation70_spill] sm:$0xff] }
 0x87b   : > { %v5300_v61 = vand.u32 2147483647, %v10921_v60  ;;  %1261 = vst.msk [vmem:[%s9159_s28 + $0x218] sm:$0xff] %vm824_vm2, %v1137_v6  ;;  %5850 = vrot.lane.b32.xlu1 %v5230_v63, %s7019_s13  ;;  %v5260_v16 = vmul.f32 %v13503_v51, %v5259_v62  ;;  %v5269_v15 = vsel %vm12169_vm14, %v10819_v41, %v5265_v34  ;;  %vm12187_vm7 = vcmp.eq.f32.partialorder %v5270_v42, 8.507059e+37  ;;  %vm12193_vm10 = vmor %vm5296_vm0, %vm5297_vm15 }
 0x87c   : > { %v5273_v7 = vor.u32 1.1754944e-38, %v5272_v30  ;;  %6891 = vrcp.f32 %v11185_v36  ;;  %5900 = vrot.lane.b32.xlu2 %v5605_v48, %s7019_s13  ;;  %vm5311_vm5 = vweird.f32 %v10899_v53  ;;  %v5339_v41 = vmul.f32 %v12091_v19, %v5338_v32  ;;  %v5835_v28 = vpop.permute.xlu2 %5834  ;;  %v5771_v31 = vpop.permute.xlu0 %5770 }
 0x87d   : > { %v5382_v5 = vmul.f32 %v12163_v23, %v11099_v33  ;;  %5854 = vrot.lane.b32.xlu0 %v5260_v16, %s7019_s13  ;;  %v5299_v1 = vsel %vm12193_vm10, %v12015_v10, %v5295_v0  ;;  %v5315_v58 = vand.u32 2147483647, %v10899_v53  ;;  %v5353_v40 = vsub.f32 1.0, %v5352_v26  ;;  %6050 = vst.msk [vmem:[%s10617_s15 + $0x1b0] sm:$0xff] %vm3458_vm4, %v5835_v28  ;;  %v7004_v10 = vld [vmem:[%s7115_s18 + $0x2a0] sm:$0xff] }
 0x87e   : > { %v12207_v22 = vpop.eup %6889  ;;  %v5303_v52 = vor.u32 1.1754944e-38, %v5302_v25  ;;  %v5274_v42 = vsel %vm12187_vm7, %v5273_v7, %v5269_v15  ;;  %v5310_v50 = vadd.f32 %v11004_v21, %v5309_v13  ;;  %vm5312_vm11 = vweird.f32 %v11004_v21  ;;  %6018 = vst.msk [vmem:[%s10617_s15 + $0xb0] sm:$0xff] %vm3458_vm4, %v5771_v31  ;;  %v1139_v29 = vpop.f32.mrf.mxu0 }
 0x87f   : > { %vm5301_vm6 = vcmp.eq.f32.partialorder %v5300_v61, 8.507059e+37  ;;  %v801_v44 = vpack.c.bf16 %v7005_v57, %v7004_v10  ;;  %v5317_v12 = vand.u32 2147483648, %v10899_v53  ;;  %6893 = vrcp.f32 %v11226_v35  ;;  %vm12234_vm13 = vmor %vm5311_vm5, %vm5312_vm11  ;;  %v13511_v53 = vld [vmem:[#allocation74_spill] sm:$0xff] }
 0x880   : > { %vm5342_vm1 = vweird.f32 %v12091_v19  ;;  %v5304_v4 = vsel %vm5301_vm6, %v5303_v52, %v5299_v1  ;;  %v5340_v54 = vadd.f32 %v12091_v19, %v5339_v41  ;;  %v5383_v17 = vsub.f32 1.0, %v5382_v5 }
 0x881   : > { %v1140_v9 = vadd.f32 %v11910_v55, %v1139_v29  ;;  %v5275_v34 = vmul.f32 %v13508_v3, %v5274_v42  ;;  %v5354_v30 = vmul.f32 %v12122_v11, %v5353_v40  ;;  %v5397_v39 = vmul.f32 %v12207_v22, %v11118_v2  ;;  %6295 = vmatmul.msk.bf16.gmra.mxu0 %vm824_vm2, %v801_v44  ;;  %v5773_v13 = vpop.permute.xlu1 %5772 }
 0x882   : > { %v12228_v37 = vpop.eup %6891  ;;  %v5347_v62 = vand.u32 2147483648, %v11016_v38  ;;  %vm5341_vm12 = vweird.f32 %v11016_v38  ;;  %v5345_v0 = vand.u32 2147483647, %v11016_v38  ;;  %v5305_v32 = vmul.f32 %v13511_v53, %v5304_v4  ;;  %6019 = vst.msk [vmem:[%s10617_s15 + $0xb8] sm:$0xff] %vm3458_vm4, %v5773_v13  ;;  %v13523_v13 = vld [vmem:[#allocation77_spill] sm:$0xff] }
 0x883   : > { %1262 = vst.msk [vmem:[%s9159_s28 + $0x220] sm:$0xff] %vm824_vm2, %v1140_v9  ;;  %5856 = vrot.lane.b32.xlu1 %v5275_v34, %s7019_s13  ;;  %v5314_v6 = vsel %vm12234_vm13, %v11004_v21, %v5310_v50  ;;  %v5318_v56 = vor.u32 1.1754944e-38, %v5317_v12  ;;  %vm12254_vm3 = vmor %vm5341_vm12, %vm5342_vm1  ;;  %6895 = vrcp.f32 %v11268_v46  ;;  %vm5316_vm9 = vcmp.eq.f32.partialorder %v5315_v58, 8.507059e+37 }
 0x884   : > { %v5384_v38 = vmul.f32 %v12163_v23, %v5383_v17  ;;  %v5427_v59 = vmul.f32 %v12228_v37, %v11185_v36  ;;  %v5344_v21 = vsel %vm12254_vm3, %v12091_v19, %v5340_v54  ;;  %vm5356_vm8 = vweird.f32 %v11007_v47  ;;  %v5841_v48 = vpop.permute.xlu2 %5840  ;;  %v5777_v15 = vpop.permute.xlu0 %5776 }
 0x885   : > { %5860 = vrot.lane.b32.xlu0 %v5305_v32, %s7019_s13  ;;  %v12266_v26 = vpop.eup %6893  ;;  %v5398_v25 = vsub.f32 1.0, %v5397_v39  ;;  %v5348_v49 = vor.u32 1.1754944e-38, %v5347_v62  ;;  %v5319_v61 = vsel %vm5316_vm9, %v5318_v56, %v5314_v6  ;;  %v5355_v51 = vadd.f32 %v12122_v11, %v5354_v30  ;;  %6053 = vst.msk [vmem:[%s10617_s15 + $0x1c8] sm:$0xff] %vm3458_vm4, %v5841_v48  ;;  %v7007_v62 = vld [vmem:[%s7115_s18 + $0x2b8] sm:$0xff] }
 0x886   : > { %vm5357_vm15 = vweird.f32 %v12122_v11  ;;  %v5360_v16 = vand.u32 2147483647, %v11007_v47  ;;  %vm5346_vm14 = vcmp.eq.f32.partialorder %v5345_v0, 8.507059e+37  ;;  %v5362_v19 = vand.u32 2147483648, %v11007_v47  ;;  %6021 = vst.msk [vmem:[%s10617_s15 + $0xc8] sm:$0xff] %vm3458_vm4, %v5777_v15  ;;  %v1141_v27 = vpop.f32.mrf.mxu0  ;;  %v13517_v47 = vld [vmem:[#allocation76_spill] sm:$0xff] }
 0x887   : > { %6897 = vrcp.f32 %v11336_v18  ;;  %vm5387_vm0 = vweird.f32 %v12163_v23  ;;  %v5349_v7 = vsel %vm5346_vm14, %v5348_v49, %v5344_v21  ;;  %v5385_v60 = vadd.f32 %v12163_v23, %v5384_v38  ;;  %vm12290_vm7 = vmor %vm5356_vm8, %vm5357_vm15  ;;  %v13522_v32 = vld [vmem:[#allocation89_spill] sm:$0xff] }
 0x888   : > { %v5428_v41 = vsub.f32 1.0, %v5427_v59  ;;  %v1142_v5 = vadd.f32 %v11910_v55, %v1141_v27  ;;  %v5320_v1 = vmul.f32 %v13514_v24, %v5319_v61  ;;  %v5399_v52 = vmul.f32 %v12207_v22, %v5398_v25 }
 0x889   : > { %v12284_v58 = vpop.eup %6895  ;;  %v5442_v28 = vmul.f32 %v12266_v26, %v11226_v35  ;;  %v5392_v42 = vand.u32 2147483648, %v11099_v33  ;;  %vm5386_vm10 = vweird.f32 %v11099_v33  ;;  %v5390_v50 = vand.u32 2147483647, %v11099_v33  ;;  %v5779_v29 = vpop.permute.xlu1 %5778 }
 0x88a   : > { %1263 = vst.msk [vmem:[%s9159_s28 + $0x228] sm:$0xff] %vm824_vm2, %v1142_v5  ;;  %v5350_v31 = vmul.f32 %v13517_v47, %v5349_v7  ;;  %v5359_v10 = vsel %vm12290_vm7, %v12122_v11, %v5355_v51  ;;  %vm12307_vm5 = vcmp.eq.f32.partialorder %v5360_v16, 8.507059e+37  ;;  %v5363_v44 = vor.u32 1.1754944e-38, %v5362_v19  ;;  %vm12313_vm11 = vmor %vm5386_vm10, %vm5387_vm0 }
 0x88b   : > { %5862 = vrot.lane.b32.xlu1 %v5320_v1, %s7019_s13  ;;  %6899 = vrcp.f32 %v11357_v45  ;;  %vm5401_vm6 = vweird.f32 %v11118_v2  ;;  %v5429_v12 = vmul.f32 %v12228_v37, %v5428_v41  ;;  %v5472_v11 = vmul.f32 %v12284_v58, %v11268_v46  ;;  %6022 = vst.msk [vmem:[%s10617_s15 + $0xd0] sm:$0xff] %vm3458_vm4, %v5779_v29 }
 0x88c   : > { %v5389_v4 = vsel %vm12313_vm11, %v12163_v23, %v5385_v60  ;;  %v5405_v17 = vand.u32 2147483647, %v11118_v2  ;;  %v5443_v9 = vsub.f32 1.0, %v5442_v28  ;;  %v5393_v3 = vor.u32 1.1754944e-38, %v5392_v42  ;;  %v5847_v34 = vpop.permute.xlu2 %5846  ;;  %v5783_v39 = vpop.permute.xlu0 %5782  ;;  %v7006_v23 = vld [vmem:[%s7115_s18 + $0x2b0] sm:$0xff] }
 0x88d   : > { %5866 = vrot.lane.b32.xlu0 %v5350_v31, %s7019_s13  ;;  %v12326_v54 = vpop.eup %6897  ;;  %v5364_v20 = vsel %vm12307_vm5, %v5363_v44, %v5359_v10  ;;  %v5400_v30 = vadd.f32 %v12207_v22, %v5399_v52  ;;  %vm5402_vm1 = vweird.f32 %v12207_v22  ;;  %vm5391_vm13 = vcmp.eq.f32.partialorder %v5390_v50, 8.507059e+37  ;;  %6056 = vst.msk [vmem:[%s10617_s15 + $0x1e0] sm:$0xff] %vm3458_vm4, %v5847_v34 }
 0x88e   : > { %v802_v0 = vpack.c.bf16 %v7007_v62, %v7006_v23  ;;  %v5407_v53 = vand.u32 2147483648, %v11118_v2  ;;  %6901 = vrcp.f32 %v13522_v32  ;;  %vm5432_vm12 = vweird.f32 %v12228_v37  ;;  %6024 = vst.msk [vmem:[%s10617_s15 + $0xe0] sm:$0xff] %vm3458_vm4, %v5783_v39  ;;  %v1144_v6 = vpop.f32.mrf.mxu0  ;;  %vm12353_vm3 = vmor %vm5401_vm6, %vm5402_vm1  ;;  %v13526_v2 = vld [vmem:[#allocation81_spill] sm:$0xff] }
 0x88f   : > { %v5394_v56 = vsel %vm5391_vm13, %v5393_v3, %v5389_v4  ;;  %v5430_v63 = vadd.f32 %v12228_v37, %v5429_v12  ;;  %v5473_v38 = vsub.f32 1.0, %v5472_v11  ;;  %v1145_v59 = vadd.f32 %v11910_v55, %v1144_v6  ;;  %v13530_v12 = vld [vmem:[#allocation83_spill] sm:$0xff] }
 0x890   : > { %v5365_v21 = vmul.f32 %v13523_v13, %v5364_v20  ;;  %v5444_v48 = vmul.f32 %v12266_v26, %v5443_v9  ;;  %v5487_v61 = vmul.f32 %v12326_v54, %v11336_v18  ;;  %v5437_v51 = vand.u32 2147483648, %v11185_v36 }
 0x891   : > { %v12347_v25 = vpop.eup %6899  ;;  %vm5431_vm9 = vweird.f32 %v11185_v36  ;;  %v5435_v16 = vand.u32 2147483647, %v11185_v36  ;;  %1264 = vst.msk [vmem:[%s9159_s28 + $0x230] sm:$0xff] %vm824_vm2, %v1145_v59  ;;  %v5395_v15 = vmul.f32 %v13526_v2, %v5394_v56  ;;  %6296 = vmatmul.msk.bf16.gmra.mxu0 %vm824_vm2, %v802_v0  ;;  %v5404_v19 = vsel %vm12353_vm3, %v12207_v22, %v5400_v30  ;;  %v13529_v36 = vld [vmem:[#allocation32_spill] sm:$0xff]  ;;  %v5785_v5 = vpop.permute.xlu1 %5784 }
 0x892   : > { %v5408_v27 = vor.u32 1.1754944e-38, %v5407_v53  ;;  %vm12373_vm8 = vmor %vm5431_vm9, %vm5432_vm12  ;;  %6903 = vrcp.f32 %v13529_v36  ;;  %vm5406_vm15 = vcmp.eq.f32.partialorder %v5405_v17, 8.507059e+37  ;;  %v5474_v60 = vmul.f32 %v12284_v58, %v5473_v38  ;;  %6025 = vst.msk [vmem:[%s10617_s15 + $0xe8] sm:$0xff] %vm3458_vm4, %v5785_v5 }
 0x893   : > { %5868 = vrot.lane.b32.xlu1 %v5365_v21, %s7019_s13  ;;  %v5517_v41 = vmul.f32 %v12347_v25, %v11357_v45  ;;  %v5434_v22 = vsel %vm12373_vm8, %v12228_v37, %v5430_v63  ;;  %vm5446_vm14 = vweird.f32 %v11226_v35  ;;  %v5488_v1 = vsub.f32 1.0, %v5487_v61  ;;  %v7009_v21 = vld [vmem:[%s7115_s18 + $0x2c8] sm:$0xff] }
 0x894   : > { %v12385_v24 = vpop.eup %6901  ;;  %v5438_v40 = vor.u32 1.1754944e-38, %v5437_v51  ;;  %v5853_v52 = vpop.permute.xlu2 %5852  ;;  %v5409_v28 = vsel %vm5406_vm15, %v5408_v27, %v5404_v19  ;;  %v5445_v42 = vadd.f32 %v12266_v26, %v5444_v48  ;;  %vm5447_vm0 = vweird.f32 %v12266_v26  ;;  %v13536_v27 = vld [vmem:[#allocation88_spill] sm:$0xff] }
 0x895   : > { %5872 = vrot.lane.b32.xlu0 %v5395_v15, %s7019_s13  ;;  %v5450_v50 = vand.u32 2147483647, %v11226_v35  ;;  %vm5436_vm7 = vcmp.eq.f32.partialorder %v5435_v16, 8.507059e+37  ;;  %v5789_v47 = vpop.permute.xlu0 %5788  ;;  %6059 = vst.msk [vmem:[%s10617_s15 + $0x1f8] sm:$0xff] %vm3458_vm4, %v5853_v52  ;;  %v5452_v37 = vand.u32 2147483648, %v11226_v35  ;;  %6905 = vrcp.f32 %v11518_v14  ;;  %vm12409_vm5 = vmor %vm5446_vm14, %vm5447_vm0  ;;  %v13533_v35 = vld [vmem:[#allocation86_spill] sm:$0xff] }
 0x896   : > { %vm5477_vm10 = vweird.f32 %v12284_v58  ;;  %6027 = vst.msk [vmem:[%s10617_s15 + $0xf8] sm:$0xff] %vm3458_vm4, %v5789_v47  ;;  %v1146_v31 = vpop.f32.mrf.mxu0  ;;  %v5439_v10 = vsel %vm5436_vm7, %v5438_v40, %v5434_v22  ;;  %v5475_v57 = vadd.f32 %v12284_v58, %v5474_v60  ;;  %v5518_v44 = vsub.f32 1.0, %v5517_v41 }
 0x897   : > { %v1147_v33 = vadd.f32 %v11910_v55, %v1146_v31  ;;  %v5410_v11 = vmul.f32 %v13530_v12, %v5409_v28  ;;  %v5489_v17 = vmul.f32 %v12326_v54, %v5488_v1  ;;  %v5532_v9 = vmul.f32 %v12385_v24, %v13522_v32 }
 0x898   : > { %v12403_v29 = vpop.eup %6903  ;;  %v5482_v3 = vand.u32 2147483648, %v11268_v46  ;;  %vm5476_vm11 = vweird.f32 %v11268_v46  ;;  %v5480_v34 = vand.u32 2147483647, %v11268_v46  ;;  %v5440_v20 = vmul.f32 %v13533_v35, %v5439_v10 }
 0x899   : > { %1265 = vst.msk [vmem:[%s9159_s28 + $0x238] sm:$0xff] %vm824_vm2, %v1147_v33  ;;  %v5449_v30 = vsel %vm12409_vm5, %v12266_v26, %v5445_v42  ;;  %v5453_v39 = vor.u32 1.1754944e-38, %v5452_v37  ;;  %vm12428_vm6 = vmor %vm5476_vm11, %vm5477_vm10  ;;  %6907 = vrcp.f32 %v11524_v43  ;;  %vm5451_vm1 = vcmp.eq.f32.partialorder %v5450_v50, 8.507059e+37  ;;  %v5791_v26 = vpop.permute.xlu1 %5790 }
 0x89a   : > { %v5519_v46 = vmul.f32 %v12347_v25, %v5518_v44  ;;  %v5562_v62 = vmul.f32 %v12403_v29, %v13529_v36  ;;  %v5479_v0 = vsel %vm12428_vm6, %v12284_v58, %v5475_v57  ;;  %vm5491_vm13 = vweird.f32 %v11336_v18  ;;  %6028 = vst.msk [vmem:[%s10617_s15 + $0x100] sm:$0xff] %vm3458_vm4, %v5791_v26  ;;  %v7008_v58 = vld [vmem:[%s7115_s18 + $0x2c0] sm:$0xff] }
 0x89b   : > { %5874 = vrot.lane.b32.xlu1 %v5410_v11, %s7019_s13  ;;  %v12440_v53 = vpop.eup %6905  ;;  %v5533_v6 = vsub.f32 1.0, %v5532_v9  ;;  %v5483_v56 = vor.u32 1.1754944e-38, %v5482_v3  ;;  %v5454_v38 = vsel %vm5451_vm1, %v5453_v39, %v5449_v30  ;;  %v5490_v59 = vadd.f32 %v12326_v54, %v5489_v17 }
 0x89c   : > { %v5859_v63 = vpop.permute.xlu2 %5858  ;;  %vm5492_vm12 = vweird.f32 %v12326_v54  ;;  %vm5481_vm3 = vcmp.eq.f32.partialorder %v5480_v34, 8.507059e+37  ;;  %v803_v49 = vpack.c.bf16 %v7009_v21, %v7008_v58  ;;  %v5495_v48 = vand.u32 2147483647, %v11336_v18 }
 0x89d   : > { %5878 = vrot.lane.b32.xlu0 %v5440_v20, %s7019_s13  ;;  %v5795_v13 = vpop.permute.xlu0 %5794  ;;  %6062 = vst.msk [vmem:[%s10617_s15 + $0x210] sm:$0xff] %vm3458_vm4, %v5859_v63  ;;  %v5497_v61 = vand.u32 2147483648, %v11336_v18  ;;  %vm5522_vm9 = vweird.f32 %v12347_v25  ;;  %v5484_v16 = vsel %vm5481_vm3, %v5483_v56, %v5479_v0  ;;  %v5520_v2 = vadd.f32 %v12347_v25, %v5519_v46  ;;  %vm12465_vm8 = vmor %vm5491_vm13, %vm5492_vm12  ;;  %v13539_v18 = vld [vmem:[#allocation93_spill] sm:$0xff]  ;;  %v13542_v20 = vld [vmem:[#allocation96_spill] sm:$0xff] }
 0x89e   : > { %6030 = vst.msk [vmem:[%s10617_s15 + $0x110] sm:$0xff] %vm3458_vm4, %v5795_v13  ;;  %v1149_v51 = vpop.f32.mrf.mxu0  ;;  %v5563_v15 = vsub.f32 1.0, %v5562_v62  ;;  %v5455_v7 = vmul.f32 %v13536_v27, %v5454_v38  ;;  %v5534_v5 = vmul.f32 %v12385_v24, %v5533_v6  ;;  %v5577_v22 = vmul.f32 %v12440_v53, %v11518_v14 }
 0x89f   : > { %v1150_v19 = vadd.f32 %v11910_v55, %v1149_v51  ;;  %v12459_v60 = vpop.eup %6907  ;;  %v5527_v1 = vand.u32 2147483648, %v11357_v45  ;;  %6909 = vrcp.f32 %v11601_v8  ;;  %vm5521_vm15 = vweird.f32 %v11357_v45 }
 0x8a0   : > { %v5525_v40 = vand.u32 2147483647, %v11357_v45  ;;  %v5485_v52 = vmul.f32 %v13539_v18, %v5484_v16  ;;  %v5494_v28 = vsel %vm12465_vm8, %v12326_v54, %v5490_v59  ;;  %v5498_v42 = vor.u32 1.1754944e-38, %v5497_v61  ;;  %vm12486_vm14 = vmor %vm5521_vm15, %vm5522_vm9 }
 0x8a1   : > { %1266 = vst.msk [vmem:[%s9159_s28 + $0x240] sm:$0xff] %vm824_vm2, %v1150_v19  ;;  %6297 = vmatmul.msk.bf16.gmra.mxu0 %vm824_vm2, %v803_v49  ;;  %vm5496_vm0 = vcmp.eq.f32.partialorder %v5495_v48, 8.507059e+37  ;;  %v5564_v45 = vmul.f32 %v12403_v29, %v5563_v15  ;;  %v5607_v47 = vmul.f32 %v12459_v60, %v11524_v43  ;;  %v5797_v37 = vpop.permute.xlu1 %5796  ;;  %v5524_v54 = vsel %vm12486_vm14, %v12347_v25, %v5520_v2  ;;  %v13548_v19 = vld [vmem:[#allocation99_spill] sm:$0xff] }
 0x8a2   : > { %v5578_v31 = vsub.f32 1.0, %v5577_v22  ;;  %v5528_v10 = vor.u32 1.1754944e-38, %v5527_v1  ;;  %6031 = vst.msk [vmem:[%s10617_s15 + $0x118] sm:$0xff] %vm3458_vm4, %v5797_v37  ;;  %v5499_v44 = vsel %vm5496_vm0, %v5498_v42, %v5494_v28  ;;  %v5535_v33 = vadd.f32 %v12385_v24, %v5534_v5  ;;  %v13551_v22 = vld [vmem:[#allocation102_spill] sm:$0xff] }
 0x8a3   : > { %5880 = vrot.lane.b32.xlu1 %v5455_v7, %s7019_s13  ;;  %vm5536_vm7 = vweird.f32 %v13522_v32  ;;  %vm5537_vm10 = vweird.f32 %v12385_v24  ;;  %vm5526_vm5 = vcmp.eq.f32.partialorder %v5525_v40, 8.507059e+37  ;;  %v5540_v25 = vand.u32 2147483647, %v13522_v32 }
 0x8a4   : > { %v5865_v57 = vpop.permute.xlu2 %5864  ;;  %v5542_v4 = vand.u32 2147483648, %v13522_v32  ;;  %vm5567_vm11 = vweird.f32 %v12403_v29  ;;  %v5529_v9 = vsel %vm5526_vm5, %v5528_v10, %v5524_v54  ;;  %v5565_v3 = vadd.f32 %v12403_v29, %v5564_v45  ;;  %vm12518_vm6 = vmor %vm5536_vm7, %vm5537_vm10  ;;  %v13545_v32 = vld [vmem:[#allocation98_spill] sm:$0xff] }
 0x8a5   : > { %5884 = vrot.lane.b32.xlu0 %v5485_v52, %s7019_s13  ;;  %v5801_v12 = vpop.permute.xlu0 %5800  ;;  %6065 = vst.msk [vmem:[%s10617_s15 + $0x228] sm:$0xff] %vm3458_vm4, %v5865_v57  ;;  %v12504_v11 = vpop.eup %6909  ;;  %v5608_v34 = vsub.f32 1.0, %v5607_v47  ;;  %v5500_v30 = vmul.f32 %v13542_v20, %v5499_v44  ;;  %v5579_v23 = vmul.f32 %v12440_v53, %v5578_v31  ;;  %vm5566_vm1 = vweird.f32 %v13529_v36  ;;  %v13554_v57 = vld [vmem:[#allocation101_spill] sm:$0xff] }
 0x8a6   : > { %6033 = vst.msk [vmem:[%s10617_s15 + $0x128] sm:$0xff] %vm3458_vm4, %v5801_v12  ;;  %v1151_v17 = vpop.f32.mrf.mxu0  ;;  %v5572_v46 = vand.u32 2147483648, %v13529_v36  ;;  %v5570_v62 = vand.u32 2147483647, %v13529_v36  ;;  %v5622_v26 = vmul.f32 %v12504_v11, %v11601_v8  ;;  %v5530_v0 = vmul.f32 %v13545_v32, %v5529_v9  ;;  %vm12537_vm13 = vmor %vm5566_vm1, %vm5567_vm11 }
 0x8a7   : > { %v1152_v35 = vadd.f32 %v11910_v55, %v1151_v17  ;;  %v5539_v6 = vsel %vm12518_vm6, %v12385_v24, %v5535_v33  ;;  %v5543_v56 = vor.u32 1.1754944e-38, %v5542_v4  ;;  %vm5541_vm12 = vcmp.eq.f32.partialorder %v5540_v25, 8.507059e+37  ;;  %v13555_v33 = vld [vmem:[#allocation104_spill] sm:$0xff] }
 0x8a8   : > { %v5609_v36 = vmul.f32 %v12459_v60, %v5608_v34  ;;  %v5569_v59 = vsel %vm12537_vm13, %v12403_v29, %v5565_v3  ;;  %v5573_v24 = vor.u32 1.1754944e-38, %v5572_v46  ;;  %v5580_v21 = vadd.f32 %v12440_v53, %v5579_v23 }
 0x8a9   : > { %1267 = vst.msk [vmem:[%s9159_s28 + $0x248] sm:$0xff] %vm824_vm2, %v1152_v35  ;;  %v5803_v38 = vpop.permute.xlu1 %5802  ;;  %v5544_v58 = vsel %vm5541_vm12, %v5543_v56, %v5539_v6  ;;  %vm5582_vm3 = vweird.f32 %v12440_v53  ;;  %vm5571_vm9 = vcmp.eq.f32.partialorder %v5570_v62, 8.507059e+37  ;;  %v5623_v49 = vsub.f32 1.0, %v5622_v26  ;;  %v13556_v35 = vld [vmem:[#allocation105_spill] sm:$0xff] }
 0x8aa   : > { %6034 = vst.msk [vmem:[%s10617_s15 + $0x130] sm:$0xff] %vm3458_vm4, %v5803_v38  ;;  %vm5581_vm8 = vweird.f32 %v11518_v14  ;;  %v5585_v61 = vand.u32 2147483647, %v11518_v14  ;;  %v5587_v29 = vand.u32 2147483648, %v11518_v14  ;;  %v5574_v16 = vsel %vm5571_vm9, %v5573_v24, %v5569_v59 }
 0x8ab   : > { %5886 = vrot.lane.b32.xlu1 %v5500_v30, %s7019_s13  ;;  %v5610_v2 = vadd.f32 %v12459_v60, %v5609_v36  ;;  %vm5612_vm15 = vweird.f32 %v12459_v60  ;;  %v5545_v27 = vmul.f32 %v13548_v19, %v5544_v58  ;;  %vm12563_vm14 = vmor %vm5581_vm8, %vm5582_vm3  ;;  %vm5611_vm0 = vweird.f32 %v11524_v43 }
 0x8ac   : > { %v5871_v13 = vpop.permute.xlu2 %5870  ;;  %v5617_v14 = vand.u32 2147483648, %v11524_v43  ;;  %v5615_v41 = vand.u32 2147483647, %v11524_v43  ;;  %v5624_v5 = vmul.f32 %v12504_v11, %v5623_v49  ;;  %v5575_v1 = vmul.f32 %v13551_v22, %v5574_v16  ;;  %vm12578_vm7 = vmor %vm5611_vm0, %vm5612_vm15 }
 0x8ad   : > { %5890 = vrot.lane.b32.xlu0 %v5530_v0, %s7019_s13  ;;  %v5807_v48 = vpop.permute.xlu0 %5806  ;;  %6068 = vst.msk [vmem:[%s10617_s15 + $0x240] sm:$0xff] %vm3458_vm4, %v5871_v13  ;;  %v5584_v40 = vsel %vm12563_vm14, %v12440_v53, %v5580_v21  ;;  %v5588_v18 = vor.u32 1.1754944e-38, %v5587_v29  ;;  %vm5586_vm10 = vcmp.eq.f32.partialorder %v5585_v61, 8.507059e+37  ;;  %v5614_v28 = vsel %vm12578_vm7, %v12459_v60, %v5610_v2 }
 0x8ae   : > { %6036 = vst.msk [vmem:[%s10617_s15 + $0x140] sm:$0xff] %vm3458_vm4, %v5807_v48  ;;  %v1154_v51 = vpop.f32.mrf.mxu0  ;;  %v5618_v42 = vor.u32 1.1754944e-38, %v5617_v14  ;;  %vm5616_vm5 = vcmp.eq.f32.partialorder %v5615_v41, 8.507059e+37  ;;  %v5625_v45 = vadd.f32 %v12504_v11, %v5624_v5  ;;  %vm5627_vm11 = vweird.f32 %v12504_v11 }
 0x8af   : > { %v1155_v15 = vadd.f32 %v11910_v55, %v1154_v51  ;;  %v5589_v53 = vsel %vm5586_vm10, %v5588_v18, %v5584_v40  ;;  %v5632_v37 = vand.u32 2147483648, %v11601_v8  ;;  %vm5626_vm6 = vweird.f32 %v11601_v8 }
 0x8b0   : > { %v5619_v54 = vsel %vm5616_vm5, %v5618_v42, %v5614_v28  ;;  %v5630_v31 = vand.u32 2147483647, %v11601_v8  ;;  %v5590_v44 = vmul.f32 %v13554_v57, %v5589_v53  ;;  %vm5628_vm1 = vmor %vm5626_vm6, %vm5627_vm11 }
 0x8b1   : > { %1268 = vst.msk [vmem:[%s9159_s28 + $0x250] sm:$0xff] %vm824_vm2, %v1155_v15  ;;  %v5809_v43 = vpop.permute.xlu1 %5808  ;;  %v5620_v12 = vmul.f32 %v13555_v33, %v5619_v54  ;;  %v5629_v25 = vsel %vm5628_vm1, %v12504_v11, %v5625_v45  ;;  %v5633_v4 = vor.u32 1.1754944e-38, %v5632_v37  ;;  %v12614_v11 = vld [vmem:[%s12731_s4] ss:$0 sm:$0xff] }
 0x8b2   : > { %6037 = vst.msk [vmem:[%s10617_s15 + $0x148] sm:$0xff] %vm3458_vm4, %v5809_v43  ;;  %vm5631_vm13 = vcmp.eq.f32.partialorder %v5630_v31, 8.507059e+37 }
 0x8b3   : > { %5892 = vrot.lane.b32.xlu1 %v5545_v27, %s7019_s13  ;;  %v5634_v17 = vsel %vm5631_vm13, %v5633_v4, %v5629_v25 }
 0x8b4   : > { %v5877_v50 = vpop.permute.xlu2 %5876  ;;  %v5635_v20 = vmul.f32 %v13556_v35, %v5634_v17 }
 0x8b5   : > { %5896 = vrot.lane.b32.xlu0 %v5575_v1, %s7019_s13  ;;  %v5813_v47 = vpop.permute.xlu0 %5812  ;;  %6071 = vst.msk [vmem:[%s10617_s15 + $0x258] sm:$0xff] %vm3458_vm4, %v5877_v50 }
 0x8b6   : > { %6039 = vst.msk [vmem:[%s10617_s15 + $0x158] sm:$0xff] %vm3458_vm4, %v5813_v47  ;;  %v1156_v60 = vpop.f32.mrf.mxu0 }
 0x8b7   : > { %v1157_v10 = vadd.f32 %v11910_v55, %v1156_v60 }
 0x8b9   : > { %1269 = vst.msk [vmem:[%s9159_s28 + $0x258] sm:$0xff] %vm824_vm2, %v1157_v10  ;;  %v5815_v8 = vpop.permute.xlu1 %5814 }
 0x8ba   : > { %6040 = vst.msk [vmem:[%s10617_s15 + $0x160] sm:$0xff] %vm3458_vm4, %v5815_v8 }
 0x8bb   : > { %5898 = vrot.lane.b32.xlu1 %v5590_v44, %s7019_s13 }
 0x8bd   : > { %5902 = vrot.lane.b32.xlu0 %v5620_v12, %s7019_s13  ;;  %v5883_v55 = vpop.permute.xlu2 %5882  ;;  %v5819_v9 = vpop.permute.xlu0 %5818 }
 0x8be   : > { %6074 = vst.msk [vmem:[%s10617_s15 + $0x270] sm:$0xff] %vm3458_vm4, %v5883_v55  ;;  %v1159_v3 = vpop.f32.mrf.mxu0 }
 0x8bf   : > { %6042 = vst.msk [vmem:[%s10617_s15 + $0x170] sm:$0xff] %vm3458_vm4, %v5819_v9  ;;  %v1160_v34 = vadd.f32 %v12614_v11, %v1159_v3 }
 0x8c1   : > { %1270 = vst.msk [vmem:[%s9159_s28 + $0x260] sm:$0xff] %vm824_vm2, %v1160_v34 }
 0x8c2   : > { %v5821_v30 = vpop.permute.xlu1 %5820 }
 0x8c3   : > { %5904 = vrot.lane.b32.xlu1 %v5635_v20, %s7019_s13  ;;  %6043 = vst.msk [vmem:[%s10617_s15 + $0x178] sm:$0xff] %vm3458_vm4, %v5821_v30 }
 0x8c5   : > { %v5825_v23 = vpop.permute.xlu0 %5824 }
 0x8c6   : > { %v5889_v39 = vpop.permute.xlu2 %5888  ;;  %6045 = vst.msk [vmem:[%s10617_s15 + $0x188] sm:$0xff] %vm3458_vm4, %v5825_v23  ;;  %v1161_v46 = vpop.f32.mrf.mxu0 }
 0x8c7   : > { %6077 = vst.msk [vmem:[%s10617_s15 + $0x288] sm:$0xff] %vm3458_vm4, %v5889_v39  ;;  %v1162_v62 = vadd.f32 %v12614_v11, %v1161_v46 }
 0x8c9   : > { %1271 = vst.msk [vmem:[%s9159_s28 + $0x268] sm:$0xff] %vm824_vm2, %v1162_v62 }
 0x8cb   : > { %v5827_v26 = vpop.permute.xlu1 %5826 }
 0x8cc   : > { %6046 = vst.msk [vmem:[%s10617_s15 + $0x190] sm:$0xff] %vm3458_vm4, %v5827_v26 }
 0x8cd   : > { %v5831_v0 = vpop.permute.xlu0 %5830 }
 0x8ce   : > { %v5895_v32 = vpop.permute.xlu2 %5894  ;;  %6048 = vst.msk [vmem:[%s10617_s15 + $0x1a0] sm:$0xff] %vm3458_vm4, %v5831_v0  ;;  %v1164_v6 = vpop.f32.mrf.mxu0 }
 0x8cf   : > { %6080 = vst.msk [vmem:[%s10617_s15 + $0x2a0] sm:$0xff] %vm3458_vm4, %v5895_v32  ;;  %v1165_v56 = vadd.f32 %v12614_v11, %v1164_v6 }
 0x8d1   : > { %1272 = vst.msk [vmem:[%s9159_s28 + $0x270] sm:$0xff] %vm824_vm2, %v1165_v56 }
 0x8d4   : > { %v5833_v63 = vpop.permute.xlu1 %5832 }
 0x8d5   : > { %6049 = vst.msk [vmem:[%s10617_s15 + $0x1a8] sm:$0xff] %vm3458_vm4, %v5833_v63  ;;  %v5837_v38 = vpop.permute.xlu0 %5836 }
 0x8d6   : > { %v5901_v36 = vpop.permute.xlu2 %5900  ;;  %6051 = vst.msk [vmem:[%s10617_s15 + $0x1b8] sm:$0xff] %vm3458_vm4, %v5837_v38  ;;  %v1166_v59 = vpop.f32.mrf.mxu0 }
 0x8d7   : > { %6083 = vst.msk [vmem:[%s10617_s15 + $0x2b8] sm:$0xff] %vm3458_vm4, %v5901_v36  ;;  %v1167_v24 = vadd.f32 %v12614_v11, %v1166_v59 }
 0x8d9   : > { %1273 = vst.msk [vmem:[%s9159_s28 + $0x278] sm:$0xff] %vm824_vm2, %v1167_v24 }
 0x8dd   : > { %v5839_v13 = vpop.permute.xlu1 %5838 }
 0x8de   : > { %6052 = vst.msk [vmem:[%s10617_s15 + $0x1c0] sm:$0xff] %vm3458_vm4, %v5839_v13  ;;  %v5843_v58 = vpop.permute.xlu0 %5842  ;;  %v1169_v21 = vpop.f32.mrf.mxu0 }
 0x8df   : > { %6054 = vst.msk [vmem:[%s10617_s15 + $0x1d0] sm:$0xff] %vm3458_vm4, %v5843_v58  ;;  %v1170_v49 = vadd.f32 %v12614_v11, %v1169_v21 }
 0x8e1   : > { %1274 = vst.msk [vmem:[%s9159_s28 + $0x280] sm:$0xff] %vm824_vm2, %v1170_v49 }
 0x8e5   : > { %v5845_v48 = vpop.permute.xlu1 %5844 }
 0x8e6   : > { %6055 = vst.msk [vmem:[%s10617_s15 + $0x1d8] sm:$0xff] %vm3458_vm4, %v5845_v48  ;;  %v1171_v29 = vpop.f32.mrf.mxu0 }
 0x8e7   : > { %v5849_v61 = vpop.permute.xlu0 %5848  ;;  %v1172_v51 = vadd.f32 %v12614_v11, %v1171_v29 }
 0x8e8   : > { %6057 = vst.msk [vmem:[%s10617_s15 + $0x1e8] sm:$0xff] %vm3458_vm4, %v5849_v61 }
 0x8e9   : > { %1275 = vst.msk [vmem:[%s9159_s28 + $0x288] sm:$0xff] %vm824_vm2, %v1172_v51 }
 0x8ed   : > { %v5851_v16 = vpop.permute.xlu1 %5850 }
 0x8ee   : > { %6058 = vst.msk [vmem:[%s10617_s15 + $0x1f0] sm:$0xff] %vm3458_vm4, %v5851_v16  ;;  %v1174_v15 = vpop.f32.mrf.mxu0 }
 0x8ef   : > { %v5855_v2 = vpop.permute.xlu0 %5854  ;;  %v1175_v19 = vadd.f32 %v12614_v11, %v1174_v15 }
 0x8f0   : > { %6060 = vst.msk [vmem:[%s10617_s15 + $0x200] sm:$0xff] %vm3458_vm4, %v5855_v2 }
 0x8f1   : > { %1276 = vst.msk [vmem:[%s9159_s28 + $0x290] sm:$0xff] %vm824_vm2, %v1175_v19 }
 0x8f5   : > { %v5857_v27 = vpop.permute.xlu1 %5856 }
 0x8f6   : > { %6061 = vst.msk [vmem:[%s10617_s15 + $0x208] sm:$0xff] %vm3458_vm4, %v5857_v27  ;;  %v1176_v14 = vpop.f32.mrf.mxu0 }
 0x8f7   : > { %v5861_v7 = vpop.permute.xlu0 %5860  ;;  %v1177_v41 = vadd.f32 %v12614_v11, %v1176_v14 }
 0x8f8   : > { %6063 = vst.msk [vmem:[%s10617_s15 + $0x218] sm:$0xff] %vm3458_vm4, %v5861_v7 }
 0x8f9   : > { %1277 = vst.msk [vmem:[%s9159_s28 + $0x298] sm:$0xff] %vm824_vm2, %v1177_v41 }
 0x8fd   : > { %v5863_v5 = vpop.permute.xlu1 %5862 }
 0x8fe   : > { %6064 = vst.msk [vmem:[%s10617_s15 + $0x220] sm:$0xff] %vm3458_vm4, %v5863_v5  ;;  %v1179_v1 = vpop.f32.mrf.mxu0 }
 0x8ff   : > { %v5867_v22 = vpop.permute.xlu0 %5866  ;;  %v1180_v40 = vadd.f32 %v12614_v11, %v1179_v1 }
 0x900   : > { %6066 = vst.msk [vmem:[%s10617_s15 + $0x230] sm:$0xff] %vm3458_vm4, %v5867_v22 }
 0x901   : > { %1278 = vst.msk [vmem:[%s9159_s28 + $0x2a0] sm:$0xff] %vm824_vm2, %v1180_v40 }
 0x905   : > { %v5869_v18 = vpop.permute.xlu1 %5868 }
 0x906   : > { %6067 = vst.msk [vmem:[%s10617_s15 + $0x238] sm:$0xff] %vm3458_vm4, %v5869_v18  ;;  %v1181_v43 = vpop.f32.mrf.mxu0 }
 0x907   : > { %v5873_v52 = vpop.permute.xlu0 %5872  ;;  %v1182_v28 = vadd.f32 %v12614_v11, %v1181_v43 }
 0x908   : > { %6069 = vst.msk [vmem:[%s10617_s15 + $0x248] sm:$0xff] %vm3458_vm4, %v5873_v52 }
 0x909   : > { %1279 = vst.msk [vmem:[%s9159_s28 + $0x2a8] sm:$0xff] %vm824_vm2, %v1182_v28 }
 0x90d   : > { %v5875_v42 = vpop.permute.xlu1 %5874 }
 0x90e   : > { %6070 = vst.msk [vmem:[%s10617_s15 + $0x250] sm:$0xff] %vm3458_vm4, %v5875_v42  ;;  %v1184_v53 = vpop.f32.mrf.mxu0 }
 0x90f   : > { %v5879_v50 = vpop.permute.xlu0 %5878  ;;  %v1185_v45 = vadd.f32 %v12614_v11, %v1184_v53 }
 0x910   : > { %6072 = vst.msk [vmem:[%s10617_s15 + $0x260] sm:$0xff] %vm3458_vm4, %v5879_v50 }
 0x911   : > { %1280 = vst.msk [vmem:[%s9159_s28 + $0x2b0] sm:$0xff] %vm824_vm2, %v1185_v45 }
 0x915   : > { %v5881_v47 = vpop.permute.xlu1 %5880 }
 0x916   : > { %6073 = vst.msk [vmem:[%s10617_s15 + $0x268] sm:$0xff] %vm3458_vm4, %v5881_v47  ;;  %v1186_v60 = vpop.f32.mrf.mxu0 }
 0x917   : > { %v5885_v37 = vpop.permute.xlu0 %5884  ;;  %v1187_v54 = vadd.f32 %v12614_v11, %v1186_v60 }
 0x918   : > { %6075 = vst.msk [vmem:[%s10617_s15 + $0x278] sm:$0xff] %vm3458_vm4, %v5885_v37 }
 0x919   : > { %1281 = vst.msk [vmem:[%s9159_s28 + $0x2b8] sm:$0xff] %vm824_vm2, %v1187_v54 }
 0x91d   : > { %v5887_v31 = vpop.permute.xlu1 %5886 }
 0x91e   : > { %6076 = vst.msk [vmem:[%s10617_s15 + $0x280] sm:$0xff] %vm3458_vm4, %v5887_v31  ;;  %v1189_v57 = vpop.f32.mrf.mxu0 }
 0x91f   : > { %v5891_v10 = vpop.permute.xlu0 %5890  ;;  %v1190_v44 = vadd.f32 %v12614_v11, %v1189_v57 }
 0x920   : > { %6078 = vst.msk [vmem:[%s10617_s15 + $0x290] sm:$0xff] %vm3458_vm4, %v5891_v10 }
 0x921   : > { %1282 = vst.msk [vmem:[%s9159_s28 + $0x2c0] sm:$0xff] %vm824_vm2, %v1190_v44 }
 0x925   : > { %v5893_v33 = vpop.permute.xlu1 %5892 }
 0x926   : > { %6079 = vst.msk [vmem:[%s10617_s15 + $0x298] sm:$0xff] %vm3458_vm4, %v5893_v33  ;;  %v1191_v25 = vpop.f32.mrf.mxu0 }
 0x927   : > { %v5897_v12 = vpop.permute.xlu0 %5896  ;;  %v1192_v4 = vadd.f32 %v12614_v11, %v1191_v25 }
 0x928   : > { %6081 = vst.msk [vmem:[%s10617_s15 + $0x2a8] sm:$0xff] %vm3458_vm4, %v5897_v12 }
 0x929   : > { %1283 = vst.msk [vmem:[%s9159_s28 + $0x2c8] sm:$0xff] %vm824_vm2, %v1192_v4 }
 0x92d   : > { %v5899_v8 = vpop.permute.xlu1 %5898 }
 0x92e   : > { %6082 = vst.msk [vmem:[%s10617_s15 + $0x2b0] sm:$0xff] %vm3458_vm4, %v5899_v8 }
 0x92f   : > { %v5903_v55 = vpop.permute.xlu0 %5902 }
 0x930   : > { %6084 = vst.msk [vmem:[%s10617_s15 + $0x2c0] sm:$0xff] %vm3458_vm4, %v5903_v55 }
 0x935   : > { %v5905_v17 = vpop.permute.xlu1 %5904 }
 0x936   : > { %6085 = vst.msk [vmem:[%s10617_s15 + $0x2c8] sm:$0xff] %vm3458_vm4, %v5905_v17 }
 0x937 PF: > { %s23_s21 = sadd.s32 1, %s7017_s21  }
 0x938   : > { %p20_p4 = scmp.ge.s32.totalorder %s23_s21, 4  }
 0x93a   :  { %22 = sbr.rel (!%p20_p4) target bundleno = 1 (0x1), region = 120 }

</bundles_post_ra>
